<compile_context>
chip_gen: v6e
topology: v6e:2x2x1
jax: 0.10.0
libtpu: 0.0.40
codegen_flags: <defaults>
</compile_context>

<pallas_src>
import functools

import jax
import jax.numpy as jnp
from jax.experimental import pallas as pl
from jax.experimental.pallas import tpu as pltpu


# --------------------------------------------------------------------------
# helpers
# --------------------------------------------------------------------------
def _round_up(x, m):
    return ((x + m - 1) // m) * m


def _pick_tile(dim, max_tile):
    """Largest multiple of 128 <= max_tile that divides `dim`."""
    assert dim % 128 == 0, f"dim {dim} must be a multiple of 128"
    assert max_tile >= 128, f"max_tile {max_tile} must be >= 128"
    t = min(max_tile, dim)
    t = (t // 128) * 128
    while dim % t:
        t -= 128
    assert t >= 128
    return t


# --------------------------------------------------------------------------
# Fused GEMM + bias + LeakyReLU Pallas kernel (conv hot path after im2col)
#   x: bf16 [Mp, Kp]   w: bf16 [Kp, Np]   b: f32 [1, Np]   out: bf16 [Mp, Np]
#   f32 accumulation (VMEM scratch only when the k axis has >1 step).
# --------------------------------------------------------------------------
def _gemm_bias_lrelu_kernel(x_ref, w_ref, b_ref, o_ref, acc_ref, *,
                            apply_act, neg_slope, nk):
    partial = jnp.dot(x_ref[...], w_ref[...],
                      preferred_element_type=jnp.float32)

    def epilogue(acc):
        y = acc + b_ref[...]                     # (tm,tn) + (1,tn), f32
        if apply_act:
            y = jnp.where(y >= 0.0, y, neg_slope * y)
        o_ref[...] = y.astype(o_ref.dtype)

    if nk == 1:
        # Single k-step: no scratch traffic at all.
        epilogue(partial)
    else:
        k = pl.program_id(2)

        @pl.when(k == 0)
        def _():
            acc_ref[...] = partial

        @pl.when(jnp.logical_and(k > 0, k < nk - 1))
        def _():
            acc_ref[...] += partial

        @pl.when(k == nk - 1)
        def _():
            epilogue(acc_ref[...] + partial)


def fused_gemm_bias_act(x, w_packed, b_packed, *, apply_act, neg_slope=0.2,
                        tm_max=256, tn_max=128, tk_max=4096):
    """y = leaky_relu(x @ w + b); x:[M,Kp] bf16 (K already padded), out bf16."""
    M, K = x.shape
    Kp, Np = w_packed.shape
    assert K == Kp, (K, Kp)
    assert Kp % 128 == 0 and Np % 128 == 0

    tm = min(tm_max, _round_up(M, 16))           # bf16 native (16,128) tile
    Mp = _round_up(M, tm)
    tn = _pick_tile(Np, tn_max)
    tk = _pick_tile(Kp, tk_max)
    nk = Kp // tk

    xp = x if Mp == M else jnp.pad(x, ((0, Mp - M), (0, 0)))

    kernel = functools.partial(_gemm_bias_lrelu_kernel,
                               apply_act=apply_act, neg_slope=neg_slope, nk=nk)
    cost = pl.CostEstimate(
        flops=2 * Mp * Kp * Np,
        transcendentals=0,
        bytes_accessed=(Mp * Kp + Kp * Np + Mp * Np) * 2 + Np * 4)

    out = pl.pallas_call(
        kernel,
        out_shape=jax.ShapeDtypeStruct((Mp, Np), jnp.bfloat16),
        grid_spec=pltpu.PrefetchScalarGridSpec(
            num_scalar_prefetch=0,
            grid=(Mp // tm, Np // tn, nk),
            in_specs=[
                pl.BlockSpec((tm, tk), lambda i, j, k: (i, k)),
                pl.BlockSpec((tk, tn), lambda i, j, k: (k, j)),
                pl.BlockSpec((1, tn), lambda i, j, k: (0, j)),
            ],
            out_specs=pl.BlockSpec((tm, tn), lambda i, j, k: (i, j)),
            scratch_shapes=[pltpu.VMEM((tm, tn), jnp.float32)],
        ),
        compiler_params=pltpu.CompilerParams(
            dimension_semantics=("parallel", "parallel", "arbitrary")),
        cost_estimate=cost,
    )(xp, w_packed, b_packed)
    return out


# --------------------------------------------------------------------------
# Mat-vec Pallas kernel for the final Cout=1 conv (no bias, no activation).
#   x: bf16 [Mp, Kp]   wt: bf16 [1, Kp]   out: f32 [Mp, 1]
#   VPU multiply-accumulate per 128-lane group into a (tm,128) accumulator;
#   one cross-lane reduce + one (masked) store at the very end.
# --------------------------------------------------------------------------
def _matvec_kernel(x_ref, wt_ref, o_ref, acc_ref, *, nk, n_groups):
    x = x_ref[...]
    w = wt_ref[...]

    part = x[:, 0:128].astype(jnp.float32) * w[:, 0:128].astype(jnp.float32)
    for g in range(1, n_groups):
        lo = g * 128
        part = part + (x[:, lo:lo + 128].astype(jnp.float32) *
                       w[:, lo:lo + 128].astype(jnp.float32))

    if nk == 1:
        o_ref[...] = jnp.sum(part, axis=1, keepdims=True)
    else:
        k = pl.program_id(1)

        @pl.when(k == 0)
        def _():
            acc_ref[...] = part

        @pl.when(jnp.logical_and(k > 0, k < nk - 1))
        def _():
            acc_ref[...] += part

        @pl.when(k == nk - 1)
        def _():
            o_ref[...] = jnp.sum(acc_ref[...] + part, axis=1, keepdims=True)


def matvec(x, wt_packed, *, tm_max=256, tk_max=8192):
    M, K = x.shape
    _, Kp = wt_packed.shape
    assert K == Kp and Kp % 128 == 0

    tm = min(tm_max, _round_up(M, 16))
    Mp = _round_up(M, tm)
    tk = _pick_tile(Kp, tk_max)
    nk = Kp // tk

    xp = x if Mp == M else jnp.pad(x, ((0, Mp - M), (0, 0)))

    kernel = functools.partial(_matvec_kernel, nk=nk, n_groups=tk // 128)
    cost = pl.CostEstimate(
        flops=2 * Mp * Kp,
        transcendentals=0,
        bytes_accessed=(Mp * Kp + Kp) * 2 + Mp * 4)

    out = pl.pallas_call(
        kernel,
        out_shape=jax.ShapeDtypeStruct((Mp, 1), jnp.float32),
        grid_spec=pltpu.PrefetchScalarGridSpec(
            num_scalar_prefetch=0,
            grid=(Mp // tm, nk),
            in_specs=[
                pl.BlockSpec((tm, tk), lambda i, k: (i, k)),
                pl.BlockSpec((1, tk), lambda i, k: (0, k)),
            ],
            out_specs=pl.BlockSpec((tm, 1), lambda i, k: (i, 0)),
            scratch_shapes=[pltpu.VMEM((tm, 128), jnp.float32)],
        ),
        compiler_params=pltpu.CompilerParams(
            dimension_semantics=("parallel", "arbitrary")),
        cost_estimate=cost,
    )(xp, wt_packed)
    return out[:M, :]


# --------------------------------------------------------------------------
# NHWC im2col (plain-JAX glue, bf16, channel dim pre-padded so K % 128 == 0)
# TODO(synk): patch extraction is still done by XLA outside the kernel; an
# in-kernel (implicit-GEMM) im2col would remove the remaining HBM round trip.
# --------------------------------------------------------------------------
def _im2col_nhwc(x, kh, kw, stride, pad, cin_padded):
    N, H, W, C = x.shape
    xp = jnp.pad(x, ((0, 0), (pad, pad), (pad, pad), (0, cin_padded - C)))
    Ho = (H + 2 * pad - kh) // stride + 1
    Wo = (W + 2 * pad - kw) // stride + 1
    cols = []
    for di in range(kh):
        for dj in range(kw):
            cols.append(
                xp[:, di:di + stride * Ho:stride, dj:dj + stride * Wo:stride, :])
    p = jnp.stack(cols, axis=3)                      # [N, Ho, Wo, kh*kw, Cp]
    return p.reshape(N * Ho * Wo, kh * kw * cin_padded), Ho, Wo


def conv2d_block(x_nhwc, w_packed, b_packed, cout, cin_padded, *, stride, pad,
                 apply_act=True, neg_slope=0.2):
    N = x_nhwc.shape[0]
    X, Ho, Wo = _im2col_nhwc(x_nhwc, 4, 4, stride, pad, cin_padded)
    Y = fused_gemm_bias_act(X, w_packed, b_packed,
                            apply_act=apply_act, neg_slope=neg_slope)
    M = N * Ho * Wo
    return Y[:M, :cout].reshape(N, Ho, Wo, cout)     # NHWC, bf16


def conv2d_final(x_nhwc, wt_packed, cin_padded, *, stride, pad):
    N = x_nhwc.shape[0]
    X, Ho, Wo = _im2col_nhwc(x_nhwc, 4, 4, stride, pad, cin_padded)
    Y = matvec(X, wt_packed)
    M = N * Ho * Wo
    return Y[:M, :].reshape(N, Ho, Wo, 1)            # NHWC, f32


# --------------------------------------------------------------------------
# Discriminator: params, one-time packing, forward
# --------------------------------------------------------------------------
def init_params(key, in_channels=3):
    """Deterministic synthetic init (PyTorch-like uniform +/- 1/sqrt(fan_in))."""
    block_chans = [(in_channels * 2, 64), (64, 128), (128, 256), (256, 512)]
    keys = jax.random.split(key, len(block_chans) + 1)
    params = []
    for kk, (cin, cout) in zip(keys[:-1], block_chans):
        kw_, kb_ = jax.random.split(kk)
        bound = 1.0 / ((cin * 4 * 4) ** 0.5)
        w = jax.random.uniform(kw_, (cout, cin, 4, 4), jnp.float32, -bound, bound)
        b = jax.random.uniform(kb_, (cout,), jnp.float32, -bound, bound)
        params.append((w, b))
    # final conv: Conv2d(512, 1, 4, padding=1, bias=False)
    bound = 1.0 / ((512 * 4 * 4) ** 0.5)
    wf = jax.random.uniform(keys[-1], (1, 512, 4, 4), jnp.float32, -bound, bound)
    params.append((wf, None))
    return params


def pack_params(params):
    """One-time packing: NHWC im2col K-ordering (kh, kw, cin_padded), cin padded
    to a multiple of 8 (so K = 16*cin_p is a multiple of 128), cout padded to a
    multiple of 128, weights cast to bf16 (bias stays f32)."""
    packed = []
    for (w, b) in params[:-1]:
        cout, cin, kh, kw = w.shape
        cinp = _round_up(cin, 8)
        wm = jnp.pad(w.transpose(2, 3, 1, 0),           # (kh, kw, cin, cout)
                     ((0, 0), (0, 0), (0, cinp - cin), (0, 0)))
        K = kh * kw * cinp
        wm = wm.reshape(K, cout)
        Np = _round_up(cout, 128)
        wp = jnp.pad(wm, ((0, 0), (0, Np - cout))).astype(jnp.bfloat16)
        bp = jnp.pad(b, ((0, Np - cout),)).astype(jnp.float32).reshape(1, Np)
        packed.append(dict(w=wp, b=bp, cout=cout, cinp=cinp))
    wf, _ = params[-1]                                  # (1, 512, 4, 4)
    cout, cin, kh, kw = wf.shape
    cinp = _round_up(cin, 8)
    wm = jnp.pad(wf.transpose(2, 3, 1, 0),
                 ((0, 0), (0, 0), (0, cinp - cin), (0, 0)))
    K = kh * kw * cinp
    wt = wm.reshape(K, cout).T.astype(jnp.bfloat16)     # row vector (1, K)
    packed.append(dict(w=wt, b=None, cout=1, cinp=cinp))
    return packed


def make_forward(packed):
    """Returns a jitted forward (static channel counts kept via closure)."""
    couts = tuple(int(p["cout"]) for p in packed)
    cinps = tuple(int(p["cinp"]) for p in packed)
    arrays = tuple((p["w"], p["b"]) for p in packed)

    def forward(arrays, img_A, img_B):
        # norm=None -> four (Conv k4 s2 p1 + LeakyReLU(0.2)) blocks,
        # then ZeroPad2d((1,0,1,0)) and Conv2d(512, 1, 4, padding=1, bias=False).
        x = jnp.concatenate([img_A, img_B], axis=1)          # NCHW channel concat
        x = jnp.transpose(x, (0, 2, 3, 1)).astype(jnp.bfloat16)  # NHWC, bf16 once
        for (wp, bp), cout, cinp in zip(arrays[:-1], couts[:-1], cinps[:-1]):
            x = conv2d_block(x, wp, bp, cout, cinp, stride=2, pad=1,
                             apply_act=True, neg_slope=0.2)
        # ZeroPad2d((left=1, right=0, top=1, bottom=0)) in NHWC
        x = jnp.pad(x, ((0, 0), (1, 0), (1, 0), (0, 0)))
        wt, _ = arrays[-1]
        x = conv2d_final(x, wt, cinps[-1], stride=1, pad=1)
        return jnp.transpose(x, (0, 3, 1, 2))                # back to NCHW, f32

    return jax.jit(forward), arrays


if __name__ == "__main__":
    key = jax.random.PRNGKey(0)
    k_par, k_a, k_b = jax.random.split(key, 3)

    in_channels = 3
    N, H, W = 2, 16, 16
    img_A = jax.random.normal(k_a, (N, in_channels, H, W), jnp.float32)
    img_B = jax.random.normal(k_b, (N, in_channels, H, W), jnp.float32)

    params = init_params(k_par, in_channels=in_channels)
    packed = pack_params(params)
    fwd, arrays = make_forward(packed)

    out = fwd(arrays, img_A, img_B)
    out = jax.block_until_ready(out)

    assert out.shape == (N, 1, 1, 1), out.shape
    assert bool(jnp.all(jnp.isfinite(out)))
    print("KERNEL_OK")
</pallas_src>

<mosaic_0001>
module attributes {stable_mosaic.version = 11 : i64} {
  func.func @_gemm_bias_lrelu_kernel(%arg0: i32, %arg1: i32, %arg2: i32, %arg3: memref<128x128xbf16, #tpu.memory_space<vmem>>, %arg4: memref<128x128xbf16, #tpu.memory_space<vmem>>, %arg5: memref<1x128xf32, #tpu.memory_space<vmem>>, %arg6: memref<128x128xbf16, #tpu.memory_space<vmem>>, %arg7: memref<128x128xf32, #tpu.memory_space<vmem>>) attributes {dimension_semantics = [#tpu.dimension_semantics<parallel>, #tpu.dimension_semantics<parallel>, #tpu.dimension_semantics<arbitrary>], iteration_bounds = array<i64: 1, 1, 1>, scalar_prefetch = 0 : i64, scratch_operands = 1 : i64, tpu.core_type = #tpu.core_type<tc>, window_params = [{transform_indices = @transform_0, window_bounds = array<i64: 128, 128>}, {transform_indices = @transform_1, window_bounds = array<i64: 128, 128>}, {transform_indices = @transform_2, window_bounds = array<i64: 1, 128>}, {transform_indices = @transform_3, window_bounds = array<i64: 128, 128>}]} {
    %c0 = arith.constant 0 : index
    %c0_0 = arith.constant 0 : index
    %0 = vector.load %arg3[%c0, %c0_0] : memref<128x128xbf16, #tpu.memory_space<vmem>>, vector<128x128xbf16>
    %c0_1 = arith.constant 0 : index
    %c0_2 = arith.constant 0 : index
    %1 = vector.load %arg4[%c0_1, %c0_2] : memref<128x128xbf16, #tpu.memory_space<vmem>>, vector<128x128xbf16>
    %cst = arith.constant dense<0.000000e+00> : vector<128x128xf32>
    %2 = tpu.matmul %0, %1, %cst {dimension_numbers = #tpu.dot_dimension_numbers<[1], [0], [0], [1], [0, 0, 1, 1], [], []>} : vector<128x128xbf16>, vector<128x128xbf16>, vector<128x128xf32> -> vector<128x128xf32>
    %c0_3 = arith.constant 0 : index
    %c0_4 = arith.constant 0 : index
    %3 = vector.load %arg5[%c0_3, %c0_4] : memref<1x128xf32, #tpu.memory_space<vmem>>, vector<1x128xf32>
    %4 = vector.broadcast %3 : vector<1x128xf32> to vector<128x128xf32>
    %5 = arith.addf %2, %4 : vector<128x128xf32>
    %cst_5 = arith.constant 0.000000e+00 : f32
    %6 = vector.broadcast %cst_5 : f32 to vector<128x128xf32>
    %7 = arith.cmpf oge, %5, %6 : vector<128x128xf32>
    %cst_6 = arith.constant 2.000000e-01 : f32
    %8 = vector.broadcast %cst_6 : f32 to vector<128x128xf32>
    %9 = arith.mulf %8, %5 : vector<128x128xf32>
    %10 = arith.select %7, %5, %9 : vector<128x128xi1>, vector<128x128xf32>
    %11 = arith.truncf %10 : vector<128x128xf32> to vector<128x128xbf16>
    %c0_7 = arith.constant 0 : index
    %c0_8 = arith.constant 0 : index
    %12 = vector.load %arg6[%c0_7, %c0_8] : memref<128x128xbf16, #tpu.memory_space<vmem>>, vector<128x128xbf16>
    tpu.vector_store %arg6[%c0_7, %c0_8], %11 {strides = array<i32>} : memref<128x128xbf16, #tpu.memory_space<vmem>>, vector<128x128xbf16>,
    return
  }
  func.func @transform_0(%arg0: i32, %arg1: i32, %arg2: i32) -> (i32, i32) {
    %c0_i32 = arith.constant 0 : i32
    return %arg0, %arg2 : i32, i32
  }
  func.func @transform_1(%arg0: i32, %arg1: i32, %arg2: i32) -> (i32, i32) {
    %c0_i32 = arith.constant 0 : i32
    return %arg2, %arg1 : i32, i32
  }
  func.func @transform_2(%arg0: i32, %arg1: i32, %arg2: i32) -> (i32, i32) {
    %c0_i32 = arith.constant 0 : i32
    %c0_i32_0 = arith.constant 0 : i32
    return %c0_i32, %arg1 : i32, i32
  }
  func.func @transform_3(%arg0: i32, %arg1: i32, %arg2: i32) -> (i32, i32) {
    %c0_i32 = arith.constant 0 : i32
    return %arg0, %arg1 : i32, i32
  }
}

module attributes {stable_mosaic.version = 11 : i64} {
  func.func @_gemm_bias_lrelu_kernel(%arg0: i32, %arg1: i32, %arg2: i32, %arg3: memref<32x1024xbf16, #tpu.memory_space<vmem>>, %arg4: memref<1024x128xbf16, #tpu.memory_space<vmem>>, %arg5: memref<1x128xf32, #tpu.memory_space<vmem>>, %arg6: memref<32x128xbf16, #tpu.memory_space<vmem>>, %arg7: memref<32x128xf32, #tpu.memory_space<vmem>>) attributes {dimension_semantics = [#tpu.dimension_semantics<parallel>, #tpu.dimension_semantics<parallel>, #tpu.dimension_semantics<arbitrary>], iteration_bounds = array<i64: 1, 1, 1>, scalar_prefetch = 0 : i64, scratch_operands = 1 : i64, tpu.core_type = #tpu.core_type<tc>, window_params = [{transform_indices = @transform_0, window_bounds = array<i64: 32, 1024>}, {transform_indices = @transform_1, window_bounds = array<i64: 1024, 128>}, {transform_indices = @transform_2, window_bounds = array<i64: 1, 128>}, {transform_indices = @transform_3, window_bounds = array<i64: 32, 128>}]} {
    %c0 = arith.constant 0 : index
    %c0_0 = arith.constant 0 : index
    %0 = vector.load %arg3[%c0, %c0_0] : memref<32x1024xbf16, #tpu.memory_space<vmem>>, vector<32x1024xbf16>
    %c0_1 = arith.constant 0 : index
    %c0_2 = arith.constant 0 : index
    %1 = vector.load %arg4[%c0_1, %c0_2] : memref<1024x128xbf16, #tpu.memory_space<vmem>>, vector<1024x128xbf16>
    %cst = arith.constant dense<0.000000e+00> : vector<32x128xf32>
    %2 = tpu.matmul %0, %1, %cst {dimension_numbers = #tpu.dot_dimension_numbers<[1], [0], [0], [1], [0, 0, 1, 1], [], []>} : vector<32x1024xbf16>, vector<1024x128xbf16>, vector<32x128xf32> -> vector<32x128xf32>
    %c0_3 = arith.constant 0 : index
    %c0_4 = arith.constant 0 : index
    %3 = vector.load %arg5[%c0_3, %c0_4] : memref<1x128xf32, #tpu.memory_space<vmem>>, vector<1x128xf32>
    %4 = vector.broadcast %3 : vector<1x128xf32> to vector<32x128xf32>
    %5 = arith.addf %2, %4 : vector<32x128xf32>
    %cst_5 = arith.constant 0.000000e+00 : f32
    %6 = vector.broadcast %cst_5 : f32 to vector<32x128xf32>
    %7 = arith.cmpf oge, %5, %6 : vector<32x128xf32>
    %cst_6 = arith.constant 2.000000e-01 : f32
    %8 = vector.broadcast %cst_6 : f32 to vector<32x128xf32>
    %9 = arith.mulf %8, %5 : vector<32x128xf32>
    %10 = arith.select %7, %5, %9 : vector<32x128xi1>, vector<32x128xf32>
    %11 = arith.truncf %10 : vector<32x128xf32> to vector<32x128xbf16>
    %c0_7 = arith.constant 0 : index
    %c0_8 = arith.constant 0 : index
    %12 = vector.load %arg6[%c0_7, %c0_8] : memref<32x128xbf16, #tpu.memory_space<vmem>>, vector<32x128xbf16>
    tpu.vector_store %arg6[%c0_7, %c0_8], %11 {strides = array<i32>} : memref<32x128xbf16, #tpu.memory_space<vmem>>, vector<32x128xbf16>,
    return
  }
  func.func @transform_0(%arg0: i32, %arg1: i32, %arg2: i32) -> (i32, i32) {
    %c0_i32 = arith.constant 0 : i32
    return %arg0, %arg2 : i32, i32
  }
  func.func @transform_1(%arg0: i32, %arg1: i32, %arg2: i32) -> (i32, i32) {
    %c0_i32 = arith.constant 0 : i32
    return %arg2, %arg1 : i32, i32
  }
  func.func @transform_2(%arg0: i32, %arg1: i32, %arg2: i32) -> (i32, i32) {
    %c0_i32 = arith.constant 0 : i32
    %c0_i32_0 = arith.constant 0 : i32
    return %c0_i32, %arg1 : i32, i32
  }
  func.func @transform_3(%arg0: i32, %arg1: i32, %arg2: i32) -> (i32, i32) {
    %c0_i32 = arith.constant 0 : i32
    return %arg0, %arg1 : i32, i32
  }
}

module attributes {stable_mosaic.version = 11 : i64} {
  func.func @_gemm_bias_lrelu_kernel(%arg0: i32, %arg1: i32, %arg2: i32, %arg3: memref<16x2048xbf16, #tpu.memory_space<vmem>>, %arg4: memref<2048x128xbf16, #tpu.memory_space<vmem>>, %arg5: memref<1x128xf32, #tpu.memory_space<vmem>>, %arg6: memref<16x128xbf16, #tpu.memory_space<vmem>>, %arg7: memref<16x128xf32, #tpu.memory_space<vmem>>) attributes {dimension_semantics = [#tpu.dimension_semantics<parallel>, #tpu.dimension_semantics<parallel>, #tpu.dimension_semantics<arbitrary>], iteration_bounds = array<i64: 1, 2, 1>, scalar_prefetch = 0 : i64, scratch_operands = 1 : i64, tpu.core_type = #tpu.core_type<tc>, window_params = [{transform_indices = @transform_0, window_bounds = array<i64: 16, 2048>}, {transform_indices = @transform_1, window_bounds = array<i64: 2048, 128>}, {transform_indices = @transform_2, window_bounds = array<i64: 1, 128>}, {transform_indices = @transform_3, window_bounds = array<i64: 16, 128>}]} {
    %c0 = arith.constant 0 : index
    %c0_0 = arith.constant 0 : index
    %0 = vector.load %arg3[%c0, %c0_0] : memref<16x2048xbf16, #tpu.memory_space<vmem>>, vector<16x2048xbf16>
    %c0_1 = arith.constant 0 : index
    %c0_2 = arith.constant 0 : index
    %1 = vector.load %arg4[%c0_1, %c0_2] : memref<2048x128xbf16, #tpu.memory_space<vmem>>, vector<2048x128xbf16>
    %cst = arith.constant dense<0.000000e+00> : vector<16x128xf32>
    %2 = tpu.matmul %0, %1, %cst {dimension_numbers = #tpu.dot_dimension_numbers<[1], [0], [0], [1], [0, 0, 1, 1], [], []>} : vector<16x2048xbf16>, vector<2048x128xbf16>, vector<16x128xf32> -> vector<16x128xf32>
    %c0_3 = arith.constant 0 : index
    %c0_4 = arith.constant 0 : index
    %3 = vector.load %arg5[%c0_3, %c0_4] : memref<1x128xf32, #tpu.memory_space<vmem>>, vector<1x128xf32>
    %4 = vector.broadcast %3 : vector<1x128xf32> to vector<16x128xf32>
    %5 = arith.addf %2, %4 : vector<16x128xf32>
    %cst_5 = arith.constant 0.000000e+00 : f32
    %6 = vector.broadcast %cst_5 : f32 to vector<16x128xf32>
    %7 = arith.cmpf oge, %5, %6 : vector<16x128xf32>
    %cst_6 = arith.constant 2.000000e-01 : f32
    %8 = vector.broadcast %cst_6 : f32 to vector<16x128xf32>
    %9 = arith.mulf %8, %5 : vector<16x128xf32>
    %10 = arith.select %7, %5, %9 : vector<16x128xi1>, vector<16x128xf32>
    %11 = arith.truncf %10 : vector<16x128xf32> to vector<16x128xbf16>
    %c0_7 = arith.constant 0 : index
    %c0_8 = arith.constant 0 : index
    %12 = vector.load %arg6[%c0_7, %c0_8] : memref<16x128xbf16, #tpu.memory_space<vmem>>, vector<16x128xbf16>
    tpu.vector_store %arg6[%c0_7, %c0_8], %11 {strides = array<i32>} : memref<16x128xbf16, #tpu.memory_space<vmem>>, vector<16x128xbf16>,
    return
  }
  func.func @transform_0(%arg0: i32, %arg1: i32, %arg2: i32) -> (i32, i32) {
    %c0_i32 = arith.constant 0 : i32
    return %arg0, %arg2 : i32, i32
  }
  func.func @transform_1(%arg0: i32, %arg1: i32, %arg2: i32) -> (i32, i32) {
    %c0_i32 = arith.constant 0 : i32
    return %arg2, %arg1 : i32, i32
  }
  func.func @transform_2(%arg0: i32, %arg1: i32, %arg2: i32) -> (i32, i32) {
    %c0_i32 = arith.constant 0 : i32
    %c0_i32_0 = arith.constant 0 : i32
    return %c0_i32, %arg1 : i32, i32
  }
  func.func @transform_3(%arg0: i32, %arg1: i32, %arg2: i32) -> (i32, i32) {
    %c0_i32 = arith.constant 0 : i32
    return %arg0, %arg1 : i32, i32
  }
}

module attributes {stable_mosaic.version = 11 : i64} {
  func.func @_gemm_bias_lrelu_kernel(%arg0: i32, %arg1: i32, %arg2: i32, %arg3: memref<16x4096xbf16, #tpu.memory_space<vmem>>, %arg4: memref<4096x128xbf16, #tpu.memory_space<vmem>>, %arg5: memref<1x128xf32, #tpu.memory_space<vmem>>, %arg6: memref<16x128xbf16, #tpu.memory_space<vmem>>, %arg7: memref<16x128xf32, #tpu.memory_space<vmem>>) attributes {dimension_semantics = [#tpu.dimension_semantics<parallel>, #tpu.dimension_semantics<parallel>, #tpu.dimension_semantics<arbitrary>], iteration_bounds = array<i64: 1, 4, 1>, scalar_prefetch = 0 : i64, scratch_operands = 1 : i64, tpu.core_type = #tpu.core_type<tc>, window_params = [{transform_indices = @transform_0, window_bounds = array<i64: 16, 4096>}, {transform_indices = @transform_1, window_bounds = array<i64: 4096, 128>}, {transform_indices = @transform_2, window_bounds = array<i64: 1, 128>}, {transform_indices = @transform_3, window_bounds = array<i64: 16, 128>}]} {
    %c0 = arith.constant 0 : index
    %c0_0 = arith.constant 0 : index
    %0 = vector.load %arg3[%c0, %c0_0] : memref<16x4096xbf16, #tpu.memory_space<vmem>>, vector<16x4096xbf16>
    %c0_1 = arith.constant 0 : index
    %c0_2 = arith.constant 0 : index
    %1 = vector.load %arg4[%c0_1, %c0_2] : memref<4096x128xbf16, #tpu.memory_space<vmem>>, vector<4096x128xbf16>
    %cst = arith.constant dense<0.000000e+00> : vector<16x128xf32>
    %2 = tpu.matmul %0, %1, %cst {dimension_numbers = #tpu.dot_dimension_numbers<[1], [0], [0], [1], [0, 0, 1, 1], [], []>} : vector<16x4096xbf16>, vector<4096x128xbf16>, vector<16x128xf32> -> vector<16x128xf32>
    %c0_3 = arith.constant 0 : index
    %c0_4 = arith.constant 0 : index
    %3 = vector.load %arg5[%c0_3, %c0_4] : memref<1x128xf32, #tpu.memory_space<vmem>>, vector<1x128xf32>
    %4 = vector.broadcast %3 : vector<1x128xf32> to vector<16x128xf32>
    %5 = arith.addf %2, %4 : vector<16x128xf32>
    %cst_5 = arith.constant 0.000000e+00 : f32
    %6 = vector.broadcast %cst_5 : f32 to vector<16x128xf32>
    %7 = arith.cmpf oge, %5, %6 : vector<16x128xf32>
    %cst_6 = arith.constant 2.000000e-01 : f32
    %8 = vector.broadcast %cst_6 : f32 to vector<16x128xf32>
    %9 = arith.mulf %8, %5 : vector<16x128xf32>
    %10 = arith.select %7, %5, %9 : vector<16x128xi1>, vector<16x128xf32>
    %11 = arith.truncf %10 : vector<16x128xf32> to vector<16x128xbf16>
    %c0_7 = arith.constant 0 : index
    %c0_8 = arith.constant 0 : index
    %12 = vector.load %arg6[%c0_7, %c0_8] : memref<16x128xbf16, #tpu.memory_space<vmem>>, vector<16x128xbf16>
    tpu.vector_store %arg6[%c0_7, %c0_8], %11 {strides = array<i32>} : memref<16x128xbf16, #tpu.memory_space<vmem>>, vector<16x128xbf16>,
    return
  }
  func.func @transform_0(%arg0: i32, %arg1: i32, %arg2: i32) -> (i32, i32) {
    %c0_i32 = arith.constant 0 : i32
    return %arg0, %arg2 : i32, i32
  }
  func.func @transform_1(%arg0: i32, %arg1: i32, %arg2: i32) -> (i32, i32) {
    %c0_i32 = arith.constant 0 : i32
    return %arg2, %arg1 : i32, i32
  }
  func.func @transform_2(%arg0: i32, %arg1: i32, %arg2: i32) -> (i32, i32) {
    %c0_i32 = arith.constant 0 : i32
    %c0_i32_0 = arith.constant 0 : i32
    return %c0_i32, %arg1 : i32, i32
  }
  func.func @transform_3(%arg0: i32, %arg1: i32, %arg2: i32) -> (i32, i32) {
    %c0_i32 = arith.constant 0 : i32
    return %arg0, %arg1 : i32, i32
  }
}

module attributes {stable_mosaic.version = 11 : i64} {
  func.func @_matvec_kernel(%arg0: i32, %arg1: i32, %arg2: memref<16x8192xbf16, #tpu.memory_space<vmem>>, %arg3: memref<1x8192xbf16, #tpu.memory_space<vmem>>, %arg4: memref<16x1xf32, #tpu.memory_space<vmem>>, %arg5: memref<16x128xf32, #tpu.memory_space<vmem>>) attributes {dimension_semantics = [#tpu.dimension_semantics<parallel>, #tpu.dimension_semantics<arbitrary>], iteration_bounds = array<i64: 1, 1>, scalar_prefetch = 0 : i64, scratch_operands = 1 : i64, tpu.core_type = #tpu.core_type<tc>, window_params = [{transform_indices = @transform_0, window_bounds = array<i64: 16, 8192>}, {transform_indices = @transform_1, window_bounds = array<i64: 1, 8192>}, {transform_indices = @transform_2, window_bounds = array<i64: 16, 1>}]} {
    %c0 = arith.constant 0 : index
    %c0_0 = arith.constant 0 : index
    %0 = vector.load %arg2[%c0, %c0_0] : memref<16x8192xbf16, #tpu.memory_space<vmem>>, vector<16x8192xbf16>
    %c0_1 = arith.constant 0 : index
    %c0_2 = arith.constant 0 : index
    %1 = vector.load %arg3[%c0_1, %c0_2] : memref<1x8192xbf16, #tpu.memory_space<vmem>>, vector<1x8192xbf16>
    %2 = vector.extract_strided_slice %0 {offsets = [0, 0], sizes = [16, 128], strides = [1, 1]} : vector<16x8192xbf16> to vector<16x128xbf16>
    %3 = arith.extf %2 : vector<16x128xbf16> to vector<16x128xf32>
    %4 = vector.extract_strided_slice %1 {offsets = [0, 0], sizes = [1, 128], strides = [1, 1]} : vector<1x8192xbf16> to vector<1x128xbf16>
    %5 = arith.extf %4 : vector<1x128xbf16> to vector<1x128xf32>
    %6 = vector.broadcast %5 : vector<1x128xf32> to vector<16x128xf32>
    %7 = arith.mulf %3, %6 : vector<16x128xf32>
    %8 = vector.extract_strided_slice %0 {offsets = [0, 128], sizes = [16, 128], strides = [1, 1]} : vector<16x8192xbf16> to vector<16x128xbf16>
    %9 = arith.extf %8 : vector<16x128xbf16> to vector<16x128xf32>
    %10 = vector.extract_strided_slice %1 {offsets = [0, 128], sizes = [1, 128], strides = [1, 1]} : vector<1x8192xbf16> to vector<1x128xbf16>
    %11 = arith.extf %10 : vector<1x128xbf16> to vector<1x128xf32>
    %12 = vector.broadcast %11 : vector<1x128xf32> to vector<16x128xf32>
    %13 = arith.mulf %9, %12 : vector<16x128xf32>
    %14 = arith.addf %7, %13 : vector<16x128xf32>
    %15 = vector.extract_strided_slice %0 {offsets = [0, 256], sizes = [16, 128], strides = [1, 1]} : vector<16x8192xbf16> to vector<16x128xbf16>
    %16 = arith.extf %15 : vector<16x128xbf16> to vector<16x128xf32>
    %17 = vector.extract_strided_slice %1 {offsets = [0, 256], sizes = [1, 128], strides = [1, 1]} : vector<1x8192xbf16> to vector<1x128xbf16>
    %18 = arith.extf %17 : vector<1x128xbf16> to vector<1x128xf32>
    %19 = vector.broadcast %18 : vector<1x128xf32> to vector<16x128xf32>
    %20 = arith.mulf %16, %19 : vector<16x128xf32>
    %21 = arith.addf %14, %20 : vector<16x128xf32>
    %22 = vector.extract_strided_slice %0 {offsets = [0, 384], sizes = [16, 128], strides = [1, 1]} : vector<16x8192xbf16> to vector<16x128xbf16>
    %23 = arith.extf %22 : vector<16x128xbf16> to vector<16x128xf32>
    %24 = vector.extract_strided_slice %1 {offsets = [0, 384], sizes = [1, 128], strides = [1, 1]} : vector<1x8192xbf16> to vector<1x128xbf16>
    %25 = arith.extf %24 : vector<1x128xbf16> to vector<1x128xf32>
    %26 = vector.broadcast %25 : vector<1x128xf32> to vector<16x128xf32>
    %27 = arith.mulf %23, %26 : vector<16x128xf32>
    %28 = arith.addf %21, %27 : vector<16x128xf32>
    %29 = vector.extract_strided_slice %0 {offsets = [0, 512], sizes = [16, 128], strides = [1, 1]} : vector<16x8192xbf16> to vector<16x128xbf16>
    %30 = arith.extf %29 : vector<16x128xbf16> to vector<16x128xf32>
    %31 = vector.extract_strided_slice %1 {offsets = [0, 512], sizes = [1, 128], strides = [1, 1]} : vector<1x8192xbf16> to vector<1x128xbf16>
    %32 = arith.extf %31 : vector<1x128xbf16> to vector<1x128xf32>
    %33 = vector.broadcast %32 : vector<1x128xf32> to vector<16x128xf32>
    %34 = arith.mulf %30, %33 : vector<16x128xf32>
    %35 = arith.addf %28, %34 : vector<16x128xf32>
    %36 = vector.extract_strided_slice %0 {offsets = [0, 640], sizes = [16, 128], strides = [1, 1]} : vector<16x8192xbf16> to vector<16x128xbf16>
    %37 = arith.extf %36 : vector<16x128xbf16> to vector<16x128xf32>
    %38 = vector.extract_strided_slice %1 {offsets = [0, 640], sizes = [1, 128], strides = [1, 1]} : vector<1x8192xbf16> to vector<1x128xbf16>
    %39 = arith.extf %38 : vector<1x128xbf16> to vector<1x128xf32>
    %40 = vector.broadcast %39 : vector<1x128xf32> to vector<16x128xf32>
    %41 = arith.mulf %37, %40 : vector<16x128xf32>
    %42 = arith.addf %35, %41 : vector<16x128xf32>
    %43 = vector.extract_strided_slice %0 {offsets = [0, 768], sizes = [16, 128], strides = [1, 1]} : vector<16x8192xbf16> to vector<16x128xbf16>
    %44 = arith.extf %43 : vector<16x128xbf16> to vector<16x128xf32>
    %45 = vector.extract_strided_slice %1 {offsets = [0, 768], sizes = [1, 128], strides = [1, 1]} : vector<1x8192xbf16> to vector<1x128xbf16>
    %46 = arith.extf %45 : vector<1x128xbf16> to vector<1x128xf32>
    %47 = vector.broadcast %46 : vector<1x128xf32> to vector<16x128xf32>
    %48 = arith.mulf %44, %47 : vector<16x128xf32>
    %49 = arith.addf %42, %48 : vector<16x128xf32>
    %50 = vector.extract_strided_slice %0 {offsets = [0, 896], sizes = [16, 128], strides = [1, 1]} : vector<16x8192xbf16> to vector<16x128xbf16>
    %51 = arith.extf %50 : vector<16x128xbf16> to vector<16x128xf32>
    %52 = vector.extract_strided_slice %1 {offsets = [0, 896], sizes = [1, 128], strides = [1, 1]} : vector<1x8192xbf16> to vector<1x128xbf16>
    %53 = arith.extf %52 : vector<1x128xbf16> to vector<1x128xf32>
    %54 = vector.broadcast %53 : vector<1x128xf32> to vector<16x128xf32>
    %55 = arith.mulf %51, %54 : vector<16x128xf32>
    %56 = arith.addf %49, %55 : vector<16x128xf32>
    %57 = vector.extract_strided_slice %0 {offsets = [0, 1024], sizes = [16, 128], strides = [1, 1]} : vector<16x8192xbf16> to vector<16x128xbf16>
    %58 = arith.extf %57 : vector<16x128xbf16> to vector<16x128xf32>
    %59 = vector.extract_strided_slice %1 {offsets = [0, 1024], sizes = [1, 128], strides = [1, 1]} : vector<1x8192xbf16> to vector<1x128xbf16>
    %60 = arith.extf %59 : vector<1x128xbf16> to vector<1x128xf32>
    %61 = vector.broadcast %60 : vector<1x128xf32> to vector<16x128xf32>
    %62 = arith.mulf %58, %61 : vector<16x128xf32>
    %63 = arith.addf %56, %62 : vector<16x128xf32>
    %64 = vector.extract_strided_slice %0 {offsets = [0, 1152], sizes = [16, 128], strides = [1, 1]} : vector<16x8192xbf16> to vector<16x128xbf16>
    %65 = arith.extf %64 : vector<16x128xbf16> to vector<16x128xf32>
    %66 = vector.extract_strided_slice %1 {offsets = [0, 1152], sizes = [1, 128], strides = [1, 1]} : vector<1x8192xbf16> to vector<1x128xbf16>
    %67 = arith.extf %66 : vector<1x128xbf16> to vector<1x128xf32>
    %68 = vector.broadcast %67 : vector<1x128xf32> to vector<16x128xf32>
    %69 = arith.mulf %65, %68 : vector<16x128xf32>
    %70 = arith.addf %63, %69 : vector<16x128xf32>
    %71 = vector.extract_strided_slice %0 {offsets = [0, 1280], sizes = [16, 128], strides = [1, 1]} : vector<16x8192xbf16> to vector<16x128xbf16>
    %72 = arith.extf %71 : vector<16x128xbf16> to vector<16x128xf32>
    %73 = vector.extract_strided_slice %1 {offsets = [0, 1280], sizes = [1, 128], strides = [1, 1]} : vector<1x8192xbf16> to vector<1x128xbf16>
    %74 = arith.extf %73 : vector<1x128xbf16> to vector<1x128xf32>
    %75 = vector.broadcast %74 : vector<1x128xf32> to vector<16x128xf32>
    %76 = arith.mulf %72, %75 : vector<16x128xf32>
    %77 = arith.addf %70, %76 : vector<16x128xf32>
    %78 = vector.extract_strided_slice %0 {offsets = [0, 1408], sizes = [16, 128], strides = [1, 1]} : vector<16x8192xbf16> to vector<16x128xbf16>
    %79 = arith.extf %78 : vector<16x128xbf16> to vector<16x128xf32>
    %80 = vector.extract_strided_slice %1 {offsets = [0, 1408], sizes = [1, 128], strides = [1, 1]} : vector<1x8192xbf16> to vector<1x128xbf16>
    %81 = arith.extf %80 : vector<1x128xbf16> to vector<1x128xf32>
    %82 = vector.broadcast %81 : vector<1x128xf32> to vector<16x128xf32>
    %83 = arith.mulf %79, %82 : vector<16x128xf32>
    %84 = arith.addf %77, %83 : vector<16x128xf32>
    %85 = vector.extract_strided_slice %0 {offsets = [0, 1536], sizes = [16, 128], strides = [1, 1]} : vector<16x8192xbf16> to vector<16x128xbf16>
    %86 = arith.extf %85 : vector<16x128xbf16> to vector<16x128xf32>
    %87 = vector.extract_strided_slice %1 {offsets = [0, 1536], sizes = [1, 128], strides = [1, 1]} : vector<1x8192xbf16> to vector<1x128xbf16>
    %88 = arith.extf %87 : vector<1x128xbf16> to vector<1x128xf32>
    %89 = vector.broadcast %88 : vector<1x128xf32> to vector<16x128xf32>
    %90 = arith.mulf %86, %89 : vector<16x128xf32>
    %91 = arith.addf %84, %90 : vector<16x128xf32>
    %92 = vector.extract_strided_slice %0 {offsets = [0, 1664], sizes = [16, 128], strides = [1, 1]} : vector<16x8192xbf16> to vector<16x128xbf16>
    %93 = arith.extf %92 : vector<16x128xbf16> to vector<16x128xf32>
    %94 = vector.extract_strided_slice %1 {offsets = [0, 1664], sizes = [1, 128], strides = [1, 1]} : vector<1x8192xbf16> to vector<1x128xbf16>
    %95 = arith.extf %94 : vector<1x128xbf16> to vector<1x128xf32>
    %96 = vector.broadcast %95 : vector<1x128xf32> to vector<16x128xf32>
    %97 = arith.mulf %93, %96 : vector<16x128xf32>
    %98 = arith.addf %91, %97 : vector<16x128xf32>
    %99 = vector.extract_strided_slice %0 {offsets = [0, 1792], sizes = [16, 128], strides = [1, 1]} : vector<16x8192xbf16> to vector<16x128xbf16>
    %100 = arith.extf %99 : vector<16x128xbf16> to vector<16x128xf32>
    %101 = vector.extract_strided_slice %1 {offsets = [0, 1792], sizes = [1, 128], strides = [1, 1]} : vector<1x8192xbf16> to vector<1x128xbf16>
    %102 = arith.extf %101 : vector<1x128xbf16> to vector<1x128xf32>
    %103 = vector.broadcast %102 : vector<1x128xf32> to vector<16x128xf32>
    %104 = arith.mulf %100, %103 : vector<16x128xf32>
    %105 = arith.addf %98, %104 : vector<16x128xf32>
    %106 = vector.extract_strided_slice %0 {offsets = [0, 1920], sizes = [16, 128], strides = [1, 1]} : vector<16x8192xbf16> to vector<16x128xbf16>
    %107 = arith.extf %106 : vector<16x128xbf16> to vector<16x128xf32>
    %108 = vector.extract_strided_slice %1 {offsets = [0, 1920], sizes = [1, 128], strides = [1, 1]} : vector<1x8192xbf16> to vector<1x128xbf16>
    %109 = arith.extf %108 : vector<1x128xbf16> to vector<1x128xf32>
    %110 = vector.broadcast %109 : vector<1x128xf32> to vector<16x128xf32>
    %111 = arith.mulf %107, %110 : vector<16x128xf32>
    %112 = arith.addf %105, %111 : vector<16x128xf32>
    %113 = vector.extract_strided_slice %0 {offsets = [0, 2048], sizes = [16, 128], strides = [1, 1]} : vector<16x8192xbf16> to vector<16x128xbf16>
    %114 = arith.extf %113 : vector<16x128xbf16> to vector<16x128xf32>
    %115 = vector.extract_strided_slice %1 {offsets = [0, 2048], sizes = [1, 128], strides = [1, 1]} : vector<1x8192xbf16> to vector<1x128xbf16>
    %116 = arith.extf %115 : vector<1x128xbf16> to vector<1x128xf32>
    %117 = vector.broadcast %116 : vector<1x128xf32> to vector<16x128xf32>
    %118 = arith.mulf %114, %117 : vector<16x128xf32>
    %119 = arith.addf %112, %118 : vector<16x128xf32>
    %120 = vector.extract_strided_slice %0 {offsets = [0, 2176], sizes = [16, 128], strides = [1, 1]} : vector<16x8192xbf16> to vector<16x128xbf16>
    %121 = arith.extf %120 : vector<16x128xbf16> to vector<16x128xf32>
    %122 = vector.extract_strided_slice %1 {offsets = [0, 2176], sizes = [1, 128], strides = [1, 1]} : vector<1x8192xbf16> to vector<1x128xbf16>
    %123 = arith.extf %122 : vector<1x128xbf16> to vector<1x128xf32>
    %124 = vector.broadcast %123 : vector<1x128xf32> to vector<16x128xf32>
    %125 = arith.mulf %121, %124 : vector<16x128xf32>
    %126 = arith.addf %119, %125 : vector<16x128xf32>
    %127 = vector.extract_strided_slice %0 {offsets = [0, 2304], sizes = [16, 128], strides = [1, 1]} : vector<16x8192xbf16> to vector<16x128xbf16>
    %128 = arith.extf %127 : vector<16x128xbf16> to vector<16x128xf32>
    %129 = vector.extract_strided_slice %1 {offsets = [0, 2304], sizes = [1, 128], strides = [1, 1]} : vector<1x8192xbf16> to vector<1x128xbf16>
    %130 = arith.extf %129 : vector<1x128xbf16> to vector<1x128xf32>
    %131 = vector.broadcast %130 : vector<1x128xf32> to vector<16x128xf32>
    %132 = arith.mulf %128, %131 : vector<16x128xf32>
    %133 = arith.addf %126, %132 : vector<16x128xf32>
    %134 = vector.extract_strided_slice %0 {offsets = [0, 2432], sizes = [16, 128], strides = [1, 1]} : vector<16x8192xbf16> to vector<16x128xbf16>
    %135 = arith.extf %134 : vector<16x128xbf16> to vector<16x128xf32>
    %136 = vector.extract_strided_slice %1 {offsets = [0, 2432], sizes = [1, 128], strides = [1, 1]} : vector<1x8192xbf16> to vector<1x128xbf16>
    %137 = arith.extf %136 : vector<1x128xbf16> to vector<1x128xf32>
    %138 = vector.broadcast %137 : vector<1x128xf32> to vector<16x128xf32>
    %139 = arith.mulf %135, %138 : vector<16x128xf32>
    %140 = arith.addf %133, %139 : vector<16x128xf32>
    %141 = vector.extract_strided_slice %0 {offsets = [0, 2560], sizes = [16, 128], strides = [1, 1]} : vector<16x8192xbf16> to vector<16x128xbf16>
    %142 = arith.extf %141 : vector<16x128xbf16> to vector<16x128xf32>
    %143 = vector.extract_strided_slice %1 {offsets = [0, 2560], sizes = [1, 128], strides = [1, 1]} : vector<1x8192xbf16> to vector<1x128xbf16>
    %144 = arith.extf %143 : vector<1x128xbf16> to vector<1x128xf32>
    %145 = vector.broadcast %144 : vector<1x128xf32> to vector<16x128xf32>
    %146 = arith.mulf %142, %145 : vector<16x128xf32>
    %147 = arith.addf %140, %146 : vector<16x128xf32>
    %148 = vector.extract_strided_slice %0 {offsets = [0, 2688], sizes = [16, 128], strides = [1, 1]} : vector<16x8192xbf16> to vector<16x128xbf16>
    %149 = arith.extf %148 : vector<16x128xbf16> to vector<16x128xf32>
    %150 = vector.extract_strided_slice %1 {offsets = [0, 2688], sizes = [1, 128], strides = [1, 1]} : vector<1x8192xbf16> to vector<1x128xbf16>
    %151 = arith.extf %150 : vector<1x128xbf16> to vector<1x128xf32>
    %152 = vector.broadcast %151 : vector<1x128xf32> to vector<16x128xf32>
    %153 = arith.mulf %149, %152 : vector<16x128xf32>
    %154 = arith.addf %147, %153 : vector<16x128xf32>
    %155 = vector.extract_strided_slice %0 {offsets = [0, 2816], sizes = [16, 128], strides = [1, 1]} : vector<16x8192xbf16> to vector<16x128xbf16>
    %156 = arith.extf %155 : vector<16x128xbf16> to vector<16x128xf32>
    %157 = vector.extract_strided_slice %1 {offsets = [0, 2816], sizes = [1, 128], strides = [1, 1]} : vector<1x8192xbf16> to vector<1x128xbf16>
    %158 = arith.extf %157 : vector<1x128xbf16> to vector<1x128xf32>
    %159 = vector.broadcast %158 : vector<1x128xf32> to vector<16x128xf32>
    %160 = arith.mulf %156, %159 : vector<16x128xf32>
    %161 = arith.addf %154, %160 : vector<16x128xf32>
    %162 = vector.extract_strided_slice %0 {offsets = [0, 2944], sizes = [16, 128], strides = [1, 1]} : vector<16x8192xbf16> to vector<16x128xbf16>
    %163 = arith.extf %162 : vector<16x128xbf16> to vector<16x128xf32>
    %164 = vector.extract_strided_slice %1 {offsets = [0, 2944], sizes = [1, 128], strides = [1, 1]} : vector<1x8192xbf16> to vector<1x128xbf16>
    %165 = arith.extf %164 : vector<1x128xbf16> to vector<1x128xf32>
    %166 = vector.broadcast %165 : vector<1x128xf32> to vector<16x128xf32>
    %167 = arith.mulf %163, %166 : vector<16x128xf32>
    %168 = arith.addf %161, %167 : vector<16x128xf32>
    %169 = vector.extract_strided_slice %0 {offsets = [0, 3072], sizes = [16, 128], strides = [1, 1]} : vector<16x8192xbf16> to vector<16x128xbf16>
    %170 = arith.extf %169 : vector<16x128xbf16> to vector<16x128xf32>
    %171 = vector.extract_strided_slice %1 {offsets = [0, 3072], sizes = [1, 128], strides = [1, 1]} : vector<1x8192xbf16> to vector<1x128xbf16>
    %172 = arith.extf %171 : vector<1x128xbf16> to vector<1x128xf32>
    %173 = vector.broadcast %172 : vector<1x128xf32> to vector<16x128xf32>
    %174 = arith.mulf %170, %173 : vector<16x128xf32>
    %175 = arith.addf %168, %174 : vector<16x128xf32>
    %176 = vector.extract_strided_slice %0 {offsets = [0, 3200], sizes = [16, 128], strides = [1, 1]} : vector<16x8192xbf16> to vector<16x128xbf16>
    %177 = arith.extf %176 : vector<16x128xbf16> to vector<16x128xf32>
    %178 = vector.extract_strided_slice %1 {offsets = [0, 3200], sizes = [1, 128], strides = [1, 1]} : vector<1x8192xbf16> to vector<1x128xbf16>
    %179 = arith.extf %178 : vector<1x128xbf16> to vector<1x128xf32>
    %180 = vector.broadcast %179 : vector<1x128xf32> to vector<16x128xf32>
    %181 = arith.mulf %177, %180 : vector<16x128xf32>
    %182 = arith.addf %175, %181 : vector<16x128xf32>
    %183 = vector.extract_strided_slice %0 {offsets = [0, 3328], sizes = [16, 128], strides = [1, 1]} : vector<16x8192xbf16> to vector<16x128xbf16>
    %184 = arith.extf %183 : vector<16x128xbf16> to vector<16x128xf32>
    %185 = vector.extract_strided_slice %1 {offsets = [0, 3328], sizes = [1, 128], strides = [1, 1]} : vector<1x8192xbf16> to vector<1x128xbf16>
    %186 = arith.extf %185 : vector<1x128xbf16> to vector<1x128xf32>
    %187 = vector.broadcast %186 : vector<1x128xf32> to vector<16x128xf32>
    %188 = arith.mulf %184, %187 : vector<16x128xf32>
    %189 = arith.addf %182, %188 : vector<16x128xf32>
    %190 = vector.extract_strided_slice %0 {offsets = [0, 3456], sizes = [16, 128], strides = [1, 1]} : vector<16x8192xbf16> to vector<16x128xbf16>
    %191 = arith.extf %190 : vector<16x128xbf16> to vector<16x128xf32>
    %192 = vector.extract_strided_slice %1 {offsets = [0, 3456], sizes = [1, 128], strides = [1, 1]} : vector<1x8192xbf16> to vector<1x128xbf16>
    %193 = arith.extf %192 : vector<1x128xbf16> to vector<1x128xf32>
    %194 = vector.broadcast %193 : vector<1x128xf32> to vector<16x128xf32>
    %195 = arith.mulf %191, %194 : vector<16x128xf32>
    %196 = arith.addf %189, %195 : vector<16x128xf32>
    %197 = vector.extract_strided_slice %0 {offsets = [0, 3584], sizes = [16, 128], strides = [1, 1]} : vector<16x8192xbf16> to vector<16x128xbf16>
    %198 = arith.extf %197 : vector<16x128xbf16> to vector<16x128xf32>
    %199 = vector.extract_strided_slice %1 {offsets = [0, 3584], sizes = [1, 128], strides = [1, 1]} : vector<1x8192xbf16> to vector<1x128xbf16>
    %200 = arith.extf %199 : vector<1x128xbf16> to vector<1x128xf32>
    %201 = vector.broadcast %200 : vector<1x128xf32> to vector<16x128xf32>
    %202 = arith.mulf %198, %201 : vector<16x128xf32>
    %203 = arith.addf %196, %202 : vector<16x128xf32>
    %204 = vector.extract_strided_slice %0 {offsets = [0, 3712], sizes = [16, 128], strides = [1, 1]} : vector<16x8192xbf16> to vector<16x128xbf16>
    %205 = arith.extf %204 : vector<16x128xbf16> to vector<16x128xf32>
    %206 = vector.extract_strided_slice %1 {offsets = [0, 3712], sizes = [1, 128], strides = [1, 1]} : vector<1x8192xbf16> to vector<1x128xbf16>
    %207 = arith.extf %206 : vector<1x128xbf16> to vector<1x128xf32>
    %208 = vector.broadcast %207 : vector<1x128xf32> to vector<16x128xf32>
    %209 = arith.mulf %205, %208 : vector<16x128xf32>
    %210 = arith.addf %203, %209 : vector<16x128xf32>
    %211 = vector.extract_strided_slice %0 {offsets = [0, 3840], sizes = [16, 128], strides = [1, 1]} : vector<16x8192xbf16> to vector<16x128xbf16>
    %212 = arith.extf %211 : vector<16x128xbf16> to vector<16x128xf32>
    %213 = vector.extract_strided_slice %1 {offsets = [0, 3840], sizes = [1, 128], strides = [1, 1]} : vector<1x8192xbf16> to vector<1x128xbf16>
    %214 = arith.extf %213 : vector<1x128xbf16> to vector<1x128xf32>
    %215 = vector.broadcast %214 : vector<1x128xf32> to vector<16x128xf32>
    %216 = arith.mulf %212, %215 : vector<16x128xf32>
    %217 = arith.addf %210, %216 : vector<16x128xf32>
    %218 = vector.extract_strided_slice %0 {offsets = [0, 3968], sizes = [16, 128], strides = [1, 1]} : vector<16x8192xbf16> to vector<16x128xbf16>
    %219 = arith.extf %218 : vector<16x128xbf16> to vector<16x128xf32>
    %220 = vector.extract_strided_slice %1 {offsets = [0, 3968], sizes = [1, 128], strides = [1, 1]} : vector<1x8192xbf16> to vector<1x128xbf16>
    %221 = arith.extf %220 : vector<1x128xbf16> to vector<1x128xf32>
    %222 = vector.broadcast %221 : vector<1x128xf32> to vector<16x128xf32>
    %223 = arith.mulf %219, %222 : vector<16x128xf32>
    %224 = arith.addf %217, %223 : vector<16x128xf32>
    %225 = vector.extract_strided_slice %0 {offsets = [0, 4096], sizes = [16, 128], strides = [1, 1]} : vector<16x8192xbf16> to vector<16x128xbf16>
    %226 = arith.extf %225 : vector<16x128xbf16> to vector<16x128xf32>
    %227 = vector.extract_strided_slice %1 {offsets = [0, 4096], sizes = [1, 128], strides = [1, 1]} : vector<1x8192xbf16> to vector<1x128xbf16>
    %228 = arith.extf %227 : vector<1x128xbf16> to vector<1x128xf32>
    %229 = vector.broadcast %228 : vector<1x128xf32> to vector<16x128xf32>
    %230 = arith.mulf %226, %229 : vector<16x128xf32>
    %231 = arith.addf %224, %230 : vector<16x128xf32>
    %232 = vector.extract_strided_slice %0 {offsets = [0, 4224], sizes = [16, 128], strides = [1, 1]} : vector<16x8192xbf16> to vector<16x128xbf16>
    %233 = arith.extf %232 : vector<16x128xbf16> to vector<16x128xf32>
    %234 = vector.extract_strided_slice %1 {offsets = [0, 4224], sizes = [1, 128], strides = [1, 1]} : vector<1x8192xbf16> to vector<1x128xbf16>
    %235 = arith.extf %234 : vector<1x128xbf16> to vector<1x128xf32>
    %236 = vector.broadcast %235 : vector<1x128xf32> to vector<16x128xf32>
    %237 = arith.mulf %233, %236 : vector<16x128xf32>
    %238 = arith.addf %231, %237 : vector<16x128xf32>
    %239 = vector.extract_strided_slice %0 {offsets = [0, 4352], sizes = [16, 128], strides = [1, 1]} : vector<16x8192xbf16> to vector<16x128xbf16>
    %240 = arith.extf %239 : vector<16x128xbf16> to vector<16x128xf32>
    %241 = vector.extract_strided_slice %1 {offsets = [0, 4352], sizes = [1, 128], strides = [1, 1]} : vector<1x8192xbf16> to vector<1x128xbf16>
    %242 = arith.extf %241 : vector<1x128xbf16> to vector<1x128xf32>
    %243 = vector.broadcast %242 : vector<1x128xf32> to vector<16x128xf32>
    %244 = arith.mulf %240, %243 : vector<16x128xf32>
    %245 = arith.addf %238, %244 : vector<16x128xf32>
    %246 = vector.extract_strided_slice %0 {offsets = [0, 4480], sizes = [16, 128], strides = [1, 1]} : vector<16x8192xbf16> to vector<16x128xbf16>
    %247 = arith.extf %246 : vector<16x128xbf16> to vector<16x128xf32>
    %248 = vector.extract_strided_slice %1 {offsets = [0, 4480], sizes = [1, 128], strides = [1, 1]} : vector<1x8192xbf16> to vector<1x128xbf16>
    %249 = arith.extf %248 : vector<1x128xbf16> to vector<1x128xf32>
    %250 = vector.broadcast %249 : vector<1x128xf32> to vector<16x128xf32>
    %251 = arith.mulf %247, %250 : vector<16x128xf32>
    %252 = arith.addf %245, %251 : vector<16x128xf32>
    %253 = vector.extract_strided_slice %0 {offsets = [0, 4608], sizes = [16, 128], strides = [1, 1]} : vector<16x8192xbf16> to vector<16x128xbf16>
    %254 = arith.extf %253 : vector<16x128xbf16> to vector<16x128xf32>
    %255 = vector.extract_strided_slice %1 {offsets = [0, 4608], sizes = [1, 128], strides = [1, 1]} : vector<1x8192xbf16> to vector<1x128xbf16>
    %256 = arith.extf %255 : vector<1x128xbf16> to vector<1x128xf32>
    %257 = vector.broadcast %256 : vector<1x128xf32> to vector<16x128xf32>
    %258 = arith.mulf %254, %257 : vector<16x128xf32>
    %259 = arith.addf %252, %258 : vector<16x128xf32>
    %260 = vector.extract_strided_slice %0 {offsets = [0, 4736], sizes = [16, 128], strides = [1, 1]} : vector<16x8192xbf16> to vector<16x128xbf16>
    %261 = arith.extf %260 : vector<16x128xbf16> to vector<16x128xf32>
    %262 = vector.extract_strided_slice %1 {offsets = [0, 4736], sizes = [1, 128], strides = [1, 1]} : vector<1x8192xbf16> to vector<1x128xbf16>
    %263 = arith.extf %262 : vector<1x128xbf16> to vector<1x128xf32>
    %264 = vector.broadcast %263 : vector<1x128xf32> to vector<16x128xf32>
    %265 = arith.mulf %261, %264 : vector<16x128xf32>
    %266 = arith.addf %259, %265 : vector<16x128xf32>
    %267 = vector.extract_strided_slice %0 {offsets = [0, 4864], sizes = [16, 128], strides = [1, 1]} : vector<16x8192xbf16> to vector<16x128xbf16>
    %268 = arith.extf %267 : vector<16x128xbf16> to vector<16x128xf32>
    %269 = vector.extract_strided_slice %1 {offsets = [0, 4864], sizes = [1, 128], strides = [1, 1]} : vector<1x8192xbf16> to vector<1x128xbf16>
    %270 = arith.extf %269 : vector<1x128xbf16> to vector<1x128xf32>
    %271 = vector.broadcast %270 : vector<1x128xf32> to vector<16x128xf32>
    %272 = arith.mulf %268, %271 : vector<16x128xf32>
    %273 = arith.addf %266, %272 : vector<16x128xf32>
    %274 = vector.extract_strided_slice %0 {offsets = [0, 4992], sizes = [16, 128], strides = [1, 1]} : vector<16x8192xbf16> to vector<16x128xbf16>
    %275 = arith.extf %274 : vector<16x128xbf16> to vector<16x128xf32>
    %276 = vector.extract_strided_slice %1 {offsets = [0, 4992], sizes = [1, 128], strides = [1, 1]} : vector<1x8192xbf16> to vector<1x128xbf16>
    %277 = arith.extf %276 : vector<1x128xbf16> to vector<1x128xf32>
    %278 = vector.broadcast %277 : vector<1x128xf32> to vector<16x128xf32>
    %279 = arith.mulf %275, %278 : vector<16x128xf32>
    %280 = arith.addf %273, %279 : vector<16x128xf32>
    %281 = vector.extract_strided_slice %0 {offsets = [0, 5120], sizes = [16, 128], strides = [1, 1]} : vector<16x8192xbf16> to vector<16x128xbf16>
    %282 = arith.extf %281 : vector<16x128xbf16> to vector<16x128xf32>
    %283 = vector.extract_strided_slice %1 {offsets = [0, 5120], sizes = [1, 128], strides = [1, 1]} : vector<1x8192xbf16> to vector<1x128xbf16>
    %284 = arith.extf %283 : vector<1x128xbf16> to vector<1x128xf32>
    %285 = vector.broadcast %284 : vector<1x128xf32> to vector<16x128xf32>
    %286 = arith.mulf %282, %285 : vector<16x128xf32>
    %287 = arith.addf %280, %286 : vector<16x128xf32>
    %288 = vector.extract_strided_slice %0 {offsets = [0, 5248], sizes = [16, 128], strides = [1, 1]} : vector<16x8192xbf16> to vector<16x128xbf16>
    %289 = arith.extf %288 : vector<16x128xbf16> to vector<16x128xf32>
    %290 = vector.extract_strided_slice %1 {offsets = [0, 5248], sizes = [1, 128], strides = [1, 1]} : vector<1x8192xbf16> to vector<1x128xbf16>
    %291 = arith.extf %290 : vector<1x128xbf16> to vector<1x128xf32>
    %292 = vector.broadcast %291 : vector<1x128xf32> to vector<16x128xf32>
    %293 = arith.mulf %289, %292 : vector<16x128xf32>
    %294 = arith.addf %287, %293 : vector<16x128xf32>
    %295 = vector.extract_strided_slice %0 {offsets = [0, 5376], sizes = [16, 128], strides = [1, 1]} : vector<16x8192xbf16> to vector<16x128xbf16>
    %296 = arith.extf %295 : vector<16x128xbf16> to vector<16x128xf32>
    %297 = vector.extract_strided_slice %1 {offsets = [0, 5376], sizes = [1, 128], strides = [1, 1]} : vector<1x8192xbf16> to vector<1x128xbf16>
    %298 = arith.extf %297 : vector<1x128xbf16> to vector<1x128xf32>
    %299 = vector.broadcast %298 : vector<1x128xf32> to vector<16x128xf32>
    %300 = arith.mulf %296, %299 : vector<16x128xf32>
    %301 = arith.addf %294, %300 : vector<16x128xf32>
    %302 = vector.extract_strided_slice %0 {offsets = [0, 5504], sizes = [16, 128], strides = [1, 1]} : vector<16x8192xbf16> to vector<16x128xbf16>
    %303 = arith.extf %302 : vector<16x128xbf16> to vector<16x128xf32>
    %304 = vector.extract_strided_slice %1 {offsets = [0, 5504], sizes = [1, 128], strides = [1, 1]} : vector<1x8192xbf16> to vector<1x128xbf16>
    %305 = arith.extf %304 : vector<1x128xbf16> to vector<1x128xf32>
    %306 = vector.broadcast %305 : vector<1x128xf32> to vector<16x128xf32>
    %307 = arith.mulf %303, %306 : vector<16x128xf32>
    %308 = arith.addf %301, %307 : vector<16x128xf32>
    %309 = vector.extract_strided_slice %0 {offsets = [0, 5632], sizes = [16, 128], strides = [1, 1]} : vector<16x8192xbf16> to vector<16x128xbf16>
    %310 = arith.extf %309 : vector<16x128xbf16> to vector<16x128xf32>
    %311 = vector.extract_strided_slice %1 {offsets = [0, 5632], sizes = [1, 128], strides = [1, 1]} : vector<1x8192xbf16> to vector<1x128xbf16>
    %312 = arith.extf %311 : vector<1x128xbf16> to vector<1x128xf32>
    %313 = vector.broadcast %312 : vector<1x128xf32> to vector<16x128xf32>
    %314 = arith.mulf %310, %313 : vector<16x128xf32>
    %315 = arith.addf %308, %314 : vector<16x128xf32>
    %316 = vector.extract_strided_slice %0 {offsets = [0, 5760], sizes = [16, 128], strides = [1, 1]} : vector<16x8192xbf16> to vector<16x128xbf16>
    %317 = arith.extf %316 : vector<16x128xbf16> to vector<16x128xf32>
    %318 = vector.extract_strided_slice %1 {offsets = [0, 5760], sizes = [1, 128], strides = [1, 1]} : vector<1x8192xbf16> to vector<1x128xbf16>
    %319 = arith.extf %318 : vector<1x128xbf16> to vector<1x128xf32>
    %320 = vector.broadcast %319 : vector<1x128xf32> to vector<16x128xf32>
    %321 = arith.mulf %317, %320 : vector<16x128xf32>
    %322 = arith.addf %315, %321 : vector<16x128xf32>
    %323 = vector.extract_strided_slice %0 {offsets = [0, 5888], sizes = [16, 128], strides = [1, 1]} : vector<16x8192xbf16> to vector<16x128xbf16>
    %324 = arith.extf %323 : vector<16x128xbf16> to vector<16x128xf32>
    %325 = vector.extract_strided_slice %1 {offsets = [0, 5888], sizes = [1, 128], strides = [1, 1]} : vector<1x8192xbf16> to vector<1x128xbf16>
    %326 = arith.extf %325 : vector<1x128xbf16> to vector<1x128xf32>
    %327 = vector.broadcast %326 : vector<1x128xf32> to vector<16x128xf32>
    %328 = arith.mulf %324, %327 : vector<16x128xf32>
    %329 = arith.addf %322, %328 : vector<16x128xf32>
    %330 = vector.extract_strided_slice %0 {offsets = [0, 6016], sizes = [16, 128], strides = [1, 1]} : vector<16x8192xbf16> to vector<16x128xbf16>
    %331 = arith.extf %330 : vector<16x128xbf16> to vector<16x128xf32>
    %332 = vector.extract_strided_slice %1 {offsets = [0, 6016], sizes = [1, 128], strides = [1, 1]} : vector<1x8192xbf16> to vector<1x128xbf16>
    %333 = arith.extf %332 : vector<1x128xbf16> to vector<1x128xf32>
    %334 = vector.broadcast %333 : vector<1x128xf32> to vector<16x128xf32>
    %335 = arith.mulf %331, %334 : vector<16x128xf32>
    %336 = arith.addf %329, %335 : vector<16x128xf32>
    %337 = vector.extract_strided_slice %0 {offsets = [0, 6144], sizes = [16, 128], strides = [1, 1]} : vector<16x8192xbf16> to vector<16x128xbf16>
    %338 = arith.extf %337 : vector<16x128xbf16> to vector<16x128xf32>
    %339 = vector.extract_strided_slice %1 {offsets = [0, 6144], sizes = [1, 128], strides = [1, 1]} : vector<1x8192xbf16> to vector<1x128xbf16>
    %340 = arith.extf %339 : vector<1x128xbf16> to vector<1x128xf32>
    %341 = vector.broadcast %340 : vector<1x128xf32> to vector<16x128xf32>
    %342 = arith.mulf %338, %341 : vector<16x128xf32>
    %343 = arith.addf %336, %342 : vector<16x128xf32>
    %344 = vector.extract_strided_slice %0 {offsets = [0, 6272], sizes = [16, 128], strides = [1, 1]} : vector<16x8192xbf16> to vector<16x128xbf16>
    %345 = arith.extf %344 : vector<16x128xbf16> to vector<16x128xf32>
    %346 = vector.extract_strided_slice %1 {offsets = [0, 6272], sizes = [1, 128], strides = [1, 1]} : vector<1x8192xbf16> to vector<1x128xbf16>
    %347 = arith.extf %346 : vector<1x128xbf16> to vector<1x128xf32>
    %348 = vector.broadcast %347 : vector<1x128xf32> to vector<16x128xf32>
    %349 = arith.mulf %345, %348 : vector<16x128xf32>
    %350 = arith.addf %343, %349 : vector<16x128xf32>
    %351 = vector.extract_strided_slice %0 {offsets = [0, 6400], sizes = [16, 128], strides = [1, 1]} : vector<16x8192xbf16> to vector<16x128xbf16>
    %352 = arith.extf %351 : vector<16x128xbf16> to vector<16x128xf32>
    %353 = vector.extract_strided_slice %1 {offsets = [0, 6400], sizes = [1, 128], strides = [1, 1]} : vector<1x8192xbf16> to vector<1x128xbf16>
    %354 = arith.extf %353 : vector<1x128xbf16> to vector<1x128xf32>
    %355 = vector.broadcast %354 : vector<1x128xf32> to vector<16x128xf32>
    %356 = arith.mulf %352, %355 : vector<16x128xf32>
    %357 = arith.addf %350, %356 : vector<16x128xf32>
    %358 = vector.extract_strided_slice %0 {offsets = [0, 6528], sizes = [16, 128], strides = [1, 1]} : vector<16x8192xbf16> to vector<16x128xbf16>
    %359 = arith.extf %358 : vector<16x128xbf16> to vector<16x128xf32>
    %360 = vector.extract_strided_slice %1 {offsets = [0, 6528], sizes = [1, 128], strides = [1, 1]} : vector<1x8192xbf16> to vector<1x128xbf16>
    %361 = arith.extf %360 : vector<1x128xbf16> to vector<1x128xf32>
    %362 = vector.broadcast %361 : vector<1x128xf32> to vector<16x128xf32>
    %363 = arith.mulf %359, %362 : vector<16x128xf32>
    %364 = arith.addf %357, %363 : vector<16x128xf32>
    %365 = vector.extract_strided_slice %0 {offsets = [0, 6656], sizes = [16, 128], strides = [1, 1]} : vector<16x8192xbf16> to vector<16x128xbf16>
    %366 = arith.extf %365 : vector<16x128xbf16> to vector<16x128xf32>
    %367 = vector.extract_strided_slice %1 {offsets = [0, 6656], sizes = [1, 128], strides = [1, 1]} : vector<1x8192xbf16> to vector<1x128xbf16>
    %368 = arith.extf %367 : vector<1x128xbf16> to vector<1x128xf32>
    %369 = vector.broadcast %368 : vector<1x128xf32> to vector<16x128xf32>
    %370 = arith.mulf %366, %369 : vector<16x128xf32>
    %371 = arith.addf %364, %370 : vector<16x128xf32>
    %372 = vector.extract_strided_slice %0 {offsets = [0, 6784], sizes = [16, 128], strides = [1, 1]} : vector<16x8192xbf16> to vector<16x128xbf16>
    %373 = arith.extf %372 : vector<16x128xbf16> to vector<16x128xf32>
    %374 = vector.extract_strided_slice %1 {offsets = [0, 6784], sizes = [1, 128], strides = [1, 1]} : vector<1x8192xbf16> to vector<1x128xbf16>
    %375 = arith.extf %374 : vector<1x128xbf16> to vector<1x128xf32>
    %376 = vector.broadcast %375 : vector<1x128xf32> to vector<16x128xf32>
    %377 = arith.mulf %373, %376 : vector<16x128xf32>
    %378 = arith.addf %371, %377 : vector<16x128xf32>
    %379 = vector.extract_strided_slice %0 {offsets = [0, 6912], sizes = [16, 128], strides = [1, 1]} : vector<16x8192xbf16> to vector<16x128xbf16>
    %380 = arith.extf %379 : vector<16x128xbf16> to vector<16x128xf32>
    %381 = vector.extract_strided_slice %1 {offsets = [0, 6912], sizes = [1, 128], strides = [1, 1]} : vector<1x8192xbf16> to vector<1x128xbf16>
    %382 = arith.extf %381 : vector<1x128xbf16> to vector<1x128xf32>
    %383 = vector.broadcast %382 : vector<1x128xf32> to vector<16x128xf32>
    %384 = arith.mulf %380, %383 : vector<16x128xf32>
    %385 = arith.addf %378, %384 : vector<16x128xf32>
    %386 = vector.extract_strided_slice %0 {offsets = [0, 7040], sizes = [16, 128], strides = [1, 1]} : vector<16x8192xbf16> to vector<16x128xbf16>
    %387 = arith.extf %386 : vector<16x128xbf16> to vector<16x128xf32>
    %388 = vector.extract_strided_slice %1 {offsets = [0, 7040], sizes = [1, 128], strides = [1, 1]} : vector<1x8192xbf16> to vector<1x128xbf16>
    %389 = arith.extf %388 : vector<1x128xbf16> to vector<1x128xf32>
    %390 = vector.broadcast %389 : vector<1x128xf32> to vector<16x128xf32>
    %391 = arith.mulf %387, %390 : vector<16x128xf32>
    %392 = arith.addf %385, %391 : vector<16x128xf32>
    %393 = vector.extract_strided_slice %0 {offsets = [0, 7168], sizes = [16, 128], strides = [1, 1]} : vector<16x8192xbf16> to vector<16x128xbf16>
    %394 = arith.extf %393 : vector<16x128xbf16> to vector<16x128xf32>
    %395 = vector.extract_strided_slice %1 {offsets = [0, 7168], sizes = [1, 128], strides = [1, 1]} : vector<1x8192xbf16> to vector<1x128xbf16>
    %396 = arith.extf %395 : vector<1x128xbf16> to vector<1x128xf32>
    %397 = vector.broadcast %396 : vector<1x128xf32> to vector<16x128xf32>
    %398 = arith.mulf %394, %397 : vector<16x128xf32>
    %399 = arith.addf %392, %398 : vector<16x128xf32>
    %400 = vector.extract_strided_slice %0 {offsets = [0, 7296], sizes = [16, 128], strides = [1, 1]} : vector<16x8192xbf16> to vector<16x128xbf16>
    %401 = arith.extf %400 : vector<16x128xbf16> to vector<16x128xf32>
    %402 = vector.extract_strided_slice %1 {offsets = [0, 7296], sizes = [1, 128], strides = [1, 1]} : vector<1x8192xbf16> to vector<1x128xbf16>
    %403 = arith.extf %402 : vector<1x128xbf16> to vector<1x128xf32>
    %404 = vector.broadcast %403 : vector<1x128xf32> to vector<16x128xf32>
    %405 = arith.mulf %401, %404 : vector<16x128xf32>
    %406 = arith.addf %399, %405 : vector<16x128xf32>
    %407 = vector.extract_strided_slice %0 {offsets = [0, 7424], sizes = [16, 128], strides = [1, 1]} : vector<16x8192xbf16> to vector<16x128xbf16>
    %408 = arith.extf %407 : vector<16x128xbf16> to vector<16x128xf32>
    %409 = vector.extract_strided_slice %1 {offsets = [0, 7424], sizes = [1, 128], strides = [1, 1]} : vector<1x8192xbf16> to vector<1x128xbf16>
    %410 = arith.extf %409 : vector<1x128xbf16> to vector<1x128xf32>
    %411 = vector.broadcast %410 : vector<1x128xf32> to vector<16x128xf32>
    %412 = arith.mulf %408, %411 : vector<16x128xf32>
    %413 = arith.addf %406, %412 : vector<16x128xf32>
    %414 = vector.extract_strided_slice %0 {offsets = [0, 7552], sizes = [16, 128], strides = [1, 1]} : vector<16x8192xbf16> to vector<16x128xbf16>
    %415 = arith.extf %414 : vector<16x128xbf16> to vector<16x128xf32>
    %416 = vector.extract_strided_slice %1 {offsets = [0, 7552], sizes = [1, 128], strides = [1, 1]} : vector<1x8192xbf16> to vector<1x128xbf16>
    %417 = arith.extf %416 : vector<1x128xbf16> to vector<1x128xf32>
    %418 = vector.broadcast %417 : vector<1x128xf32> to vector<16x128xf32>
    %419 = arith.mulf %415, %418 : vector<16x128xf32>
    %420 = arith.addf %413, %419 : vector<16x128xf32>
    %421 = vector.extract_strided_slice %0 {offsets = [0, 7680], sizes = [16, 128], strides = [1, 1]} : vector<16x8192xbf16> to vector<16x128xbf16>
    %422 = arith.extf %421 : vector<16x128xbf16> to vector<16x128xf32>
    %423 = vector.extract_strided_slice %1 {offsets = [0, 7680], sizes = [1, 128], strides = [1, 1]} : vector<1x8192xbf16> to vector<1x128xbf16>
    %424 = arith.extf %423 : vector<1x128xbf16> to vector<1x128xf32>
    %425 = vector.broadcast %424 : vector<1x128xf32> to vector<16x128xf32>
    %426 = arith.mulf %422, %425 : vector<16x128xf32>
    %427 = arith.addf %420, %426 : vector<16x128xf32>
    %428 = vector.extract_strided_slice %0 {offsets = [0, 7808], sizes = [16, 128], strides = [1, 1]} : vector<16x8192xbf16> to vector<16x128xbf16>
    %429 = arith.extf %428 : vector<16x128xbf16> to vector<16x128xf32>
    %430 = vector.extract_strided_slice %1 {offsets = [0, 7808], sizes = [1, 128], strides = [1, 1]} : vector<1x8192xbf16> to vector<1x128xbf16>
    %431 = arith.extf %430 : vector<1x128xbf16> to vector<1x128xf32>
    %432 = vector.broadcast %431 : vector<1x128xf32> to vector<16x128xf32>
    %433 = arith.mulf %429, %432 : vector<16x128xf32>
    %434 = arith.addf %427, %433 : vector<16x128xf32>
    %435 = vector.extract_strided_slice %0 {offsets = [0, 7936], sizes = [16, 128], strides = [1, 1]} : vector<16x8192xbf16> to vector<16x128xbf16>
    %436 = arith.extf %435 : vector<16x128xbf16> to vector<16x128xf32>
    %437 = vector.extract_strided_slice %1 {offsets = [0, 7936], sizes = [1, 128], strides = [1, 1]} : vector<1x8192xbf16> to vector<1x128xbf16>
    %438 = arith.extf %437 : vector<1x128xbf16> to vector<1x128xf32>
    %439 = vector.broadcast %438 : vector<1x128xf32> to vector<16x128xf32>
    %440 = arith.mulf %436, %439 : vector<16x128xf32>
    %441 = arith.addf %434, %440 : vector<16x128xf32>
    %442 = vector.extract_strided_slice %0 {offsets = [0, 8064], sizes = [16, 128], strides = [1, 1]} : vector<16x8192xbf16> to vector<16x128xbf16>
    %443 = arith.extf %442 : vector<16x128xbf16> to vector<16x128xf32>
    %444 = vector.extract_strided_slice %1 {offsets = [0, 8064], sizes = [1, 128], strides = [1, 1]} : vector<1x8192xbf16> to vector<1x128xbf16>
    %445 = arith.extf %444 : vector<1x128xbf16> to vector<1x128xf32>
    %446 = vector.broadcast %445 : vector<1x128xf32> to vector<16x128xf32>
    %447 = arith.mulf %443, %446 : vector<16x128xf32>
    %448 = arith.addf %441, %447 : vector<16x128xf32>
    %cst = arith.constant dense<0.000000e+00> : vector<16xf32>
    %449 = vector.multi_reduction <add>, %448, %cst [1] : vector<16x128xf32> to vector<16xf32>
    %450 = vector.shape_cast %449 : vector<16xf32> to vector<16x1xf32>
    %c0_3 = arith.constant 0 : index
    %c0_4 = arith.constant 0 : index
    %451 = vector.load %arg4[%c0_3, %c0_4] : memref<16x1xf32, #tpu.memory_space<vmem>>, vector<16x1xf32>
    tpu.vector_store %arg4[%c0_3, %c0_4], %450 {strides = array<i32>} : memref<16x1xf32, #tpu.memory_space<vmem>>, vector<16x1xf32>,
    return
  }
  func.func @transform_0(%arg0: i32, %arg1: i32) -> (i32, i32) {
    %c0_i32 = arith.constant 0 : i32
    return %arg0, %arg1 : i32, i32
  }
  func.func @transform_1(%arg0: i32, %arg1: i32) -> (i32, i32) {
    %c0_i32 = arith.constant 0 : i32
    %c0_i32_0 = arith.constant 0 : i32
    return %c0_i32, %arg1 : i32, i32
  }
  func.func @transform_2(%arg0: i32, %arg1: i32) -> (i32, i32) {
    %c0_i32 = arith.constant 0 : i32
    %c0_i32_0 = arith.constant 0 : i32
    return %arg0, %c0_i32 : i32, i32
  }
}

</mosaic_0001>

<bundles_post_ra>
// kernel: forward.5
= control target key start
LH: loop header
LB: loop body
LE: loop exit
PB: predicated region body
PF: predicated region fallthrough
CT: control target
= control target key end

     0   :  { %8 = vsyncpa [#allocation4], 0  ;;  %s733_s0 = inlined_call_operand.vmem [shape: bf16[128,128], index: 0, kind: input, shape index: {}]   ;;  %s734_s1 = inlined_call_operand.hbm [shape: bf16[128,128], index: 1, kind: input, shape index: {}]   ;;  %s735_s2 = inlined_call_operand.hbm [shape: f32[1,128], index: 2, kind: input, shape index: {}]   ;;  %s736_s3 = inlined_call_operand.vmem [shape: bf16[128,128], index: 3, kind: output, shape index: {}]  }
   0x1   :  { %9 = vsyncpa [#allocation6], 0  ;;  %s631_s12 = smov [#allocation3]  }
   0x2   :  { %s17_s13 = sshll.u32 %s631_s12, 4  ;;  %s18_s13 = int_to_ptr.vmem [resolvable:$true] %s17_s13 }
   0x3   :  { %s595_s14 = scalar_lea.vmem %s18_s13, 1024  ;;  %p600_p1 = scmp.lt.s32.totalorder %s18_s13, %s18_s13 }
   0x4   :  { %p596_p0 = scmp.ne.s32.totalorder %s18_s13, %s595_s14  ;;  %p601_p2 = scmp.lt.s32.totalorder %s595_s14, %s595_s14 }
   0x6   :  { %p602_p3 = por %p601_p2, %p600_p1 }
   0x8   :  { %p603_p4 = pnand %p602_p3, %p596_p0 }
   0xa   :  { %606 = shalt.err (!%p603_p4)
}
   0xb   :  { %s632_s15 = smov 64   ;;  %s633_s16 = smov 4  }
   0xc   :  { %23 = dma.hbm_to_vmem [thread:$0]  %s734_s1, 1024, %s18_s13, [#allocation4], %s632_s15, %s632_s15, %s633_s16  }
   0xd   :  { %s634_s19 = smov [#allocation5]  }
   0xe   :  { %s30_s20 = sshll.u32 %s634_s19, 4  ;;  %s31_s20 = int_to_ptr.vmem [resolvable:$true] %s30_s20 }
   0xf   :  { %s615_s21 = scalar_lea.vmem %s31_s20, 16  ;;  %s619_s22 = scalar_lea.vmem %s31_s20, 32 }
  0x10   :  { %p616_p5 = scmp.ne.s32.totalorder %s31_s20, %s615_s21  ;;  %p620_p6 = scmp.lt.s32.totalorder %s31_s20, %s31_s20 }
  0x11   :  { %p621_p7 = scmp.lt.s32.totalorder %s619_s22, %s615_s21 }
  0x13   :  { %p622_p8 = por %p621_p7, %p620_p6 }
  0x15   :  { %p623_p9 = pnand %p622_p8, %p616_p5 }
  0x17   :  { %626 = shalt.err (!%p623_p9)
}
  0x18   :  { %33 = dma.hbm_to_vmem [thread:$0]  %s735_s2, 16, %s31_s20, [#allocation6]  }
  0x19   :  { %627 = dma.done.wait [#allocation4], 1024  }
  0x1a   :  { %628 = vsyncadd [#allocation4], 4294966272 }
  0x1b   :  { %629 = dma.done.wait [#allocation6], 16  }
  0x1c   :  { %630 = vsyncadd [#allocation6], 4294967280  ;;  %v571_v0 = vld [vmem:[#allocation3 + $0x38] sm:$0xff]   ;;  %v572_v1 = vld [vmem:[#allocation3 + $0x30] sm:$0xff]  }
  0x1d   :  { %519 = vmatprep.subr.bf16.mxu0 %v571_v0  ;;  %551 = vmatprep.subr.bf16.mxu1 %v571_v0  ;;  %v573_v2 = vld [vmem:[#allocation3 + $0x28] sm:$0xff]   ;;  %v574_v3 = vld [vmem:[#allocation3 + $0x20] sm:$0xff]   ;;  %v575_v6 = vld [vmem:[#allocation3 + $0x18] sm:$0xff]  }
  0x1e   :  { %520 = vmatpush3.bf16.msra.mxu0 %v571_v0  ;;  %559 = vmatpush3.bf16.msra.mxu1 %v571_v0  ;;  %v579_v4 = vld [vmem:[%s733_s0] sm:$0xff]   ;;  %v576_v7 = vld [vmem:[#allocation3 + $0x10] sm:$0xff]   ;;  %v577_v8 = vld [vmem:[#allocation3 + $0x8] sm:$0xff]  }
  0x1f   :  { %521 = vmatprep.subr.bf16.mxu0 %v572_v1  ;;  %552 = vmatprep.subr.bf16.mxu1 %v572_v1  ;;  %v580_v5 = vld [vmem:[%s733_s0 + $0x20] sm:$0xff]   ;;  %v581_v10 = vld [vmem:[%s733_s0 + $0x8] sm:$0xff]   ;;  %v583_v12 = vld [vmem:[%s733_s0 + $0x10] sm:$0xff]  }
  0x20   :  { %535 = vmatprep.mubr.bf16.mxu0 %v579_v4  ;;  %543 = vmatprep.mubr.bf16.mxu1 %v580_v5  ;;  %v578_v9 = vld [vmem:[#allocation3] sm:$0xff]   ;;  %v582_v11 = vld [vmem:[%s733_s0 + $0x28] sm:$0xff]   ;;  %v584_v13 = vld [vmem:[%s733_s0 + $0x30] sm:$0xff]  }
  0x21   :  { %v585_v14 = vld [vmem:[%s733_s0 + $0x18] sm:$0xff]   ;;  %v685_v16 = vld [vmem:[#allocation5] ss:$0 sm:$0xff] }
  0x22   :  { %522 = vmatpush3.bf16.msra.mxu0 %v572_v1  ;;  %560 = vmatpush3.bf16.msra.mxu1 %v572_v1  ;;  %v586_v15 = vld [vmem:[%s733_s0 + $0x38] sm:$0xff]  }
  0x23   :  { %523 = vmatprep.subr.bf16.mxu0 %v573_v2  ;;  %553 = vmatprep.subr.bf16.mxu1 %v573_v2 }
  0x26   :  { %524 = vmatpush3.bf16.msra.mxu0 %v573_v2  ;;  %561 = vmatpush3.bf16.msra.mxu1 %v573_v2 }
  0x27   :  { %525 = vmatprep.subr.bf16.mxu0 %v574_v3  ;;  %554 = vmatprep.subr.bf16.mxu1 %v574_v3 }
  0x2a   :  { %526 = vmatpush3.bf16.msra.mxu0 %v574_v3  ;;  %562 = vmatpush3.bf16.msra.mxu1 %v574_v3 }
  0x2b   :  { %527 = vmatprep.subr.bf16.mxu0 %v575_v6  ;;  %555 = vmatprep.subr.bf16.mxu1 %v575_v6 }
  0x2e   :  { %528 = vmatpush3.bf16.msra.mxu0 %v575_v6  ;;  %563 = vmatpush3.bf16.msra.mxu1 %v575_v6 }
  0x2f   :  { %529 = vmatprep.subr.bf16.mxu0 %v576_v7  ;;  %556 = vmatprep.subr.bf16.mxu1 %v576_v7 }
  0x32   :  { %530 = vmatpush3.bf16.msra.mxu0 %v576_v7  ;;  %564 = vmatpush3.bf16.msra.mxu1 %v576_v7 }
  0x33   :  { %531 = vmatprep.subr.bf16.mxu0 %v577_v8  ;;  %557 = vmatprep.subr.bf16.mxu1 %v577_v8 }
  0x36   :  { %532 = vmatpush3.bf16.msra.mxu0 %v577_v8  ;;  %565 = vmatpush3.bf16.msra.mxu1 %v577_v8 }
  0x37   :  { %533 = vmatprep.subr.bf16.mxu0 %v578_v9  ;;  %558 = vmatprep.subr.bf16.mxu1 %v578_v9 }
  0x3a   :  { %534 = vmatpush3.bf16.msra.mxu0 %v578_v9  ;;  %566 = vmatpush3.bf16.msra.mxu1 %v578_v9 }
  0x3d   :  { %536 = vmatmul.mubr.bf16.vlgmr.msra.gmra.mxu0 %v581_v10  ;;  %544 = vmatmul.mubr.bf16.vlgmr.msra.gmra.mxu1 %v582_v11 }
  0x3e   :  { %539 = vmatprep.mubr.bf16.mxu0 %v583_v12  ;;  %547 = vmatprep.mubr.bf16.mxu1 %v584_v13 }
  0x45   :  { %540 = vmatmul.mubr.bf16.gmra.mxu0 %v585_v14  ;;  %548 = vmatmul.mubr.bf16.gmra.mxu1 %v586_v15 }
  0xfd   :  { %v537_v17 = vpop.f32.mrf.mxu0  ;;  %v545_v18 = vpop.f32.mrf.mxu1 }
  0xfe   :  { %v219_v19 = vadd.f32 %v537_v17, %v685_v16  ;;  %v251_v20 = vadd.f32 %v545_v18, %v685_v16 }
  0xff   :  { %v210_v21 = vpop.f32.mrf.mxu0  ;;  %v242_v22 = vpop.f32.mrf.mxu1 }
 0x100   :  { %vm275_vm0 = vcmp.ge.f32.partialorder %v219_v19, 0.0  ;;  %v291_v23 = vmul.f32 0.2, %v219_v19  ;;  %vm283_vm1 = vcmp.ge.f32.partialorder %v251_v20, 0.0  ;;  %v299_v24 = vmul.f32 0.2, %v251_v20 }
 0x101   :  { %v211_v25 = vadd.f32 %v685_v16, %v210_v21  ;;  %v243_v26 = vadd.f32 %v685_v16, %v242_v22  ;;  %v538_v27 = vpop.f32.mrf.mxu0  ;;  %v546_v28 = vpop.f32.mrf.mxu1 }
 0x102   :  { %v222_v29 = vadd.f32 %v538_v27, %v685_v16  ;;  %v254_v30 = vadd.f32 %v546_v28, %v685_v16  ;;  %v307_v31 = vsel %vm275_vm0, %v219_v19, %v291_v23  ;;  %v315_v32 = vsel %vm283_vm1, %v251_v20, %v299_v24 }
 0x103   :  { %vm273_vm2 = vcmp.ge.f32.partialorder %v211_v25, 0.0  ;;  %v289_v33 = vmul.f32 0.2, %v211_v25  ;;  %v213_v34 = vpop.f32.mrf.mxu0  ;;  %v245_v35 = vpop.f32.mrf.mxu1  ;;  %vm281_vm5 = vcmp.ge.f32.partialorder %v243_v26, 0.0  ;;  %v297_v38 = vmul.f32 0.2, %v243_v26 }
 0x104   :  { %vm276_vm3 = vcmp.ge.f32.partialorder %v222_v29, 0.0  ;;  %v292_v36 = vmul.f32 0.2, %v222_v29  ;;  %vm284_vm4 = vcmp.ge.f32.partialorder %v254_v30, 0.0  ;;  %v300_v37 = vmul.f32 0.2, %v254_v30 }
 0x105   :  { %v214_v39 = vadd.f32 %v685_v16, %v213_v34  ;;  %v246_v40 = vadd.f32 %v685_v16, %v245_v35  ;;  %v541_v41 = vpop.f32.mrf.mxu0  ;;  %v549_v42 = vpop.f32.mrf.mxu1  ;;  %v305_v53 = vsel %vm273_vm2, %v211_v25, %v289_v33  ;;  %v313_v58 = vsel %vm281_vm5, %v243_v26, %v297_v38 }
 0x106   :  { %v308_v43 = vsel %vm276_vm3, %v222_v29, %v292_v36  ;;  %v316_v44 = vsel %vm284_vm4, %v254_v30, %v300_v37  ;;  %v235_v45 = vadd.f32 %v541_v41, %v685_v16  ;;  %v267_v46 = vadd.f32 %v549_v42, %v685_v16 }
 0x107   :  { %v464_v47 = vpack.c.bf16 %v308_v43, %v307_v31  ;;  %v484_v48 = vpack.c.bf16 %v316_v44, %v315_v32  ;;  %vm274_vm6 = vcmp.ge.f32.partialorder %v214_v39, 0.0  ;;  %v290_v49 = vmul.f32 0.2, %v214_v39  ;;  %v226_v50 = vpop.f32.mrf.mxu0  ;;  %v258_v51 = vpop.f32.mrf.mxu1 }
 0x108   :  { %vm282_vm7 = vcmp.ge.f32.partialorder %v246_v40, 0.0  ;;  %v298_v52 = vmul.f32 0.2, %v246_v40  ;;  %v227_v55 = vadd.f32 %v685_v16, %v226_v50  ;;  %v259_v61 = vadd.f32 %v685_v16, %v258_v51 }
 0x109   :  { %496 = vst [vmem:[%s736_s3 + $0x8] sm:$0xff] %v464_v47   ;;  %500 = vst [vmem:[%s736_s3 + $0x28] sm:$0xff] %v484_v48   ;;  %v306_v54 = vsel %vm274_vm6, %v214_v39, %v290_v49  ;;  %v542_v56 = vpop.f32.mrf.mxu0  ;;  %v550_v57 = vpop.f32.mrf.mxu1  ;;  %vm279_vm8 = vcmp.ge.f32.partialorder %v235_v45, 0.0  ;;  %v295_v63 = vmul.f32 0.2, %v235_v45  ;;  %vm287_vm9 = vcmp.ge.f32.partialorder %v267_v46, 0.0 }
 0x10a   :  { %v459_v59 = vpack.c.bf16 %v306_v54, %v305_v53  ;;  %v314_v60 = vsel %vm282_vm7, %v246_v40, %v298_v52  ;;  %v303_v2 = vmul.f32 0.2, %v267_v46  ;;  %vm277_vm10 = vcmp.ge.f32.partialorder %v227_v55, 0.0 }
 0x10b   :  { %v479_v62 = vpack.c.bf16 %v314_v60, %v313_v58  ;;  %v229_v0 = vpop.f32.mrf.mxu0  ;;  %v261_v1 = vpop.f32.mrf.mxu1  ;;  %v238_v3 = vadd.f32 %v542_v56, %v685_v16  ;;  %v270_v4 = vadd.f32 %v550_v57, %v685_v16  ;;  %v293_v5 = vmul.f32 0.2, %v227_v55 }
 0x10c   :  { %460 = vst [vmem:[%s736_s3] sm:$0xff] %v459_v59   ;;  %vm285_vm11 = vcmp.ge.f32.partialorder %v259_v61, 0.0  ;;  %v230_v6 = vadd.f32 %v685_v16, %v229_v0  ;;  %v262_v7 = vadd.f32 %v685_v16, %v261_v1  ;;  %v301_v8 = vmul.f32 0.2, %v259_v61 }
 0x10d   :  { %499 = vst [vmem:[%s736_s3 + $0x20] sm:$0xff] %v479_v62   ;;  %vm280_vm12 = vcmp.ge.f32.partialorder %v238_v3, 0.0  ;;  %v296_v9 = vmul.f32 0.2, %v238_v3  ;;  %vm288_vm13 = vcmp.ge.f32.partialorder %v270_v4, 0.0  ;;  %v311_v12 = vsel %vm279_vm8, %v235_v45, %v295_v63 }
 0x10e   :  { %v304_v10 = vmul.f32 0.2, %v270_v4  ;;  %vm278_vm14 = vcmp.ge.f32.partialorder %v230_v6, 0.0  ;;  %v294_v11 = vmul.f32 0.2, %v230_v6  ;;  %vm286_vm15 = vcmp.ge.f32.partialorder %v262_v7, 0.0 }
 0x10f   :  { %v319_v13 = vsel %vm287_vm9, %v267_v46, %v303_v2  ;;  %v312_v14 = vsel %vm280_vm12, %v238_v3, %v296_v9  ;;  %v302_v15 = vmul.f32 0.2, %v262_v7  ;;  %v309_v17 = vsel %vm277_vm10, %v227_v55, %v293_v5 }
 0x110   :  { %v474_v18 = vpack.c.bf16 %v312_v14, %v311_v12  ;;  %v320_v19 = vsel %vm288_vm13, %v270_v4, %v304_v10  ;;  %v310_v20 = vsel %vm278_vm14, %v230_v6, %v294_v11  ;;  %v317_v16 = vsel %vm285_vm11, %v259_v61, %v301_v8 }
 0x111   :  { %v494_v21 = vpack.c.bf16 %v320_v19, %v319_v13  ;;  %v469_v22 = vpack.c.bf16 %v310_v20, %v309_v17  ;;  %v318_v23 = vsel %vm286_vm15, %v262_v7, %v302_v15 }
 0x112   :  { %498 = vst [vmem:[%s736_s3 + $0x18] sm:$0xff] %v474_v18   ;;  %v489_v24 = vpack.c.bf16 %v318_v23, %v317_v16 }
 0x113   :  { %502 = vst [vmem:[%s736_s3 + $0x38] sm:$0xff] %v494_v21   ;;  %497 = vst [vmem:[%s736_s3 + $0x10] sm:$0xff] %v469_v22  }
 0x114   :  { %501 = vst [vmem:[%s736_s3 + $0x30] sm:$0xff] %v489_v24  }
 0x115   :  { %405 = vsyncpa [#allocation4], 1 }
 0x116   :  { %406 = vsyncpa [#allocation6], 1 }

// kernel: forward.6
= control target key start
LH: loop header
LB: loop body
LE: loop exit
PB: predicated region body
PF: predicated region fallthrough
CT: control target
= control target key end

     0   :  { %s1407_s1 = inlined_call_operand.vmem [shape: bf16[1024,128], index: 1, kind: input, shape index: {}]   ;;  %s1408_s0 = inlined_call_operand.vmem [shape: bf16[32,1024], index: 0, kind: input, shape index: {}]   ;;  %s1409_s2 = inlined_call_operand.vmem [shape: f32[1,128], index: 2, kind: input, shape index: {}]   ;;  %s1410_s3 = inlined_call_operand.vmem [shape: bf16[32,128], index: 3, kind: output, shape index: {}]  }
   0x1   :  { %v1074_v0 = vld [vmem:[%s1407_s1 + $0x78] sm:$0xff]   ;;  %v1078_v4 = vld [vmem:[%s1407_s1 + $0x70] sm:$0xff]   ;;  %v1082_v8 = vld [vmem:[%s1407_s1 + $0x68] sm:$0xff]  }
   0x2   :  { %v1075_v1 = vld [vmem:[%s1407_s1 + $0xf8] sm:$0xff]   ;;  %962 = vmatprep.subr.bf16.mxu0 %v1074_v0  ;;  %v1079_v5 = vld [vmem:[%s1407_s1 + $0xf0] sm:$0xff]   ;;  %v1083_v9 = vld [vmem:[%s1407_s1 + $0xe8] sm:$0xff]  }
   0x3   :  { %v1076_v2 = vld [vmem:[%s1407_s1 + $0x38] sm:$0xff]   ;;  %990 = vmatprep.subr.bf16.mxu1 %v1075_v1  ;;  %v1080_v6 = vld [vmem:[%s1407_s1 + $0x30] sm:$0xff]   ;;  %v1084_v10 = vld [vmem:[%s1407_s1 + $0x28] sm:$0xff]  }
   0x4   :  { %v1077_v3 = vld [vmem:[%s1407_s1 + $0xb8] sm:$0xff]   ;;  %963 = vmatpush3.bf16.msra.mxu0 %v1076_v2  ;;  %v1081_v7 = vld [vmem:[%s1407_s1 + $0xb0] sm:$0xff]   ;;  %v1085_v11 = vld [vmem:[%s1407_s1 + $0xa8] sm:$0xff]  }
   0x5   :  { %991 = vmatpush3.bf16.msra.mxu1 %v1077_v3  ;;  %964 = vmatprep.subr.bf16.mxu0 %v1078_v4  ;;  %v1086_v12 = vld [vmem:[%s1407_s1 + $0x60] sm:$0xff]   ;;  %v1090_v16 = vld [vmem:[%s1407_s1 + $0x58] sm:$0xff]   ;;  %v1094_v20 = vld [vmem:[%s1407_s1 + $0x50] sm:$0xff]  }
   0x6   :  { %992 = vmatprep.subr.bf16.mxu1 %v1079_v5  ;;  %v1087_v13 = vld [vmem:[%s1407_s1 + $0xe0] sm:$0xff]   ;;  %v1091_v17 = vld [vmem:[%s1407_s1 + $0xd8] sm:$0xff]   ;;  %v1095_v21 = vld [vmem:[%s1407_s1 + $0xd0] sm:$0xff]  }
   0x7   :  { %v1088_v14 = vld [vmem:[%s1407_s1 + $0x20] sm:$0xff]   ;;  %v1092_v18 = vld [vmem:[%s1407_s1 + $0x18] sm:$0xff]   ;;  %v1096_v22 = vld [vmem:[%s1407_s1 + $0x10] sm:$0xff]  }
   0x8   :  { %965 = vmatpush3.bf16.msra.mxu0 %v1080_v6  ;;  %v1089_v15 = vld [vmem:[%s1407_s1 + $0xa0] sm:$0xff]   ;;  %v1093_v19 = vld [vmem:[%s1407_s1 + $0x98] sm:$0xff]   ;;  %v1097_v23 = vld [vmem:[%s1407_s1 + $0x90] sm:$0xff]  }
   0x9   :  { %993 = vmatpush3.bf16.msra.mxu1 %v1081_v7  ;;  %966 = vmatprep.subr.bf16.mxu0 %v1082_v8  ;;  %v1098_v24 = vld [vmem:[%s1407_s1 + $0x48] sm:$0xff]   ;;  %v1102_v28 = vld [vmem:[%s1407_s1 + $0x40] sm:$0xff]   ;;  %v1106_v40 = vld [vmem:[%s1407_s1 + $0x178] sm:$0xff]  }
   0xa   :  { %994 = vmatprep.subr.bf16.mxu1 %v1083_v9  ;;  %v1099_v25 = vld [vmem:[%s1407_s1 + $0xc8] sm:$0xff]   ;;  %v1103_v29 = vld [vmem:[%s1407_s1 + $0xc0] sm:$0xff]   ;;  %v1107_v41 = vld [vmem:[%s1407_s1 + $0x1f8] sm:$0xff]  }
   0xb   :  { %v1100_v26 = vld [vmem:[%s1407_s1 + $0x8] sm:$0xff]   ;;  %v1104_v30 = vld [vmem:[%s1407_s1] sm:$0xff]   ;;  %v1108_v42 = vld [vmem:[%s1407_s1 + $0x138] sm:$0xff]  }
   0xc   :  { %967 = vmatpush3.bf16.msra.mxu0 %v1084_v10  ;;  %v1101_v27 = vld [vmem:[%s1407_s1 + $0x88] sm:$0xff]   ;;  %v1105_v31 = vld [vmem:[%s1407_s1 + $0x80] sm:$0xff]   ;;  %v1109_v43 = vld [vmem:[%s1407_s1 + $0x1b8] sm:$0xff]  }
   0xd   :  { %995 = vmatpush3.bf16.msra.mxu1 %v1085_v11  ;;  %968 = vmatprep.subr.bf16.mxu0 %v1086_v12  ;;  %v15_v32 = vld [vmem:[%s1408_s0] sm:$0xff]  ;;  %v16_v34 = vld [vmem:[%s1408_s0 + $0x8] sm:$0xff]  ;;  %v1110_v44 = vld [vmem:[%s1407_s1 + $0x170] sm:$0xff]  }
   0xe   :  { %996 = vmatprep.subr.bf16.mxu1 %v1087_v13  ;;  %v19_v33 = vld [vmem:[%s1408_s0 + $0x20] sm:$0xff]  ;;  %v20_v37 = vld [vmem:[%s1408_s0 + $0x28] sm:$0xff]  ;;  %v1111_v45 = vld [vmem:[%s1407_s1 + $0x1f0] sm:$0xff]  }
   0xf   :  { %v863_v35 = vcombine.low %v15_v32, %v19_v33  ;;  %v864_v36 = vcombine.high %v15_v32, %v19_v33  ;;  %v865_v38 = vcombine.low %v16_v34, %v20_v37  ;;  %v866_v39 = vcombine.high %v16_v34, %v20_v37  ;;  %v1112_v46 = vld [vmem:[%s1407_s1 + $0x130] sm:$0xff]   ;;  %v1114_v48 = vld [vmem:[%s1407_s1 + $0x168] sm:$0xff]   ;;  %v1118_v52 = vld [vmem:[%s1407_s1 + $0x160] sm:$0xff]  }
  0x10   :  { %969 = vmatpush3.bf16.msra.mxu0 %v1088_v14  ;;  %v1113_v47 = vld [vmem:[%s1407_s1 + $0x1b0] sm:$0xff]   ;;  %v1115_v49 = vld [vmem:[%s1407_s1 + $0x1e8] sm:$0xff]   ;;  %v1119_v53 = vld [vmem:[%s1407_s1 + $0x1e0] sm:$0xff]  }
  0x11   :  { %997 = vmatpush3.bf16.msra.mxu1 %v1089_v15  ;;  %970 = vmatprep.subr.bf16.mxu0 %v1090_v16  ;;  %v1116_v50 = vld [vmem:[%s1407_s1 + $0x128] sm:$0xff]   ;;  %v1120_v54 = vld [vmem:[%s1407_s1 + $0x120] sm:$0xff]   ;;  %v1122_v56 = vld [vmem:[%s1407_s1 + $0x158] sm:$0xff]  }
  0x12   :  { %998 = vmatprep.subr.bf16.mxu1 %v1091_v17  ;;  %662 = vmatprep.mubr.bf16.mxu0 %v864_v36  ;;  %v1117_v51 = vld [vmem:[%s1407_s1 + $0x1a8] sm:$0xff]   ;;  %v1121_v55 = vld [vmem:[%s1407_s1 + $0x1a0] sm:$0xff]   ;;  %v1123_v57 = vld [vmem:[%s1407_s1 + $0x1d8] sm:$0xff]  }
  0x13   :  { %711 = vmatprep.mubr.bf16.mxu1 %v866_v39  ;;  %v23_v58 = vld [vmem:[%s1408_s0 + $0x40] sm:$0xff]  ;;  %v1124_v61 = vld [vmem:[%s1407_s1 + $0x118] sm:$0xff]   ;;  %v24_v0 = vld [vmem:[%s1408_s0 + $0x48] sm:$0xff] }
  0x14   :  { %971 = vmatpush3.bf16.msra.mxu0 %v1092_v18  ;;  %v27_v59 = vld [vmem:[%s1408_s0 + $0x60] sm:$0xff]  ;;  %v1125_v63 = vld [vmem:[%s1407_s1 + $0x198] sm:$0xff]   ;;  %v28_v1 = vld [vmem:[%s1408_s0 + $0x68] sm:$0xff] }
  0x15   :  { %999 = vmatpush3.bf16.msra.mxu1 %v1093_v19  ;;  %972 = vmatprep.subr.bf16.mxu0 %v1094_v20  ;;  %v872_v60 = vcombine.high %v23_v58, %v27_v59  ;;  %v871_v62 = vcombine.low %v23_v58, %v27_v59  ;;  %v874_v2 = vcombine.high %v24_v0, %v28_v1  ;;  %v1126_v4 = vld [vmem:[%s1407_s1 + $0x150] sm:$0xff]   ;;  %v1130_v8 = vld [vmem:[%s1407_s1 + $0x148] sm:$0xff]   ;;  %v1134_v12 = vld [vmem:[%s1407_s1 + $0x140] sm:$0xff]  }
  0x16   :  { %1000 = vmatprep.subr.bf16.mxu1 %v1095_v21  ;;  %v873_v3 = vcombine.low %v24_v0, %v28_v1  ;;  %v1127_v5 = vld [vmem:[%s1407_s1 + $0x1d0] sm:$0xff]   ;;  %v1131_v9 = vld [vmem:[%s1407_s1 + $0x1c8] sm:$0xff]   ;;  %v1135_v13 = vld [vmem:[%s1407_s1 + $0x1c0] sm:$0xff]  }
  0x17   :  { %v1128_v6 = vld [vmem:[%s1407_s1 + $0x110] sm:$0xff]   ;;  %v1132_v10 = vld [vmem:[%s1407_s1 + $0x108] sm:$0xff]   ;;  %v1136_v14 = vld [vmem:[%s1407_s1 + $0x100] sm:$0xff]  }
  0x18   :  { %973 = vmatpush3.bf16.msra.mxu0 %v1096_v22  ;;  %v1129_v7 = vld [vmem:[%s1407_s1 + $0x190] sm:$0xff]   ;;  %v1133_v11 = vld [vmem:[%s1407_s1 + $0x188] sm:$0xff]   ;;  %v1137_v15 = vld [vmem:[%s1407_s1 + $0x180] sm:$0xff]  }
  0x19   :  { %1001 = vmatpush3.bf16.msra.mxu1 %v1097_v23  ;;  %974 = vmatprep.subr.bf16.mxu0 %v1098_v24  ;;  %v17_v16 = vld [vmem:[%s1408_s0 + $0x10] sm:$0xff]  ;;  %v18_v18 = vld [vmem:[%s1408_s0 + $0x18] sm:$0xff] }
  0x1a   :  { %1002 = vmatprep.subr.bf16.mxu1 %v1099_v25  ;;  %v21_v17 = vld [vmem:[%s1408_s0 + $0x30] sm:$0xff]  ;;  %v22_v19 = vld [vmem:[%s1408_s0 + $0x38] sm:$0xff] }
  0x1b   :  { %v867_v20 = vcombine.low %v17_v16, %v21_v17  ;;  %v868_v21 = vcombine.high %v17_v16, %v21_v17  ;;  %v869_v22 = vcombine.low %v18_v18, %v22_v19  ;;  %v870_v23 = vcombine.high %v18_v18, %v22_v19  ;;  %v25_v24 = vld [vmem:[%s1408_s0 + $0x50] sm:$0xff] }
  0x1c   :  { %975 = vmatpush3.bf16.msra.mxu0 %v1100_v26  ;;  %v29_v25 = vld [vmem:[%s1408_s0 + $0x70] sm:$0xff]  ;;  %v26_v26 = vld [vmem:[%s1408_s0 + $0x58] sm:$0xff] }
  0x1d   :  { %1003 = vmatpush3.bf16.msra.mxu1 %v1101_v27  ;;  %976 = vmatprep.subr.bf16.mxu0 %v1102_v28  ;;  %v876_v27 = vcombine.high %v25_v24, %v29_v25  ;;  %v30_v28 = vld [vmem:[%s1408_s0 + $0x78] sm:$0xff] }
  0x1e   :  { %1004 = vmatprep.subr.bf16.mxu1 %v1103_v29  ;;  %v878_v29 = vcombine.high %v26_v26, %v30_v28 }
  0x20   :  { %977 = vmatpush3.bf16.msra.mxu0 %v1104_v30  ;;  %v875_v30 = vcombine.low %v25_v24, %v29_v25 }
  0x21   :  { %1005 = vmatpush3.bf16.msra.mxu1 %v1105_v31  ;;  %1018 = vmatprep.subr.bf16.mxu0 %v1106_v40  ;;  %v877_v31 = vcombine.low %v26_v26, %v30_v28 }
  0x22   :  { %1046 = vmatprep.subr.bf16.mxu1 %v1107_v41 }
  0x23   :  { %663 = vmatmul.mubr.bf16.vlgmr.msra.gmra.mxu0 %v863_v35 }
  0x24   :  { %712 = vmatmul.mubr.bf16.vlgmr.msra.gmra.mxu1 %v865_v38  ;;  %1019 = vmatpush3.bf16.msra.mxu0 %v1108_v42 }
  0x25   :  { %1047 = vmatpush3.bf16.msra.mxu1 %v1109_v43  ;;  %1020 = vmatprep.subr.bf16.mxu0 %v1110_v44 }
  0x26   :  { %1048 = vmatprep.subr.bf16.mxu1 %v1111_v45  ;;  %670 = vmatprep.mubr.bf16.mxu0 %v872_v60 }
  0x27   :  { %719 = vmatprep.mubr.bf16.mxu1 %v874_v2 }
  0x28   :  { %1021 = vmatpush3.bf16.msra.mxu0 %v1112_v46 }
  0x29   :  { %1049 = vmatpush3.bf16.msra.mxu1 %v1113_v47  ;;  %1022 = vmatprep.subr.bf16.mxu0 %v1114_v48  ;;  %v862_v47 = vld [vmem:[%s1409_s2] ss:$0 sm:$0xff] }
  0x2a   :  { %1050 = vmatprep.subr.bf16.mxu1 %v1115_v49 }
  0x2b   :  { %671 = vmatmul.mubr.bf16.gmra.mxu0 %v871_v62 }
  0x2c   :  { %1023 = vmatpush3.bf16.msra.mxu0 %v1116_v50  ;;  %720 = vmatmul.mubr.bf16.gmra.mxu1 %v873_v3 }
  0x2d   :  { %1051 = vmatpush3.bf16.msra.mxu1 %v1117_v51  ;;  %1024 = vmatprep.subr.bf16.mxu0 %v1118_v52 }
  0x2e   :  { %1052 = vmatprep.subr.bf16.mxu1 %v1119_v53  ;;  %760 = vmatprep.mubr.bf16.mxu0 %v868_v21 }
  0x2f   :  { %809 = vmatprep.mubr.bf16.mxu1 %v870_v23 }
  0x30   :  { %1025 = vmatpush3.bf16.msra.mxu0 %v1120_v54 }
  0x31   :  { %1053 = vmatpush3.bf16.msra.mxu1 %v1121_v55  ;;  %1026 = vmatprep.subr.bf16.mxu0 %v1122_v56 }
  0x32   :  { %1054 = vmatprep.subr.bf16.mxu1 %v1123_v57 }
  0x34   :  { %1027 = vmatpush3.bf16.msra.mxu0 %v1124_v61 }
  0x35   :  { %1055 = vmatpush3.bf16.msra.mxu1 %v1125_v63  ;;  %1028 = vmatprep.subr.bf16.mxu0 %v1126_v4 }
  0x36   :  { %1056 = vmatprep.subr.bf16.mxu1 %v1127_v5 }
  0x38   :  { %1029 = vmatpush3.bf16.msra.mxu0 %v1128_v6 }
  0x39   :  { %1057 = vmatpush3.bf16.msra.mxu1 %v1129_v7  ;;  %1030 = vmatprep.subr.bf16.mxu0 %v1130_v8 }
  0x3a   :  { %1058 = vmatprep.subr.bf16.mxu1 %v1131_v9 }
  0x3c   :  { %1031 = vmatpush3.bf16.msra.mxu0 %v1132_v10 }
  0x3d   :  { %1059 = vmatpush3.bf16.msra.mxu1 %v1133_v11  ;;  %1032 = vmatprep.subr.bf16.mxu0 %v1134_v12 }
  0x3e   :  { %1060 = vmatprep.subr.bf16.mxu1 %v1135_v13 }
  0x40   :  { %1033 = vmatpush3.bf16.msra.mxu0 %v1136_v14 }
  0x41   :  { %1061 = vmatpush3.bf16.msra.mxu1 %v1137_v15 }
  0x43   :  { %761 = vmatmul.mubr.bf16.vlgmr.msra.gmra.mxu0 %v867_v20 }
  0x44   :  { %810 = vmatmul.mubr.bf16.vlgmr.msra.gmra.mxu1 %v869_v22  ;;  %768 = vmatprep.mubr.bf16.mxu0 %v876_v27 }
  0x45   :  { %817 = vmatprep.mubr.bf16.mxu1 %v878_v29 }
  0x4b   :  { %769 = vmatmul.mubr.bf16.gmra.mxu0 %v875_v30 }
  0x4c   :  { %818 = vmatmul.mubr.bf16.gmra.mxu1 %v877_v31 }
  0xe3   :  { %v978_v32 = vpop.f32.mrf.mxu0 }
  0xe4   :  { %v1006_v33 = vpop.f32.mrf.mxu1 }
  0xe5   :  { %v979_v34 = vpop.f32.mrf.mxu0 }
  0xe6   :  { %v1007_v35 = vpop.f32.mrf.mxu1  ;;  %v980_v46 = vadd.f32 %v979_v34, %v978_v32 }
  0xe7   :  { %v981_v36 = vpop.f32.mrf.mxu0  ;;  %v1008_v52 = vadd.f32 %v1007_v35, %v1006_v33 }
  0xe8   :  { %v1009_v37 = vpop.f32.mrf.mxu1  ;;  %v665_v51 = vadd.f32 %v980_v46, %v862_v47 }
  0xe9   :  { %v982_v38 = vpop.f32.mrf.mxu0 }
  0xea   :  { %v1010_v39 = vpop.f32.mrf.mxu1  ;;  %v983_v48 = vadd.f32 %v982_v38, %v981_v36  ;;  %v714_v58 = vadd.f32 %v1008_v52, %v665_v51 }
  0xeb   :  { %v984_v40 = vpop.f32.mrf.mxu0  ;;  %v1011_v61 = vadd.f32 %v1010_v39, %v1009_v37 }
  0xec   :  { %v1012_v41 = vpop.f32.mrf.mxu1  ;;  %v668_v55 = vadd.f32 %v983_v48, %v862_v47 }
  0xed   :  { %v985_v42 = vpop.f32.mrf.mxu0 }
  0xee   :  { %v1013_v43 = vpop.f32.mrf.mxu1  ;;  %v986_v59 = vadd.f32 %v985_v42, %v984_v40  ;;  %v717_v2 = vadd.f32 %v1011_v61, %v668_v55 }
  0xef   :  { %v987_v44 = vpop.f32.mrf.mxu0  ;;  %v1014_v7 = vadd.f32 %v1013_v43, %v1012_v41 }
  0xf0   :  { %v1015_v45 = vpop.f32.mrf.mxu1  ;;  %v673_v6 = vadd.f32 %v986_v59, %v862_v47 }
  0xf1   :  { %v988_v49 = vpop.f32.mrf.mxu0 }
  0xf2   :  { %v1016_v50 = vpop.f32.mrf.mxu1  ;;  %v989_v3 = vadd.f32 %v988_v49, %v987_v44  ;;  %v722_v18 = vadd.f32 %v1014_v7, %v673_v6 }
  0xf3   :  { %v1017_v15 = vadd.f32 %v1016_v50, %v1015_v45 }
  0xf4   :  { %v676_v14 = vadd.f32 %v989_v3, %v862_v47 }
  0xf6   :  { %v725_v27 = vadd.f32 %v1017_v15, %v676_v14 }
 0x103   :  { %v1034_v53 = vpop.f32.mrf.mxu0 }
 0x104   :  { %v1062_v54 = vpop.f32.mrf.mxu1 }
 0x105   :  { %v1035_v56 = vpop.f32.mrf.mxu0 }
 0x106   :  { %v1063_v57 = vpop.f32.mrf.mxu1  ;;  %v1036_v60 = vadd.f32 %v1035_v56, %v1034_v53 }
 0x107   :  { %v1037_v62 = vpop.f32.mrf.mxu0  ;;  %v1064_v1 = vadd.f32 %v1063_v57, %v1062_v54 }
 0x108   :  { %v1065_v63 = vpop.f32.mrf.mxu1  ;;  %v763_v0 = vadd.f32 %v1036_v60, %v714_v58 }
 0x109   :  { %v1038_v4 = vpop.f32.mrf.mxu0 }
 0x10a   :  { %v1066_v5 = vpop.f32.mrf.mxu1  ;;  %v812_v8 = vadd.f32 %v1064_v1, %v763_v0  ;;  %v1039_v9 = vadd.f32 %v1038_v4, %v1037_v62 }
 0x10b   :  { %v1040_v10 = vpop.f32.mrf.mxu0  ;;  %v1067_v13 = vadd.f32 %v1066_v5, %v1065_v63 }
 0x10c   :  { %v1068_v11 = vpop.f32.mrf.mxu1  ;;  %v766_v12 = vadd.f32 %v1039_v9, %v717_v2  ;;  %v830_v19 = vmul.f32 0.2, %v812_v8  ;;  %vm826_vm0 = vcmp.ge.f32.partialorder %v812_v8, 0.0 }
 0x10d   :  { %v1041_v16 = vpop.f32.mrf.mxu0 }
 0x10e   :  { %v1069_v17 = vpop.f32.mrf.mxu1  ;;  %v815_v20 = vadd.f32 %v1067_v13, %v766_v12  ;;  %v1042_v21 = vadd.f32 %v1041_v16, %v1040_v10  ;;  %v834_v30 = vsel %vm826_vm0, %v812_v8, %v830_v19 }
 0x10f   :  { %v1043_v22 = vpop.f32.mrf.mxu0  ;;  %v1070_v26 = vadd.f32 %v1069_v17, %v1068_v11 }
 0x110   :  { %v1071_v23 = vpop.f32.mrf.mxu1  ;;  %vm827_vm1 = vcmp.ge.f32.partialorder %v815_v20, 0.0  ;;  %v831_v24 = vmul.f32 0.2, %v815_v20  ;;  %v771_v25 = vadd.f32 %v1042_v21, %v722_v18 }
 0x111   :  { %v1044_v28 = vpop.f32.mrf.mxu0 }
 0x112   :  { %v1072_v29 = vpop.f32.mrf.mxu1  ;;  %v835_v31 = vsel %vm827_vm1, %v815_v20, %v831_v24  ;;  %v820_v32 = vadd.f32 %v1070_v26, %v771_v25  ;;  %v1045_v33 = vadd.f32 %v1044_v28, %v1043_v22 }
 0x113   :  { %v954_v34 = vpack.c.bf16 %v835_v31, %v834_v30  ;;  %v1073_v36 = vadd.f32 %v1072_v29, %v1071_v23 }
 0x114   :  { %v774_v35 = vadd.f32 %v1045_v33, %v725_v27  ;;  %v832_v37 = vmul.f32 0.2, %v820_v32  ;;  %vm828_vm2 = vcmp.ge.f32.partialorder %v820_v32, 0.0 }
 0x115   :  { %955 = vst [vmem:[%s1410_s3] sm:$0xff] %v954_v34  }
 0x116   :  { %v823_v38 = vadd.f32 %v1073_v36, %v774_v35  ;;  %v836_v40 = vsel %vm828_vm2, %v820_v32, %v832_v37 }
 0x118   :  { %vm829_vm3 = vcmp.ge.f32.partialorder %v823_v38, 0.0  ;;  %v833_v39 = vmul.f32 0.2, %v823_v38 }
 0x11a   :  { %v837_v41 = vsel %vm829_vm3, %v823_v38, %v833_v39 }
 0x11b   :  { %v959_v42 = vpack.c.bf16 %v837_v41, %v836_v40 }
 0x11d   :  { %961 = vst [vmem:[%s1410_s3 + $0x8] sm:$0xff] %v959_v42  }

// kernel: forward.7
= control target key start
LH: loop header
LB: loop body
LE: loop exit
PB: predicated region body
PF: predicated region fallthrough
CT: control target
= control target key end

     0   :  { %s3514_s12 = smov 0   ;;  %s3516_s13 = smov 0   ;;  %s4321_s0 = inlined_call_operand.vmem [shape: bf16[16,2048], index: 0, kind: input, shape index: {}]   ;;  %s4322_s1 = inlined_call_operand.vmem [shape: bf16[2048,256], index: 1, kind: input, shape index: {}]   ;;  %s4323_s2 = inlined_call_operand.vmem [shape: f32[1,256], index: 2, kind: input, shape index: {}]   ;;  %s4324_s3 = inlined_call_operand.vmem [shape: bf16[16,256], index: 3, kind: output, shape index: {}]  }
   0x1   :  { %s3518_s14 = smov 0   ;;  %s3520_s15 = smov 0  }
   0x2   :  { %s3522_s16 = smov 0  }
   0x3 LB: > { %s28_s17 = sadd.s32 1, %s3488_s15  ;;  %s2942_s18 = sadd.s32 4294967295, %s3492_s16   ;;  %s3492_s16 = sphi %s3522_s16, %s13_s16   ;;  %s3488_s15 = sphi %s3520_s15, %s4329_s15   ;;  %s3484_s14 = sphi %s3518_s14, %s4328_s14   ;;  %s3480_s13 = sphi %s3516_s13, %s4327_s13   ;;  %s3476_s12 = sphi %s3514_s12, %s4326_s12  }
   0x4   : > { %p30_p0 = scmp.ge.s32.totalorder %s28_s17, 2  ;;  %p76_p1 = scmp.ne.s32.totalorder %s3480_s13, %s3476_s12 }
   0x5   : > { %p77_p2 = scmp.eq.s32.totalorder %s3492_s16, 0  ;;  %p134_p4 = scmp.eq.s32.totalorder %s2942_s18, 1 }
   0x6   : > { %s4331_s17 = smov (%p30_p0, %s28_s17), 0  ;;  %s69_s20 = sadd.s32 1, %s3480_s13 }
   0x7   : > { %p78_p3 = por %p77_p2, %p76_p1  ;;  %s65_s19 = ssub.s32 %s3488_s15, %s4331_s17 }
   0x8   : > { %p67_p5 = scmp.eq.s32.totalorder %s65_s19, 0  ;;  %p3549_p6 = por %p134_p4, %p76_p1 }
   0x9   : > { %p2946_p7 = scmp.ge.s32.totalorder %s3492_s16, 2 }
   0xa   : > { %s3554_s22 = scalar_select %p67_p5, %s3480_s13, %s69_s20  }
   0xb   : > { %171 = sbr.rel (%p2946_p7) target bundleno = 190 (0xbe), region = 20 }
  0x10   : > { %174 = sbr.rel (!%p78_p3) target bundleno = 190 (0xbe), region = 24  ;;  %s176_s23 = sand.u32 (%p78_p3), 1, %s3480_s13  }
  0x11   : > { %s2948_s24 = sshll.u32 (%p78_p3), %s3488_s15, 2  ;;  %s2947_s25 = sshll.u32 (%p78_p3), %s176_s23, 10 }
  0x12   : > { %s3562_s28 = scalar_lea.vmem (%p78_p3), %s4322_s1, %s2948_s24  ;;  %s3566_s29 = scalar_lea.vmem (%p78_p3), [#allocation3], %s2947_s25 }
  0x13   : > { %v200_v0 = vld [vmem:[%s3562_s28] sm:$0xf] (%p78_p3)  ;;  %v202_v1 = vld [vmem:[%s3562_s28 + $0x8] sm:$0xf] (%p78_p3)  ;;  %v204_v2 = vld [vmem:[%s3562_s28 + $0x10] sm:$0xf] (%p78_p3) }
  0x14   : > { %201 = vst [vmem:[%s3566_s29] sm:$0xf] (%p78_p3), %v200_v0  ;;  %203 = vst [vmem:[%s3566_s29 + $0x4] sm:$0xf] (%p78_p3), %v202_v1  ;;  %v206_v3 = vld [vmem:[%s3562_s28 + $0x18] sm:$0xf] (%p78_p3) }
  0x15   : > { %v208_v4 = vld [vmem:[%s3562_s28 + $0x20] sm:$0xf]  ;;  %205 = vst [vmem:[%s3566_s29 + $0x8] sm:$0xf] %v204_v2  ;;  %207 = vst [vmem:[%s3566_s29 + $0xc] sm:$0xf] %v206_v3 }
  0x16   : > { %209 = vst [vmem:[%s3566_s29 + $0x10] sm:$0xf] %v208_v4  ;;  %v210_v5 = vld [vmem:[%s3562_s28 + $0x28] sm:$0xf]  ;;  %v212_v6 = vld [vmem:[%s3562_s28 + $0x30] sm:$0xf] }
  0x17   : > { %v214_v7 = vld [vmem:[%s3562_s28 + $0x38] sm:$0xf]  ;;  %211 = vst [vmem:[%s3566_s29 + $0x14] sm:$0xf] %v210_v5  ;;  %213 = vst [vmem:[%s3566_s29 + $0x18] sm:$0xf] %v212_v6 }
  0x18   : > { %215 = vst [vmem:[%s3566_s29 + $0x1c] sm:$0xf] %v214_v7  ;;  %v216_v8 = vld [vmem:[%s3562_s28 + $0x40] sm:$0xf]  ;;  %v218_v9 = vld [vmem:[%s3562_s28 + $0x48] sm:$0xf] }
  0x19   : > { %v220_v10 = vld [vmem:[%s3562_s28 + $0x50] sm:$0xf]  ;;  %217 = vst [vmem:[%s3566_s29 + $0x20] sm:$0xf] %v216_v8  ;;  %219 = vst [vmem:[%s3566_s29 + $0x24] sm:$0xf] %v218_v9 }
  0x1a   : > { %221 = vst [vmem:[%s3566_s29 + $0x28] sm:$0xf] %v220_v10  ;;  %v222_v11 = vld [vmem:[%s3562_s28 + $0x58] sm:$0xf]  ;;  %v224_v12 = vld [vmem:[%s3562_s28 + $0x60] sm:$0xf] }
  0x1b   : > { %v226_v13 = vld [vmem:[%s3562_s28 + $0x68] sm:$0xf]  ;;  %223 = vst [vmem:[%s3566_s29 + $0x2c] sm:$0xf] %v222_v11  ;;  %225 = vst [vmem:[%s3566_s29 + $0x30] sm:$0xf] %v224_v12 }
  0x1c   : > { %227 = vst [vmem:[%s3566_s29 + $0x34] sm:$0xf] %v226_v13  ;;  %v228_v14 = vld [vmem:[%s3562_s28 + $0x70] sm:$0xf]  ;;  %v230_v15 = vld [vmem:[%s3562_s28 + $0x78] sm:$0xf] }
  0x1d   : > { %v232_v16 = vld [vmem:[%s3562_s28 + $0x80] sm:$0xf]  ;;  %229 = vst [vmem:[%s3566_s29 + $0x38] sm:$0xf] %v228_v14  ;;  %231 = vst [vmem:[%s3566_s29 + $0x3c] sm:$0xf] %v230_v15 }
  0x1e   : > { %233 = vst [vmem:[%s3566_s29 + $0x40] sm:$0xf] %v232_v16  ;;  %v234_v17 = vld [vmem:[%s3562_s28 + $0x88] sm:$0xf]  ;;  %v236_v18 = vld [vmem:[%s3562_s28 + $0x90] sm:$0xf] }
  0x1f   : > { %v238_v19 = vld [vmem:[%s3562_s28 + $0x98] sm:$0xf]  ;;  %235 = vst [vmem:[%s3566_s29 + $0x44] sm:$0xf] %v234_v17  ;;  %237 = vst [vmem:[%s3566_s29 + $0x48] sm:$0xf] %v236_v18 }
  0x20   : > { %239 = vst [vmem:[%s3566_s29 + $0x4c] sm:$0xf] %v238_v19  ;;  %v240_v20 = vld [vmem:[%s3562_s28 + $0xa0] sm:$0xf]  ;;  %v242_v21 = vld [vmem:[%s3562_s28 + $0xa8] sm:$0xf] }
  0x21   : > { %v244_v22 = vld [vmem:[%s3562_s28 + $0xb0] sm:$0xf]  ;;  %241 = vst [vmem:[%s3566_s29 + $0x50] sm:$0xf] %v240_v20  ;;  %243 = vst [vmem:[%s3566_s29 + $0x54] sm:$0xf] %v242_v21 }
  0x22   : > { %245 = vst [vmem:[%s3566_s29 + $0x58] sm:$0xf] %v244_v22  ;;  %v246_v23 = vld [vmem:[%s3562_s28 + $0xb8] sm:$0xf]  ;;  %v248_v24 = vld [vmem:[%s3562_s28 + $0xc0] sm:$0xf] }
  0x23   : > { %v250_v25 = vld [vmem:[%s3562_s28 + $0xc8] sm:$0xf]  ;;  %247 = vst [vmem:[%s3566_s29 + $0x5c] sm:$0xf] %v246_v23  ;;  %249 = vst [vmem:[%s3566_s29 + $0x60] sm:$0xf] %v248_v24 }
  0x24   : > { %251 = vst [vmem:[%s3566_s29 + $0x64] sm:$0xf] %v250_v25  ;;  %v252_v26 = vld [vmem:[%s3562_s28 + $0xd0] sm:$0xf]  ;;  %v254_v27 = vld [vmem:[%s3562_s28 + $0xd8] sm:$0xf] }
  0x25   : > { %v256_v28 = vld [vmem:[%s3562_s28 + $0xe0] sm:$0xf]  ;;  %253 = vst [vmem:[%s3566_s29 + $0x68] sm:$0xf] %v252_v26  ;;  %255 = vst [vmem:[%s3566_s29 + $0x6c] sm:$0xf] %v254_v27 }
  0x26   : > { %257 = vst [vmem:[%s3566_s29 + $0x70] sm:$0xf] %v256_v28  ;;  %v258_v29 = vld [vmem:[%s3562_s28 + $0xe8] sm:$0xf]  ;;  %v260_v30 = vld [vmem:[%s3562_s28 + $0xf0] sm:$0xf] }
  0x27   : > { %v262_v31 = vld [vmem:[%s3562_s28 + $0xf8] sm:$0xf]  ;;  %259 = vst [vmem:[%s3566_s29 + $0x74] sm:$0xf] %v258_v29  ;;  %261 = vst [vmem:[%s3566_s29 + $0x78] sm:$0xf] %v260_v30 }
  0x28   : > { %263 = vst [vmem:[%s3566_s29 + $0x7c] sm:$0xf] %v262_v31  ;;  %v264_v32 = vld [vmem:[%s3562_s28 + $0x100] sm:$0xf]  ;;  %v266_v33 = vld [vmem:[%s3562_s28 + $0x108] sm:$0xf] }
  0x29   : > { %v268_v34 = vld [vmem:[%s3562_s28 + $0x110] sm:$0xf]  ;;  %265 = vst [vmem:[%s3566_s29 + $0x80] sm:$0xf] %v264_v32  ;;  %267 = vst [vmem:[%s3566_s29 + $0x84] sm:$0xf] %v266_v33 }
  0x2a   : > { %269 = vst [vmem:[%s3566_s29 + $0x88] sm:$0xf] %v268_v34  ;;  %v270_v35 = vld [vmem:[%s3562_s28 + $0x118] sm:$0xf]  ;;  %v272_v36 = vld [vmem:[%s3562_s28 + $0x120] sm:$0xf] }
  0x2b   : > { %v274_v37 = vld [vmem:[%s3562_s28 + $0x128] sm:$0xf]  ;;  %271 = vst [vmem:[%s3566_s29 + $0x8c] sm:$0xf] %v270_v35  ;;  %273 = vst [vmem:[%s3566_s29 + $0x90] sm:$0xf] %v272_v36 }
  0x2c   : > { %275 = vst [vmem:[%s3566_s29 + $0x94] sm:$0xf] %v274_v37  ;;  %v276_v38 = vld [vmem:[%s3562_s28 + $0x130] sm:$0xf]  ;;  %v278_v39 = vld [vmem:[%s3562_s28 + $0x138] sm:$0xf] }
  0x2d   : > { %v280_v40 = vld [vmem:[%s3562_s28 + $0x140] sm:$0xf]  ;;  %277 = vst [vmem:[%s3566_s29 + $0x98] sm:$0xf] %v276_v38  ;;  %279 = vst [vmem:[%s3566_s29 + $0x9c] sm:$0xf] %v278_v39 }
  0x2e   : > { %281 = vst [vmem:[%s3566_s29 + $0xa0] sm:$0xf] %v280_v40  ;;  %v282_v41 = vld [vmem:[%s3562_s28 + $0x148] sm:$0xf]  ;;  %v284_v42 = vld [vmem:[%s3562_s28 + $0x150] sm:$0xf] }
  0x2f   : > { %v286_v43 = vld [vmem:[%s3562_s28 + $0x158] sm:$0xf]  ;;  %283 = vst [vmem:[%s3566_s29 + $0xa4] sm:$0xf] %v282_v41  ;;  %285 = vst [vmem:[%s3566_s29 + $0xa8] sm:$0xf] %v284_v42 }
  0x30   : > { %287 = vst [vmem:[%s3566_s29 + $0xac] sm:$0xf] %v286_v43  ;;  %v288_v44 = vld [vmem:[%s3562_s28 + $0x160] sm:$0xf]  ;;  %v290_v45 = vld [vmem:[%s3562_s28 + $0x168] sm:$0xf] }
  0x31   : > { %v292_v46 = vld [vmem:[%s3562_s28 + $0x170] sm:$0xf]  ;;  %289 = vst [vmem:[%s3566_s29 + $0xb0] sm:$0xf] %v288_v44  ;;  %291 = vst [vmem:[%s3566_s29 + $0xb4] sm:$0xf] %v290_v45 }
  0x32   : > { %293 = vst [vmem:[%s3566_s29 + $0xb8] sm:$0xf] %v292_v46  ;;  %v294_v47 = vld [vmem:[%s3562_s28 + $0x178] sm:$0xf]  ;;  %v296_v48 = vld [vmem:[%s3562_s28 + $0x180] sm:$0xf] }
  0x33   : > { %v298_v49 = vld [vmem:[%s3562_s28 + $0x188] sm:$0xf]  ;;  %295 = vst [vmem:[%s3566_s29 + $0xbc] sm:$0xf] %v294_v47  ;;  %297 = vst [vmem:[%s3566_s29 + $0xc0] sm:$0xf] %v296_v48 }
  0x34   : > { %299 = vst [vmem:[%s3566_s29 + $0xc4] sm:$0xf] %v298_v49  ;;  %v300_v50 = vld [vmem:[%s3562_s28 + $0x190] sm:$0xf]  ;;  %v302_v51 = vld [vmem:[%s3562_s28 + $0x198] sm:$0xf] }
  0x35   : > { %v304_v52 = vld [vmem:[%s3562_s28 + $0x1a0] sm:$0xf]  ;;  %301 = vst [vmem:[%s3566_s29 + $0xc8] sm:$0xf] %v300_v50  ;;  %303 = vst [vmem:[%s3566_s29 + $0xcc] sm:$0xf] %v302_v51 }
  0x36   : > { %305 = vst [vmem:[%s3566_s29 + $0xd0] sm:$0xf] %v304_v52  ;;  %v306_v53 = vld [vmem:[%s3562_s28 + $0x1a8] sm:$0xf]  ;;  %v308_v54 = vld [vmem:[%s3562_s28 + $0x1b0] sm:$0xf] }
  0x37   : > { %v310_v55 = vld [vmem:[%s3562_s28 + $0x1b8] sm:$0xf]  ;;  %307 = vst [vmem:[%s3566_s29 + $0xd4] sm:$0xf] %v306_v53  ;;  %309 = vst [vmem:[%s3566_s29 + $0xd8] sm:$0xf] %v308_v54 }
  0x38   : > { %311 = vst [vmem:[%s3566_s29 + $0xdc] sm:$0xf] %v310_v55  ;;  %v312_v56 = vld [vmem:[%s3562_s28 + $0x1c0] sm:$0xf]  ;;  %v314_v57 = vld [vmem:[%s3562_s28 + $0x1c8] sm:$0xf] }
  0x39   : > { %v316_v58 = vld [vmem:[%s3562_s28 + $0x1d0] sm:$0xf]  ;;  %313 = vst [vmem:[%s3566_s29 + $0xe0] sm:$0xf] %v312_v56  ;;  %315 = vst [vmem:[%s3566_s29 + $0xe4] sm:$0xf] %v314_v57 }
  0x3a   : > { %317 = vst [vmem:[%s3566_s29 + $0xe8] sm:$0xf] %v316_v58  ;;  %v318_v59 = vld [vmem:[%s3562_s28 + $0x1d8] sm:$0xf]  ;;  %v320_v60 = vld [vmem:[%s3562_s28 + $0x1e0] sm:$0xf] }
  0x3b   : > { %v322_v61 = vld [vmem:[%s3562_s28 + $0x1e8] sm:$0xf]  ;;  %319 = vst [vmem:[%s3566_s29 + $0xec] sm:$0xf] %v318_v59  ;;  %321 = vst [vmem:[%s3566_s29 + $0xf0] sm:$0xf] %v320_v60 }
  0x3c   : > { %323 = vst [vmem:[%s3566_s29 + $0xf4] sm:$0xf] %v322_v61  ;;  %v324_v62 = vld [vmem:[%s3562_s28 + $0x1f0] sm:$0xf]  ;;  %v326_v63 = vld [vmem:[%s3562_s28 + $0x1f8] sm:$0xf] }
  0x3d   : > { %v328_v0 = vld [vmem:[%s3562_s28 + $0x200] sm:$0xf]  ;;  %325 = vst [vmem:[%s3566_s29 + $0xf8] sm:$0xf] %v324_v62  ;;  %327 = vst [vmem:[%s3566_s29 + $0xfc] sm:$0xf] %v326_v63 }
  0x3e   : > { %329 = vst [vmem:[%s3566_s29 + $0x100] sm:$0xf] %v328_v0  ;;  %v330_v1 = vld [vmem:[%s3562_s28 + $0x208] sm:$0xf]  ;;  %v332_v2 = vld [vmem:[%s3562_s28 + $0x210] sm:$0xf] }
  0x3f   : > { %v334_v3 = vld [vmem:[%s3562_s28 + $0x218] sm:$0xf]  ;;  %331 = vst [vmem:[%s3566_s29 + $0x104] sm:$0xf] %v330_v1  ;;  %333 = vst [vmem:[%s3566_s29 + $0x108] sm:$0xf] %v332_v2 }
  0x40   : > { %335 = vst [vmem:[%s3566_s29 + $0x10c] sm:$0xf] %v334_v3  ;;  %v336_v4 = vld [vmem:[%s3562_s28 + $0x220] sm:$0xf]  ;;  %v338_v5 = vld [vmem:[%s3562_s28 + $0x228] sm:$0xf] }
  0x41   : > { %v340_v6 = vld [vmem:[%s3562_s28 + $0x230] sm:$0xf]  ;;  %337 = vst [vmem:[%s3566_s29 + $0x110] sm:$0xf] %v336_v4  ;;  %339 = vst [vmem:[%s3566_s29 + $0x114] sm:$0xf] %v338_v5 }
  0x42   : > { %341 = vst [vmem:[%s3566_s29 + $0x118] sm:$0xf] %v340_v6  ;;  %v342_v7 = vld [vmem:[%s3562_s28 + $0x238] sm:$0xf]  ;;  %v344_v8 = vld [vmem:[%s3562_s28 + $0x240] sm:$0xf] }
  0x43   : > { %v346_v9 = vld [vmem:[%s3562_s28 + $0x248] sm:$0xf]  ;;  %343 = vst [vmem:[%s3566_s29 + $0x11c] sm:$0xf] %v342_v7  ;;  %345 = vst [vmem:[%s3566_s29 + $0x120] sm:$0xf] %v344_v8 }
  0x44   : > { %347 = vst [vmem:[%s3566_s29 + $0x124] sm:$0xf] %v346_v9  ;;  %v348_v10 = vld [vmem:[%s3562_s28 + $0x250] sm:$0xf]  ;;  %v350_v11 = vld [vmem:[%s3562_s28 + $0x258] sm:$0xf] }
  0x45   : > { %v352_v12 = vld [vmem:[%s3562_s28 + $0x260] sm:$0xf]  ;;  %349 = vst [vmem:[%s3566_s29 + $0x128] sm:$0xf] %v348_v10  ;;  %351 = vst [vmem:[%s3566_s29 + $0x12c] sm:$0xf] %v350_v11 }
  0x46   : > { %353 = vst [vmem:[%s3566_s29 + $0x130] sm:$0xf] %v352_v12  ;;  %v354_v13 = vld [vmem:[%s3562_s28 + $0x268] sm:$0xf]  ;;  %v356_v14 = vld [vmem:[%s3562_s28 + $0x270] sm:$0xf] }
  0x47   : > { %v358_v15 = vld [vmem:[%s3562_s28 + $0x278] sm:$0xf]  ;;  %355 = vst [vmem:[%s3566_s29 + $0x134] sm:$0xf] %v354_v13  ;;  %357 = vst [vmem:[%s3566_s29 + $0x138] sm:$0xf] %v356_v14 }
  0x48   : > { %359 = vst [vmem:[%s3566_s29 + $0x13c] sm:$0xf] %v358_v15  ;;  %v360_v16 = vld [vmem:[%s3562_s28 + $0x280] sm:$0xf]  ;;  %v362_v17 = vld [vmem:[%s3562_s28 + $0x288] sm:$0xf] }
  0x49   : > { %v364_v18 = vld [vmem:[%s3562_s28 + $0x290] sm:$0xf]  ;;  %361 = vst [vmem:[%s3566_s29 + $0x140] sm:$0xf] %v360_v16  ;;  %363 = vst [vmem:[%s3566_s29 + $0x144] sm:$0xf] %v362_v17 }
  0x4a   : > { %365 = vst [vmem:[%s3566_s29 + $0x148] sm:$0xf] %v364_v18  ;;  %v366_v19 = vld [vmem:[%s3562_s28 + $0x298] sm:$0xf]  ;;  %v368_v20 = vld [vmem:[%s3562_s28 + $0x2a0] sm:$0xf] }
  0x4b   : > { %v370_v21 = vld [vmem:[%s3562_s28 + $0x2a8] sm:$0xf]  ;;  %367 = vst [vmem:[%s3566_s29 + $0x14c] sm:$0xf] %v366_v19  ;;  %369 = vst [vmem:[%s3566_s29 + $0x150] sm:$0xf] %v368_v20 }
  0x4c   : > { %371 = vst [vmem:[%s3566_s29 + $0x154] sm:$0xf] %v370_v21  ;;  %v372_v22 = vld [vmem:[%s3562_s28 + $0x2b0] sm:$0xf]  ;;  %v374_v23 = vld [vmem:[%s3562_s28 + $0x2b8] sm:$0xf] }
  0x4d   : > { %v376_v24 = vld [vmem:[%s3562_s28 + $0x2c0] sm:$0xf]  ;;  %373 = vst [vmem:[%s3566_s29 + $0x158] sm:$0xf] %v372_v22  ;;  %375 = vst [vmem:[%s3566_s29 + $0x15c] sm:$0xf] %v374_v23 }
  0x4e   : > { %377 = vst [vmem:[%s3566_s29 + $0x160] sm:$0xf] %v376_v24  ;;  %v378_v25 = vld [vmem:[%s3562_s28 + $0x2c8] sm:$0xf]  ;;  %v380_v26 = vld [vmem:[%s3562_s28 + $0x2d0] sm:$0xf] }
  0x4f   : > { %v382_v27 = vld [vmem:[%s3562_s28 + $0x2d8] sm:$0xf]  ;;  %379 = vst [vmem:[%s3566_s29 + $0x164] sm:$0xf] %v378_v25  ;;  %381 = vst [vmem:[%s3566_s29 + $0x168] sm:$0xf] %v380_v26 }
  0x50   : > { %383 = vst [vmem:[%s3566_s29 + $0x16c] sm:$0xf] %v382_v27  ;;  %v384_v28 = vld [vmem:[%s3562_s28 + $0x2e0] sm:$0xf]  ;;  %v386_v29 = vld [vmem:[%s3562_s28 + $0x2e8] sm:$0xf] }
  0x51   : > { %v388_v30 = vld [vmem:[%s3562_s28 + $0x2f0] sm:$0xf]  ;;  %385 = vst [vmem:[%s3566_s29 + $0x170] sm:$0xf] %v384_v28  ;;  %387 = vst [vmem:[%s3566_s29 + $0x174] sm:$0xf] %v386_v29 }
  0x52   : > { %389 = vst [vmem:[%s3566_s29 + $0x178] sm:$0xf] %v388_v30  ;;  %v390_v31 = vld [vmem:[%s3562_s28 + $0x2f8] sm:$0xf]  ;;  %v392_v32 = vld [vmem:[%s3562_s28 + $0x300] sm:$0xf] }
  0x53   : > { %v394_v33 = vld [vmem:[%s3562_s28 + $0x308] sm:$0xf]  ;;  %391 = vst [vmem:[%s3566_s29 + $0x17c] sm:$0xf] %v390_v31  ;;  %393 = vst [vmem:[%s3566_s29 + $0x180] sm:$0xf] %v392_v32 }
  0x54   : > { %395 = vst [vmem:[%s3566_s29 + $0x184] sm:$0xf] %v394_v33  ;;  %v396_v34 = vld [vmem:[%s3562_s28 + $0x310] sm:$0xf]  ;;  %v398_v35 = vld [vmem:[%s3562_s28 + $0x318] sm:$0xf] }
  0x55   : > { %v400_v36 = vld [vmem:[%s3562_s28 + $0x320] sm:$0xf]  ;;  %397 = vst [vmem:[%s3566_s29 + $0x188] sm:$0xf] %v396_v34  ;;  %399 = vst [vmem:[%s3566_s29 + $0x18c] sm:$0xf] %v398_v35 }
  0x56   : > { %401 = vst [vmem:[%s3566_s29 + $0x190] sm:$0xf] %v400_v36  ;;  %v402_v37 = vld [vmem:[%s3562_s28 + $0x328] sm:$0xf]  ;;  %v404_v38 = vld [vmem:[%s3562_s28 + $0x330] sm:$0xf] }
  0x57   : > { %v406_v39 = vld [vmem:[%s3562_s28 + $0x338] sm:$0xf]  ;;  %403 = vst [vmem:[%s3566_s29 + $0x194] sm:$0xf] %v402_v37  ;;  %405 = vst [vmem:[%s3566_s29 + $0x198] sm:$0xf] %v404_v38 }
  0x58   : > { %407 = vst [vmem:[%s3566_s29 + $0x19c] sm:$0xf] %v406_v39  ;;  %v408_v40 = vld [vmem:[%s3562_s28 + $0x340] sm:$0xf]  ;;  %v410_v41 = vld [vmem:[%s3562_s28 + $0x348] sm:$0xf] }
  0x59   : > { %v412_v42 = vld [vmem:[%s3562_s28 + $0x350] sm:$0xf]  ;;  %409 = vst [vmem:[%s3566_s29 + $0x1a0] sm:$0xf] %v408_v40  ;;  %411 = vst [vmem:[%s3566_s29 + $0x1a4] sm:$0xf] %v410_v41 }
  0x5a   : > { %413 = vst [vmem:[%s3566_s29 + $0x1a8] sm:$0xf] %v412_v42  ;;  %v414_v43 = vld [vmem:[%s3562_s28 + $0x358] sm:$0xf]  ;;  %v416_v44 = vld [vmem:[%s3562_s28 + $0x360] sm:$0xf] }
  0x5b   : > { %v418_v45 = vld [vmem:[%s3562_s28 + $0x368] sm:$0xf]  ;;  %415 = vst [vmem:[%s3566_s29 + $0x1ac] sm:$0xf] %v414_v43  ;;  %417 = vst [vmem:[%s3566_s29 + $0x1b0] sm:$0xf] %v416_v44 }
  0x5c   : > { %419 = vst [vmem:[%s3566_s29 + $0x1b4] sm:$0xf] %v418_v45  ;;  %v420_v46 = vld [vmem:[%s3562_s28 + $0x370] sm:$0xf]  ;;  %v422_v47 = vld [vmem:[%s3562_s28 + $0x378] sm:$0xf] }
  0x5d   : > { %v424_v48 = vld [vmem:[%s3562_s28 + $0x380] sm:$0xf]  ;;  %421 = vst [vmem:[%s3566_s29 + $0x1b8] sm:$0xf] %v420_v46  ;;  %423 = vst [vmem:[%s3566_s29 + $0x1bc] sm:$0xf] %v422_v47 }
  0x5e   : > { %425 = vst [vmem:[%s3566_s29 + $0x1c0] sm:$0xf] %v424_v48  ;;  %v426_v49 = vld [vmem:[%s3562_s28 + $0x388] sm:$0xf]  ;;  %v428_v50 = vld [vmem:[%s3562_s28 + $0x390] sm:$0xf] }
  0x5f   : > { %v430_v51 = vld [vmem:[%s3562_s28 + $0x398] sm:$0xf]  ;;  %427 = vst [vmem:[%s3566_s29 + $0x1c4] sm:$0xf] %v426_v49  ;;  %429 = vst [vmem:[%s3566_s29 + $0x1c8] sm:$0xf] %v428_v50 }
  0x60   : > { %431 = vst [vmem:[%s3566_s29 + $0x1cc] sm:$0xf] %v430_v51  ;;  %v432_v52 = vld [vmem:[%s3562_s28 + $0x3a0] sm:$0xf]  ;;  %v434_v53 = vld [vmem:[%s3562_s28 + $0x3a8] sm:$0xf] }
  0x61   : > { %v436_v54 = vld [vmem:[%s3562_s28 + $0x3b0] sm:$0xf]  ;;  %433 = vst [vmem:[%s3566_s29 + $0x1d0] sm:$0xf] %v432_v52  ;;  %435 = vst [vmem:[%s3566_s29 + $0x1d4] sm:$0xf] %v434_v53 }
  0x62   : > { %437 = vst [vmem:[%s3566_s29 + $0x1d8] sm:$0xf] %v436_v54  ;;  %v438_v55 = vld [vmem:[%s3562_s28 + $0x3b8] sm:$0xf]  ;;  %v440_v56 = vld [vmem:[%s3562_s28 + $0x3c0] sm:$0xf] }
  0x63   : > { %v442_v57 = vld [vmem:[%s3562_s28 + $0x3c8] sm:$0xf]  ;;  %439 = vst [vmem:[%s3566_s29 + $0x1dc] sm:$0xf] %v438_v55  ;;  %441 = vst [vmem:[%s3566_s29 + $0x1e0] sm:$0xf] %v440_v56 }
  0x64   : > { %443 = vst [vmem:[%s3566_s29 + $0x1e4] sm:$0xf] %v442_v57  ;;  %v444_v58 = vld [vmem:[%s3562_s28 + $0x3d0] sm:$0xf]  ;;  %v446_v59 = vld [vmem:[%s3562_s28 + $0x3d8] sm:$0xf] }
  0x65   : > { %v448_v60 = vld [vmem:[%s3562_s28 + $0x3e0] sm:$0xf]  ;;  %445 = vst [vmem:[%s3566_s29 + $0x1e8] sm:$0xf] %v444_v58  ;;  %447 = vst [vmem:[%s3566_s29 + $0x1ec] sm:$0xf] %v446_v59 }
  0x66   : > { %449 = vst [vmem:[%s3566_s29 + $0x1f0] sm:$0xf] %v448_v60  ;;  %v450_v61 = vld [vmem:[%s3562_s28 + $0x3e8] sm:$0xf]  ;;  %v452_v62 = vld [vmem:[%s3562_s28 + $0x3f0] sm:$0xf] }
  0x67   : > { %v454_v63 = vld [vmem:[%s3562_s28 + $0x3f8] sm:$0xf]  ;;  %451 = vst [vmem:[%s3566_s29 + $0x1f4] sm:$0xf] %v450_v61  ;;  %453 = vst [vmem:[%s3566_s29 + $0x1f8] sm:$0xf] %v452_v62 }
  0x68   : > { %455 = vst [vmem:[%s3566_s29 + $0x1fc] sm:$0xf] %v454_v63  ;;  %v456_v0 = vld [vmem:[%s3562_s28 + $0x400] sm:$0xf]  ;;  %v458_v1 = vld [vmem:[%s3562_s28 + $0x408] sm:$0xf] }
  0x69   : > { %v460_v2 = vld [vmem:[%s3562_s28 + $0x410] sm:$0xf]  ;;  %457 = vst [vmem:[%s3566_s29 + $0x200] sm:$0xf] %v456_v0  ;;  %459 = vst [vmem:[%s3566_s29 + $0x204] sm:$0xf] %v458_v1 }
  0x6a   : > { %461 = vst [vmem:[%s3566_s29 + $0x208] sm:$0xf] %v460_v2  ;;  %v462_v3 = vld [vmem:[%s3562_s28 + $0x418] sm:$0xf]  ;;  %v464_v4 = vld [vmem:[%s3562_s28 + $0x420] sm:$0xf] }
  0x6b   : > { %v466_v5 = vld [vmem:[%s3562_s28 + $0x428] sm:$0xf]  ;;  %463 = vst [vmem:[%s3566_s29 + $0x20c] sm:$0xf] %v462_v3  ;;  %465 = vst [vmem:[%s3566_s29 + $0x210] sm:$0xf] %v464_v4 }
  0x6c   : > { %467 = vst [vmem:[%s3566_s29 + $0x214] sm:$0xf] %v466_v5  ;;  %v468_v6 = vld [vmem:[%s3562_s28 + $0x430] sm:$0xf]  ;;  %v470_v7 = vld [vmem:[%s3562_s28 + $0x438] sm:$0xf] }
  0x6d   : > { %v472_v8 = vld [vmem:[%s3562_s28 + $0x440] sm:$0xf]  ;;  %469 = vst [vmem:[%s3566_s29 + $0x218] sm:$0xf] %v468_v6  ;;  %471 = vst [vmem:[%s3566_s29 + $0x21c] sm:$0xf] %v470_v7 }
  0x6e   : > { %473 = vst [vmem:[%s3566_s29 + $0x220] sm:$0xf] %v472_v8  ;;  %v474_v9 = vld [vmem:[%s3562_s28 + $0x448] sm:$0xf]  ;;  %v476_v10 = vld [vmem:[%s3562_s28 + $0x450] sm:$0xf] }
  0x6f   : > { %v478_v11 = vld [vmem:[%s3562_s28 + $0x458] sm:$0xf]  ;;  %475 = vst [vmem:[%s3566_s29 + $0x224] sm:$0xf] %v474_v9  ;;  %477 = vst [vmem:[%s3566_s29 + $0x228] sm:$0xf] %v476_v10 }
  0x70   : > { %479 = vst [vmem:[%s3566_s29 + $0x22c] sm:$0xf] %v478_v11  ;;  %v480_v12 = vld [vmem:[%s3562_s28 + $0x460] sm:$0xf]  ;;  %v482_v13 = vld [vmem:[%s3562_s28 + $0x468] sm:$0xf] }
  0x71   : > { %v484_v14 = vld [vmem:[%s3562_s28 + $0x470] sm:$0xf]  ;;  %481 = vst [vmem:[%s3566_s29 + $0x230] sm:$0xf] %v480_v12  ;;  %483 = vst [vmem:[%s3566_s29 + $0x234] sm:$0xf] %v482_v13 }
  0x72   : > { %485 = vst [vmem:[%s3566_s29 + $0x238] sm:$0xf] %v484_v14  ;;  %v486_v15 = vld [vmem:[%s3562_s28 + $0x478] sm:$0xf]  ;;  %v488_v16 = vld [vmem:[%s3562_s28 + $0x480] sm:$0xf] }
  0x73   : > { %v490_v17 = vld [vmem:[%s3562_s28 + $0x488] sm:$0xf]  ;;  %487 = vst [vmem:[%s3566_s29 + $0x23c] sm:$0xf] %v486_v15  ;;  %489 = vst [vmem:[%s3566_s29 + $0x240] sm:$0xf] %v488_v16 }
  0x74   : > { %491 = vst [vmem:[%s3566_s29 + $0x244] sm:$0xf] %v490_v17  ;;  %v492_v18 = vld [vmem:[%s3562_s28 + $0x490] sm:$0xf]  ;;  %v494_v19 = vld [vmem:[%s3562_s28 + $0x498] sm:$0xf] }
  0x75   : > { %v496_v20 = vld [vmem:[%s3562_s28 + $0x4a0] sm:$0xf]  ;;  %493 = vst [vmem:[%s3566_s29 + $0x248] sm:$0xf] %v492_v18  ;;  %495 = vst [vmem:[%s3566_s29 + $0x24c] sm:$0xf] %v494_v19 }
  0x76   : > { %497 = vst [vmem:[%s3566_s29 + $0x250] sm:$0xf] %v496_v20  ;;  %v498_v21 = vld [vmem:[%s3562_s28 + $0x4a8] sm:$0xf]  ;;  %v500_v22 = vld [vmem:[%s3562_s28 + $0x4b0] sm:$0xf] }
  0x77   : > { %v502_v23 = vld [vmem:[%s3562_s28 + $0x4b8] sm:$0xf]  ;;  %499 = vst [vmem:[%s3566_s29 + $0x254] sm:$0xf] %v498_v21  ;;  %501 = vst [vmem:[%s3566_s29 + $0x258] sm:$0xf] %v500_v22 }
  0x78   : > { %503 = vst [vmem:[%s3566_s29 + $0x25c] sm:$0xf] %v502_v23  ;;  %v504_v24 = vld [vmem:[%s3562_s28 + $0x4c0] sm:$0xf]  ;;  %v506_v25 = vld [vmem:[%s3562_s28 + $0x4c8] sm:$0xf] }
  0x79   : > { %v508_v26 = vld [vmem:[%s3562_s28 + $0x4d0] sm:$0xf]  ;;  %505 = vst [vmem:[%s3566_s29 + $0x260] sm:$0xf] %v504_v24  ;;  %507 = vst [vmem:[%s3566_s29 + $0x264] sm:$0xf] %v506_v25 }
  0x7a   : > { %509 = vst [vmem:[%s3566_s29 + $0x268] sm:$0xf] %v508_v26  ;;  %v510_v27 = vld [vmem:[%s3562_s28 + $0x4d8] sm:$0xf]  ;;  %v512_v28 = vld [vmem:[%s3562_s28 + $0x4e0] sm:$0xf] }
  0x7b   : > { %v514_v29 = vld [vmem:[%s3562_s28 + $0x4e8] sm:$0xf]  ;;  %511 = vst [vmem:[%s3566_s29 + $0x26c] sm:$0xf] %v510_v27  ;;  %513 = vst [vmem:[%s3566_s29 + $0x270] sm:$0xf] %v512_v28 }
  0x7c   : > { %515 = vst [vmem:[%s3566_s29 + $0x274] sm:$0xf] %v514_v29  ;;  %v516_v30 = vld [vmem:[%s3562_s28 + $0x4f0] sm:$0xf]  ;;  %v518_v31 = vld [vmem:[%s3562_s28 + $0x4f8] sm:$0xf] }
  0x7d   : > { %v520_v32 = vld [vmem:[%s3562_s28 + $0x500] sm:$0xf]  ;;  %517 = vst [vmem:[%s3566_s29 + $0x278] sm:$0xf] %v516_v30  ;;  %519 = vst [vmem:[%s3566_s29 + $0x27c] sm:$0xf] %v518_v31 }
  0x7e   : > { %521 = vst [vmem:[%s3566_s29 + $0x280] sm:$0xf] %v520_v32  ;;  %v522_v33 = vld [vmem:[%s3562_s28 + $0x508] sm:$0xf]  ;;  %v524_v34 = vld [vmem:[%s3562_s28 + $0x510] sm:$0xf] }
  0x7f   : > { %v526_v35 = vld [vmem:[%s3562_s28 + $0x518] sm:$0xf]  ;;  %523 = vst [vmem:[%s3566_s29 + $0x284] sm:$0xf] %v522_v33  ;;  %525 = vst [vmem:[%s3566_s29 + $0x288] sm:$0xf] %v524_v34 }
  0x80   : > { %527 = vst [vmem:[%s3566_s29 + $0x28c] sm:$0xf] %v526_v35  ;;  %v528_v36 = vld [vmem:[%s3562_s28 + $0x520] sm:$0xf]  ;;  %v530_v37 = vld [vmem:[%s3562_s28 + $0x528] sm:$0xf] }
  0x81   : > { %v532_v38 = vld [vmem:[%s3562_s28 + $0x530] sm:$0xf]  ;;  %529 = vst [vmem:[%s3566_s29 + $0x290] sm:$0xf] %v528_v36  ;;  %531 = vst [vmem:[%s3566_s29 + $0x294] sm:$0xf] %v530_v37 }
  0x82   : > { %533 = vst [vmem:[%s3566_s29 + $0x298] sm:$0xf] %v532_v38  ;;  %v534_v39 = vld [vmem:[%s3562_s28 + $0x538] sm:$0xf]  ;;  %v536_v40 = vld [vmem:[%s3562_s28 + $0x540] sm:$0xf] }
  0x83   : > { %v538_v41 = vld [vmem:[%s3562_s28 + $0x548] sm:$0xf]  ;;  %535 = vst [vmem:[%s3566_s29 + $0x29c] sm:$0xf] %v534_v39  ;;  %537 = vst [vmem:[%s3566_s29 + $0x2a0] sm:$0xf] %v536_v40 }
  0x84   : > { %539 = vst [vmem:[%s3566_s29 + $0x2a4] sm:$0xf] %v538_v41  ;;  %v540_v42 = vld [vmem:[%s3562_s28 + $0x550] sm:$0xf]  ;;  %v542_v43 = vld [vmem:[%s3562_s28 + $0x558] sm:$0xf] }
  0x85   : > { %v544_v44 = vld [vmem:[%s3562_s28 + $0x560] sm:$0xf]  ;;  %541 = vst [vmem:[%s3566_s29 + $0x2a8] sm:$0xf] %v540_v42  ;;  %543 = vst [vmem:[%s3566_s29 + $0x2ac] sm:$0xf] %v542_v43 }
  0x86   : > { %545 = vst [vmem:[%s3566_s29 + $0x2b0] sm:$0xf] %v544_v44  ;;  %v546_v45 = vld [vmem:[%s3562_s28 + $0x568] sm:$0xf]  ;;  %v548_v46 = vld [vmem:[%s3562_s28 + $0x570] sm:$0xf] }
  0x87   : > { %v550_v47 = vld [vmem:[%s3562_s28 + $0x578] sm:$0xf]  ;;  %547 = vst [vmem:[%s3566_s29 + $0x2b4] sm:$0xf] %v546_v45  ;;  %549 = vst [vmem:[%s3566_s29 + $0x2b8] sm:$0xf] %v548_v46 }
  0x88   : > { %551 = vst [vmem:[%s3566_s29 + $0x2bc] sm:$0xf] %v550_v47  ;;  %v552_v48 = vld [vmem:[%s3562_s28 + $0x580] sm:$0xf]  ;;  %v554_v49 = vld [vmem:[%s3562_s28 + $0x588] sm:$0xf] }
  0x89   : > { %v556_v50 = vld [vmem:[%s3562_s28 + $0x590] sm:$0xf]  ;;  %553 = vst [vmem:[%s3566_s29 + $0x2c0] sm:$0xf] %v552_v48  ;;  %555 = vst [vmem:[%s3566_s29 + $0x2c4] sm:$0xf] %v554_v49 }
  0x8a   : > { %557 = vst [vmem:[%s3566_s29 + $0x2c8] sm:$0xf] %v556_v50  ;;  %v558_v51 = vld [vmem:[%s3562_s28 + $0x598] sm:$0xf]  ;;  %v560_v52 = vld [vmem:[%s3562_s28 + $0x5a0] sm:$0xf] }
  0x8b   : > { %v562_v53 = vld [vmem:[%s3562_s28 + $0x5a8] sm:$0xf]  ;;  %559 = vst [vmem:[%s3566_s29 + $0x2cc] sm:$0xf] %v558_v51  ;;  %561 = vst [vmem:[%s3566_s29 + $0x2d0] sm:$0xf] %v560_v52 }
  0x8c   : > { %563 = vst [vmem:[%s3566_s29 + $0x2d4] sm:$0xf] %v562_v53  ;;  %v564_v54 = vld [vmem:[%s3562_s28 + $0x5b0] sm:$0xf]  ;;  %v566_v55 = vld [vmem:[%s3562_s28 + $0x5b8] sm:$0xf] }
  0x8d   : > { %v568_v56 = vld [vmem:[%s3562_s28 + $0x5c0] sm:$0xf]  ;;  %565 = vst [vmem:[%s3566_s29 + $0x2d8] sm:$0xf] %v564_v54  ;;  %567 = vst [vmem:[%s3566_s29 + $0x2dc] sm:$0xf] %v566_v55 }
  0x8e   : > { %569 = vst [vmem:[%s3566_s29 + $0x2e0] sm:$0xf] %v568_v56  ;;  %v570_v57 = vld [vmem:[%s3562_s28 + $0x5c8] sm:$0xf]  ;;  %v572_v58 = vld [vmem:[%s3562_s28 + $0x5d0] sm:$0xf] }
  0x8f   : > { %v574_v59 = vld [vmem:[%s3562_s28 + $0x5d8] sm:$0xf]  ;;  %571 = vst [vmem:[%s3566_s29 + $0x2e4] sm:$0xf] %v570_v57  ;;  %573 = vst [vmem:[%s3566_s29 + $0x2e8] sm:$0xf] %v572_v58 }
  0x90   : > { %575 = vst [vmem:[%s3566_s29 + $0x2ec] sm:$0xf] %v574_v59  ;;  %v576_v60 = vld [vmem:[%s3562_s28 + $0x5e0] sm:$0xf]  ;;  %v578_v61 = vld [vmem:[%s3562_s28 + $0x5e8] sm:$0xf] }
  0x91   : > { %v580_v62 = vld [vmem:[%s3562_s28 + $0x5f0] sm:$0xf]  ;;  %577 = vst [vmem:[%s3566_s29 + $0x2f0] sm:$0xf] %v576_v60  ;;  %579 = vst [vmem:[%s3566_s29 + $0x2f4] sm:$0xf] %v578_v61 }
  0x92   : > { %581 = vst [vmem:[%s3566_s29 + $0x2f8] sm:$0xf] %v580_v62  ;;  %v582_v63 = vld [vmem:[%s3562_s28 + $0x5f8] sm:$0xf]  ;;  %v584_v0 = vld [vmem:[%s3562_s28 + $0x600] sm:$0xf] }
  0x93   : > { %v586_v1 = vld [vmem:[%s3562_s28 + $0x608] sm:$0xf]  ;;  %583 = vst [vmem:[%s3566_s29 + $0x2fc] sm:$0xf] %v582_v63  ;;  %585 = vst [vmem:[%s3566_s29 + $0x300] sm:$0xf] %v584_v0 }
  0x94   : > { %587 = vst [vmem:[%s3566_s29 + $0x304] sm:$0xf] %v586_v1  ;;  %v588_v2 = vld [vmem:[%s3562_s28 + $0x610] sm:$0xf]  ;;  %v590_v3 = vld [vmem:[%s3562_s28 + $0x618] sm:$0xf] }
  0x95   : > { %v592_v4 = vld [vmem:[%s3562_s28 + $0x620] sm:$0xf]  ;;  %589 = vst [vmem:[%s3566_s29 + $0x308] sm:$0xf] %v588_v2  ;;  %591 = vst [vmem:[%s3566_s29 + $0x30c] sm:$0xf] %v590_v3 }
  0x96   : > { %593 = vst [vmem:[%s3566_s29 + $0x310] sm:$0xf] %v592_v4  ;;  %v594_v5 = vld [vmem:[%s3562_s28 + $0x628] sm:$0xf]  ;;  %v596_v6 = vld [vmem:[%s3562_s28 + $0x630] sm:$0xf] }
  0x97   : > { %v598_v7 = vld [vmem:[%s3562_s28 + $0x638] sm:$0xf]  ;;  %595 = vst [vmem:[%s3566_s29 + $0x314] sm:$0xf] %v594_v5  ;;  %597 = vst [vmem:[%s3566_s29 + $0x318] sm:$0xf] %v596_v6 }
  0x98   : > { %599 = vst [vmem:[%s3566_s29 + $0x31c] sm:$0xf] %v598_v7  ;;  %v600_v8 = vld [vmem:[%s3562_s28 + $0x640] sm:$0xf]  ;;  %v602_v9 = vld [vmem:[%s3562_s28 + $0x648] sm:$0xf] }
  0x99   : > { %v604_v10 = vld [vmem:[%s3562_s28 + $0x650] sm:$0xf]  ;;  %601 = vst [vmem:[%s3566_s29 + $0x320] sm:$0xf] %v600_v8  ;;  %603 = vst [vmem:[%s3566_s29 + $0x324] sm:$0xf] %v602_v9 }
  0x9a   : > { %605 = vst [vmem:[%s3566_s29 + $0x328] sm:$0xf] %v604_v10  ;;  %v606_v11 = vld [vmem:[%s3562_s28 + $0x658] sm:$0xf]  ;;  %v608_v12 = vld [vmem:[%s3562_s28 + $0x660] sm:$0xf] }
  0x9b   : > { %v610_v13 = vld [vmem:[%s3562_s28 + $0x668] sm:$0xf]  ;;  %607 = vst [vmem:[%s3566_s29 + $0x32c] sm:$0xf] %v606_v11  ;;  %609 = vst [vmem:[%s3566_s29 + $0x330] sm:$0xf] %v608_v12 }
  0x9c   : > { %611 = vst [vmem:[%s3566_s29 + $0x334] sm:$0xf] %v610_v13  ;;  %v612_v14 = vld [vmem:[%s3562_s28 + $0x670] sm:$0xf]  ;;  %v614_v15 = vld [vmem:[%s3562_s28 + $0x678] sm:$0xf] }
  0x9d   : > { %v616_v16 = vld [vmem:[%s3562_s28 + $0x680] sm:$0xf]  ;;  %613 = vst [vmem:[%s3566_s29 + $0x338] sm:$0xf] %v612_v14  ;;  %615 = vst [vmem:[%s3566_s29 + $0x33c] sm:$0xf] %v614_v15 }
  0x9e   : > { %617 = vst [vmem:[%s3566_s29 + $0x340] sm:$0xf] %v616_v16  ;;  %v618_v17 = vld [vmem:[%s3562_s28 + $0x688] sm:$0xf]  ;;  %v620_v18 = vld [vmem:[%s3562_s28 + $0x690] sm:$0xf] }
  0x9f   : > { %v622_v19 = vld [vmem:[%s3562_s28 + $0x698] sm:$0xf]  ;;  %619 = vst [vmem:[%s3566_s29 + $0x344] sm:$0xf] %v618_v17  ;;  %621 = vst [vmem:[%s3566_s29 + $0x348] sm:$0xf] %v620_v18 }
  0xa0   : > { %623 = vst [vmem:[%s3566_s29 + $0x34c] sm:$0xf] %v622_v19  ;;  %v624_v20 = vld [vmem:[%s3562_s28 + $0x6a0] sm:$0xf]  ;;  %v626_v21 = vld [vmem:[%s3562_s28 + $0x6a8] sm:$0xf] }
  0xa1   : > { %v628_v22 = vld [vmem:[%s3562_s28 + $0x6b0] sm:$0xf]  ;;  %625 = vst [vmem:[%s3566_s29 + $0x350] sm:$0xf] %v624_v20  ;;  %627 = vst [vmem:[%s3566_s29 + $0x354] sm:$0xf] %v626_v21 }
  0xa2   : > { %629 = vst [vmem:[%s3566_s29 + $0x358] sm:$0xf] %v628_v22  ;;  %v630_v23 = vld [vmem:[%s3562_s28 + $0x6b8] sm:$0xf]  ;;  %v632_v24 = vld [vmem:[%s3562_s28 + $0x6c0] sm:$0xf] }
  0xa3   : > { %v634_v25 = vld [vmem:[%s3562_s28 + $0x6c8] sm:$0xf]  ;;  %631 = vst [vmem:[%s3566_s29 + $0x35c] sm:$0xf] %v630_v23  ;;  %633 = vst [vmem:[%s3566_s29 + $0x360] sm:$0xf] %v632_v24 }
  0xa4   : > { %635 = vst [vmem:[%s3566_s29 + $0x364] sm:$0xf] %v634_v25  ;;  %v636_v26 = vld [vmem:[%s3562_s28 + $0x6d0] sm:$0xf]  ;;  %v638_v27 = vld [vmem:[%s3562_s28 + $0x6d8] sm:$0xf] }
  0xa5   : > { %v640_v28 = vld [vmem:[%s3562_s28 + $0x6e0] sm:$0xf]  ;;  %637 = vst [vmem:[%s3566_s29 + $0x368] sm:$0xf] %v636_v26  ;;  %639 = vst [vmem:[%s3566_s29 + $0x36c] sm:$0xf] %v638_v27 }
  0xa6   : > { %641 = vst [vmem:[%s3566_s29 + $0x370] sm:$0xf] %v640_v28  ;;  %v642_v29 = vld [vmem:[%s3562_s28 + $0x6e8] sm:$0xf]  ;;  %v644_v30 = vld [vmem:[%s3562_s28 + $0x6f0] sm:$0xf] }
  0xa7   : > { %v646_v31 = vld [vmem:[%s3562_s28 + $0x6f8] sm:$0xf]  ;;  %643 = vst [vmem:[%s3566_s29 + $0x374] sm:$0xf] %v642_v29  ;;  %645 = vst [vmem:[%s3566_s29 + $0x378] sm:$0xf] %v644_v30 }
  0xa8   : > { %647 = vst [vmem:[%s3566_s29 + $0x37c] sm:$0xf] %v646_v31  ;;  %v648_v32 = vld [vmem:[%s3562_s28 + $0x700] sm:$0xf]  ;;  %v650_v33 = vld [vmem:[%s3562_s28 + $0x708] sm:$0xf] }
  0xa9   : > { %v652_v34 = vld [vmem:[%s3562_s28 + $0x710] sm:$0xf]  ;;  %649 = vst [vmem:[%s3566_s29 + $0x380] sm:$0xf] %v648_v32  ;;  %651 = vst [vmem:[%s3566_s29 + $0x384] sm:$0xf] %v650_v33 }
  0xaa   : > { %653 = vst [vmem:[%s3566_s29 + $0x388] sm:$0xf] %v652_v34  ;;  %v654_v35 = vld [vmem:[%s3562_s28 + $0x718] sm:$0xf]  ;;  %v656_v36 = vld [vmem:[%s3562_s28 + $0x720] sm:$0xf] }
  0xab   : > { %v658_v37 = vld [vmem:[%s3562_s28 + $0x728] sm:$0xf]  ;;  %655 = vst [vmem:[%s3566_s29 + $0x38c] sm:$0xf] %v654_v35  ;;  %657 = vst [vmem:[%s3566_s29 + $0x390] sm:$0xf] %v656_v36 }
  0xac   : > { %659 = vst [vmem:[%s3566_s29 + $0x394] sm:$0xf] %v658_v37  ;;  %v660_v38 = vld [vmem:[%s3562_s28 + $0x730] sm:$0xf]  ;;  %v662_v39 = vld [vmem:[%s3562_s28 + $0x738] sm:$0xf] }
  0xad   : > { %v664_v40 = vld [vmem:[%s3562_s28 + $0x740] sm:$0xf]  ;;  %661 = vst [vmem:[%s3566_s29 + $0x398] sm:$0xf] %v660_v38  ;;  %663 = vst [vmem:[%s3566_s29 + $0x39c] sm:$0xf] %v662_v39 }
  0xae   : > { %665 = vst [vmem:[%s3566_s29 + $0x3a0] sm:$0xf] %v664_v40  ;;  %v666_v41 = vld [vmem:[%s3562_s28 + $0x748] sm:$0xf]  ;;  %v668_v42 = vld [vmem:[%s3562_s28 + $0x750] sm:$0xf] }
  0xaf   : > { %v670_v43 = vld [vmem:[%s3562_s28 + $0x758] sm:$0xf]  ;;  %667 = vst [vmem:[%s3566_s29 + $0x3a4] sm:$0xf] %v666_v41  ;;  %669 = vst [vmem:[%s3566_s29 + $0x3a8] sm:$0xf] %v668_v42 }
  0xb0   : > { %671 = vst [vmem:[%s3566_s29 + $0x3ac] sm:$0xf] %v670_v43  ;;  %v672_v44 = vld [vmem:[%s3562_s28 + $0x760] sm:$0xf]  ;;  %v674_v45 = vld [vmem:[%s3562_s28 + $0x768] sm:$0xf] }
  0xb1   : > { %v676_v46 = vld [vmem:[%s3562_s28 + $0x770] sm:$0xf]  ;;  %673 = vst [vmem:[%s3566_s29 + $0x3b0] sm:$0xf] %v672_v44  ;;  %675 = vst [vmem:[%s3566_s29 + $0x3b4] sm:$0xf] %v674_v45 }
  0xb2   : > { %677 = vst [vmem:[%s3566_s29 + $0x3b8] sm:$0xf] %v676_v46  ;;  %v678_v47 = vld [vmem:[%s3562_s28 + $0x778] sm:$0xf]  ;;  %v680_v48 = vld [vmem:[%s3562_s28 + $0x780] sm:$0xf] }
  0xb3   : > { %v682_v49 = vld [vmem:[%s3562_s28 + $0x788] sm:$0xf]  ;;  %679 = vst [vmem:[%s3566_s29 + $0x3bc] sm:$0xf] %v678_v47  ;;  %681 = vst [vmem:[%s3566_s29 + $0x3c0] sm:$0xf] %v680_v48 }
  0xb4   : > { %683 = vst [vmem:[%s3566_s29 + $0x3c4] sm:$0xf] %v682_v49  ;;  %v684_v50 = vld [vmem:[%s3562_s28 + $0x790] sm:$0xf]  ;;  %v686_v51 = vld [vmem:[%s3562_s28 + $0x798] sm:$0xf] }
  0xb5   : > { %v688_v52 = vld [vmem:[%s3562_s28 + $0x7a0] sm:$0xf]  ;;  %685 = vst [vmem:[%s3566_s29 + $0x3c8] sm:$0xf] %v684_v50  ;;  %687 = vst [vmem:[%s3566_s29 + $0x3cc] sm:$0xf] %v686_v51 }
  0xb6   : > { %689 = vst [vmem:[%s3566_s29 + $0x3d0] sm:$0xf] %v688_v52  ;;  %v690_v53 = vld [vmem:[%s3562_s28 + $0x7a8] sm:$0xf]  ;;  %v692_v54 = vld [vmem:[%s3562_s28 + $0x7b0] sm:$0xf] }
  0xb7   : > { %v694_v55 = vld [vmem:[%s3562_s28 + $0x7b8] sm:$0xf]  ;;  %691 = vst [vmem:[%s3566_s29 + $0x3d4] sm:$0xf] %v690_v53  ;;  %693 = vst [vmem:[%s3566_s29 + $0x3d8] sm:$0xf] %v692_v54 }
  0xb8   : > { %695 = vst [vmem:[%s3566_s29 + $0x3dc] sm:$0xf] %v694_v55  ;;  %v696_v56 = vld [vmem:[%s3562_s28 + $0x7c0] sm:$0xf]  ;;  %v698_v57 = vld [vmem:[%s3562_s28 + $0x7c8] sm:$0xf] }
  0xb9   : > { %v700_v58 = vld [vmem:[%s3562_s28 + $0x7d0] sm:$0xf]  ;;  %697 = vst [vmem:[%s3566_s29 + $0x3e0] sm:$0xf] %v696_v56  ;;  %699 = vst [vmem:[%s3566_s29 + $0x3e4] sm:$0xf] %v698_v57 }
  0xba   : > { %701 = vst [vmem:[%s3566_s29 + $0x3e8] sm:$0xf] %v700_v58  ;;  %v702_v59 = vld [vmem:[%s3562_s28 + $0x7d8] sm:$0xf]  ;;  %v704_v60 = vld [vmem:[%s3562_s28 + $0x7e0] sm:$0xf] }
  0xbb   : > { %v706_v61 = vld [vmem:[%s3562_s28 + $0x7e8] sm:$0xf]  ;;  %703 = vst [vmem:[%s3566_s29 + $0x3ec] sm:$0xf] %v702_v59  ;;  %705 = vst [vmem:[%s3566_s29 + $0x3f0] sm:$0xf] %v704_v60 }
  0xbc   : > { %707 = vst [vmem:[%s3566_s29 + $0x3f4] sm:$0xf] %v706_v61  ;;  %v708_v62 = vld [vmem:[%s3562_s28 + $0x7f0] sm:$0xf]  ;;  %v710_v63 = vld [vmem:[%s3562_s28 + $0x7f8] sm:$0xf] }
  0xbd   : > { %709 = vst [vmem:[%s3566_s29 + $0x3f8] sm:$0xf] %v708_v62  ;;  %711 = vst [vmem:[%s3566_s29 + $0x3fc] sm:$0xf] %v710_v63 }
  0xbe PF: > { %p2949_p8 = scmp.ge.s32.totalorder %s3492_s16, 1  ;;  %p1252_p9 = scmp.lt.s32.totalorder %s3492_s16, 3 }
  0xc0   : > { %p1253_p10 = pnand %p2949_p8, %p1252_p9 }
  0xc1   : > { %s1259_s30 = sand.u32 (!%p1253_p10), 1, %s3476_s12   ;;  %p1307_p11 = scmp.lt.s32.totalorder (!%p1253_p10), %s3484_s14, 1 }
  0xc2   : > { %1256 = sbr.rel (%p1253_p10) target bundleno = 548 (0x224), region = 69  ;;  %s2950_s10 = sshll.u32 (!%p1253_p10), %s1259_s30, 10 }
  0xc3   : > { %s4107_s19 = scalar_lea.vmem (!%p1253_p10), [#allocation3], %s2950_s10  ;;  %s2951_s6 = sshll.u32 (!%p1253_p10), %s1259_s30, 3 }
  0xc4   : > { %s1293_s7 = scalar_lea.vmem (!%p1253_p10), [#allocation4], %s2951_s6 }
  0xc7   : > { %v4084_v0 = vld [vmem:[%s4321_s0] sm:$0xff]  ;;  %v4094_v2 = vld [vmem:[%s4321_s0 + $0x8] sm:$0xff]  ;;  %v3326_v6 = vld [vmem:[%s4107_s19 + $0x78] sm:$0xff]   ;;  %s3100_s8 = sshll.u32 (%p3549_p6), %s3484_s14, 2 }
  0xc8   : > { %v4089_v1 = vld [vmem:[%s4321_s0 + $0x40] sm:$0xff]  ;;  %v4103_v4 = vld [vmem:[%s4321_s0 + $0x48] sm:$0xff]  ;;  %v3327_v7 = vld [vmem:[%s4107_s19 + $0xf8] sm:$0xff]   ;;  %3110 = vmatprep.subr.bf16.mxu0 %v3326_v6  ;;  %s2794_s11 = scalar_lea.vmem (%p3549_p6), %s4324_s3, %s3100_s8 }
  0xc9   : > { %v2954_v3 = vcombine.high %v4084_v0, %v4089_v1  ;;  %v2956_v5 = vcombine.high %v4094_v2, %v4103_v4  ;;  %v3328_v8 = vld [vmem:[%s4107_s19 + $0x38] sm:$0xff]   ;;  %3132 = vmatprep.subr.bf16.mxu1 %v3327_v7  ;;  %v3330_v10 = vld [vmem:[%s4107_s19 + $0x70] sm:$0xff]   ;;  %v3334_v14 = vld [vmem:[%s4107_s19 + $0x68] sm:$0xff]   ;;  %v2953_v42 = vcombine.low %v4084_v0, %v4089_v1  ;;  %v2955_v43 = vcombine.low %v4094_v2, %v4103_v4 }
  0xca   : > { %v3329_v9 = vld [vmem:[%s4107_s19 + $0xb8] sm:$0xff]   ;;  %3111 = vmatpush3.bf16.msra.mxu0 %v3328_v8  ;;  %v3331_v11 = vld [vmem:[%s4107_s19 + $0xf0] sm:$0xff]   ;;  %v3335_v15 = vld [vmem:[%s4107_s19 + $0xe8] sm:$0xff]  }
  0xcb   : > { %2471 = vmatprep.mubr.bf16.mxu0 %v2954_v3  ;;  %2512 = vmatprep.mubr.bf16.mxu1 %v2956_v5  ;;  %v3332_v12 = vld [vmem:[%s4107_s19 + $0x30] sm:$0xff]   ;;  %v3336_v16 = vld [vmem:[%s4107_s19 + $0x28] sm:$0xff]   ;;  %v3338_v18 = vld [vmem:[%s4107_s19 + $0x60] sm:$0xff]  }
  0xcc   : > { %3133 = vmatpush3.bf16.msra.mxu1 %v3329_v9  ;;  %3112 = vmatprep.subr.bf16.mxu0 %v3330_v10  ;;  %v3333_v13 = vld [vmem:[%s4107_s19 + $0xb0] sm:$0xff]   ;;  %v3337_v17 = vld [vmem:[%s4107_s19 + $0xa8] sm:$0xff]   ;;  %v3339_v19 = vld [vmem:[%s4107_s19 + $0xe0] sm:$0xff]  }
  0xcd   : > { %3134 = vmatprep.subr.bf16.mxu1 %v3331_v11  ;;  %v3340_v20 = vld [vmem:[%s4107_s19 + $0x20] sm:$0xff]   ;;  %v3342_v22 = vld [vmem:[%s4107_s19 + $0x58] sm:$0xff]   ;;  %v3346_v26 = vld [vmem:[%s4107_s19 + $0x50] sm:$0xff]  }
  0xce   : > { %3113 = vmatpush3.bf16.msra.mxu0 %v3332_v12  ;;  %v3341_v21 = vld [vmem:[%s4107_s19 + $0xa0] sm:$0xff]   ;;  %v3343_v23 = vld [vmem:[%s4107_s19 + $0xd8] sm:$0xff]   ;;  %v3347_v27 = vld [vmem:[%s4107_s19 + $0xd0] sm:$0xff]  }
  0xcf   : > { %3114 = vmatprep.subr.bf16.mxu0 %v3334_v14  ;;  %v3344_v24 = vld [vmem:[%s4107_s19 + $0x18] sm:$0xff]   ;;  %v3348_v28 = vld [vmem:[%s4107_s19 + $0x10] sm:$0xff]   ;;  %v3350_v30 = vld [vmem:[%s4107_s19 + $0x48] sm:$0xff]  }
  0xd0   : > { %3135 = vmatpush3.bf16.msra.mxu1 %v3333_v13  ;;  %v3345_v25 = vld [vmem:[%s4107_s19 + $0x98] sm:$0xff]   ;;  %v3349_v29 = vld [vmem:[%s4107_s19 + $0x90] sm:$0xff]   ;;  %v3351_v31 = vld [vmem:[%s4107_s19 + $0xc8] sm:$0xff]  }
  0xd1   : > { %3136 = vmatprep.subr.bf16.mxu1 %v3335_v15  ;;  %v3352_v32 = vld [vmem:[%s4107_s19 + $0x8] sm:$0xff]   ;;  %v3354_v34 = vld [vmem:[%s4107_s19 + $0x40] sm:$0xff]   ;;  %v4141_v35 = vld [vmem:[%s4321_s0 + $0x10] sm:$0xff] }
  0xd2   : > { %3115 = vmatpush3.bf16.msra.mxu0 %v3336_v16  ;;  %v3353_v33 = vld [vmem:[%s4107_s19 + $0x88] sm:$0xff]   ;;  %v4146_v36 = vld [vmem:[%s4321_s0 + $0x50] sm:$0xff]  ;;  %v3355_v37 = vld [vmem:[%s4107_s19 + $0xc0] sm:$0xff]  }
  0xd3   : > { %3116 = vmatprep.subr.bf16.mxu0 %v3338_v18  ;;  %v4152_v38 = vld [vmem:[%s4321_s0 + $0x18] sm:$0xff]  ;;  %v3356_v40 = vld [vmem:[%s4107_s19] sm:$0xff]   ;;  %v2958_v46 = vcombine.high %v4141_v35, %v4146_v36  ;;  %v3362_v50 = vld [vmem:[%s4107_s19 + $0x170] sm:$0xff]   ;;  %v2957_v14 = vcombine.low %v4141_v35, %v4146_v36 }
  0xd4   : > { %3137 = vmatpush3.bf16.msra.mxu1 %v3337_v17  ;;  %v4157_v39 = vld [vmem:[%s4321_s0 + $0x58] sm:$0xff]  ;;  %v3357_v41 = vld [vmem:[%s4107_s19 + $0x80] sm:$0xff]   ;;  %v3363_v51 = vld [vmem:[%s4107_s19 + $0x1f0] sm:$0xff]  }
  0xd5   : > { %3138 = vmatprep.subr.bf16.mxu1 %v3339_v19  ;;  %v3358_v44 = vld [vmem:[%s4107_s19 + $0x178] sm:$0xff]   ;;  %v2960_v48 = vcombine.high %v4152_v38, %v4157_v39  ;;  %v3364_v52 = vld [vmem:[%s4107_s19 + $0x130] sm:$0xff]   ;;  %v3366_v54 = vld [vmem:[%s4107_s19 + $0x168] sm:$0xff]   ;;  %v2959_v15 = vcombine.low %v4152_v38, %v4157_v39 }
  0xd6   : > { %3117 = vmatpush3.bf16.msra.mxu0 %v3340_v20  ;;  %v3359_v45 = vld [vmem:[%s4107_s19 + $0x1f8] sm:$0xff]   ;;  %v3365_v53 = vld [vmem:[%s4107_s19 + $0x1b0] sm:$0xff]   ;;  %v3367_v55 = vld [vmem:[%s4107_s19 + $0x1e8] sm:$0xff]  }
  0xd7   : > { %3118 = vmatprep.subr.bf16.mxu0 %v3342_v22  ;;  %v3360_v47 = vld [vmem:[%s4107_s19 + $0x138] sm:$0xff]   ;;  %v3368_v56 = vld [vmem:[%s4107_s19 + $0x128] sm:$0xff]   ;;  %v3370_v58 = vld [vmem:[%s4107_s19 + $0x160] sm:$0xff]  }
  0xd8   : > { %3139 = vmatpush3.bf16.msra.mxu1 %v3341_v21  ;;  %v3361_v49 = vld [vmem:[%s4107_s19 + $0x1b8] sm:$0xff]   ;;  %v3369_v57 = vld [vmem:[%s4107_s19 + $0x1a8] sm:$0xff]   ;;  %v3371_v59 = vld [vmem:[%s4107_s19 + $0x1e0] sm:$0xff]  }
  0xd9   : > { %3140 = vmatprep.subr.bf16.mxu1 %v3343_v23  ;;  %v3372_v60 = vld [vmem:[%s4107_s19 + $0x120] sm:$0xff]   ;;  %v3374_v62 = vld [vmem:[%s4107_s19 + $0x158] sm:$0xff]   ;;  %v3378_v2 = vld [vmem:[%s4107_s19 + $0x150] sm:$0xff]  }
  0xda   : > { %3119 = vmatpush3.bf16.msra.mxu0 %v3344_v24  ;;  %v3373_v61 = vld [vmem:[%s4107_s19 + $0x1a0] sm:$0xff]   ;;  %v3375_v63 = vld [vmem:[%s4107_s19 + $0x1d8] sm:$0xff]   ;;  %v3379_v3 = vld [vmem:[%s4107_s19 + $0x1d0] sm:$0xff]  }
  0xdb   : > { %3120 = vmatprep.subr.bf16.mxu0 %v3346_v26  ;;  %v3376_v0 = vld [vmem:[%s4107_s19 + $0x118] sm:$0xff]   ;;  %v3380_v4 = vld [vmem:[%s4107_s19 + $0x110] sm:$0xff]   ;;  %v3382_v6 = vld [vmem:[%s4107_s19 + $0x148] sm:$0xff]  }
  0xdc   : > { %3141 = vmatpush3.bf16.msra.mxu1 %v3345_v25  ;;  %v3377_v1 = vld [vmem:[%s4107_s19 + $0x198] sm:$0xff]   ;;  %v3381_v5 = vld [vmem:[%s4107_s19 + $0x190] sm:$0xff]   ;;  %v3383_v7 = vld [vmem:[%s4107_s19 + $0x1c8] sm:$0xff]  }
  0xdd   : > { %3142 = vmatprep.subr.bf16.mxu1 %v3347_v27  ;;  %v3384_v8 = vld [vmem:[%s4107_s19 + $0x108] sm:$0xff]   ;;  %v3386_v10 = vld [vmem:[%s4107_s19 + $0x140] sm:$0xff]   ;;  %v3390_v16 = vld [vmem:[%s4107_s19 + $0x278] sm:$0xff]  }
  0xde   : > { %3121 = vmatpush3.bf16.msra.mxu0 %v3348_v28  ;;  %v3385_v9 = vld [vmem:[%s4107_s19 + $0x188] sm:$0xff]   ;;  %v3387_v11 = vld [vmem:[%s4107_s19 + $0x1c0] sm:$0xff]   ;;  %v3391_v17 = vld [vmem:[%s4107_s19 + $0x2f8] sm:$0xff]  }
  0xdf   : > { %3122 = vmatprep.subr.bf16.mxu0 %v3350_v30  ;;  %v3388_v12 = vld [vmem:[%s4107_s19 + $0x100] sm:$0xff]   ;;  %v3392_v18 = vld [vmem:[%s4107_s19 + $0x238] sm:$0xff]   ;;  %v3394_v20 = vld [vmem:[%s4107_s19 + $0x270] sm:$0xff]  }
  0xe0   : > { %3143 = vmatpush3.bf16.msra.mxu1 %v3349_v29  ;;  %v3389_v13 = vld [vmem:[%s4107_s19 + $0x180] sm:$0xff]   ;;  %v3393_v19 = vld [vmem:[%s4107_s19 + $0x2b8] sm:$0xff]   ;;  %v3395_v21 = vld [vmem:[%s4107_s19 + $0x2f0] sm:$0xff]  }
  0xe1   : > { %3144 = vmatprep.subr.bf16.mxu1 %v3351_v31  ;;  %v3396_v22 = vld [vmem:[%s4107_s19 + $0x230] sm:$0xff]   ;;  %v3398_v24 = vld [vmem:[%s4107_s19 + $0x268] sm:$0xff]   ;;  %v3402_v28 = vld [vmem:[%s4107_s19 + $0x260] sm:$0xff]  }
  0xe2   : > { %3123 = vmatpush3.bf16.msra.mxu0 %v3352_v32  ;;  %v3397_v23 = vld [vmem:[%s4107_s19 + $0x2b0] sm:$0xff]   ;;  %v3399_v25 = vld [vmem:[%s4107_s19 + $0x2e8] sm:$0xff]   ;;  %v3403_v29 = vld [vmem:[%s4107_s19 + $0x2e0] sm:$0xff]  }
  0xe3   : > { %3124 = vmatprep.subr.bf16.mxu0 %v3354_v34  ;;  %v3400_v26 = vld [vmem:[%s4107_s19 + $0x228] sm:$0xff]   ;;  %v3404_v30 = vld [vmem:[%s4107_s19 + $0x220] sm:$0xff]   ;;  %v3406_v32 = vld [vmem:[%s4107_s19 + $0x258] sm:$0xff]  }
  0xe4   : > { %3145 = vmatpush3.bf16.msra.mxu1 %v3353_v33  ;;  %v3401_v27 = vld [vmem:[%s4107_s19 + $0x2a8] sm:$0xff]   ;;  %v3405_v31 = vld [vmem:[%s4107_s19 + $0x2a0] sm:$0xff]   ;;  %v3407_v33 = vld [vmem:[%s4107_s19 + $0x2d8] sm:$0xff]  }
  0xe5   : > { %3146 = vmatprep.subr.bf16.mxu1 %v3355_v37  ;;  %v3408_v34 = vld [vmem:[%s4107_s19 + $0x218] sm:$0xff]   ;;  %v3410_v36 = vld [vmem:[%s4107_s19 + $0x250] sm:$0xff]  }
  0xe6   : > { %3125 = vmatpush3.bf16.msra.mxu0 %v3356_v40  ;;  %v3409_v35 = vld [vmem:[%s4107_s19 + $0x298] sm:$0xff]   ;;  %v3411_v37 = vld [vmem:[%s4107_s19 + $0x2d0] sm:$0xff]   ;;  %v3414_v40 = vld [vmem:[%s4107_s19 + $0x248] sm:$0xff]  }
  0xe7   : > { %3154 = vmatprep.subr.bf16.mxu0 %v3358_v44  ;;  %v3412_v38 = vld [vmem:[%s4107_s19 + $0x210] sm:$0xff]   ;;  %v3418_v44 = vld [vmem:[%s4107_s19 + $0x240] sm:$0xff]  }
  0xe8   : > { %3147 = vmatpush3.bf16.msra.mxu1 %v3357_v41  ;;  %v3413_v39 = vld [vmem:[%s4107_s19 + $0x290] sm:$0xff]   ;;  %v3415_v41 = vld [vmem:[%s4107_s19 + $0x2c8] sm:$0xff]  }
  0xe9   : > { %2472 = vmatmul.mubr.bf16.vlgmr.msra.gmra.mxu0 %v2953_v42  ;;  %3176 = vmatprep.subr.bf16.mxu1 %v3359_v45  ;;  %v3416_v42 = vld [vmem:[%s4107_s19 + $0x208] sm:$0xff]   ;;  %v1316_v45 = vld [vmem:[%s4321_s0 + $0x20] sm:$0xff] }
  0xea   : > { %3155 = vmatpush3.bf16.msra.mxu0 %v3360_v47  ;;  %2553 = vmatprep.mubr.bf16.mxu0 %v2958_v46  ;;  %v3419_v46 = vld [vmem:[%s4107_s19 + $0x2c0] sm:$0xff]  }
  0xeb   : > { %2513 = vmatmul.mubr.bf16.vlgmr.msra.gmra.mxu1 %v2955_v43  ;;  %3156 = vmatprep.subr.bf16.mxu0 %v3362_v50  ;;  %v3417_v43 = vld [vmem:[%s4107_s19 + $0x288] sm:$0xff]   ;;  %v3420_v47 = vld [vmem:[%s4107_s19 + $0x200] sm:$0xff]  }
  0xec   : > { %3177 = vmatpush3.bf16.msra.mxu1 %v3361_v49  ;;  %2594 = vmatprep.mubr.bf16.mxu1 %v2960_v48  ;;  %v3421_v48 = vld [vmem:[%s4107_s19 + $0x280] sm:$0xff]   ;;  %v1317_v50 = vld [vmem:[%s4321_s0 + $0x28] sm:$0xff] }
  0xed   : > { %3178 = vmatprep.subr.bf16.mxu1 %v3363_v51  ;;  %v1324_v49 = vld [vmem:[%s4321_s0 + $0x60] sm:$0xff]  ;;  %v1325_v51 = vld [vmem:[%s4321_s0 + $0x68] sm:$0xff] }
  0xee   : > { %3157 = vmatpush3.bf16.msra.mxu0 %v3364_v52  ;;  %v2961_v52 = vcombine.low %v1316_v45, %v1324_v49 }
  0xef   : > { %3158 = vmatprep.subr.bf16.mxu0 %v3366_v54  ;;  %v2963_v54 = vcombine.low %v1317_v50, %v1325_v51 }
  0xf0   : > { %3179 = vmatpush3.bf16.msra.mxu1 %v3365_v53  ;;  %v2962_v53 = vcombine.high %v1316_v45, %v1324_v49 }
  0xf1   : > { %3180 = vmatprep.subr.bf16.mxu1 %v3367_v55  ;;  %v2964_v55 = vcombine.high %v1317_v50, %v1325_v51 }
  0xf2   : > { %3159 = vmatpush3.bf16.msra.mxu0 %v3368_v56  ;;  %v3422_v56 = vld [vmem:[%s4107_s19 + $0x378] sm:$0xff]  }
  0xf3   : > { %3160 = vmatprep.subr.bf16.mxu0 %v3370_v58  ;;  %v3424_v58 = vld [vmem:[%s4107_s19 + $0x338] sm:$0xff]  }
  0xf4   : > { %3181 = vmatpush3.bf16.msra.mxu1 %v3369_v57  ;;  %v3423_v57 = vld [vmem:[%s4107_s19 + $0x3f8] sm:$0xff]  }
  0xf5   : > { %3182 = vmatprep.subr.bf16.mxu1 %v3371_v59  ;;  %v3425_v59 = vld [vmem:[%s4107_s19 + $0x3b8] sm:$0xff]  }
  0xf6   : > { %3161 = vmatpush3.bf16.msra.mxu0 %v3372_v60  ;;  %v3426_v60 = vld [vmem:[%s4107_s19 + $0x370] sm:$0xff]  }
  0xf7   : > { %3162 = vmatprep.subr.bf16.mxu0 %v3374_v62  ;;  %v3428_v62 = vld [vmem:[%s4107_s19 + $0x330] sm:$0xff]  }
  0xf8   : > { %3183 = vmatpush3.bf16.msra.mxu1 %v3373_v61  ;;  %v3427_v61 = vld [vmem:[%s4107_s19 + $0x3f0] sm:$0xff]  }
  0xf9   : > { %3184 = vmatprep.subr.bf16.mxu1 %v3375_v63  ;;  %v3429_v63 = vld [vmem:[%s4107_s19 + $0x3b0] sm:$0xff]  }
  0xfa   : > { %3163 = vmatpush3.bf16.msra.mxu0 %v3376_v0  ;;  %v3430_v0 = vld [vmem:[%s4107_s19 + $0x368] sm:$0xff]  }
  0xfb   : > { %3164 = vmatprep.subr.bf16.mxu0 %v3378_v2  ;;  %v3432_v2 = vld [vmem:[%s4107_s19 + $0x328] sm:$0xff]  }
  0xfc   : > { %3185 = vmatpush3.bf16.msra.mxu1 %v3377_v1  ;;  %v3431_v1 = vld [vmem:[%s4107_s19 + $0x3e8] sm:$0xff]  }
  0xfd   : > { %3186 = vmatprep.subr.bf16.mxu1 %v3379_v3  ;;  %v3433_v3 = vld [vmem:[%s4107_s19 + $0x3a8] sm:$0xff]  }
  0xfe   : > { %3165 = vmatpush3.bf16.msra.mxu0 %v3380_v4  ;;  %v3434_v4 = vld [vmem:[%s4107_s19 + $0x360] sm:$0xff]  }
  0xff   : > { %3166 = vmatprep.subr.bf16.mxu0 %v3382_v6  ;;  %v3436_v6 = vld [vmem:[%s4107_s19 + $0x320] sm:$0xff]  }
 0x100   : > { %3187 = vmatpush3.bf16.msra.mxu1 %v3381_v5  ;;  %v3435_v5 = vld [vmem:[%s4107_s19 + $0x3e0] sm:$0xff]  }
 0x101   : > { %3188 = vmatprep.subr.bf16.mxu1 %v3383_v7  ;;  %v3437_v7 = vld [vmem:[%s4107_s19 + $0x3a0] sm:$0xff]  }
 0x102   : > { %3167 = vmatpush3.bf16.msra.mxu0 %v3384_v8  ;;  %v3438_v8 = vld [vmem:[%s4107_s19 + $0x358] sm:$0xff]  }
 0x103   : > { %3168 = vmatprep.subr.bf16.mxu0 %v3386_v10  ;;  %v3440_v10 = vld [vmem:[%s4107_s19 + $0x318] sm:$0xff]  }
 0x104   : > { %3189 = vmatpush3.bf16.msra.mxu1 %v3385_v9  ;;  %v3439_v9 = vld [vmem:[%s4107_s19 + $0x3d8] sm:$0xff]  }
 0x105   : > { %3190 = vmatprep.subr.bf16.mxu1 %v3387_v11  ;;  %v3441_v11 = vld [vmem:[%s4107_s19 + $0x398] sm:$0xff]  }
 0x106   : > { %3169 = vmatpush3.bf16.msra.mxu0 %v3388_v12  ;;  %v3442_v12 = vld [vmem:[%s4107_s19 + $0x350] sm:$0xff]  }
 0x107   : > { %3198 = vmatprep.subr.bf16.mxu0 %v3390_v16  ;;  %v3446_v16 = vld [vmem:[%s4107_s19 + $0x348] sm:$0xff]  }
 0x108   : > { %3191 = vmatpush3.bf16.msra.mxu1 %v3389_v13  ;;  %v3443_v13 = vld [vmem:[%s4107_s19 + $0x3d0] sm:$0xff]  }
 0x109   : > { %2554 = vmatmul.mubr.bf16.vlgmr.msra.gmra.mxu0 %v2957_v14  ;;  %3220 = vmatprep.subr.bf16.mxu1 %v3391_v17  ;;  %v3444_v14 = vld [vmem:[%s4107_s19 + $0x310] sm:$0xff]   ;;  %v3447_v17 = vld [vmem:[%s4107_s19 + $0x3c8] sm:$0xff]  }
 0x10a   : > { %3199 = vmatpush3.bf16.msra.mxu0 %v3392_v18  ;;  %2635 = vmatprep.mubr.bf16.mxu0 %v2962_v53  ;;  %v3448_v18 = vld [vmem:[%s4107_s19 + $0x308] sm:$0xff]  }
 0x10b   : > { %2595 = vmatmul.mubr.bf16.vlgmr.msra.gmra.mxu1 %v2959_v15  ;;  %3200 = vmatprep.subr.bf16.mxu0 %v3394_v20  ;;  %v3445_v15 = vld [vmem:[%s4107_s19 + $0x390] sm:$0xff]   ;;  %v3450_v20 = vld [vmem:[%s4107_s19 + $0x340] sm:$0xff]  }
 0x10c   : > { %3221 = vmatpush3.bf16.msra.mxu1 %v3393_v19  ;;  %2676 = vmatprep.mubr.bf16.mxu1 %v2964_v55  ;;  %v3449_v19 = vld [vmem:[%s4107_s19 + $0x388] sm:$0xff]  }
 0x10d   : > { %3222 = vmatprep.subr.bf16.mxu1 %v3395_v21  ;;  %v3451_v21 = vld [vmem:[%s4107_s19 + $0x3c0] sm:$0xff]  }
 0x10e   : > { %3201 = vmatpush3.bf16.msra.mxu0 %v3396_v22  ;;  %v3452_v22 = vld [vmem:[%s4107_s19 + $0x300] sm:$0xff]  }
 0x10f   : > { %3202 = vmatprep.subr.bf16.mxu0 %v3398_v24  ;;  %v1318_v24 = vld [vmem:[%s4321_s0 + $0x30] sm:$0xff] }
 0x110   : > { %3223 = vmatpush3.bf16.msra.mxu1 %v3397_v23  ;;  %v3453_v23 = vld [vmem:[%s4107_s19 + $0x380] sm:$0xff]   ;;  %s1308_s19 = scalar_select %p1307_p11, %s3484_s14, 1 }
 0x111   : > { %3224 = vmatprep.subr.bf16.mxu1 %v3399_v25  ;;  %v1326_v25 = vld [vmem:[%s4321_s0 + $0x70] sm:$0xff] }
 0x112   : > { %3203 = vmatpush3.bf16.msra.mxu0 %v3400_v26  ;;  %v1319_v26 = vld [vmem:[%s4321_s0 + $0x38] sm:$0xff]  ;;  %s1309_s5 = scalar_lea.vmem %s4323_s2, %s1308_s19 }
 0x113   : > { %3204 = vmatprep.subr.bf16.mxu0 %v3402_v28  ;;  %v2966_v28 = vcombine.high %v1318_v24, %v1326_v25 }
 0x114   : > { %3225 = vmatpush3.bf16.msra.mxu1 %v3401_v27  ;;  %v2965_v27 = vcombine.low %v1318_v24, %v1326_v25 }
 0x115   : > { %3226 = vmatprep.subr.bf16.mxu1 %v3403_v29  ;;  %v1327_v29 = vld [vmem:[%s4321_s0 + $0x78] sm:$0xff] }
 0x116   : > { %3205 = vmatpush3.bf16.msra.mxu0 %v3404_v30  ;;  %v2967_v30 = vcombine.low %v1319_v26, %v1327_v29 }
 0x117   : > { %3206 = vmatprep.subr.bf16.mxu0 %v3406_v32 }
 0x118   : > { %3227 = vmatpush3.bf16.msra.mxu1 %v3405_v31  ;;  %v2968_v31 = vcombine.high %v1319_v26, %v1327_v29 }
 0x119   : > { %3228 = vmatprep.subr.bf16.mxu1 %v3407_v33 }
 0x11a   : > { %3207 = vmatpush3.bf16.msra.mxu0 %v3408_v34 }
 0x11b   : > { %3208 = vmatprep.subr.bf16.mxu0 %v3410_v36 }
 0x11c   : > { %3229 = vmatpush3.bf16.msra.mxu1 %v3409_v35 }
 0x11d   : > { %3230 = vmatprep.subr.bf16.mxu1 %v3411_v37 }
 0x11e   : > { %3209 = vmatpush3.bf16.msra.mxu0 %v3412_v38 }
 0x11f   : > { %3210 = vmatprep.subr.bf16.mxu0 %v3414_v40 }
 0x120   : > { %3231 = vmatpush3.bf16.msra.mxu1 %v3413_v39 }
 0x121   : > { %3232 = vmatprep.subr.bf16.mxu1 %v3415_v41 }
 0x122   : > { %3211 = vmatpush3.bf16.msra.mxu0 %v3416_v42 }
 0x123   : > { %3212 = vmatprep.subr.bf16.mxu0 %v3418_v44 }
 0x124   : > { %3233 = vmatpush3.bf16.msra.mxu1 %v3417_v43 }
 0x125   : > { %3234 = vmatprep.subr.bf16.mxu1 %v3419_v46 }
 0x126   : > { %3213 = vmatpush3.bf16.msra.mxu0 %v3420_v47 }
 0x127   : > { %3242 = vmatprep.subr.bf16.mxu0 %v3422_v56 }
 0x128   : > { %3235 = vmatpush3.bf16.msra.mxu1 %v3421_v48  ;;  %v2952_v48 = vld [vmem:[%s1309_s5] ss:$0 sm:$0xff] }
 0x129   : > { %2636 = vmatmul.mubr.bf16.vlgmr.msra.gmra.mxu0 %v2961_v52  ;;  %3264 = vmatprep.subr.bf16.mxu1 %v3423_v57 }
 0x12a   : > { %3243 = vmatpush3.bf16.msra.mxu0 %v3424_v58  ;;  %2717 = vmatprep.mubr.bf16.mxu0 %v2966_v28 }
 0x12b   : > { %2677 = vmatmul.mubr.bf16.vlgmr.msra.gmra.mxu1 %v2963_v54  ;;  %3244 = vmatprep.subr.bf16.mxu0 %v3426_v60 }
 0x12c   : > { %3265 = vmatpush3.bf16.msra.mxu1 %v3425_v59  ;;  %2758 = vmatprep.mubr.bf16.mxu1 %v2968_v31 }
 0x12d   : > { %3266 = vmatprep.subr.bf16.mxu1 %v3427_v61 }
 0x12e   : > { %3245 = vmatpush3.bf16.msra.mxu0 %v3428_v62 }
 0x12f   : > { %3246 = vmatprep.subr.bf16.mxu0 %v3430_v0 }
 0x130   : > { %3267 = vmatpush3.bf16.msra.mxu1 %v3429_v63 }
 0x131   : > { %3268 = vmatprep.subr.bf16.mxu1 %v3431_v1 }
 0x132   : > { %3247 = vmatpush3.bf16.msra.mxu0 %v3432_v2 }
 0x133   : > { %3248 = vmatprep.subr.bf16.mxu0 %v3434_v4 }
 0x134   : > { %3269 = vmatpush3.bf16.msra.mxu1 %v3433_v3 }
 0x135   : > { %3270 = vmatprep.subr.bf16.mxu1 %v3435_v5 }
 0x136   : > { %3249 = vmatpush3.bf16.msra.mxu0 %v3436_v6 }
 0x137   : > { %3250 = vmatprep.subr.bf16.mxu0 %v3438_v8 }
 0x138   : > { %3271 = vmatpush3.bf16.msra.mxu1 %v3437_v7 }
 0x139   : > { %3272 = vmatprep.subr.bf16.mxu1 %v3439_v9 }
 0x13a   : > { %3251 = vmatpush3.bf16.msra.mxu0 %v3440_v10 }
 0x13b   : > { %3252 = vmatprep.subr.bf16.mxu0 %v3442_v12 }
 0x13c   : > { %3273 = vmatpush3.bf16.msra.mxu1 %v3441_v11 }
 0x13d   : > { %3274 = vmatprep.subr.bf16.mxu1 %v3443_v13 }
 0x13e   : > { %3253 = vmatpush3.bf16.msra.mxu0 %v3444_v14 }
 0x13f   : > { %3254 = vmatprep.subr.bf16.mxu0 %v3446_v16 }
 0x140   : > { %3275 = vmatpush3.bf16.msra.mxu1 %v3445_v15 }
 0x141   : > { %3276 = vmatprep.subr.bf16.mxu1 %v3447_v17 }
 0x142   : > { %3255 = vmatpush3.bf16.msra.mxu0 %v3448_v18 }
 0x143   : > { %3256 = vmatprep.subr.bf16.mxu0 %v3450_v20 }
 0x144   : > { %3277 = vmatpush3.bf16.msra.mxu1 %v3449_v19 }
 0x145   : > { %3278 = vmatprep.subr.bf16.mxu1 %v3451_v21 }
 0x146   : > { %3257 = vmatpush3.bf16.msra.mxu0 %v3452_v22 }
 0x148   : > { %3279 = vmatpush3.bf16.msra.mxu1 %v3453_v23 }
 0x149   : > { %2718 = vmatmul.mubr.bf16.vlgmr.msra.gmra.mxu0 %v2965_v27 }
 0x14b   : > { %2759 = vmatmul.mubr.bf16.vlgmr.msra.gmra.mxu1 %v2967_v30 }
 0x1a9   : > { %v3126_v32 = vpop.f32.mrf.mxu0 }
 0x1ab   : > { %v3148_v33 = vpop.f32.mrf.mxu1  ;;  %v3127_v34 = vpop.f32.mrf.mxu0 }
 0x1ac   : > { %v3128_v47 = vadd.f32 %v3127_v34, %v3126_v32 }
 0x1ad   : > { %v3149_v35 = vpop.f32.mrf.mxu1  ;;  %v3129_v36 = vpop.f32.mrf.mxu0 }
 0x1ae   : > { %v2474_v51 = vadd.f32 %v3128_v47, %v2952_v48  ;;  %v3150_v52 = vadd.f32 %v3149_v35, %v3148_v33 }
 0x1af   : > { %v3151_v37 = vpop.f32.mrf.mxu1  ;;  %v3130_v38 = vpop.f32.mrf.mxu0 }
 0x1b0   : > { %v3131_v53 = vadd.f32 %v3130_v38, %v3129_v36  ;;  %v2515_v57 = vadd.f32 %v3150_v52, %v2474_v51 }
 0x1b1   : > { %v3152_v40 = vpop.f32.mrf.mxu1 }
 0x1b2   : > { %v2477_v58 = vadd.f32 %v3131_v53, %v2952_v48  ;;  %v3153_v61 = vadd.f32 %v3152_v40, %v3151_v37 }
 0x1b4   : > { %v2518_v1 = vadd.f32 %v3153_v61, %v2477_v58 }
 0x1c9   : > { %v3170_v39 = vpop.f32.mrf.mxu0 }
 0x1cb   : > { %v3192_v41 = vpop.f32.mrf.mxu1  ;;  %v3171_v42 = vpop.f32.mrf.mxu0 }
 0x1cc   : > { %v3172_v56 = vadd.f32 %v3171_v42, %v3170_v39 }
 0x1cd   : > { %v3193_v43 = vpop.f32.mrf.mxu1  ;;  %v3173_v44 = vpop.f32.mrf.mxu0 }
 0x1ce   : > { %v2556_v62 = vadd.f32 %v3172_v56, %v2515_v57  ;;  %v3194_v63 = vadd.f32 %v3193_v43, %v3192_v41 }
 0x1cf   : > { %v3195_v45 = vpop.f32.mrf.mxu1  ;;  %v3174_v46 = vpop.f32.mrf.mxu0 }
 0x1d0   : > { %v3175_v0 = vadd.f32 %v3174_v46, %v3173_v44  ;;  %v2597_v5 = vadd.f32 %v3194_v63, %v2556_v62 }
 0x1d1   : > { %v3196_v50 = vpop.f32.mrf.mxu1 }
 0x1d2   : > { %v2559_v6 = vadd.f32 %v3175_v0, %v2518_v1  ;;  %v3197_v7 = vadd.f32 %v3196_v50, %v3195_v45 }
 0x1d4   : > { %v2600_v13 = vadd.f32 %v3197_v7, %v2559_v6 }
 0x1e9   : > { %v3214_v49 = vpop.f32.mrf.mxu0 }
 0x1eb   : > { %v3236_v54 = vpop.f32.mrf.mxu1  ;;  %v3215_v55 = vpop.f32.mrf.mxu0 }
 0x1ec   : > { %v3216_v2 = vadd.f32 %v3215_v55, %v3214_v49 }
 0x1ed   : > { %v3237_v59 = vpop.f32.mrf.mxu1  ;;  %v3217_v60 = vpop.f32.mrf.mxu0 }
 0x1ee   : > { %v2638_v8 = vadd.f32 %v3216_v2, %v2597_v5  ;;  %v3238_v9 = vadd.f32 %v3237_v59, %v3236_v54 }
 0x1ef   : > { %v3239_v3 = vpop.f32.mrf.mxu1  ;;  %v3218_v4 = vpop.f32.mrf.mxu0 }
 0x1f0   : > { %v3219_v10 = vadd.f32 %v3218_v4, %v3217_v60  ;;  %v2679_v16 = vadd.f32 %v3238_v9, %v2638_v8 }
 0x1f1   : > { %v3240_v11 = vpop.f32.mrf.mxu1 }
 0x1f2   : > { %v2641_v17 = vadd.f32 %v3219_v10, %v2600_v13  ;;  %v3241_v21 = vadd.f32 %v3240_v11, %v3239_v3 }
 0x1f4   : > { %v2682_v26 = vadd.f32 %v3241_v21, %v2641_v17 }
 0x209   : > { %v3258_v12 = vpop.f32.mrf.mxu0 }
 0x20b   : > { %v3280_v14 = vpop.f32.mrf.mxu1  ;;  %v3259_v15 = vpop.f32.mrf.mxu0 }
 0x20c   : > { %v3260_v18 = vadd.f32 %v3259_v15, %v3258_v12 }
 0x20d   : > { %v3281_v19 = vpop.f32.mrf.mxu1  ;;  %v3261_v20 = vpop.f32.mrf.mxu0 }
 0x20e   : > { %v2720_v22 = vadd.f32 %v3260_v18, %v2679_v16  ;;  %v3282_v23 = vadd.f32 %v3281_v19, %v3280_v14 }
 0x20f   : > { %v3283_v24 = vpop.f32.mrf.mxu1  ;;  %v3262_v25 = vpop.f32.mrf.mxu0 }
 0x210   : > { %v2761_v27 = vadd.f32 %v3282_v23, %v2720_v22  ;;  %v3263_v28 = vadd.f32 %v3262_v25, %v3261_v20 }
 0x211   : > { %v3284_v29 = vpop.f32.mrf.mxu1 }
 0x212   : > { %v2723_v30 = vadd.f32 %v3263_v28, %v2682_v26  ;;  %v3285_v31 = vadd.f32 %v3284_v29, %v3283_v24  ;;  %v2769_v32 = vmul.f32 0.2, %v2761_v27  ;;  %vm2767_vm0 = vcmp.ge.f32.partialorder %v2761_v27, 0.0 }
 0x214   : > { %v2764_v33 = vadd.f32 %v3285_v31, %v2723_v30  ;;  %v2771_v35 = vsel %vm2767_vm0, %v2761_v27, %v2769_v32 }
 0x216   : > { %vm2768_vm1 = vcmp.ge.f32.partialorder %v2764_v33, 0.0  ;;  %v2770_v34 = vmul.f32 0.2, %v2764_v33 }
 0x217   : > { %2789 = sbr.rel (!%p3549_p6) target bundleno = 548 (0x224), region = 77 }
 0x218   : > { %v2772_v36 = vsel %vm2768_vm1, %v2764_v33, %v2770_v34 }
 0x219   : > { %v3108_v37 = vpack.c.bf16 %v2772_v36, %v2771_v35 }
 0x21b   : > { %3109 = vst [vmem:[%s1293_s7] sm:$0xff] %v3108_v37  }
 0x222   : > { %v2811_v38 = vld [vmem:[%s1293_s7] sm:$0xf]  ;;  %v2813_v39 = vld [vmem:[%s1293_s7 + $0x4] sm:$0xf] }
 0x223   : > { %2812 = vst [vmem:[%s2794_s11] sm:$0xf] %v2811_v38  ;;  %2814 = vst [vmem:[%s2794_s11 + $0x8] sm:$0xf] %v2813_v39 }
 0x224 PF: > { %s13_s16 = sadd.s32 1, %s3492_s16   ;;  %s4326_s12 = smov %s3480_s13 }
 0x225   : > { %p10_p12 = scmp.ge.s32.totalorder %s13_s16, 4   ;;  %s4327_s13 = smov %s3554_s22 }
 0x226   : > { %s4328_s14 = smov %s3488_s15  ;;  %s4329_s15 = smov %s4331_s17 }
 0x227   :  { %12 = sbr.rel (!%p10_p12) target bundleno = 3 (0x3), region = 155 }

// kernel: forward.9
= control target key start
LH: loop header
LB: loop body
LE: loop exit
PB: predicated region body
PF: predicated region fallthrough
CT: control target
= control target key end

     0   :  { %v86_v0 = vlaneseq  ;;  %vm1101_vm0 = vcmask 7168   ;;  %s2074_s0 = inlined_call_operand.vmem [shape: bf16[16,8192], index: 0, kind: input, shape index: {}]   ;;  %s2075_s1 = inlined_call_operand.vmem [shape: bf16[1,8192], index: 1, kind: input, shape index: {}]   ;;  %s2076_s2 = inlined_call_operand.vmem [shape: f32[16,1], index: 2, kind: output, shape index: {}]  }
   0x1   :  { %v1126_v1 = vld [vmem:[%s2074_s0] sm:$0xff]  ;;  %v1131_v2 = vld [vmem:[%s2074_s0 + $0x8] sm:$0xff]  ;;  %v1136_v3 = vld [vmem:[%s2074_s0 + $0x10] sm:$0xff] }
   0x2   :  { %v1141_v4 = vld [vmem:[%s2074_s0 + $0x18] sm:$0xff]  ;;  %v1146_v5 = vld [vmem:[%s2074_s0 + $0x20] sm:$0xff]  ;;  %v87_v6 = vshrl.u32 %v86_v0, 7  ;;  %v94_v7 = vrot.slane %v1126_v1, 4  ;;  %v1152_v8 = vld [vmem:[%s2074_s0 + $0x28] sm:$0xff]  ;;  %v83_v10 = vunpack.c.l.bf16 %v1126_v1  ;;  %v112_v11 = vunpack.c.l.bf16 %v1131_v2 }
   0x3   :  { %v1157_v9 = vld [vmem:[%s2074_s0 + $0x30] sm:$0xff]  ;;  %v127_v12 = vrot.slane %v1131_v2, 4  ;;  %v159_v13 = vrot.slane %v1136_v3, 4  ;;  %v1166_v14 = vld [vmem:[%s2074_s0 + $0x38] sm:$0xff]  ;;  %v144_v16 = vunpack.c.l.bf16 %v1136_v3  ;;  %v176_v17 = vunpack.c.l.bf16 %v1141_v4  ;;  %v1176_v19 = vld [vmem:[%s2074_s0 + $0x40] sm:$0xff] }
   0x4   :  { %v1168_v15 = vsub.s32 0, %v87_v6  ;;  %v191_v18 = vrot.slane %v1141_v4, 4  ;;  %v98_v20 = vunpack.c.l.bf16 %v94_v7  ;;  %v208_v22 = vunpack.c.l.bf16 %v1146_v5  ;;  %v1185_v24 = vld [vmem:[%s2074_s0 + $0x48] sm:$0xff]  ;;  %v1190_v25 = vld [vmem:[%s2074_s0 + $0x50] sm:$0xff]  ;;  %v1198_v30 = vld [vmem:[%s2074_s0 + $0x58] sm:$0xff] }
   0x5   :  { %v1178_v21 = vunpack.c.l.bf16 %v127_v12  ;;  %v221_v23 = vrot.slane %v1146_v5, 4  ;;  %v163_v26 = vunpack.c.l.bf16 %v159_v13  ;;  %v239_v27 = vunpack.c.l.bf16 %v1152_v8  ;;  %v1209_v35 = vld [vmem:[%s2074_s0 + $0x60] sm:$0xff]  ;;  %v76_v53 = vld [vmem:[%s2075_s1 + $0x8] sm:$0xff] }
   0x6   :  { %v254_v28 = vrot.slane %v1152_v8, 4  ;;  %v286_v29 = vrot.slane %v1157_v9, 4  ;;  %v1200_v31 = vunpack.c.l.bf16 %v191_v18  ;;  %v271_v33 = vunpack.c.l.bf16 %v1157_v9  ;;  %v75_v48 = vld [vmem:[%s2075_s1] sm:$0xff]  ;;  %v1245_v6 = vld [vmem:[%s2074_s0 + $0x68] sm:$0xff] }
   0x7   :  { %v1202_v32 = vunpack.c.l.bf16 %v221_v23  ;;  %v318_v34 = vrot.slane %v1166_v14, 4  ;;  %v303_v37 = vunpack.c.l.bf16 %v1166_v14  ;;  %v335_v38 = vunpack.c.l.bf16 %v1176_v19 }
   0x8   :  { %v1211_v36 = vunpack.c.l.bf16 %v254_v28  ;;  %v348_v39 = vrot.slane %v1176_v19, 4  ;;  %v1216_v40 = vunpack.c.l.bf16 %v286_v29  ;;  %v366_v41 = vunpack.c.l.bf16 %v1185_v24 }
   0x9   :  { %v381_v42 = vrot.slane %v1185_v24, 4  ;;  %v413_v43 = vrot.slane %v1190_v25, 4  ;;  %v1221_v44 = vunpack.c.l.bf16 %v318_v34  ;;  %v398_v46 = vunpack.c.l.bf16 %v1190_v25  ;;  %v25_v24 = vld [vmem:[%s2074_s0 + $0x70] sm:$0xff] }
   0xa   :  { %v1223_v45 = vunpack.c.l.bf16 %v348_v39  ;;  %v430_v47 = vunpack.c.l.bf16 %v1198_v30  ;;  %v445_v51 = vrot.slane %v1198_v30, 4  ;;  %v462_v52 = vunpack.c.l.bf16 %v1209_v35 }
   0xb   :  { %v1230_v49 = vunpack.c.l.bf16 %v381_v42  ;;  %v1232_v50 = vunpack.c.l.bf16 %v413_v43  ;;  %v85_v54 = vunpack.c.l.bf16 %v75_v48  ;;  %v101_v55 = vrot.slane %v75_v48, 1 }
   0xc   :  { %v114_v56 = vrot.slane %v75_v48, 2  ;;  %v133_v57 = vrot.slane %v75_v48, 3  ;;  %v146_v58 = vrot.slane %v75_v48, 4  ;;  %v165_v59 = vrot.slane %v75_v48, 5 }
   0xd   :  { %v178_v60 = vrot.slane %v75_v48, 6  ;;  %v210_v61 = vunpack.c.l.bf16 %v76_v53  ;;  %v1240_v62 = vrot.slane %v85_v54, %v1168_v15  ;;  %v103_v63 = vunpack.c.l.bf16 %v101_v55 }
   0xe   :  { %v116_v0 = vunpack.c.l.bf16 %v114_v56  ;;  %v135_v1 = vunpack.c.l.bf16 %v133_v57  ;;  %v148_v7 = vunpack.c.l.bf16 %v146_v58  ;;  %v167_v12 = vunpack.c.l.bf16 %v165_v59  ;;  %v77_v56 = vld [vmem:[%s2075_s1 + $0x10] sm:$0xff] }
   0xf   :  { %v180_v13 = vunpack.c.l.bf16 %v178_v60  ;;  %v197_v18 = vrot.slane %v75_v48, 7  ;;  %v90_v23 = vmul.f32 %v1240_v62, %v83_v10  ;;  %v1249_v28 = vrot.slane %v103_v63, %v1168_v15 }
  0x10   :  { %v1252_v29 = vrot.slane %v116_v0, %v1168_v15  ;;  %v1255_v34 = vrot.slane %v135_v1, %v1168_v15  ;;  %v1258_v39 = vrot.slane %v148_v7, %v1168_v15  ;;  %v1261_v42 = vrot.slane %v167_v12, %v1168_v15 }
  0x11   :  { %v1264_v43 = vrot.slane %v180_v13, %v1168_v15  ;;  %v199_v48 = vunpack.c.l.bf16 %v197_v18  ;;  %v108_v10 = vmul.f32 %v1249_v28, %v98_v20  ;;  %v475_v55 = vrot.slane %v1209_v35, 4  ;;  %v1439_v35 = vld [vmem:[%s2075_s1 + $0x20] sm:$0xff] }
  0x12   :  { %v121_v54 = vmul.f32 %v1252_v29, %v112_v11  ;;  %v140_v57 = vmul.f32 %v1255_v34, %v1178_v21  ;;  %v153_v58 = vmul.f32 %v1258_v39, %v144_v16  ;;  %v172_v59 = vmul.f32 %v1261_v42, %v163_v26 }
  0x13   :  { %v1279_v60 = vrot.slane %v210_v61, %v1168_v15  ;;  %v110_v20 = vadd.f32 %v108_v10, %v90_v23  ;;  %v185_v2 = vmul.f32 %v1264_v43, %v176_v17  ;;  %v228_v11 = vrot.slane %v76_v53, 1 }
  0x14   :  { %v241_v63 = vrot.slane %v76_v53, 2  ;;  %v1285_v0 = vrot.slane %v199_v48, %v1168_v15  ;;  %v260_v21 = vrot.slane %v76_v53, 3  ;;  %v273_v1 = vrot.slane %v76_v53, 4 }
  0x15   :  { %v292_v3 = vrot.slane %v76_v53, 5  ;;  %v123_v7 = vadd.f32 %v121_v54, %v110_v20  ;;  %v230_v16 = vunpack.c.l.bf16 %v228_v11  ;;  %v305_v26 = vrot.slane %v76_v53, 6 }
  0x16   :  { %v243_v12 = vunpack.c.l.bf16 %v241_v63  ;;  %v262_v13 = vunpack.c.l.bf16 %v260_v21  ;;  %v275_v61 = vunpack.c.l.bf16 %v273_v1  ;;  %v324_v23 = vrot.slane %v76_v53, 7 }
  0x17   :  { %v294_v18 = vunpack.c.l.bf16 %v292_v3  ;;  %v142_v10 = vadd.f32 %v140_v57, %v123_v7  ;;  %v1288_v4 = vrot.slane %v230_v16, %v1168_v15  ;;  %v307_v48 = vunpack.c.l.bf16 %v305_v26 }
  0x18   :  { %v1291_v17 = vrot.slane %v243_v12, %v1168_v15  ;;  %v1297_v54 = vrot.slane %v262_v13, %v1168_v15  ;;  %v1300_v20 = vrot.slane %v275_v61, %v1168_v15  ;;  %v326_v57 = vunpack.c.l.bf16 %v324_v23 }
  0x19   :  { %v1303_v53 = vrot.slane %v294_v18, %v1168_v15  ;;  %v155_v11 = vadd.f32 %v153_v58, %v142_v10  ;;  %v204_v63 = vmul.f32 %v1285_v0, %v1200_v31  ;;  %v215_v21 = vmul.f32 %v1279_v60, %v208_v22 }
  0x1a   :  { %v235_v1 = vmul.f32 %v1288_v4, %v1202_v32  ;;  %v248_v3 = vmul.f32 %v1291_v17, %v239_v27  ;;  %v267_v7 = vmul.f32 %v1297_v54, %v1211_v36  ;;  %v280_v58 = vmul.f32 %v1300_v20, %v271_v33 }
  0x1b   :  { %v1321_v31 = vrot.slane %v307_v48, %v1168_v15  ;;  %v174_v5 = vadd.f32 %v172_v59, %v155_v11  ;;  %v1325_v22 = vmul.f32 %v1303_v53, %v1216_v40  ;;  %v337_v32 = vunpack.c.l.bf16 %v77_v56 }
  0x1c   :  { %v355_v16 = vrot.slane %v77_v56, 1  ;;  %v1328_v8 = vrot.slane %v326_v57, %v1168_v15  ;;  %v368_v27 = vrot.slane %v77_v56, 2  ;;  %v387_v12 = vrot.slane %v77_v56, 3 }
  0x1d   :  { %v400_v36 = vrot.slane %v77_v56, 4  ;;  %v187_v26 = vadd.f32 %v185_v2, %v174_v5  ;;  %v1331_v9 = vrot.slane %v337_v32, %v1168_v15  ;;  %v419_v13 = vrot.slane %v77_v56, 5  ;;  %v1342_v2 = vld [vmem:[%s2075_s1 + $0x18] sm:$0xff] }
  0x1e   :  { %v357_v33 = vunpack.c.l.bf16 %v355_v16  ;;  %v370_v61 = vunpack.c.l.bf16 %v368_v27  ;;  %v389_v59 = vunpack.c.l.bf16 %v387_v12  ;;  %v432_v23 = vrot.slane %v77_v56, 6 }
  0x1f   :  { %v402_v18 = vunpack.c.l.bf16 %v400_v36  ;;  %v206_v40 = vadd.f32 %v204_v63, %v187_v26  ;;  %v312_v10 = vmul.f32 %v1321_v31, %v303_v37  ;;  %v421_v57 = vunpack.c.l.bf16 %v419_v13 }
  0x20   :  { %v1337_v48 = vrot.slane %v357_v33, %v1168_v15  ;;  %v1345_v11 = vrot.slane %v370_v61, %v1168_v15  ;;  %v1348_v5 = vrot.slane %v389_v59, %v1168_v15  ;;  %v434_v14 = vunpack.c.l.bf16 %v432_v23 }
  0x21   :  { %v1351_v63 = vrot.slane %v402_v18, %v1168_v15  ;;  %v217_v37 = vadd.f32 %v215_v21, %v206_v40  ;;  %v331_v32 = vmul.f32 %v1328_v8, %v1221_v44  ;;  %v1358_v16 = vmul.f32 %v1331_v9, %v335_v38 }
  0x22   :  { %2117 = vst [vmem:[#allocation3_spill] sm:$0xff] %v1348_v5  ;;  %v1361_v27 = vrot.slane %v421_v57, %v1168_v15  ;;  %v1365_v12 = vmul.f32 %v1337_v48, %v1223_v45  ;;  %v1370_v36 = vmul.f32 %v1345_v11, %v366_v41  ;;  %v1373_v21 = vrot.slane %v434_v14, %v1168_v15 }
  0x23   :  { %v449_v19 = vunpack.c.l.bf16 %v445_v51  ;;  %v237_v38 = vadd.f32 %v235_v1, %v217_v37  ;;  %v1379_v44 = vmul.f32 %v1348_v5, %v1230_v49  ;;  %v451_v26 = vrot.slane %v77_v56, 7 }
  0x24   :  { %2118 = vst [vmem:[#allocation4_spill] sm:$0xff] %v1361_v27  ;;  %2119 = vst [vmem:[#allocation5_spill] sm:$0xff] %v1373_v21  ;;  %v464_v45 = vunpack.c.l.bf16 %v1342_v2  ;;  %v1388_v41 = vmul.f32 %v1351_v63, %v398_v46  ;;  %v1392_v51 = vmul.f32 %v1361_v27, %v1232_v50  ;;  %v482_v1 = vrot.slane %v1342_v2, 1 }
  0x25   :  { %v495_v49 = vrot.slane %v1342_v2, 2  ;;  %v250_v56 = vadd.f32 %v248_v3, %v237_v38  ;;  %v1399_v33 = vmul.f32 %v1373_v21, %v430_v47  ;;  %v453_v13 = vunpack.c.l.bf16 %v451_v26 }
  0x26   :  { %v1402_v25 = vrot.slane %v464_v45, %v1168_v15  ;;  %v484_v46 = vunpack.c.l.bf16 %v482_v1  ;;  %v508_v59 = vrot.slane %v1245_v6, 4  ;;  %v514_v50 = vrot.slane %v1342_v2, 3 }
  0x27   :  { %v497_v61 = vunpack.c.l.bf16 %v495_v49  ;;  %v269_v18 = vadd.f32 %v267_v7, %v250_v56  ;;  %v1407_v23 = vrot.slane %v453_v13, %v1168_v15  ;;  %v479_v30 = vunpack.c.l.bf16 %v475_v55  ;;  %v26_v7 = vld [vmem:[%s2074_s0 + $0x78] sm:$0xff] }
  0x28   :  { %2120 = vst [vmem:[#allocation6_spill] sm:$0xff] %v1402_v25  ;;  %v525_v3 = vunpack.c.l.bf16 %v25_v24  ;;  %v1412_v47 = vrot.slane %v484_v46, %v1168_v15  ;;  %v516_v57 = vunpack.c.l.bf16 %v514_v50  ;;  %v527_v14 = vrot.slane %v1342_v2, 4 }
  0x29   :  { %2121 = vst [vmem:[#allocation7_spill] sm:$0xff] %v1407_v23  ;;  %v1415_v40 = vrot.slane %v497_v61, %v1168_v15  ;;  %v282_v37 = vadd.f32 %v280_v58, %v269_v18  ;;  %v1424_v38 = vmul.f32 %v1402_v25, %v462_v52  ;;  %v540_v55 = vrot.slane %v25_v24, 4  ;;  %v27_v58 = vld [vmem:[%s2074_s0 + $0x80] sm:$0xff] }
  0x2a   :  { %2122 = vst [vmem:[#allocation8_spill] sm:$0xff] %v1412_v47  ;;  %v546_v26 = vrot.slane %v1342_v2, 5  ;;  %v1428_v45 = vmul.f32 %v1407_v23, %v449_v19  ;;  %v512_v1 = vunpack.c.l.bf16 %v508_v59  ;;  %v1431_v49 = vrot.slane %v516_v57, %v1168_v15 }
  0x2b   :  { %2123 = vst [vmem:[#allocation9_spill] sm:$0xff] %v1415_v40  ;;  %v529_v56 = vunpack.c.l.bf16 %v527_v14  ;;  %v301_v52 = vadd.f32 %v1325_v22, %v282_v37  ;;  %v1443_v24 = vmul.f32 %v1412_v47, %v479_v30  ;;  %v2125_v19 = vunpack.c.l.bf16 %v1245_v6 }
  0x2c   :  { %2124 = vst [vmem:[#allocation10_spill] sm:$0xff] %v1431_v49  ;;  %v548_v46 = vunpack.c.l.bf16 %v546_v26  ;;  %v544_v59 = vunpack.c.l.bf16 %v540_v55  ;;  %v559_v50 = vrot.slane %v1342_v2, 6  ;;  %v572_v18 = vrot.slane %v26_v7, 4  ;;  %v28_v55 = vld [vmem:[%s2074_s0 + $0x88] sm:$0xff] }
  0x2d   :  { %v1448_v13 = vmul.f32 %v1415_v40, %v2125_v19  ;;  %v1451_v61 = vrot.slane %v529_v56, %v1168_v15  ;;  %v314_v57 = vadd.f32 %v312_v10, %v301_v52  ;;  %v557_v22 = vunpack.c.l.bf16 %v26_v7 }
  0x2e   :  { %v1455_v14 = vrot.slane %v548_v46, %v1168_v15  ;;  %v578_v30 = vrot.slane %v1342_v2, 7  ;;  %v1459_v6 = vmul.f32 %v1431_v49, %v512_v1  ;;  %v561_v37 = vunpack.c.l.bf16 %v559_v50 }
  0x2f   :  { %2126 = vst [vmem:[#allocation11_spill] sm:$0xff] %v1451_v61  ;;  %v589_v19 = vunpack.c.l.bf16 %v27_v58  ;;  %v591_v26 = vunpack.c.l.bf16 %v1439_v35  ;;  %v333_v56 = vadd.f32 %v331_v32, %v314_v57  ;;  %v1466_v10 = vmul.f32 %v1451_v61, %v525_v3 }
  0x30   :  { %2127 = vst [vmem:[#allocation12_spill] sm:$0xff] %v1455_v14  ;;  %v580_v52 = vunpack.c.l.bf16 %v578_v30  ;;  %v602_v46 = vrot.slane %v27_v58, 4  ;;  %v1469_v7 = vrot.slane %v561_v37, %v1168_v15  ;;  %v576_v2 = vunpack.c.l.bf16 %v572_v18  ;;  %v29_v58 = vld [vmem:[%s2074_s0 + $0x90] sm:$0xff] }
  0x31   :  { %v1472_v1 = vrot.slane %v591_v26, %v1168_v15  ;;  %v609_v50 = vrot.slane %v1439_v35, 1  ;;  %v344_v49 = vadd.f32 %v1358_v16, %v333_v56  ;;  %v1477_v40 = vmul.f32 %v1455_v14, %v544_v59 }
  0x32   :  { %2128 = vst [vmem:[#allocation13_spill] sm:$0xff] %v1469_v7  ;;  %v1480_v32 = vrot.slane %v580_v52, %v1168_v15  ;;  %v622_v3 = vrot.slane %v1439_v35, 2  ;;  %v606_v18 = vunpack.c.l.bf16 %v602_v46  ;;  %v620_v30 = vunpack.c.l.bf16 %v28_v55  ;;  %v30_v52 = vld [vmem:[%s2074_s0 + $0x98] sm:$0xff] }
  0x33   :  { %2129 = vst [vmem:[#allocation14_spill] sm:$0xff] %v1472_v1  ;;  %v611_v57 = vunpack.c.l.bf16 %v609_v50  ;;  %v635_v37 = vrot.slane %v28_v55, 4  ;;  %v364_v26 = vadd.f32 %v1365_v12, %v344_v49  ;;  %v1488_v16 = vmul.f32 %v1469_v7, %v557_v22 }
  0x34   :  { %2130 = vst [vmem:[#allocation15_spill] sm:$0xff] %v1480_v32  ;;  %v624_v59 = vunpack.c.l.bf16 %v622_v3  ;;  %v641_v56 = vrot.slane %v1439_v35, 3  ;;  %v1495_v14 = vmul.f32 %v1480_v32, %v576_v2  ;;  %v1498_v46 = vmul.f32 %v1472_v1, %v589_v19  ;;  %v31_v19 = vld [vmem:[%s2074_s0 + $0xa0] sm:$0xff] }
  0x35   :  { %v1501_v55 = vrot.slane %v611_v57, %v1168_v15  ;;  %v654_v12 = vrot.slane %v1439_v35, 4  ;;  %v377_v49 = vadd.f32 %v1370_v36, %v364_v26  ;;  %v667_v3 = vrot.slane %v29_v58, 4 }
  0x36   :  { %v1506_v22 = vrot.slane %v624_v59, %v1168_v15  ;;  %v643_v50 = vunpack.c.l.bf16 %v641_v56  ;;  %v639_v7 = vunpack.c.l.bf16 %v635_v37  ;;  %v652_v61 = vunpack.c.l.bf16 %v29_v58  ;;  %v1522_v58 = vld [vmem:[%s2075_s1 + $0x28] sm:$0xff] }
  0x37   :  { %2131 = vst [vmem:[#allocation16_spill] sm:$0xff] %v1501_v55  ;;  %v656_v47 = vunpack.c.l.bf16 %v654_v12  ;;  %v673_v2 = vrot.slane %v1439_v35, 5  ;;  %v396_v57 = vadd.f32 %v1379_v44, %v377_v49  ;;  %v1514_v1 = vmul.f32 %v1501_v55, %v606_v18 }
  0x38   :  { %2132 = vst [vmem:[#allocation17_spill] sm:$0xff] %v1506_v22  ;;  %v1517_v36 = vrot.slane %v643_v50, %v1168_v15  ;;  %v684_v26 = vunpack.c.l.bf16 %v30_v52  ;;  %v686_v56 = vrot.slane %v1439_v35, 6  ;;  %v699_v12 = vrot.slane %v30_v52, 4  ;;  %v32_v52 = vld [vmem:[%s2074_s0 + $0xa8] sm:$0xff] }
  0x39   :  { %v1525_v37 = vrot.slane %v656_v47, %v1168_v15  ;;  %v675_v59 = vunpack.c.l.bf16 %v673_v2  ;;  %v409_v44 = vadd.f32 %v1388_v41, %v396_v57  ;;  %v1530_v18 = vmul.f32 %v1506_v22, %v620_v30 }
  0x3a   :  { %2133 = vst [vmem:[#allocation18_spill] sm:$0xff] %v1517_v36  ;;  %v671_v49 = vunpack.c.l.bf16 %v667_v3  ;;  %v705_v50 = vrot.slane %v1439_v35, 7  ;;  %v1534_v55 = vmul.f32 %v1517_v36, %v639_v7  ;;  %v688_v47 = vunpack.c.l.bf16 %v686_v56 }
  0x3b   :  { %2134 = vst [vmem:[#allocation19_spill] sm:$0xff] %v1525_v37  ;;  %v1537_v32 = vrot.slane %v675_v59, %v1168_v15  ;;  %v716_v23 = vunpack.c.l.bf16 %v31_v19  ;;  %v428_v41 = vadd.f32 %v1392_v51, %v409_v44  ;;  %v718_v30 = vunpack.c.l.bf16 %v1522_v58 }
  0x3c   :  { %v707_v2 = vunpack.c.l.bf16 %v705_v50  ;;  %v729_v3 = vrot.slane %v31_v19, 4  ;;  %v1545_v35 = vmul.f32 %v1525_v37, %v652_v61  ;;  %v1548_v7 = vrot.slane %v688_v47, %v1168_v15  ;;  %v33_v61 = vld [vmem:[%s2074_s0 + $0xb0] sm:$0xff] }
  0x3d   :  { %2135 = vst [vmem:[#allocation20_spill] sm:$0xff] %v1537_v32  ;;  %v703_v57 = vunpack.c.l.bf16 %v699_v12  ;;  %v736_v59 = vrot.slane %v1522_v58, 1  ;;  %v441_v56 = vadd.f32 %v1399_v33, %v428_v41  ;;  %v1553_v36 = vmul.f32 %v1537_v32, %v671_v49 }
  0x3e   :  { %2136 = vst [vmem:[#allocation21_spill] sm:$0xff] %v1548_v7  ;;  %v1556_v51 = vrot.slane %v707_v2, %v1168_v15  ;;  %v1559_v44 = vrot.slane %v718_v30, %v1168_v15  ;;  %v747_v50 = vunpack.c.l.bf16 %v32_v52  ;;  %v749_v12 = vrot.slane %v1522_v58, 2 }
  0x3f   :  { %v738_v19 = vunpack.c.l.bf16 %v736_v59  ;;  %v762_v47 = vrot.slane %v32_v52, 4  ;;  %v460_v33 = vadd.f32 %v1428_v45, %v441_v56  ;;  %v1567_v49 = vmul.f32 %v1548_v7, %v684_v26  ;;  %v34_v45 = vld [vmem:[%s2074_s0 + $0xb8] sm:$0xff] }
  0x40   :  { %2137 = vst [vmem:[#allocation22_spill] sm:$0xff] %v1556_v51  ;;  %2138 = vst [vmem:[#allocation23_spill] sm:$0xff] %v1559_v44  ;;  %v733_v41 = vunpack.c.l.bf16 %v729_v3  ;;  %v768_v2 = vrot.slane %v1522_v58, 3  ;;  %v1571_v30 = vmul.f32 %v1556_v51, %v703_v57  ;;  %v1574_v32 = vmul.f32 %v1559_v44, %v716_v23 }
  0x41   :  { %v1577_v59 = vrot.slane %v738_v19, %v1168_v15  ;;  %v751_v37 = vunpack.c.l.bf16 %v749_v12  ;;  %v471_v26 = vadd.f32 %v1424_v38, %v460_v33  ;;  %v1583_v52 = vunpack.c.l.bf16 %v762_v47  ;;  %v35_v12 = vld [vmem:[%s2074_s0 + $0xc0] sm:$0xff] }
  0x42   :  { %v781_v3 = vrot.slane %v1522_v58, 4  ;;  %v794_v56 = vrot.slane %v33_v61, 4  ;;  %v1589_v23 = vunpack.c.l.bf16 %v768_v2  ;;  %v779_v44 = vunpack.c.l.bf16 %v33_v61 }
  0x43   :  { %2139 = vst [vmem:[#allocation24_spill] sm:$0xff] %v1577_v59  ;;  %v1587_v57 = vrot.slane %v751_v37, %v1168_v15  ;;  %v800_v19 = vrot.slane %v1522_v58, 5  ;;  %v491_v51 = vadd.f32 %v1443_v24, %v471_v26  ;;  %v1597_v38 = vmul.f32 %v1577_v59, %v733_v41  ;;  %v1602_v37 = vld [vmem:[%s2075_s1 + $0x30] sm:$0xff] }
  0x44   :  { %v783_v47 = vunpack.c.l.bf16 %v781_v3  ;;  %v798_v33 = vunpack.c.l.bf16 %v794_v56  ;;  %v813_v7 = vrot.slane %v1522_v58, 6  ;;  %v826_v22 = vrot.slane %v34_v45, 4  ;;  %v36_v3 = vld [vmem:[%s2074_s0 + $0xc8] sm:$0xff] }
  0x45   :  { %2140 = vst [vmem:[#allocation25_spill] sm:$0xff] %v1587_v57  ;;  %v1605_v61 = vmul.f32 %v1587_v57, %v747_v50  ;;  %v802_v2 = vunpack.c.l.bf16 %v800_v19  ;;  %v504_v25 = vadd.f32 %v1448_v13, %v491_v51  ;;  %v811_v41 = vunpack.c.l.bf16 %v34_v45 }
  0x46   :  { %v1610_v24 = vrot.slane %v783_v47, %v1168_v15  ;;  %v832_v26 = vrot.slane %v1522_v58, 7  ;;  %v815_v50 = vunpack.c.l.bf16 %v813_v7  ;;  %v830_v19 = vunpack.c.l.bf16 %v826_v22  ;;  %v37_v22 = vld [vmem:[%s2074_s0 + $0xd0] sm:$0xff] }
  0x47   :  { %v1617_v56 = vrot.slane %v802_v2, %v1168_v15  ;;  %v843_v59 = vunpack.c.l.bf16 %v35_v12  ;;  %v523_v57 = vadd.f32 %v1459_v6, %v504_v25  ;;  %v845_v45 = vunpack.c.l.bf16 %v1602_v37 }
  0x48   :  { %2141 = vst [vmem:[#allocation26_spill] sm:$0xff] %v1610_v24  ;;  %v1621_v13 = vmul.f32 %v1610_v24, %v779_v44  ;;  %v834_v51 = vunpack.c.l.bf16 %v832_v26  ;;  %v1628_v47 = vrot.slane %v815_v50, %v1168_v15  ;;  %v856_v27 = vrot.slane %v35_v12, 4 }
  0x49   :  { %2142 = vst [vmem:[#allocation27_spill] sm:$0xff] %v1617_v56  ;;  %v1625_v58 = vmul.f32 %v1617_v56, %v798_v33  ;;  %v863_v2 = vrot.slane %v1602_v37, 1  ;;  %v536_v25 = vadd.f32 %v1466_v10, %v523_v57  ;;  %v1639_v7 = vrot.slane %v845_v45, %v1168_v15 }
  0x4a   :  { %2143 = vst [vmem:[#allocation28_spill] sm:$0xff] %v1628_v47  ;;  %v1636_v6 = vrot.slane %v834_v51, %v1168_v15  ;;  %v874_v44 = vunpack.c.l.bf16 %v36_v3  ;;  %v1642_v33 = vmul.f32 %v1628_v47, %v811_v41  ;;  %v860_v26 = vunpack.c.l.bf16 %v856_v27  ;;  %v38_v51 = vld [vmem:[%s2074_s0 + $0xd8] sm:$0xff] }
  0x4b   :  { %2145 = vst [vmem:[#allocation30_spill] sm:$0xff] %v1639_v7  ;;  %v865_v12 = vunpack.c.l.bf16 %v863_v2  ;;  %v876_v50 = vrot.slane %v1602_v37, 2  ;;  %v555_v56 = vadd.f32 %v1477_v40, %v536_v25  ;;  %v1650_v10 = vmul.f32 %v1639_v7, %v843_v59 }
  0x4c   :  { %2144 = vst [vmem:[#allocation29_spill] sm:$0xff] %v1636_v6  ;;  %v1647_v24 = vmul.f32 %v1636_v6, %v830_v19  ;;  %v889_v57 = vrot.slane %v36_v3, 4  ;;  %v895_v45 = vrot.slane %v1602_v37, 3  ;;  %v906_v2 = vunpack.c.l.bf16 %v37_v22 }
  0x4d   :  { %v1656_v41 = vrot.slane %v865_v12, %v1168_v15  ;;  %v878_v27 = vunpack.c.l.bf16 %v876_v50  ;;  %v568_v40 = vadd.f32 %v1488_v16, %v555_v56  ;;  %v908_v19 = vrot.slane %v1602_v37, 4  ;;  %v39_v50 = vld [vmem:[%s2074_s0 + $0xe0] sm:$0xff] }
  0x4e   :  { %v893_v25 = vunpack.c.l.bf16 %v889_v57  ;;  %v921_v6 = vrot.slane %v37_v22, 4  ;;  %v897_v7 = vunpack.c.l.bf16 %v895_v45  ;;  %v927_v12 = vrot.slane %v1602_v37, 5 }
  0x4f   :  { %2146 = vst [vmem:[#allocation31_spill] sm:$0xff] %v1656_v41  ;;  %v1662_v59 = vmul.f32 %v1656_v41, %v860_v26  ;;  %v1665_v3 = vrot.slane %v878_v27, %v1168_v15  ;;  %v587_v47 = vadd.f32 %v1495_v14, %v568_v40  ;;  %v910_v16 = vunpack.c.l.bf16 %v908_v19  ;;  %v1682_v41 = vld [vmem:[%s2075_s1 + $0x38] sm:$0xff] }
  0x50   :  { %v925_v56 = vunpack.c.l.bf16 %v921_v6  ;;  %v938_v57 = vunpack.c.l.bf16 %v38_v51  ;;  %v1676_v26 = vrot.slane %v897_v7, %v1168_v15  ;;  %v929_v27 = vunpack.c.l.bf16 %v927_v12 }
  0x51   :  { %2147 = vst [vmem:[#allocation32_spill] sm:$0xff] %v1665_v3  ;;  %v1673_v22 = vmul.f32 %v1665_v3, %v874_v44  ;;  %v940_v45 = vrot.slane %v1602_v37, 6  ;;  %v598_v21 = vadd.f32 %v1498_v46, %v587_v47  ;;  %v1686_v14 = vrot.slane %v910_v16, %v1168_v15 }
  0x52   :  { %2148 = vst [vmem:[#allocation33_spill] sm:$0xff] %v1676_v26  ;;  %v953_v6 = vrot.slane %v38_v51, 4  ;;  %v959_v44 = vrot.slane %v1602_v37, 7  ;;  %v1690_v40 = vmul.f32 %v1676_v26, %v893_v25  ;;  %v1693_v7 = vrot.slane %v929_v27, %v1168_v15  ;;  %v40_v51 = vld [vmem:[%s2074_s0 + $0xe8] sm:$0xff] }
  0x53   :  { %2149 = vst [vmem:[#allocation34_spill] sm:$0xff] %v1686_v14  ;;  %v942_v19 = vunpack.c.l.bf16 %v940_v45  ;;  %v970_v12 = vunpack.c.l.bf16 %v39_v50  ;;  %v618_v3 = vadd.f32 %v1514_v1, %v598_v21  ;;  %v1697_v5 = vmul.f32 %v1686_v14, %v906_v2 }
  0x54   :  { %2150 = vst [vmem:[#allocation35_spill] sm:$0xff] %v1693_v7  ;;  %v957_v46 = vunpack.c.l.bf16 %v953_v6  ;;  %v961_v47 = vunpack.c.l.bf16 %v959_v44  ;;  %v1703_v37 = vmul.f32 %v1693_v7, %v925_v56  ;;  %v972_v16 = vunpack.c.l.bf16 %v1682_v41 }
  0x55   :  { %v1706_v25 = vrot.slane %v942_v19, %v1168_v15  ;;  %v983_v27 = vrot.slane %v39_v50, 4  ;;  %v631_v21 = vadd.f32 %v1530_v18, %v618_v3  ;;  %v1712_v1 = vrot.slane %v1589_v23, %v1168_v15  ;;  %v41_v18 = vld [vmem:[%s2074_s0 + $0xf0] sm:$0xff] }
  0x56   :  { %v1715_v2 = vrot.slane %v961_v47, %v1168_v15  ;;  %v990_v45 = vrot.slane %v1682_v41, 1  ;;  %v1722_v6 = vrot.slane %v972_v16, %v1168_v15  ;;  %v1003_v50 = vrot.slane %v1682_v41, 2 }
  0x57   :  { %2151 = vst [vmem:[#allocation36_spill] sm:$0xff] %v1706_v25  ;;  %v1719_v56 = vmul.f32 %v1706_v25, %v938_v57  ;;  %v987_v44 = vunpack.c.l.bf16 %v983_v27  ;;  %v650_v23 = vadd.f32 %v1534_v55, %v631_v21  ;;  %v1016_v47 = vrot.slane %v40_v51, 4 }
  0x58   :  { %2152 = vst [vmem:[#allocation37_spill] sm:$0xff] %v1715_v2  ;;  %2153 = vst [vmem:[#allocation38_spill] sm:$0xff] %v1722_v6  ;;  %v1730_v3 = vmul.f32 %v1715_v2, %v957_v46  ;;  %v992_v19 = vunpack.c.l.bf16 %v990_v45  ;;  %v1733_v57 = vmul.f32 %v1722_v6, %v970_v12  ;;  %v1001_v7 = vunpack.c.l.bf16 %v40_v51  ;;  %v42_v46 = vld [vmem:[%s2074_s0 + $0xf8] sm:$0xff] }
  0x59   :  { %v1005_v16 = vunpack.c.l.bf16 %v1003_v50  ;;  %v1022_v27 = vrot.slane %v1682_v41, 3  ;;  %v663_v25 = vadd.f32 %v1545_v35, %v650_v23  ;;  %v1020_v14 = vunpack.c.l.bf16 %v1016_v47 }
  0x5a   :  { %2154 = vst [vmem:[#allocation39_spill] sm:$0xff] %v1733_v57  ;;  %v1738_v26 = vrot.slane %v992_v19, %v1168_v15  ;;  %v1035_v55 = vrot.slane %v1682_v41, 4  ;;  %v1048_v51 = vrot.slane %v41_v18, 4  ;;  %v1054_v45 = vrot.slane %v1682_v41, 5 }
  0x5b   :  { %v1745_v21 = vrot.slane %v1005_v16, %v1168_v15  ;;  %v1024_v12 = vunpack.c.l.bf16 %v1022_v27  ;;  %v682_v50 = vadd.f32 %v1553_v36, %v663_v25  ;;  %v1033_v23 = vunpack.c.l.bf16 %v41_v18 }
  0x5c   :  { %2155 = vst [vmem:[#allocation40_spill] sm:$0xff] %v1738_v26  ;;  %v1750_v35 = vmul.f32 %v1738_v26, %v987_v44  ;;  %v1037_v19 = vunpack.c.l.bf16 %v1035_v55  ;;  %v1052_v6 = vunpack.c.l.bf16 %v1048_v51  ;;  %v1056_v16 = vunpack.c.l.bf16 %v1054_v45  ;;  %v43_v44 = vld [vmem:[%s2074_s0 + $0x100] sm:$0xff] }
  0x5d   :  { %2156 = vst [vmem:[#allocation41_spill] sm:$0xff] %v1745_v21  ;;  %v1753_v47 = vmul.f32 %v1745_v21, %v1001_v7  ;;  %v1756_v2 = vrot.slane %v1024_v12, %v1168_v15  ;;  %v695_v27 = vadd.f32 %v1567_v49, %v682_v50  ;;  %v1067_v36 = vrot.slane %v1682_v41, 6  ;;  %v44_v49 = vld [vmem:[%s2074_s0 + $0x108] sm:$0xff] }
  0x5e   :  { %v1760_v57 = vrot.slane %v1037_v19, %v1168_v15  ;;  %v1080_v25 = vrot.slane %v42_v46, 4  ;;  %v1770_v18 = vrot.slane %v1056_v16, %v1168_v15  ;;  %v1086_v55 = vrot.slane %v1682_v41, 7 }
  0x5f   :  { %2157 = vst [vmem:[#allocation42_spill] sm:$0xff] %v1756_v2  ;;  %v1767_v7 = vmul.f32 %v1756_v2, %v1020_v14  ;;  %v84_v12 = vunpack.c.l.bf16 %v43_v44  ;;  %v714_v51 = vadd.f32 %v1571_v30, %v695_v27  ;;  %v1065_v50 = vunpack.c.l.bf16 %v42_v46  ;;  %v45_v14 = vld [vmem:[%s2074_s0 + $0x110] sm:$0xff] }
  0x60   :  { %2158 = vst [vmem:[#allocation43_spill] sm:$0xff] %v1760_v57  ;;  %v1778_v45 = vmul.f32 %v1760_v57, %v1033_v23  ;;  %v1069_v19 = vunpack.c.l.bf16 %v1067_v36  ;;  %v1784_v16 = vmul.f32 %v1770_v18, %v1052_v6  ;;  %v1084_v41 = vunpack.c.l.bf16 %v1080_v25 }
  0x61   :  { %2159 = vst [vmem:[#allocation44_spill] sm:$0xff] %v1767_v7  ;;  %v1088_v2 = vunpack.c.l.bf16 %v1086_v55  ;;  %v95_v26 = vrot.slane %v43_v44, 4  ;;  %v725_v21 = vadd.f32 %v1574_v32, %v714_v51  ;;  %v113_v30 = vunpack.c.l.bf16 %v44_v49  ;;  %v46_v32 = vld [vmem:[%s2074_s0 + $0x118] sm:$0xff] }
  0x62   :  { %v1788_v7 = vrot.slane %v1069_v19, %v1168_v15  ;;  %v128_v23 = vrot.slane %v44_v49, 4  ;;  %v91_v27 = vmul.f32 %v1240_v62, %v84_v12  ;;  %v160_v57 = vrot.slane %v45_v14, 4 }
  0x63   :  { %v1791_v46 = vrot.slane %v1088_v2, %v1168_v15  ;;  %v99_v36 = vunpack.c.l.bf16 %v95_v26  ;;  %v745_v6 = vadd.f32 %v1597_v38, %v725_v21  ;;  %v775_v25 = vmul.f32 %v1712_v1, %v1583_v52 }
  0x64   :  { %v1798_v44 = vmul.f32 %v1788_v7, %v1065_v50  ;;  %v132_v55 = vunpack.c.l.bf16 %v128_v23  ;;  %v122_v26 = vmul.f32 %v1252_v29, %v113_v30  ;;  %v145_v2 = vunpack.c.l.bf16 %v45_v14  ;;  %v47_v50 = vld [vmem:[%s2074_s0 + $0x120] sm:$0xff] }
  0x65   :  { %v1804_v15 = vmul.f32 %v1791_v46, %v1084_v41  ;;  %v109_v62 = vmul.f32 %v1249_v28, %v99_v36  ;;  %v758_v38 = vadd.f32 %v1605_v61, %v745_v6  ;;  %v164_v49 = vunpack.c.l.bf16 %v160_v57  ;;  %v48_v57 = vld [vmem:[%s2074_s0 + $0x128] sm:$0xff] }
  0x66   :  { %v141_v52 = vmul.f32 %v1255_v34, %v132_v55  ;;  %v192_v12 = vrot.slane %v46_v32, 4  ;;  %v154_v41 = vmul.f32 %v1258_v39, %v145_v2  ;;  %v177_v23 = vunpack.c.l.bf16 %v46_v32 }
  0x67   :  { %v111_v21 = vadd.f32 %v109_v62, %v91_v27  ;;  %v777_v51 = vadd.f32 %v775_v25, %v758_v38  ;;  %v173_v14 = vmul.f32 %v1261_v42, %v164_v49  ;;  %v222_v30 = vrot.slane %v47_v50, 4 }
  0x68   :  { %v196_v61 = vunpack.c.l.bf16 %v192_v12  ;;  %v186_v36 = vmul.f32 %v1264_v43, %v177_v23  ;;  %v209_v6 = vunpack.c.l.bf16 %v47_v50  ;;  %v255_v55 = vrot.slane %v48_v57, 4 }
  0x69   :  { %v124_v19 = vadd.f32 %v122_v26, %v111_v21  ;;  %v790_v28 = vadd.f32 %v1621_v13, %v777_v51  ;;  %v226_v32 = vunpack.c.l.bf16 %v222_v30  ;;  %v240_v2 = vunpack.c.l.bf16 %v48_v57 }
  0x6a   :  { %v205_v13 = vmul.f32 %v1285_v0, %v196_v61  ;;  %v216_v26 = vmul.f32 %v1279_v60, %v209_v6  ;;  %v259_v21 = vunpack.c.l.bf16 %v255_v55  ;;  %v55_v6 = vld [vmem:[%s2074_s0 + $0x160] sm:$0xff] }
  0x6b   :  { %v143_v29 = vadd.f32 %v141_v52, %v124_v19  ;;  %v809_v34 = vadd.f32 %v1625_v58, %v790_v28  ;;  %v49_v58 = vld [vmem:[%s2074_s0 + $0x130] sm:$0xff]  ;;  %v249_v12 = vmul.f32 %v1291_v17, %v240_v2  ;;  %v54_v28 = vld [vmem:[%s2074_s0 + $0x158] sm:$0xff] }
  0x6c   :  { %v287_v52 = vrot.slane %v49_v58, 4  ;;  %v272_v51 = vunpack.c.l.bf16 %v49_v58  ;;  %v53_v17 = vld [vmem:[%s2074_s0 + $0x150] sm:$0xff] }
  0x6d   :  { %v156_v27 = vadd.f32 %v154_v41, %v143_v29  ;;  %v822_v39 = vadd.f32 %v1642_v33, %v809_v34  ;;  %v236_v33 = vmul.f32 %v1288_v4, %v226_v32  ;;  %v52_v4 = vld [vmem:[%s2074_s0 + $0x148] sm:$0xff] }
  0x6e   :  { %v291_v19 = vunpack.c.l.bf16 %v287_v52  ;;  %v367_v55 = vunpack.c.l.bf16 %v52_v4 }
  0x6f   :  { %v175_v25 = vadd.f32 %v173_v14, %v156_v27  ;;  %v841_v42 = vadd.f32 %v1647_v24, %v822_v39  ;;  %v50_v24 = vld [vmem:[%s2074_s0 + $0x138] sm:$0xff]  ;;  %v281_v14 = vmul.f32 %v1300_v20, %v272_v51  ;;  %v414_v27 = vrot.slane %v53_v17, 4  ;;  %v2161_v51 = vld [vmem:[#allocation3_spill] sm:$0xff] }
  0x70   :  { %v319_v41 = vrot.slane %v50_v24, 4  ;;  %v300_v57 = vmul.f32 %v1303_v53, %v291_v19  ;;  %v431_v53 = vunpack.c.l.bf16 %v54_v28  ;;  %v2164_v19 = vld [vmem:[#allocation6_spill] sm:$0xff] }
  0x71   :  { %v188_v62 = vadd.f32 %v186_v36, %v175_v25  ;;  %v852_v43 = vadd.f32 %v1650_v10, %v841_v42  ;;  %v51_v10 = vld [vmem:[%s2074_s0 + $0x140] sm:$0xff]  ;;  %v418_v2 = vunpack.c.l.bf16 %v414_v27 }
  0x72   :  { %v349_v61 = vrot.slane %v51_v10, 4  ;;  %v336_v25 = vunpack.c.l.bf16 %v51_v10  ;;  %v2162_v10 = vld [vmem:[#allocation5_spill] sm:$0xff] }
  0x73   :  { %v207_v38 = vadd.f32 %v205_v13, %v188_v62  ;;  %v872_v0 = vadd.f32 %v1662_v59, %v852_v43  ;;  %v268_v59 = vmul.f32 %v1297_v54, %v259_v21  ;;  %v382_v54 = vrot.slane %v52_v4, 4 }
  0x74   :  { %v446_v13 = vrot.slane %v54_v28, 4  ;;  %v353_v32 = vunpack.c.l.bf16 %v349_v61  ;;  %v476_v21 = vrot.slane %v55_v6, 4  ;;  %v1881_v4 = vmul.f32 %v2162_v10, %v431_v53  ;;  %v67_v61 = vld [vmem:[%s2074_s0 + $0x1c0] sm:$0xff] }
  0x75   :  { %v218_v49 = vadd.f32 %v216_v26, %v207_v38  ;;  %v885_v60 = vadd.f32 %v1673_v22, %v872_v0  ;;  %v304_v22 = vunpack.c.l.bf16 %v50_v24  ;;  %v386_v58 = vunpack.c.l.bf16 %v382_v54  ;;  %v1869_v38 = vld [vmem:[%s2074_s0 + $0x1a8] sm:$0xff]  ;;  %v2166_v54 = vld [vmem:[#allocation25_spill] sm:$0xff] }
  0x76   :  { %v363_v0 = vmul.f32 %v1337_v48, %v353_v32  ;;  %v376_v24 = vmul.f32 %v1345_v11, %v367_v55  ;;  %v1887_v48 = vld [vmem:[%s2074_s0 + $0x170] sm:$0xff]  ;;  %v66_v11 = vld [vmem:[%s2074_s0 + $0x1b8] sm:$0xff] }
  0x77   :  { %v238_v50 = vadd.f32 %v236_v33, %v218_v49  ;;  %v904_v23 = vadd.f32 %v1690_v40, %v885_v60  ;;  %v323_v40 = vunpack.c.l.bf16 %v319_v41  ;;  %v313_v39 = vmul.f32 %v1321_v31, %v304_v22  ;;  %v2160_v49 = vld [vmem:[#allocation39_spill] sm:$0xff] }
  0x78   :  { %v463_v31 = vunpack.c.l.bf16 %v55_v6  ;;  %v450_v33 = vunpack.c.l.bf16 %v446_v13  ;;  %v395_v60 = vmul.f32 %v2161_v51, %v386_v58  ;;  %v2165_v22 = vld [vmem:[#allocation7_spill] sm:$0xff]  ;;  %v812_v6 = vunpack.c.l.bf16 %v66_v11  ;;  %v2167_v13 = vld [vmem:[#allocation26_spill] sm:$0xff]  ;;  %v2169_v58 = vld [vmem:[#allocation8_spill] sm:$0xff] }
  0x79   :  { %v251_v29 = vadd.f32 %v249_v12, %v238_v50  ;;  %v917_v30 = vadd.f32 %v1697_v5, %v904_v23  ;;  %v399_v5 = vunpack.c.l.bf16 %v53_v17  ;;  %v332_v26 = vmul.f32 %v1328_v8, %v323_v40  ;;  %v2163_v50 = vld [vmem:[#allocation4_spill] sm:$0xff] }
  0x7a   :  { %v1894_v41 = vmul.f32 %v2164_v19, %v463_v31  ;;  %v748_v23 = vunpack.c.l.bf16 %v1869_v38  ;;  %v1899_v28 = vmul.f32 %v2165_v22, %v450_v33  ;;  %v827_v55 = vrot.slane %v66_v11, 4  ;;  %v2174_v19 = vld [vmem:[#allocation32_spill] sm:$0xff] }
  0x7b   :  { %v270_v34 = vadd.f32 %v268_v59, %v251_v29  ;;  %v936_v36 = vadd.f32 %v1703_v37, %v917_v30  ;;  %v1862_v37 = vld [vmem:[%s2074_s0 + $0x168] sm:$0xff]  ;;  %v408_v8 = vmul.f32 %v1351_v63, %v399_v5  ;;  %v427_v59 = vmul.f32 %v2163_v50, %v418_v2 }
  0x7c   :  { %v480_v29 = vunpack.c.l.bf16 %v476_v21  ;;  %v2168_v5 = vld [vmem:[#allocation44_spill] sm:$0xff]  ;;  %v844_v2 = vunpack.c.l.bf16 %v67_v61  ;;  %v831_v33 = vunpack.c.l.bf16 %v827_v55  ;;  %v857_v21 = vrot.slane %v67_v61, 4  ;;  %v2175_v61 = vld [vmem:[#allocation31_spill] sm:$0xff] }
  0x7d   :  { %v283_v20 = vadd.f32 %v281_v14, %v270_v34  ;;  %v949_v42 = vadd.f32 %v1719_v56, %v936_v36  ;;  %v343_v56 = vmul.f32 %v1331_v9, %v336_v25  ;;  %v509_v9 = vrot.slane %v1862_v37, 4 }
  0x7e   :  { %v494_v14 = vunpack.c.l.bf16 %v1862_v37  ;;  %v1906_v34 = vmul.f32 %v2166_v54, %v748_v23  ;;  %v1923_v53 = vmul.f32 %v2169_v58, %v480_v29  ;;  %v2176_v54 = vld [vmem:[#allocation34_spill] sm:$0xff]  ;;  %v2179_v58 = vld [vmem:[#allocation35_spill] sm:$0xff] }
  0x7f   :  { %v302_v62 = vadd.f32 %v300_v57, %v283_v20  ;;  %v968_v43 = vadd.f32 %v1730_v3, %v949_v42  ;;  %v65_v3 = vld [vmem:[%s2074_s0 + $0x1b0] sm:$0xff]  ;;  %v1909_v36 = vunpack.c.l.bf16 %v509_v9 }
  0x80   :  { %v780_v57 = vunpack.c.l.bf16 %v65_v3  ;;  %v795_v40 = vrot.slane %v65_v3, 4  ;;  %v2173_v9 = vld [vmem:[#allocation29_spill] sm:$0xff] }
  0x81   :  { %v315_v52 = vadd.f32 %v313_v39, %v302_v62  ;;  %v979_v12 = vadd.f32 %v2160_v49, %v968_v43  ;;  %v68_v39 = vld [vmem:[%s2074_s0 + $0x1c8] sm:$0xff]  ;;  %v2171_v43 = vld [vmem:[#allocation27_spill] sm:$0xff]  ;;  %v2172_v49 = vld [vmem:[#allocation30_spill] sm:$0xff]  ;;  %v1939_v11 = vmul.f32 %v2173_v9, %v831_v33 }
  0x82   :  { %v1916_v20 = vmul.f32 %v2167_v13, %v780_v57  ;;  %v799_v32 = vunpack.c.l.bf16 %v795_v40  ;;  %v2170_v62 = vld [vmem:[#allocation28_spill] sm:$0xff]  ;;  %v875_v3 = vunpack.c.l.bf16 %v68_v39  ;;  %v890_v51 = vrot.slane %v68_v39, 4  ;;  %v73_v13 = vld [vmem:[%s2074_s0 + $0x1f0] sm:$0xff]  ;;  %v2180_v33 = vld [vmem:[#allocation38_spill] sm:$0xff] }
  0x83   :  { %v334_v63 = vadd.f32 %v332_v26, %v315_v52  ;;  %v999_v17 = vadd.f32 %v1750_v35, %v979_v12  ;;  %v541_v35 = vrot.slane %v1887_v48, 4  ;;  %v1926_v26 = vmul.f32 %v2170_v62, %v812_v6 }
  0x84   :  { %v1936_v12 = vmul.f32 %v2172_v49, %v844_v2  ;;  %v1946_v23 = vmul.f32 %v2174_v19, %v875_v3  ;;  %v526_v19 = vunpack.c.l.bf16 %v1887_v48  ;;  %v60_v48 = vld [vmem:[%s2074_s0 + $0x188] sm:$0xff] }
  0x85   :  { %v345_v30 = vadd.f32 %v343_v56, %v334_v63  ;;  %v1012_v27 = vadd.f32 %v1753_v47, %v999_v17  ;;  %v69_v47 = vld [vmem:[%s2074_s0 + $0x1d0] sm:$0xff]  ;;  %v1929_v56 = vmul.f32 %v2171_v43, %v799_v32  ;;  %v894_v17 = vunpack.c.l.bf16 %v890_v51 }
  0x86   :  { %v907_v63 = vunpack.c.l.bf16 %v69_v47  ;;  %v922_v22 = vrot.slane %v69_v47, 4  ;;  %v1034_v51 = vunpack.c.l.bf16 %v73_v13  ;;  %v545_v37 = vunpack.c.l.bf16 %v541_v35 }
  0x87   :  { %v365_v25 = vadd.f32 %v363_v0, %v345_v30  ;;  %v1031_v42 = vadd.f32 %v2168_v5, %v1012_v27  ;;  %v70_v0 = vld [vmem:[%s2074_s0 + $0x1d8] sm:$0xff]  ;;  %v2177_v27 = vld [vmem:[#allocation33_spill] sm:$0xff] }
  0x88   :  { %v1955_v57 = vmul.f32 %v2176_v54, %v907_v63  ;;  %v1959_v6 = vmul.f32 %v2177_v27, %v894_v17  ;;  %v926_v39 = vunpack.c.l.bf16 %v922_v22  ;;  %v2184_v17 = vld [vmem:[#allocation43_spill] sm:$0xff] }
  0x89   :  { %v378_v31 = vadd.f32 %v376_v24, %v365_v25  ;;  %v1044_v52 = vadd.f32 %v1778_v45, %v1031_v42  ;;  %v861_v24 = vunpack.c.l.bf16 %v857_v21  ;;  %v71_v45 = vld [vmem:[%s2074_s0 + $0x1e0] sm:$0xff]  ;;  %v954_v25 = vrot.slane %v70_v0, 4 }
  0x8a   :  { %v971_v5 = vunpack.c.l.bf16 %v71_v45  ;;  %v984_v42 = vrot.slane %v71_v45, 4  ;;  %v1972_v62 = vmul.f32 %v2179_v58, %v926_v39  ;;  %v58_v45 = vld [vmem:[%s2074_s0 + $0x178] sm:$0xff]  ;;  %v1993_v22 = vmul.f32 %v2184_v17, %v1034_v51  ;;  %v61_v51 = vld [vmem:[%s2074_s0 + $0x190] sm:$0xff] }
  0x8b   :  { %v397_v10 = vadd.f32 %v395_v60, %v378_v31  ;;  %v1063_v50 = vadd.f32 %v1784_v16, %v1044_v52  ;;  %v72_v60 = vld [vmem:[%s2074_s0 + $0x1e8] sm:$0xff]  ;;  %v1952_v30 = vmul.f32 %v2175_v61, %v861_v24  ;;  %v939_v16 = vunpack.c.l.bf16 %v70_v0  ;;  %v2181_v0 = vld [vmem:[#allocation37_spill] sm:$0xff] }
  0x8c   :  { %v958_v2 = vunpack.c.l.bf16 %v954_v25  ;;  %v1002_v31 = vunpack.c.l.bf16 %v72_v60  ;;  %v988_v21 = vunpack.c.l.bf16 %v984_v42  ;;  %v1017_v52 = vrot.slane %v72_v60, 4  ;;  %v2183_v24 = vld [vmem:[#allocation40_spill] sm:$0xff] }
  0x8d   :  { %v410_v29 = vadd.f32 %v408_v8, %v397_v10  ;;  %v1076_v40 = vadd.f32 %v1798_v44, %v1063_v50  ;;  %v2178_v8 = vld [vmem:[#allocation36_spill] sm:$0xff]  ;;  %v74_v44 = vld [vmem:[%s2074_s0 + $0x1f8] sm:$0xff]  ;;  %v1049_v10 = vrot.slane %v73_v13, 4 }
  0x8e   :  { %v1965_v55 = vmul.f32 %v2178_v8, %v939_v16  ;;  %v1979_v49 = vmul.f32 %v2181_v0, %v958_v2  ;;  %v1986_v63 = vmul.f32 %v2183_v24, %v988_v21  ;;  %v1066_v50 = vunpack.c.l.bf16 %v74_v44  ;;  %v2186_v16 = vld [vmem:[#allocation42_spill] sm:$0xff] }
  0x8f   :  { %v429_v32 = vadd.f32 %v427_v59, %v410_v29  ;;  %v1095_v47 = vadd.f32 %v1804_v15, %v1076_v40  ;;  %v1976_v59 = vmul.f32 %v2180_v33, %v971_v5  ;;  %v2182_v15 = vld [vmem:[#allocation41_spill] sm:$0xff]  ;;  %v1053_v60 = vunpack.c.l.bf16 %v1049_v10 }
  0x90   :  { %v1982_v3 = vmul.f32 %v2182_v15, %v1002_v31  ;;  %v1081_v29 = vrot.slane %v74_v44, 4  ;;  %v2003_v27 = vmul.f32 %v1788_v7, %v1066_v50  ;;  %v2190_v31 = vld [vmem:[#allocation13_spill] sm:$0xff]  ;;  %v636_v15 = vrot.slane %v60_v48, 4 }
  0x91   :  { %v442_v43 = vadd.f32 %v1881_v4, %v429_v32  ;;  %1097 = vadd.xlane.f32.xlu0 %v1095_v47  ;;  %v1021_v4 = vunpack.c.l.bf16 %v1017_v52  ;;  %v2006_v39 = vmul.f32 %v1770_v18, %v1053_v60  ;;  %v2187_v32 = vld [vmem:[#allocation10_spill] sm:$0xff]  ;;  %v2188_v18 = vld [vmem:[#allocation11_spill] sm:$0xff]  ;;  %v558_v47 = vunpack.c.l.bf16 %v58_v45 }
  0x92   :  { %v1085_v25 = vunpack.c.l.bf16 %v1081_v29  ;;  %v522_v8 = vmul.f32 %v2187_v32, %v1909_v36  ;;  %v535_v42 = vmul.f32 %v2188_v18, %v526_v19  ;;  %v640_v17 = vunpack.c.l.bf16 %v636_v15  ;;  %v62_v29 = vld [vmem:[%s2074_s0 + $0x198] sm:$0xff]  ;;  %v2200_v15 = vld [vmem:[#allocation23_spill] sm:$0xff] }
  0x93   :  { %v461_v9 = vadd.f32 %v1899_v28, %v442_v43  ;;  %v2185_v28 = vld [vmem:[#allocation9_spill] sm:$0xff]  ;;  %v2000_v40 = vmul.f32 %v2186_v16, %v1021_v4  ;;  %v567_v43 = vmul.f32 %v2190_v31, %v558_v47  ;;  %v621_v4 = vunpack.c.l.bf16 %v60_v48 }
  0x94   :  { %v503_v54 = vmul.f32 %v2185_v28, %v494_v14  ;;  %v59_v14 = vld [vmem:[%s2074_s0 + $0x180] sm:$0xff]  ;;  %v2017_v7 = vmul.f32 %v1791_v46, %v1085_v25  ;;  %v668_v60 = vrot.slane %v61_v51, 4  ;;  %v2194_v28 = vld [vmem:[#allocation17_spill] sm:$0xff]  ;;  %v653_v16 = vunpack.c.l.bf16 %v61_v51 }
  0x95   :  { %v472_v61 = vadd.f32 %v1894_v41, %v461_v9  ;;  %v573_v41 = vrot.slane %v58_v45, 4  ;;  %v603_v36 = vrot.slane %v59_v14, 4  ;;  %v590_v33 = vunpack.c.l.bf16 %v59_v14  ;;  %v2191_v46 = vld [vmem:[#allocation15_spill] sm:$0xff]  ;;  %v2192_v9 = vld [vmem:[#allocation14_spill] sm:$0xff]  ;;  %v2193_v45 = vld [vmem:[#allocation16_spill] sm:$0xff] }
  0x96   :  { %v2198_v48 = vld [vmem:[#allocation21_spill] sm:$0xff] }
  0x97   :  { %v492_v13 = vadd.f32 %v1923_v53, %v472_v61  ;;  %v2189_v53 = vld [vmem:[#allocation12_spill] sm:$0xff]  ;;  %v577_v2 = vunpack.c.l.bf16 %v573_v41  ;;  %v607_v0 = vunpack.c.l.bf16 %v603_v36  ;;  %v597_v24 = vmul.f32 %v2192_v9, %v590_v33  ;;  %v63_v41 = vld [vmem:[%s2074_s0 + $0x1a0] sm:$0xff]  ;;  %v2199_v33 = vld [vmem:[#allocation22_spill] sm:$0xff] }
  0x98   :  { %v554_v58 = vmul.f32 %v2189_v53, %v545_v37  ;;  %v700_v37 = vrot.slane %v62_v29, 4  ;;  %v717_v31 = vunpack.c.l.bf16 %v63_v41  ;;  %v2201_v9 = vld [vmem:[#allocation24_spill] sm:$0xff] }
  0x99   :  { %v505_v5 = vadd.f32 %v503_v54, %v492_v13  ;;  %v586_v52 = vmul.f32 %v2191_v46, %v577_v2  ;;  %v617_v19 = vmul.f32 %v2193_v45, %v607_v0  ;;  %v630_v54 = vmul.f32 %v2194_v28, %v621_v4  ;;  %v2195_v13 = vld [vmem:[#allocation18_spill] sm:$0xff] }
  0x9a   :  { %v649_v32 = vmul.f32 %v2195_v13, %v640_v17  ;;  %v730_v2 = vrot.slane %v63_v41, 4  ;;  %v724_v51 = vmul.f32 %v2200_v15, %v717_v31 }
  0x9b   :  { %v524_v44 = vadd.f32 %v522_v8, %v505_v5  ;;  %v672_v8 = vunpack.c.l.bf16 %v668_v60  ;;  %v2196_v5 = vld [vmem:[#allocation19_spill] sm:$0xff] }
  0x9c   :  { %v662_v18 = vmul.f32 %v2196_v5, %v653_v16  ;;  %v734_v46 = vunpack.c.l.bf16 %v730_v2 }
  0x9d   :  { %v537_v35 = vadd.f32 %v535_v42, %v524_v44  ;;  %v685_v42 = vunpack.c.l.bf16 %v62_v29  ;;  %v2197_v44 = vld [vmem:[#allocation20_spill] sm:$0xff] }
  0x9e   :  { %v681_v53 = vmul.f32 %v2197_v44, %v672_v8 }
  0x9f   :  { %v556_v21 = vadd.f32 %v554_v58, %v537_v35  ;;  %v704_v58 = vunpack.c.l.bf16 %v700_v37  ;;  %v694_v35 = vmul.f32 %v2198_v48, %v685_v42 }
  0xa1   :  { %v569_v10 = vadd.f32 %v567_v43, %v556_v21  ;;  %v713_v21 = vmul.f32 %v2199_v33, %v704_v58 }
  0xa3   :  { %v588_v50 = vadd.f32 %v586_v52, %v569_v10  ;;  %v763_v52 = vrot.slane %v1869_v38, 4 }
  0xa5   :  { %v599_v61 = vadd.f32 %v597_v24, %v588_v50  ;;  %v744_v24 = vmul.f32 %v2201_v9, %v734_v46  ;;  %v767_v4 = vunpack.c.l.bf16 %v763_v52 }
  0xa7   :  { %v619_v25 = vadd.f32 %v617_v19, %v599_v61  ;;  %v776_v19 = vmul.f32 %v1712_v1, %v767_v4 }
  0xa9   :  { %v632_v14 = vadd.f32 %v630_v54, %v619_v25 }
  0xab   :  { %v651_v47 = vadd.f32 %v649_v32, %v632_v14 }
  0xad   :  { %v664_v36 = vadd.f32 %v662_v18, %v651_v47 }
  0xaf   :  { %v683_v43 = vadd.f32 %v681_v53, %v664_v36 }
  0xb1   :  { %v696_v0 = vadd.f32 %v694_v35, %v683_v43 }
  0xb3   :  { %v715_v10 = vadd.f32 %v713_v21, %v696_v0 }
  0xb5   :  { %v726_v50 = vadd.f32 %v724_v51, %v715_v10 }
  0xb7   :  { %v746_v45 = vadd.f32 %v744_v24, %v726_v50 }
  0xb9   :  { %v759_v17 = vadd.f32 %v1906_v34, %v746_v45 }
  0xbb   :  { %v778_v60 = vadd.f32 %v776_v19, %v759_v17 }
  0xbd   :  { %v791_v29 = vadd.f32 %v1916_v20, %v778_v60 }
  0xbf   :  { %v810_v61 = vadd.f32 %v1929_v56, %v791_v29 }
  0xc1   :  { %v823_v38 = vadd.f32 %v1926_v26, %v810_v61 }
  0xc3   :  { %v842_v28 = vadd.f32 %v1939_v11, %v823_v38 }
  0xc5   :  { %v853_v54 = vadd.f32 %v1936_v12, %v842_v28 }
  0xc7   :  { %v873_v16 = vadd.f32 %v1952_v30, %v853_v54 }
  0xc9   :  { %v886_v25 = vadd.f32 %v1946_v23, %v873_v16 }
  0xcb   :  { %v905_v13 = vadd.f32 %v1959_v6, %v886_v25 }
  0xcd   :  { %v918_v1 = vadd.f32 %v1955_v57, %v905_v13 }
  0xcf   :  { %v937_v34 = vadd.f32 %v1972_v62, %v918_v1 }
  0xd1   :  { %v950_v20 = vadd.f32 %v1965_v55, %v937_v34 }
  0xd3   :  { %v969_v56 = vadd.f32 %v1979_v49, %v950_v20 }
  0xd5   :  { %v980_v26 = vadd.f32 %v1976_v59, %v969_v56 }
  0xd7   :  { %v1000_v11 = vadd.f32 %v1986_v63, %v980_v26 }
  0xd9   :  { %v1013_v12 = vadd.f32 %v1982_v3, %v1000_v11 }
  0xdb   :  { %v1032_v30 = vadd.f32 %v2000_v40, %v1013_v12 }
  0xdd   :  { %v1045_v23 = vadd.f32 %v1993_v22, %v1032_v30 }
  0xdf   :  { %v1064_v6 = vadd.f32 %v2006_v39, %v1045_v23 }
  0xe1   :  { %v1077_v57 = vadd.f32 %v2003_v27, %v1064_v6 }
  0xe3   :  { %v1096_v62 = vadd.f32 %v2017_v7, %v1077_v57 }
  0xe5   :  { %1099 = vadd.xlane.f32.xlu0 %v1096_v62 }
 0x11a   :  { %v1098_v55 = vpop.xlane.xlu0 %1097 }
 0x11b   :  { %1102 = vst.msk [vmem:[%s2076_s2] sm:$0xff] %vm1101_vm0, %v1098_v55 }
 0x16e   :  { %v1100_v59 = vpop.xlane.xlu0 %1099 }
 0x16f   :  { %1103 = vst.msk [vmem:[%s2076_s2 + $0x8] sm:$0xff] %vm1101_vm0, %v1100_v59 }

// kernel: forward.8
= control target key start
LH: loop header
LB: loop body
LE: loop exit
PB: predicated region body
PF: predicated region fallthrough
CT: control target
= control target key end

     0   :  { %s8520_s12 = smov 0   ;;  %s8522_s13 = smov 0   ;;  %s10015_s0 = inlined_call_operand.vmem [shape: bf16[16,4096], index: 0, kind: input, shape index: {}]   ;;  %s10016_s1 = inlined_call_operand.vmem [shape: bf16[4096,512], index: 1, kind: input, shape index: {}]   ;;  %s10017_s2 = inlined_call_operand.vmem [shape: f32[1,512], index: 2, kind: input, shape index: {}]   ;;  %s10018_s3 = inlined_call_operand.vmem [shape: bf16[16,512], index: 3, kind: output, shape index: {}]  }
   0x1   :  { %s8524_s14 = smov 0   ;;  %s8526_s15 = smov 0  }
   0x2   :  { %s8528_s16 = smov 0  }
   0x3 LB: > { %s28_s17 = sadd.s32 1, %s8494_s15  ;;  %s7500_s18 = sadd.s32 4294967295, %s8498_s16   ;;  %s8498_s16 = sphi %s8528_s16, %s13_s16   ;;  %s8494_s15 = sphi %s8526_s15, %s10023_s15   ;;  %s8490_s14 = sphi %s8524_s14, %s10022_s14   ;;  %s8486_s13 = sphi %s8522_s13, %s10021_s13   ;;  %s8482_s12 = sphi %s8520_s12, %s10020_s12  }
   0x4   : > { %p30_p0 = scmp.ge.s32.totalorder %s28_s17, 4  ;;  %p76_p1 = scmp.ne.s32.totalorder %s8486_s13, %s8482_s12 }
   0x5   : > { %p77_p2 = scmp.eq.s32.totalorder %s8498_s16, 0  ;;  %p134_p4 = scmp.eq.s32.totalorder %s7500_s18, 3 }
   0x6   : > { %s10025_s17 = smov (%p30_p0, %s28_s17), 0  ;;  %s69_s20 = sadd.s32 1, %s8486_s13 }
   0x7   : > { %p78_p3 = por %p77_p2, %p76_p1  ;;  %s65_s19 = ssub.s32 %s8494_s15, %s10025_s17 }
   0x8   : > { %p67_p5 = scmp.eq.s32.totalorder %s65_s19, 0  ;;  %p8555_p6 = por %p134_p4, %p76_p1 }
   0x9   : > { %p7504_p7 = scmp.ge.s32.totalorder %s8498_s16, 4 }
   0xa   : > { %s8560_s22 = scalar_select %p67_p5, %s8486_s13, %s69_s20  }
   0xb   : > { %171 = sbr.rel (%p7504_p7) target bundleno = 361 (0x169), region = 20 }
  0x10   : > { %174 = sbr.rel (!%p78_p3) target bundleno = 361 (0x169), region = 24  ;;  %s176_s23 = sand.u32 (%p78_p3), 1, %s8486_s13  }
  0x11   : > { %s7506_s24 = sshll.u32 (%p78_p3), %s8494_s15, 2  ;;  %s7505_s25 = sshll.u32 (%p78_p3), %s176_s23, 11 }
  0x12   : > { %s8568_s28 = scalar_lea.vmem (%p78_p3), %s10016_s1, %s7506_s24  ;;  %s8572_s29 = scalar_lea.vmem (%p78_p3), [#allocation3], %s7505_s25 }
  0x13   : > { %v200_v0 = vld [vmem:[%s8568_s28] sm:$0xf] (%p78_p3)  ;;  %v202_v1 = vld [vmem:[%s8568_s28 + $0x10] sm:$0xf] (%p78_p3) }
  0x14   : > { %201 = vst [vmem:[%s8572_s29] sm:$0xf] (%p78_p3), %v200_v0  ;;  %203 = vst [vmem:[%s8572_s29 + $0x4] sm:$0xf] (%p78_p3), %v202_v1  ;;  %v204_v2 = vld [vmem:[%s8568_s28 + $0x20] sm:$0xf] (%p78_p3) }
  0x15   : > { %v206_v3 = vld [vmem:[%s8568_s28 + $0x30] sm:$0xf]  ;;  %v208_v4 = vld [vmem:[%s8568_s28 + $0x40] sm:$0xf]  ;;  %205 = vst [vmem:[%s8572_s29 + $0x8] sm:$0xf] %v204_v2 }
  0x16   : > { %207 = vst [vmem:[%s8572_s29 + $0xc] sm:$0xf] %v206_v3  ;;  %209 = vst [vmem:[%s8572_s29 + $0x10] sm:$0xf] %v208_v4  ;;  %v210_v5 = vld [vmem:[%s8568_s28 + $0x50] sm:$0xf] }
  0x17   : > { %v212_v6 = vld [vmem:[%s8568_s28 + $0x60] sm:$0xf]  ;;  %v214_v7 = vld [vmem:[%s8568_s28 + $0x70] sm:$0xf]  ;;  %211 = vst [vmem:[%s8572_s29 + $0x14] sm:$0xf] %v210_v5 }
  0x18   : > { %213 = vst [vmem:[%s8572_s29 + $0x18] sm:$0xf] %v212_v6  ;;  %215 = vst [vmem:[%s8572_s29 + $0x1c] sm:$0xf] %v214_v7  ;;  %v216_v8 = vld [vmem:[%s8568_s28 + $0x80] sm:$0xf] }
  0x19   : > { %v218_v9 = vld [vmem:[%s8568_s28 + $0x90] sm:$0xf]  ;;  %v220_v10 = vld [vmem:[%s8568_s28 + $0xa0] sm:$0xf]  ;;  %217 = vst [vmem:[%s8572_s29 + $0x20] sm:$0xf] %v216_v8 }
  0x1a   : > { %219 = vst [vmem:[%s8572_s29 + $0x24] sm:$0xf] %v218_v9  ;;  %221 = vst [vmem:[%s8572_s29 + $0x28] sm:$0xf] %v220_v10  ;;  %v222_v11 = vld [vmem:[%s8568_s28 + $0xb0] sm:$0xf] }
  0x1b   : > { %v224_v12 = vld [vmem:[%s8568_s28 + $0xc0] sm:$0xf]  ;;  %v226_v13 = vld [vmem:[%s8568_s28 + $0xd0] sm:$0xf]  ;;  %223 = vst [vmem:[%s8572_s29 + $0x2c] sm:$0xf] %v222_v11 }
  0x1c   : > { %225 = vst [vmem:[%s8572_s29 + $0x30] sm:$0xf] %v224_v12  ;;  %227 = vst [vmem:[%s8572_s29 + $0x34] sm:$0xf] %v226_v13  ;;  %v228_v14 = vld [vmem:[%s8568_s28 + $0xe0] sm:$0xf] }
  0x1d   : > { %v230_v15 = vld [vmem:[%s8568_s28 + $0xf0] sm:$0xf]  ;;  %v232_v16 = vld [vmem:[%s8568_s28 + $0x100] sm:$0xf]  ;;  %229 = vst [vmem:[%s8572_s29 + $0x38] sm:$0xf] %v228_v14 }
  0x1e   : > { %231 = vst [vmem:[%s8572_s29 + $0x3c] sm:$0xf] %v230_v15  ;;  %233 = vst [vmem:[%s8572_s29 + $0x40] sm:$0xf] %v232_v16  ;;  %v234_v17 = vld [vmem:[%s8568_s28 + $0x110] sm:$0xf] }
  0x1f   : > { %v236_v18 = vld [vmem:[%s8568_s28 + $0x120] sm:$0xf]  ;;  %v238_v19 = vld [vmem:[%s8568_s28 + $0x130] sm:$0xf]  ;;  %235 = vst [vmem:[%s8572_s29 + $0x44] sm:$0xf] %v234_v17 }
  0x20   : > { %237 = vst [vmem:[%s8572_s29 + $0x48] sm:$0xf] %v236_v18  ;;  %239 = vst [vmem:[%s8572_s29 + $0x4c] sm:$0xf] %v238_v19  ;;  %v240_v20 = vld [vmem:[%s8568_s28 + $0x140] sm:$0xf] }
  0x21   : > { %v242_v21 = vld [vmem:[%s8568_s28 + $0x150] sm:$0xf]  ;;  %v244_v22 = vld [vmem:[%s8568_s28 + $0x160] sm:$0xf]  ;;  %241 = vst [vmem:[%s8572_s29 + $0x50] sm:$0xf] %v240_v20 }
  0x22   : > { %243 = vst [vmem:[%s8572_s29 + $0x54] sm:$0xf] %v242_v21  ;;  %245 = vst [vmem:[%s8572_s29 + $0x58] sm:$0xf] %v244_v22  ;;  %v246_v23 = vld [vmem:[%s8568_s28 + $0x170] sm:$0xf] }
  0x23   : > { %v248_v24 = vld [vmem:[%s8568_s28 + $0x180] sm:$0xf]  ;;  %v250_v25 = vld [vmem:[%s8568_s28 + $0x190] sm:$0xf]  ;;  %247 = vst [vmem:[%s8572_s29 + $0x5c] sm:$0xf] %v246_v23 }
  0x24   : > { %249 = vst [vmem:[%s8572_s29 + $0x60] sm:$0xf] %v248_v24  ;;  %251 = vst [vmem:[%s8572_s29 + $0x64] sm:$0xf] %v250_v25  ;;  %v252_v26 = vld [vmem:[%s8568_s28 + $0x1a0] sm:$0xf] }
  0x25   : > { %v254_v27 = vld [vmem:[%s8568_s28 + $0x1b0] sm:$0xf]  ;;  %v256_v28 = vld [vmem:[%s8568_s28 + $0x1c0] sm:$0xf]  ;;  %253 = vst [vmem:[%s8572_s29 + $0x68] sm:$0xf] %v252_v26 }
  0x26   : > { %255 = vst [vmem:[%s8572_s29 + $0x6c] sm:$0xf] %v254_v27  ;;  %257 = vst [vmem:[%s8572_s29 + $0x70] sm:$0xf] %v256_v28  ;;  %v258_v29 = vld [vmem:[%s8568_s28 + $0x1d0] sm:$0xf] }
  0x27   : > { %v260_v30 = vld [vmem:[%s8568_s28 + $0x1e0] sm:$0xf]  ;;  %v262_v31 = vld [vmem:[%s8568_s28 + $0x1f0] sm:$0xf]  ;;  %259 = vst [vmem:[%s8572_s29 + $0x74] sm:$0xf] %v258_v29 }
  0x28   : > { %261 = vst [vmem:[%s8572_s29 + $0x78] sm:$0xf] %v260_v30  ;;  %263 = vst [vmem:[%s8572_s29 + $0x7c] sm:$0xf] %v262_v31  ;;  %v264_v32 = vld [vmem:[%s8568_s28 + $0x200] sm:$0xf] }
  0x29   : > { %v266_v33 = vld [vmem:[%s8568_s28 + $0x210] sm:$0xf]  ;;  %v268_v34 = vld [vmem:[%s8568_s28 + $0x220] sm:$0xf]  ;;  %265 = vst [vmem:[%s8572_s29 + $0x80] sm:$0xf] %v264_v32 }
  0x2a   : > { %267 = vst [vmem:[%s8572_s29 + $0x84] sm:$0xf] %v266_v33  ;;  %269 = vst [vmem:[%s8572_s29 + $0x88] sm:$0xf] %v268_v34  ;;  %v270_v35 = vld [vmem:[%s8568_s28 + $0x230] sm:$0xf] }
  0x2b   : > { %v272_v36 = vld [vmem:[%s8568_s28 + $0x240] sm:$0xf]  ;;  %v274_v37 = vld [vmem:[%s8568_s28 + $0x250] sm:$0xf]  ;;  %271 = vst [vmem:[%s8572_s29 + $0x8c] sm:$0xf] %v270_v35 }
  0x2c   : > { %273 = vst [vmem:[%s8572_s29 + $0x90] sm:$0xf] %v272_v36  ;;  %275 = vst [vmem:[%s8572_s29 + $0x94] sm:$0xf] %v274_v37  ;;  %v276_v38 = vld [vmem:[%s8568_s28 + $0x260] sm:$0xf] }
  0x2d   : > { %v278_v39 = vld [vmem:[%s8568_s28 + $0x270] sm:$0xf]  ;;  %v280_v40 = vld [vmem:[%s8568_s28 + $0x280] sm:$0xf]  ;;  %277 = vst [vmem:[%s8572_s29 + $0x98] sm:$0xf] %v276_v38 }
  0x2e   : > { %279 = vst [vmem:[%s8572_s29 + $0x9c] sm:$0xf] %v278_v39  ;;  %281 = vst [vmem:[%s8572_s29 + $0xa0] sm:$0xf] %v280_v40  ;;  %v282_v41 = vld [vmem:[%s8568_s28 + $0x290] sm:$0xf] }
  0x2f   : > { %v284_v42 = vld [vmem:[%s8568_s28 + $0x2a0] sm:$0xf]  ;;  %v286_v43 = vld [vmem:[%s8568_s28 + $0x2b0] sm:$0xf]  ;;  %283 = vst [vmem:[%s8572_s29 + $0xa4] sm:$0xf] %v282_v41 }
  0x30   : > { %285 = vst [vmem:[%s8572_s29 + $0xa8] sm:$0xf] %v284_v42  ;;  %287 = vst [vmem:[%s8572_s29 + $0xac] sm:$0xf] %v286_v43  ;;  %v288_v44 = vld [vmem:[%s8568_s28 + $0x2c0] sm:$0xf] }
  0x31   : > { %v290_v45 = vld [vmem:[%s8568_s28 + $0x2d0] sm:$0xf]  ;;  %v292_v46 = vld [vmem:[%s8568_s28 + $0x2e0] sm:$0xf]  ;;  %289 = vst [vmem:[%s8572_s29 + $0xb0] sm:$0xf] %v288_v44 }
  0x32   : > { %291 = vst [vmem:[%s8572_s29 + $0xb4] sm:$0xf] %v290_v45  ;;  %293 = vst [vmem:[%s8572_s29 + $0xb8] sm:$0xf] %v292_v46  ;;  %v294_v47 = vld [vmem:[%s8568_s28 + $0x2f0] sm:$0xf] }
  0x33   : > { %v296_v48 = vld [vmem:[%s8568_s28 + $0x300] sm:$0xf]  ;;  %v298_v49 = vld [vmem:[%s8568_s28 + $0x310] sm:$0xf]  ;;  %295 = vst [vmem:[%s8572_s29 + $0xbc] sm:$0xf] %v294_v47 }
  0x34   : > { %297 = vst [vmem:[%s8572_s29 + $0xc0] sm:$0xf] %v296_v48  ;;  %299 = vst [vmem:[%s8572_s29 + $0xc4] sm:$0xf] %v298_v49  ;;  %v300_v50 = vld [vmem:[%s8568_s28 + $0x320] sm:$0xf] }
  0x35   : > { %v302_v51 = vld [vmem:[%s8568_s28 + $0x330] sm:$0xf]  ;;  %v304_v52 = vld [vmem:[%s8568_s28 + $0x340] sm:$0xf]  ;;  %301 = vst [vmem:[%s8572_s29 + $0xc8] sm:$0xf] %v300_v50 }
  0x36   : > { %303 = vst [vmem:[%s8572_s29 + $0xcc] sm:$0xf] %v302_v51  ;;  %305 = vst [vmem:[%s8572_s29 + $0xd0] sm:$0xf] %v304_v52  ;;  %v306_v53 = vld [vmem:[%s8568_s28 + $0x350] sm:$0xf] }
  0x37   : > { %v308_v54 = vld [vmem:[%s8568_s28 + $0x360] sm:$0xf]  ;;  %v310_v55 = vld [vmem:[%s8568_s28 + $0x370] sm:$0xf]  ;;  %307 = vst [vmem:[%s8572_s29 + $0xd4] sm:$0xf] %v306_v53 }
  0x38   : > { %309 = vst [vmem:[%s8572_s29 + $0xd8] sm:$0xf] %v308_v54  ;;  %311 = vst [vmem:[%s8572_s29 + $0xdc] sm:$0xf] %v310_v55  ;;  %v312_v56 = vld [vmem:[%s8568_s28 + $0x380] sm:$0xf] }
  0x39   : > { %v314_v57 = vld [vmem:[%s8568_s28 + $0x390] sm:$0xf]  ;;  %v316_v58 = vld [vmem:[%s8568_s28 + $0x3a0] sm:$0xf]  ;;  %313 = vst [vmem:[%s8572_s29 + $0xe0] sm:$0xf] %v312_v56 }
  0x3a   : > { %315 = vst [vmem:[%s8572_s29 + $0xe4] sm:$0xf] %v314_v57  ;;  %317 = vst [vmem:[%s8572_s29 + $0xe8] sm:$0xf] %v316_v58  ;;  %v318_v59 = vld [vmem:[%s8568_s28 + $0x3b0] sm:$0xf] }
  0x3b   : > { %v320_v60 = vld [vmem:[%s8568_s28 + $0x3c0] sm:$0xf]  ;;  %v322_v61 = vld [vmem:[%s8568_s28 + $0x3d0] sm:$0xf]  ;;  %319 = vst [vmem:[%s8572_s29 + $0xec] sm:$0xf] %v318_v59 }
  0x3c   : > { %321 = vst [vmem:[%s8572_s29 + $0xf0] sm:$0xf] %v320_v60  ;;  %323 = vst [vmem:[%s8572_s29 + $0xf4] sm:$0xf] %v322_v61  ;;  %v324_v62 = vld [vmem:[%s8568_s28 + $0x3e0] sm:$0xf] }
  0x3d   : > { %v326_v63 = vld [vmem:[%s8568_s28 + $0x3f0] sm:$0xf]  ;;  %v328_v0 = vld [vmem:[%s8568_s28 + $0x400] sm:$0xf]  ;;  %325 = vst [vmem:[%s8572_s29 + $0xf8] sm:$0xf] %v324_v62 }
  0x3e   : > { %327 = vst [vmem:[%s8572_s29 + $0xfc] sm:$0xf] %v326_v63  ;;  %329 = vst [vmem:[%s8572_s29 + $0x100] sm:$0xf] %v328_v0  ;;  %v330_v1 = vld [vmem:[%s8568_s28 + $0x410] sm:$0xf] }
  0x3f   : > { %v332_v2 = vld [vmem:[%s8568_s28 + $0x420] sm:$0xf]  ;;  %v334_v3 = vld [vmem:[%s8568_s28 + $0x430] sm:$0xf]  ;;  %331 = vst [vmem:[%s8572_s29 + $0x104] sm:$0xf] %v330_v1 }
  0x40   : > { %333 = vst [vmem:[%s8572_s29 + $0x108] sm:$0xf] %v332_v2  ;;  %335 = vst [vmem:[%s8572_s29 + $0x10c] sm:$0xf] %v334_v3  ;;  %v336_v4 = vld [vmem:[%s8568_s28 + $0x440] sm:$0xf] }
  0x41   : > { %v338_v5 = vld [vmem:[%s8568_s28 + $0x450] sm:$0xf]  ;;  %v340_v6 = vld [vmem:[%s8568_s28 + $0x460] sm:$0xf]  ;;  %337 = vst [vmem:[%s8572_s29 + $0x110] sm:$0xf] %v336_v4 }
  0x42   : > { %339 = vst [vmem:[%s8572_s29 + $0x114] sm:$0xf] %v338_v5  ;;  %341 = vst [vmem:[%s8572_s29 + $0x118] sm:$0xf] %v340_v6  ;;  %v342_v7 = vld [vmem:[%s8568_s28 + $0x470] sm:$0xf] }
  0x43   : > { %v344_v8 = vld [vmem:[%s8568_s28 + $0x480] sm:$0xf]  ;;  %v346_v9 = vld [vmem:[%s8568_s28 + $0x490] sm:$0xf]  ;;  %343 = vst [vmem:[%s8572_s29 + $0x11c] sm:$0xf] %v342_v7 }
  0x44   : > { %345 = vst [vmem:[%s8572_s29 + $0x120] sm:$0xf] %v344_v8  ;;  %347 = vst [vmem:[%s8572_s29 + $0x124] sm:$0xf] %v346_v9  ;;  %v348_v10 = vld [vmem:[%s8568_s28 + $0x4a0] sm:$0xf] }
  0x45   : > { %v350_v11 = vld [vmem:[%s8568_s28 + $0x4b0] sm:$0xf]  ;;  %v352_v12 = vld [vmem:[%s8568_s28 + $0x4c0] sm:$0xf]  ;;  %349 = vst [vmem:[%s8572_s29 + $0x128] sm:$0xf] %v348_v10 }
  0x46   : > { %351 = vst [vmem:[%s8572_s29 + $0x12c] sm:$0xf] %v350_v11  ;;  %353 = vst [vmem:[%s8572_s29 + $0x130] sm:$0xf] %v352_v12  ;;  %v354_v13 = vld [vmem:[%s8568_s28 + $0x4d0] sm:$0xf] }
  0x47   : > { %v356_v14 = vld [vmem:[%s8568_s28 + $0x4e0] sm:$0xf]  ;;  %v358_v15 = vld [vmem:[%s8568_s28 + $0x4f0] sm:$0xf]  ;;  %355 = vst [vmem:[%s8572_s29 + $0x134] sm:$0xf] %v354_v13 }
  0x48   : > { %357 = vst [vmem:[%s8572_s29 + $0x138] sm:$0xf] %v356_v14  ;;  %359 = vst [vmem:[%s8572_s29 + $0x13c] sm:$0xf] %v358_v15  ;;  %v360_v16 = vld [vmem:[%s8568_s28 + $0x500] sm:$0xf] }
  0x49   : > { %v362_v17 = vld [vmem:[%s8568_s28 + $0x510] sm:$0xf]  ;;  %v364_v18 = vld [vmem:[%s8568_s28 + $0x520] sm:$0xf]  ;;  %361 = vst [vmem:[%s8572_s29 + $0x140] sm:$0xf] %v360_v16 }
  0x4a   : > { %363 = vst [vmem:[%s8572_s29 + $0x144] sm:$0xf] %v362_v17  ;;  %365 = vst [vmem:[%s8572_s29 + $0x148] sm:$0xf] %v364_v18  ;;  %v366_v19 = vld [vmem:[%s8568_s28 + $0x530] sm:$0xf] }
  0x4b   : > { %v368_v20 = vld [vmem:[%s8568_s28 + $0x540] sm:$0xf]  ;;  %v370_v21 = vld [vmem:[%s8568_s28 + $0x550] sm:$0xf]  ;;  %367 = vst [vmem:[%s8572_s29 + $0x14c] sm:$0xf] %v366_v19 }
  0x4c   : > { %369 = vst [vmem:[%s8572_s29 + $0x150] sm:$0xf] %v368_v20  ;;  %371 = vst [vmem:[%s8572_s29 + $0x154] sm:$0xf] %v370_v21  ;;  %v372_v22 = vld [vmem:[%s8568_s28 + $0x560] sm:$0xf] }
  0x4d   : > { %v374_v23 = vld [vmem:[%s8568_s28 + $0x570] sm:$0xf]  ;;  %v376_v24 = vld [vmem:[%s8568_s28 + $0x580] sm:$0xf]  ;;  %373 = vst [vmem:[%s8572_s29 + $0x158] sm:$0xf] %v372_v22 }
  0x4e   : > { %375 = vst [vmem:[%s8572_s29 + $0x15c] sm:$0xf] %v374_v23  ;;  %377 = vst [vmem:[%s8572_s29 + $0x160] sm:$0xf] %v376_v24  ;;  %v378_v25 = vld [vmem:[%s8568_s28 + $0x590] sm:$0xf] }
  0x4f   : > { %v380_v26 = vld [vmem:[%s8568_s28 + $0x5a0] sm:$0xf]  ;;  %v382_v27 = vld [vmem:[%s8568_s28 + $0x5b0] sm:$0xf]  ;;  %379 = vst [vmem:[%s8572_s29 + $0x164] sm:$0xf] %v378_v25 }
  0x50   : > { %381 = vst [vmem:[%s8572_s29 + $0x168] sm:$0xf] %v380_v26  ;;  %383 = vst [vmem:[%s8572_s29 + $0x16c] sm:$0xf] %v382_v27  ;;  %v384_v28 = vld [vmem:[%s8568_s28 + $0x5c0] sm:$0xf] }
  0x51   : > { %v386_v29 = vld [vmem:[%s8568_s28 + $0x5d0] sm:$0xf]  ;;  %v388_v30 = vld [vmem:[%s8568_s28 + $0x5e0] sm:$0xf]  ;;  %385 = vst [vmem:[%s8572_s29 + $0x170] sm:$0xf] %v384_v28 }
  0x52   : > { %387 = vst [vmem:[%s8572_s29 + $0x174] sm:$0xf] %v386_v29  ;;  %389 = vst [vmem:[%s8572_s29 + $0x178] sm:$0xf] %v388_v30  ;;  %v390_v31 = vld [vmem:[%s8568_s28 + $0x5f0] sm:$0xf] }
  0x53   : > { %v392_v32 = vld [vmem:[%s8568_s28 + $0x600] sm:$0xf]  ;;  %v394_v33 = vld [vmem:[%s8568_s28 + $0x610] sm:$0xf]  ;;  %391 = vst [vmem:[%s8572_s29 + $0x17c] sm:$0xf] %v390_v31 }
  0x54   : > { %393 = vst [vmem:[%s8572_s29 + $0x180] sm:$0xf] %v392_v32  ;;  %395 = vst [vmem:[%s8572_s29 + $0x184] sm:$0xf] %v394_v33  ;;  %v396_v34 = vld [vmem:[%s8568_s28 + $0x620] sm:$0xf] }
  0x55   : > { %v398_v35 = vld [vmem:[%s8568_s28 + $0x630] sm:$0xf]  ;;  %v400_v36 = vld [vmem:[%s8568_s28 + $0x640] sm:$0xf]  ;;  %397 = vst [vmem:[%s8572_s29 + $0x188] sm:$0xf] %v396_v34 }
  0x56   : > { %399 = vst [vmem:[%s8572_s29 + $0x18c] sm:$0xf] %v398_v35  ;;  %401 = vst [vmem:[%s8572_s29 + $0x190] sm:$0xf] %v400_v36  ;;  %v402_v37 = vld [vmem:[%s8568_s28 + $0x650] sm:$0xf] }
  0x57   : > { %v404_v38 = vld [vmem:[%s8568_s28 + $0x660] sm:$0xf]  ;;  %v406_v39 = vld [vmem:[%s8568_s28 + $0x670] sm:$0xf]  ;;  %403 = vst [vmem:[%s8572_s29 + $0x194] sm:$0xf] %v402_v37 }
  0x58   : > { %405 = vst [vmem:[%s8572_s29 + $0x198] sm:$0xf] %v404_v38  ;;  %407 = vst [vmem:[%s8572_s29 + $0x19c] sm:$0xf] %v406_v39  ;;  %v408_v40 = vld [vmem:[%s8568_s28 + $0x680] sm:$0xf] }
  0x59   : > { %v410_v41 = vld [vmem:[%s8568_s28 + $0x690] sm:$0xf]  ;;  %v412_v42 = vld [vmem:[%s8568_s28 + $0x6a0] sm:$0xf]  ;;  %409 = vst [vmem:[%s8572_s29 + $0x1a0] sm:$0xf] %v408_v40 }
  0x5a   : > { %411 = vst [vmem:[%s8572_s29 + $0x1a4] sm:$0xf] %v410_v41  ;;  %413 = vst [vmem:[%s8572_s29 + $0x1a8] sm:$0xf] %v412_v42  ;;  %v414_v43 = vld [vmem:[%s8568_s28 + $0x6b0] sm:$0xf] }
  0x5b   : > { %v416_v44 = vld [vmem:[%s8568_s28 + $0x6c0] sm:$0xf]  ;;  %v418_v45 = vld [vmem:[%s8568_s28 + $0x6d0] sm:$0xf]  ;;  %415 = vst [vmem:[%s8572_s29 + $0x1ac] sm:$0xf] %v414_v43 }
  0x5c   : > { %417 = vst [vmem:[%s8572_s29 + $0x1b0] sm:$0xf] %v416_v44  ;;  %419 = vst [vmem:[%s8572_s29 + $0x1b4] sm:$0xf] %v418_v45  ;;  %v420_v46 = vld [vmem:[%s8568_s28 + $0x6e0] sm:$0xf] }
  0x5d   : > { %v422_v47 = vld [vmem:[%s8568_s28 + $0x6f0] sm:$0xf]  ;;  %v424_v48 = vld [vmem:[%s8568_s28 + $0x700] sm:$0xf]  ;;  %421 = vst [vmem:[%s8572_s29 + $0x1b8] sm:$0xf] %v420_v46 }
  0x5e   : > { %423 = vst [vmem:[%s8572_s29 + $0x1bc] sm:$0xf] %v422_v47  ;;  %425 = vst [vmem:[%s8572_s29 + $0x1c0] sm:$0xf] %v424_v48  ;;  %v426_v49 = vld [vmem:[%s8568_s28 + $0x710] sm:$0xf] }
  0x5f   : > { %v428_v50 = vld [vmem:[%s8568_s28 + $0x720] sm:$0xf]  ;;  %v430_v51 = vld [vmem:[%s8568_s28 + $0x730] sm:$0xf]  ;;  %427 = vst [vmem:[%s8572_s29 + $0x1c4] sm:$0xf] %v426_v49 }
  0x60   : > { %429 = vst [vmem:[%s8572_s29 + $0x1c8] sm:$0xf] %v428_v50  ;;  %431 = vst [vmem:[%s8572_s29 + $0x1cc] sm:$0xf] %v430_v51  ;;  %v432_v52 = vld [vmem:[%s8568_s28 + $0x740] sm:$0xf] }
  0x61   : > { %v434_v53 = vld [vmem:[%s8568_s28 + $0x750] sm:$0xf]  ;;  %v436_v54 = vld [vmem:[%s8568_s28 + $0x760] sm:$0xf]  ;;  %433 = vst [vmem:[%s8572_s29 + $0x1d0] sm:$0xf] %v432_v52 }
  0x62   : > { %435 = vst [vmem:[%s8572_s29 + $0x1d4] sm:$0xf] %v434_v53  ;;  %437 = vst [vmem:[%s8572_s29 + $0x1d8] sm:$0xf] %v436_v54  ;;  %v438_v55 = vld [vmem:[%s8568_s28 + $0x770] sm:$0xf] }
  0x63   : > { %v440_v56 = vld [vmem:[%s8568_s28 + $0x780] sm:$0xf]  ;;  %v442_v57 = vld [vmem:[%s8568_s28 + $0x790] sm:$0xf]  ;;  %439 = vst [vmem:[%s8572_s29 + $0x1dc] sm:$0xf] %v438_v55 }
  0x64   : > { %441 = vst [vmem:[%s8572_s29 + $0x1e0] sm:$0xf] %v440_v56  ;;  %443 = vst [vmem:[%s8572_s29 + $0x1e4] sm:$0xf] %v442_v57  ;;  %v444_v58 = vld [vmem:[%s8568_s28 + $0x7a0] sm:$0xf] }
  0x65   : > { %v446_v59 = vld [vmem:[%s8568_s28 + $0x7b0] sm:$0xf]  ;;  %v448_v60 = vld [vmem:[%s8568_s28 + $0x7c0] sm:$0xf]  ;;  %445 = vst [vmem:[%s8572_s29 + $0x1e8] sm:$0xf] %v444_v58 }
  0x66   : > { %447 = vst [vmem:[%s8572_s29 + $0x1ec] sm:$0xf] %v446_v59  ;;  %449 = vst [vmem:[%s8572_s29 + $0x1f0] sm:$0xf] %v448_v60  ;;  %v450_v61 = vld [vmem:[%s8568_s28 + $0x7d0] sm:$0xf] }
  0x67   : > { %v452_v62 = vld [vmem:[%s8568_s28 + $0x7e0] sm:$0xf]  ;;  %v454_v63 = vld [vmem:[%s8568_s28 + $0x7f0] sm:$0xf]  ;;  %451 = vst [vmem:[%s8572_s29 + $0x1f4] sm:$0xf] %v450_v61 }
  0x68   : > { %453 = vst [vmem:[%s8572_s29 + $0x1f8] sm:$0xf] %v452_v62  ;;  %455 = vst [vmem:[%s8572_s29 + $0x1fc] sm:$0xf] %v454_v63  ;;  %v456_v0 = vld [vmem:[%s8568_s28 + $0x800] sm:$0xf] }
  0x69   : > { %v458_v1 = vld [vmem:[%s8568_s28 + $0x810] sm:$0xf]  ;;  %v460_v2 = vld [vmem:[%s8568_s28 + $0x820] sm:$0xf]  ;;  %457 = vst [vmem:[%s8572_s29 + $0x200] sm:$0xf] %v456_v0 }
  0x6a   : > { %459 = vst [vmem:[%s8572_s29 + $0x204] sm:$0xf] %v458_v1  ;;  %461 = vst [vmem:[%s8572_s29 + $0x208] sm:$0xf] %v460_v2  ;;  %v462_v3 = vld [vmem:[%s8568_s28 + $0x830] sm:$0xf] }
  0x6b   : > { %v464_v4 = vld [vmem:[%s8568_s28 + $0x840] sm:$0xf]  ;;  %v466_v5 = vld [vmem:[%s8568_s28 + $0x850] sm:$0xf]  ;;  %463 = vst [vmem:[%s8572_s29 + $0x20c] sm:$0xf] %v462_v3 }
  0x6c   : > { %465 = vst [vmem:[%s8572_s29 + $0x210] sm:$0xf] %v464_v4  ;;  %467 = vst [vmem:[%s8572_s29 + $0x214] sm:$0xf] %v466_v5  ;;  %v468_v6 = vld [vmem:[%s8568_s28 + $0x860] sm:$0xf] }
  0x6d   : > { %v470_v7 = vld [vmem:[%s8568_s28 + $0x870] sm:$0xf]  ;;  %v472_v8 = vld [vmem:[%s8568_s28 + $0x880] sm:$0xf]  ;;  %469 = vst [vmem:[%s8572_s29 + $0x218] sm:$0xf] %v468_v6 }
  0x6e   : > { %471 = vst [vmem:[%s8572_s29 + $0x21c] sm:$0xf] %v470_v7  ;;  %473 = vst [vmem:[%s8572_s29 + $0x220] sm:$0xf] %v472_v8  ;;  %v474_v9 = vld [vmem:[%s8568_s28 + $0x890] sm:$0xf] }
  0x6f   : > { %v476_v10 = vld [vmem:[%s8568_s28 + $0x8a0] sm:$0xf]  ;;  %v478_v11 = vld [vmem:[%s8568_s28 + $0x8b0] sm:$0xf]  ;;  %475 = vst [vmem:[%s8572_s29 + $0x224] sm:$0xf] %v474_v9 }
  0x70   : > { %477 = vst [vmem:[%s8572_s29 + $0x228] sm:$0xf] %v476_v10  ;;  %479 = vst [vmem:[%s8572_s29 + $0x22c] sm:$0xf] %v478_v11  ;;  %v480_v12 = vld [vmem:[%s8568_s28 + $0x8c0] sm:$0xf] }
  0x71   : > { %v482_v13 = vld [vmem:[%s8568_s28 + $0x8d0] sm:$0xf]  ;;  %v484_v14 = vld [vmem:[%s8568_s28 + $0x8e0] sm:$0xf]  ;;  %481 = vst [vmem:[%s8572_s29 + $0x230] sm:$0xf] %v480_v12 }
  0x72   : > { %483 = vst [vmem:[%s8572_s29 + $0x234] sm:$0xf] %v482_v13  ;;  %485 = vst [vmem:[%s8572_s29 + $0x238] sm:$0xf] %v484_v14  ;;  %v486_v15 = vld [vmem:[%s8568_s28 + $0x8f0] sm:$0xf] }
  0x73   : > { %v488_v16 = vld [vmem:[%s8568_s28 + $0x900] sm:$0xf]  ;;  %v490_v17 = vld [vmem:[%s8568_s28 + $0x910] sm:$0xf]  ;;  %487 = vst [vmem:[%s8572_s29 + $0x23c] sm:$0xf] %v486_v15 }
  0x74   : > { %489 = vst [vmem:[%s8572_s29 + $0x240] sm:$0xf] %v488_v16  ;;  %491 = vst [vmem:[%s8572_s29 + $0x244] sm:$0xf] %v490_v17  ;;  %v492_v18 = vld [vmem:[%s8568_s28 + $0x920] sm:$0xf] }
  0x75   : > { %v494_v19 = vld [vmem:[%s8568_s28 + $0x930] sm:$0xf]  ;;  %v496_v20 = vld [vmem:[%s8568_s28 + $0x940] sm:$0xf]  ;;  %493 = vst [vmem:[%s8572_s29 + $0x248] sm:$0xf] %v492_v18 }
  0x76   : > { %495 = vst [vmem:[%s8572_s29 + $0x24c] sm:$0xf] %v494_v19  ;;  %497 = vst [vmem:[%s8572_s29 + $0x250] sm:$0xf] %v496_v20  ;;  %v498_v21 = vld [vmem:[%s8568_s28 + $0x950] sm:$0xf] }
  0x77   : > { %v500_v22 = vld [vmem:[%s8568_s28 + $0x960] sm:$0xf]  ;;  %v502_v23 = vld [vmem:[%s8568_s28 + $0x970] sm:$0xf]  ;;  %499 = vst [vmem:[%s8572_s29 + $0x254] sm:$0xf] %v498_v21 }
  0x78   : > { %501 = vst [vmem:[%s8572_s29 + $0x258] sm:$0xf] %v500_v22  ;;  %503 = vst [vmem:[%s8572_s29 + $0x25c] sm:$0xf] %v502_v23  ;;  %v504_v24 = vld [vmem:[%s8568_s28 + $0x980] sm:$0xf] }
  0x79   : > { %v506_v25 = vld [vmem:[%s8568_s28 + $0x990] sm:$0xf]  ;;  %v508_v26 = vld [vmem:[%s8568_s28 + $0x9a0] sm:$0xf]  ;;  %505 = vst [vmem:[%s8572_s29 + $0x260] sm:$0xf] %v504_v24 }
  0x7a   : > { %507 = vst [vmem:[%s8572_s29 + $0x264] sm:$0xf] %v506_v25  ;;  %509 = vst [vmem:[%s8572_s29 + $0x268] sm:$0xf] %v508_v26  ;;  %v510_v27 = vld [vmem:[%s8568_s28 + $0x9b0] sm:$0xf] }
  0x7b   : > { %v512_v28 = vld [vmem:[%s8568_s28 + $0x9c0] sm:$0xf]  ;;  %v514_v29 = vld [vmem:[%s8568_s28 + $0x9d0] sm:$0xf]  ;;  %511 = vst [vmem:[%s8572_s29 + $0x26c] sm:$0xf] %v510_v27 }
  0x7c   : > { %513 = vst [vmem:[%s8572_s29 + $0x270] sm:$0xf] %v512_v28  ;;  %515 = vst [vmem:[%s8572_s29 + $0x274] sm:$0xf] %v514_v29  ;;  %v516_v30 = vld [vmem:[%s8568_s28 + $0x9e0] sm:$0xf] }
  0x7d   : > { %v518_v31 = vld [vmem:[%s8568_s28 + $0x9f0] sm:$0xf]  ;;  %v520_v32 = vld [vmem:[%s8568_s28 + $0xa00] sm:$0xf]  ;;  %517 = vst [vmem:[%s8572_s29 + $0x278] sm:$0xf] %v516_v30 }
  0x7e   : > { %519 = vst [vmem:[%s8572_s29 + $0x27c] sm:$0xf] %v518_v31  ;;  %521 = vst [vmem:[%s8572_s29 + $0x280] sm:$0xf] %v520_v32  ;;  %v522_v33 = vld [vmem:[%s8568_s28 + $0xa10] sm:$0xf] }
  0x7f   : > { %v524_v34 = vld [vmem:[%s8568_s28 + $0xa20] sm:$0xf]  ;;  %v526_v35 = vld [vmem:[%s8568_s28 + $0xa30] sm:$0xf]  ;;  %523 = vst [vmem:[%s8572_s29 + $0x284] sm:$0xf] %v522_v33 }
  0x80   : > { %525 = vst [vmem:[%s8572_s29 + $0x288] sm:$0xf] %v524_v34  ;;  %527 = vst [vmem:[%s8572_s29 + $0x28c] sm:$0xf] %v526_v35  ;;  %v528_v36 = vld [vmem:[%s8568_s28 + $0xa40] sm:$0xf] }
  0x81   : > { %v530_v37 = vld [vmem:[%s8568_s28 + $0xa50] sm:$0xf]  ;;  %v532_v38 = vld [vmem:[%s8568_s28 + $0xa60] sm:$0xf]  ;;  %529 = vst [vmem:[%s8572_s29 + $0x290] sm:$0xf] %v528_v36 }
  0x82   : > { %531 = vst [vmem:[%s8572_s29 + $0x294] sm:$0xf] %v530_v37  ;;  %533 = vst [vmem:[%s8572_s29 + $0x298] sm:$0xf] %v532_v38  ;;  %v534_v39 = vld [vmem:[%s8568_s28 + $0xa70] sm:$0xf] }
  0x83   : > { %v536_v40 = vld [vmem:[%s8568_s28 + $0xa80] sm:$0xf]  ;;  %v538_v41 = vld [vmem:[%s8568_s28 + $0xa90] sm:$0xf]  ;;  %535 = vst [vmem:[%s8572_s29 + $0x29c] sm:$0xf] %v534_v39 }
  0x84   : > { %537 = vst [vmem:[%s8572_s29 + $0x2a0] sm:$0xf] %v536_v40  ;;  %539 = vst [vmem:[%s8572_s29 + $0x2a4] sm:$0xf] %v538_v41  ;;  %v540_v42 = vld [vmem:[%s8568_s28 + $0xaa0] sm:$0xf] }
  0x85   : > { %v542_v43 = vld [vmem:[%s8568_s28 + $0xab0] sm:$0xf]  ;;  %v544_v44 = vld [vmem:[%s8568_s28 + $0xac0] sm:$0xf]  ;;  %541 = vst [vmem:[%s8572_s29 + $0x2a8] sm:$0xf] %v540_v42 }
  0x86   : > { %543 = vst [vmem:[%s8572_s29 + $0x2ac] sm:$0xf] %v542_v43  ;;  %545 = vst [vmem:[%s8572_s29 + $0x2b0] sm:$0xf] %v544_v44  ;;  %v546_v45 = vld [vmem:[%s8568_s28 + $0xad0] sm:$0xf] }
  0x87   : > { %v548_v46 = vld [vmem:[%s8568_s28 + $0xae0] sm:$0xf]  ;;  %v550_v47 = vld [vmem:[%s8568_s28 + $0xaf0] sm:$0xf]  ;;  %547 = vst [vmem:[%s8572_s29 + $0x2b4] sm:$0xf] %v546_v45 }
  0x88   : > { %549 = vst [vmem:[%s8572_s29 + $0x2b8] sm:$0xf] %v548_v46  ;;  %551 = vst [vmem:[%s8572_s29 + $0x2bc] sm:$0xf] %v550_v47  ;;  %v552_v48 = vld [vmem:[%s8568_s28 + $0xb00] sm:$0xf] }
  0x89   : > { %v554_v49 = vld [vmem:[%s8568_s28 + $0xb10] sm:$0xf]  ;;  %v556_v50 = vld [vmem:[%s8568_s28 + $0xb20] sm:$0xf]  ;;  %553 = vst [vmem:[%s8572_s29 + $0x2c0] sm:$0xf] %v552_v48 }
  0x8a   : > { %555 = vst [vmem:[%s8572_s29 + $0x2c4] sm:$0xf] %v554_v49  ;;  %557 = vst [vmem:[%s8572_s29 + $0x2c8] sm:$0xf] %v556_v50  ;;  %v558_v51 = vld [vmem:[%s8568_s28 + $0xb30] sm:$0xf] }
  0x8b   : > { %v560_v52 = vld [vmem:[%s8568_s28 + $0xb40] sm:$0xf]  ;;  %v562_v53 = vld [vmem:[%s8568_s28 + $0xb50] sm:$0xf]  ;;  %559 = vst [vmem:[%s8572_s29 + $0x2cc] sm:$0xf] %v558_v51 }
  0x8c   : > { %561 = vst [vmem:[%s8572_s29 + $0x2d0] sm:$0xf] %v560_v52  ;;  %563 = vst [vmem:[%s8572_s29 + $0x2d4] sm:$0xf] %v562_v53  ;;  %v564_v54 = vld [vmem:[%s8568_s28 + $0xb60] sm:$0xf] }
  0x8d   : > { %v566_v55 = vld [vmem:[%s8568_s28 + $0xb70] sm:$0xf]  ;;  %v568_v56 = vld [vmem:[%s8568_s28 + $0xb80] sm:$0xf]  ;;  %565 = vst [vmem:[%s8572_s29 + $0x2d8] sm:$0xf] %v564_v54 }
  0x8e   : > { %567 = vst [vmem:[%s8572_s29 + $0x2dc] sm:$0xf] %v566_v55  ;;  %569 = vst [vmem:[%s8572_s29 + $0x2e0] sm:$0xf] %v568_v56  ;;  %v570_v57 = vld [vmem:[%s8568_s28 + $0xb90] sm:$0xf] }
  0x8f   : > { %v572_v58 = vld [vmem:[%s8568_s28 + $0xba0] sm:$0xf]  ;;  %v574_v59 = vld [vmem:[%s8568_s28 + $0xbb0] sm:$0xf]  ;;  %571 = vst [vmem:[%s8572_s29 + $0x2e4] sm:$0xf] %v570_v57 }
  0x90   : > { %573 = vst [vmem:[%s8572_s29 + $0x2e8] sm:$0xf] %v572_v58  ;;  %575 = vst [vmem:[%s8572_s29 + $0x2ec] sm:$0xf] %v574_v59  ;;  %v576_v60 = vld [vmem:[%s8568_s28 + $0xbc0] sm:$0xf] }
  0x91   : > { %v578_v61 = vld [vmem:[%s8568_s28 + $0xbd0] sm:$0xf]  ;;  %v580_v62 = vld [vmem:[%s8568_s28 + $0xbe0] sm:$0xf]  ;;  %577 = vst [vmem:[%s8572_s29 + $0x2f0] sm:$0xf] %v576_v60 }
  0x92   : > { %579 = vst [vmem:[%s8572_s29 + $0x2f4] sm:$0xf] %v578_v61  ;;  %581 = vst [vmem:[%s8572_s29 + $0x2f8] sm:$0xf] %v580_v62  ;;  %v582_v63 = vld [vmem:[%s8568_s28 + $0xbf0] sm:$0xf] }
  0x93   : > { %v584_v0 = vld [vmem:[%s8568_s28 + $0xc00] sm:$0xf]  ;;  %v586_v1 = vld [vmem:[%s8568_s28 + $0xc10] sm:$0xf]  ;;  %583 = vst [vmem:[%s8572_s29 + $0x2fc] sm:$0xf] %v582_v63 }
  0x94   : > { %585 = vst [vmem:[%s8572_s29 + $0x300] sm:$0xf] %v584_v0  ;;  %587 = vst [vmem:[%s8572_s29 + $0x304] sm:$0xf] %v586_v1  ;;  %v588_v2 = vld [vmem:[%s8568_s28 + $0xc20] sm:$0xf] }
  0x95   : > { %v590_v3 = vld [vmem:[%s8568_s28 + $0xc30] sm:$0xf]  ;;  %v592_v4 = vld [vmem:[%s8568_s28 + $0xc40] sm:$0xf]  ;;  %589 = vst [vmem:[%s8572_s29 + $0x308] sm:$0xf] %v588_v2 }
  0x96   : > { %591 = vst [vmem:[%s8572_s29 + $0x30c] sm:$0xf] %v590_v3  ;;  %593 = vst [vmem:[%s8572_s29 + $0x310] sm:$0xf] %v592_v4  ;;  %v594_v5 = vld [vmem:[%s8568_s28 + $0xc50] sm:$0xf] }
  0x97   : > { %v596_v6 = vld [vmem:[%s8568_s28 + $0xc60] sm:$0xf]  ;;  %v598_v7 = vld [vmem:[%s8568_s28 + $0xc70] sm:$0xf]  ;;  %595 = vst [vmem:[%s8572_s29 + $0x314] sm:$0xf] %v594_v5 }
  0x98   : > { %597 = vst [vmem:[%s8572_s29 + $0x318] sm:$0xf] %v596_v6  ;;  %599 = vst [vmem:[%s8572_s29 + $0x31c] sm:$0xf] %v598_v7  ;;  %v600_v8 = vld [vmem:[%s8568_s28 + $0xc80] sm:$0xf] }
  0x99   : > { %v602_v9 = vld [vmem:[%s8568_s28 + $0xc90] sm:$0xf]  ;;  %v604_v10 = vld [vmem:[%s8568_s28 + $0xca0] sm:$0xf]  ;;  %601 = vst [vmem:[%s8572_s29 + $0x320] sm:$0xf] %v600_v8 }
  0x9a   : > { %603 = vst [vmem:[%s8572_s29 + $0x324] sm:$0xf] %v602_v9  ;;  %605 = vst [vmem:[%s8572_s29 + $0x328] sm:$0xf] %v604_v10  ;;  %v606_v11 = vld [vmem:[%s8568_s28 + $0xcb0] sm:$0xf] }
  0x9b   : > { %v608_v12 = vld [vmem:[%s8568_s28 + $0xcc0] sm:$0xf]  ;;  %v610_v13 = vld [vmem:[%s8568_s28 + $0xcd0] sm:$0xf]  ;;  %607 = vst [vmem:[%s8572_s29 + $0x32c] sm:$0xf] %v606_v11 }
  0x9c   : > { %609 = vst [vmem:[%s8572_s29 + $0x330] sm:$0xf] %v608_v12  ;;  %611 = vst [vmem:[%s8572_s29 + $0x334] sm:$0xf] %v610_v13  ;;  %v612_v14 = vld [vmem:[%s8568_s28 + $0xce0] sm:$0xf] }
  0x9d   : > { %v614_v15 = vld [vmem:[%s8568_s28 + $0xcf0] sm:$0xf]  ;;  %v616_v16 = vld [vmem:[%s8568_s28 + $0xd00] sm:$0xf]  ;;  %613 = vst [vmem:[%s8572_s29 + $0x338] sm:$0xf] %v612_v14 }
  0x9e   : > { %615 = vst [vmem:[%s8572_s29 + $0x33c] sm:$0xf] %v614_v15  ;;  %617 = vst [vmem:[%s8572_s29 + $0x340] sm:$0xf] %v616_v16  ;;  %v618_v17 = vld [vmem:[%s8568_s28 + $0xd10] sm:$0xf] }
  0x9f   : > { %v620_v18 = vld [vmem:[%s8568_s28 + $0xd20] sm:$0xf]  ;;  %v622_v19 = vld [vmem:[%s8568_s28 + $0xd30] sm:$0xf]  ;;  %619 = vst [vmem:[%s8572_s29 + $0x344] sm:$0xf] %v618_v17 }
  0xa0   : > { %621 = vst [vmem:[%s8572_s29 + $0x348] sm:$0xf] %v620_v18  ;;  %623 = vst [vmem:[%s8572_s29 + $0x34c] sm:$0xf] %v622_v19  ;;  %v624_v20 = vld [vmem:[%s8568_s28 + $0xd40] sm:$0xf] }
  0xa1   : > { %v626_v21 = vld [vmem:[%s8568_s28 + $0xd50] sm:$0xf]  ;;  %v628_v22 = vld [vmem:[%s8568_s28 + $0xd60] sm:$0xf]  ;;  %625 = vst [vmem:[%s8572_s29 + $0x350] sm:$0xf] %v624_v20 }
  0xa2   : > { %627 = vst [vmem:[%s8572_s29 + $0x354] sm:$0xf] %v626_v21  ;;  %629 = vst [vmem:[%s8572_s29 + $0x358] sm:$0xf] %v628_v22  ;;  %v630_v23 = vld [vmem:[%s8568_s28 + $0xd70] sm:$0xf] }
  0xa3   : > { %v632_v24 = vld [vmem:[%s8568_s28 + $0xd80] sm:$0xf]  ;;  %v634_v25 = vld [vmem:[%s8568_s28 + $0xd90] sm:$0xf]  ;;  %631 = vst [vmem:[%s8572_s29 + $0x35c] sm:$0xf] %v630_v23 }
  0xa4   : > { %633 = vst [vmem:[%s8572_s29 + $0x360] sm:$0xf] %v632_v24  ;;  %635 = vst [vmem:[%s8572_s29 + $0x364] sm:$0xf] %v634_v25  ;;  %v636_v26 = vld [vmem:[%s8568_s28 + $0xda0] sm:$0xf] }
  0xa5   : > { %v638_v27 = vld [vmem:[%s8568_s28 + $0xdb0] sm:$0xf]  ;;  %v640_v28 = vld [vmem:[%s8568_s28 + $0xdc0] sm:$0xf]  ;;  %637 = vst [vmem:[%s8572_s29 + $0x368] sm:$0xf] %v636_v26 }
  0xa6   : > { %639 = vst [vmem:[%s8572_s29 + $0x36c] sm:$0xf] %v638_v27  ;;  %641 = vst [vmem:[%s8572_s29 + $0x370] sm:$0xf] %v640_v28  ;;  %v642_v29 = vld [vmem:[%s8568_s28 + $0xdd0] sm:$0xf] }
  0xa7   : > { %v644_v30 = vld [vmem:[%s8568_s28 + $0xde0] sm:$0xf]  ;;  %v646_v31 = vld [vmem:[%s8568_s28 + $0xdf0] sm:$0xf]  ;;  %643 = vst [vmem:[%s8572_s29 + $0x374] sm:$0xf] %v642_v29 }
  0xa8   : > { %645 = vst [vmem:[%s8572_s29 + $0x378] sm:$0xf] %v644_v30  ;;  %647 = vst [vmem:[%s8572_s29 + $0x37c] sm:$0xf] %v646_v31  ;;  %v648_v32 = vld [vmem:[%s8568_s28 + $0xe00] sm:$0xf] }
  0xa9   : > { %v650_v33 = vld [vmem:[%s8568_s28 + $0xe10] sm:$0xf]  ;;  %v652_v34 = vld [vmem:[%s8568_s28 + $0xe20] sm:$0xf]  ;;  %649 = vst [vmem:[%s8572_s29 + $0x380] sm:$0xf] %v648_v32 }
  0xaa   : > { %651 = vst [vmem:[%s8572_s29 + $0x384] sm:$0xf] %v650_v33  ;;  %653 = vst [vmem:[%s8572_s29 + $0x388] sm:$0xf] %v652_v34  ;;  %v654_v35 = vld [vmem:[%s8568_s28 + $0xe30] sm:$0xf] }
  0xab   : > { %v656_v36 = vld [vmem:[%s8568_s28 + $0xe40] sm:$0xf]  ;;  %v658_v37 = vld [vmem:[%s8568_s28 + $0xe50] sm:$0xf]  ;;  %655 = vst [vmem:[%s8572_s29 + $0x38c] sm:$0xf] %v654_v35 }
  0xac   : > { %657 = vst [vmem:[%s8572_s29 + $0x390] sm:$0xf] %v656_v36  ;;  %659 = vst [vmem:[%s8572_s29 + $0x394] sm:$0xf] %v658_v37  ;;  %v660_v38 = vld [vmem:[%s8568_s28 + $0xe60] sm:$0xf] }
  0xad   : > { %v662_v39 = vld [vmem:[%s8568_s28 + $0xe70] sm:$0xf]  ;;  %v664_v40 = vld [vmem:[%s8568_s28 + $0xe80] sm:$0xf]  ;;  %661 = vst [vmem:[%s8572_s29 + $0x398] sm:$0xf] %v660_v38 }
  0xae   : > { %663 = vst [vmem:[%s8572_s29 + $0x39c] sm:$0xf] %v662_v39  ;;  %665 = vst [vmem:[%s8572_s29 + $0x3a0] sm:$0xf] %v664_v40  ;;  %v666_v41 = vld [vmem:[%s8568_s28 + $0xe90] sm:$0xf] }
  0xaf   : > { %v668_v42 = vld [vmem:[%s8568_s28 + $0xea0] sm:$0xf]  ;;  %v670_v43 = vld [vmem:[%s8568_s28 + $0xeb0] sm:$0xf]  ;;  %667 = vst [vmem:[%s8572_s29 + $0x3a4] sm:$0xf] %v666_v41 }
  0xb0   : > { %669 = vst [vmem:[%s8572_s29 + $0x3a8] sm:$0xf] %v668_v42  ;;  %671 = vst [vmem:[%s8572_s29 + $0x3ac] sm:$0xf] %v670_v43  ;;  %v672_v44 = vld [vmem:[%s8568_s28 + $0xec0] sm:$0xf] }
  0xb1   : > { %v674_v45 = vld [vmem:[%s8568_s28 + $0xed0] sm:$0xf]  ;;  %v676_v46 = vld [vmem:[%s8568_s28 + $0xee0] sm:$0xf]  ;;  %673 = vst [vmem:[%s8572_s29 + $0x3b0] sm:$0xf] %v672_v44 }
  0xb2   : > { %675 = vst [vmem:[%s8572_s29 + $0x3b4] sm:$0xf] %v674_v45  ;;  %677 = vst [vmem:[%s8572_s29 + $0x3b8] sm:$0xf] %v676_v46  ;;  %v678_v47 = vld [vmem:[%s8568_s28 + $0xef0] sm:$0xf] }
  0xb3   : > { %v680_v48 = vld [vmem:[%s8568_s28 + $0xf00] sm:$0xf]  ;;  %v682_v49 = vld [vmem:[%s8568_s28 + $0xf10] sm:$0xf]  ;;  %679 = vst [vmem:[%s8572_s29 + $0x3bc] sm:$0xf] %v678_v47 }
  0xb4   : > { %681 = vst [vmem:[%s8572_s29 + $0x3c0] sm:$0xf] %v680_v48  ;;  %683 = vst [vmem:[%s8572_s29 + $0x3c4] sm:$0xf] %v682_v49  ;;  %v684_v50 = vld [vmem:[%s8568_s28 + $0xf20] sm:$0xf] }
  0xb5   : > { %v686_v51 = vld [vmem:[%s8568_s28 + $0xf30] sm:$0xf]  ;;  %v688_v52 = vld [vmem:[%s8568_s28 + $0xf40] sm:$0xf]  ;;  %685 = vst [vmem:[%s8572_s29 + $0x3c8] sm:$0xf] %v684_v50 }
  0xb6   : > { %687 = vst [vmem:[%s8572_s29 + $0x3cc] sm:$0xf] %v686_v51  ;;  %689 = vst [vmem:[%s8572_s29 + $0x3d0] sm:$0xf] %v688_v52  ;;  %v690_v53 = vld [vmem:[%s8568_s28 + $0xf50] sm:$0xf] }
  0xb7   : > { %v692_v54 = vld [vmem:[%s8568_s28 + $0xf60] sm:$0xf]  ;;  %v694_v55 = vld [vmem:[%s8568_s28 + $0xf70] sm:$0xf]  ;;  %691 = vst [vmem:[%s8572_s29 + $0x3d4] sm:$0xf] %v690_v53 }
  0xb8   : > { %693 = vst [vmem:[%s8572_s29 + $0x3d8] sm:$0xf] %v692_v54  ;;  %695 = vst [vmem:[%s8572_s29 + $0x3dc] sm:$0xf] %v694_v55  ;;  %v696_v56 = vld [vmem:[%s8568_s28 + $0xf80] sm:$0xf] }
  0xb9   : > { %v698_v57 = vld [vmem:[%s8568_s28 + $0xf90] sm:$0xf]  ;;  %v700_v58 = vld [vmem:[%s8568_s28 + $0xfa0] sm:$0xf]  ;;  %697 = vst [vmem:[%s8572_s29 + $0x3e0] sm:$0xf] %v696_v56 }
  0xba   : > { %699 = vst [vmem:[%s8572_s29 + $0x3e4] sm:$0xf] %v698_v57  ;;  %701 = vst [vmem:[%s8572_s29 + $0x3e8] sm:$0xf] %v700_v58  ;;  %v702_v59 = vld [vmem:[%s8568_s28 + $0xfb0] sm:$0xf] }
  0xbb   : > { %v704_v60 = vld [vmem:[%s8568_s28 + $0xfc0] sm:$0xf]  ;;  %v706_v61 = vld [vmem:[%s8568_s28 + $0xfd0] sm:$0xf]  ;;  %703 = vst [vmem:[%s8572_s29 + $0x3ec] sm:$0xf] %v702_v59 }
  0xbc   : > { %705 = vst [vmem:[%s8572_s29 + $0x3f0] sm:$0xf] %v704_v60  ;;  %707 = vst [vmem:[%s8572_s29 + $0x3f4] sm:$0xf] %v706_v61  ;;  %v708_v62 = vld [vmem:[%s8568_s28 + $0xfe0] sm:$0xf] }
  0xbd   : > { %v710_v63 = vld [vmem:[%s8568_s28 + $0xff0] sm:$0xf]  ;;  %v712_v0 = vld [vmem:[%s8568_s28 + $0x1000] sm:$0xf]  ;;  %709 = vst [vmem:[%s8572_s29 + $0x3f8] sm:$0xf] %v708_v62 }
  0xbe   : > { %711 = vst [vmem:[%s8572_s29 + $0x3fc] sm:$0xf] %v710_v63  ;;  %713 = vst [vmem:[%s8572_s29 + $0x400] sm:$0xf] %v712_v0  ;;  %v714_v1 = vld [vmem:[%s8568_s28 + $0x1010] sm:$0xf] }
  0xbf   : > { %v716_v2 = vld [vmem:[%s8568_s28 + $0x1020] sm:$0xf]  ;;  %v718_v3 = vld [vmem:[%s8568_s28 + $0x1030] sm:$0xf]  ;;  %715 = vst [vmem:[%s8572_s29 + $0x404] sm:$0xf] %v714_v1 }
  0xc0   : > { %717 = vst [vmem:[%s8572_s29 + $0x408] sm:$0xf] %v716_v2  ;;  %719 = vst [vmem:[%s8572_s29 + $0x40c] sm:$0xf] %v718_v3  ;;  %v720_v4 = vld [vmem:[%s8568_s28 + $0x1040] sm:$0xf] }
  0xc1   : > { %v722_v5 = vld [vmem:[%s8568_s28 + $0x1050] sm:$0xf]  ;;  %v724_v6 = vld [vmem:[%s8568_s28 + $0x1060] sm:$0xf]  ;;  %721 = vst [vmem:[%s8572_s29 + $0x410] sm:$0xf] %v720_v4 }
  0xc2   : > { %723 = vst [vmem:[%s8572_s29 + $0x414] sm:$0xf] %v722_v5  ;;  %725 = vst [vmem:[%s8572_s29 + $0x418] sm:$0xf] %v724_v6  ;;  %v726_v7 = vld [vmem:[%s8568_s28 + $0x1070] sm:$0xf] }
  0xc3   : > { %v728_v8 = vld [vmem:[%s8568_s28 + $0x1080] sm:$0xf]  ;;  %v730_v9 = vld [vmem:[%s8568_s28 + $0x1090] sm:$0xf]  ;;  %727 = vst [vmem:[%s8572_s29 + $0x41c] sm:$0xf] %v726_v7 }
  0xc4   : > { %729 = vst [vmem:[%s8572_s29 + $0x420] sm:$0xf] %v728_v8  ;;  %731 = vst [vmem:[%s8572_s29 + $0x424] sm:$0xf] %v730_v9  ;;  %v732_v10 = vld [vmem:[%s8568_s28 + $0x10a0] sm:$0xf] }
  0xc5   : > { %v734_v11 = vld [vmem:[%s8568_s28 + $0x10b0] sm:$0xf]  ;;  %v736_v12 = vld [vmem:[%s8568_s28 + $0x10c0] sm:$0xf]  ;;  %733 = vst [vmem:[%s8572_s29 + $0x428] sm:$0xf] %v732_v10 }
  0xc6   : > { %735 = vst [vmem:[%s8572_s29 + $0x42c] sm:$0xf] %v734_v11  ;;  %737 = vst [vmem:[%s8572_s29 + $0x430] sm:$0xf] %v736_v12  ;;  %v738_v13 = vld [vmem:[%s8568_s28 + $0x10d0] sm:$0xf] }
  0xc7   : > { %v740_v14 = vld [vmem:[%s8568_s28 + $0x10e0] sm:$0xf]  ;;  %v742_v15 = vld [vmem:[%s8568_s28 + $0x10f0] sm:$0xf]  ;;  %739 = vst [vmem:[%s8572_s29 + $0x434] sm:$0xf] %v738_v13 }
  0xc8   : > { %741 = vst [vmem:[%s8572_s29 + $0x438] sm:$0xf] %v740_v14  ;;  %743 = vst [vmem:[%s8572_s29 + $0x43c] sm:$0xf] %v742_v15  ;;  %v744_v16 = vld [vmem:[%s8568_s28 + $0x1100] sm:$0xf] }
  0xc9   : > { %v746_v17 = vld [vmem:[%s8568_s28 + $0x1110] sm:$0xf]  ;;  %v748_v18 = vld [vmem:[%s8568_s28 + $0x1120] sm:$0xf]  ;;  %745 = vst [vmem:[%s8572_s29 + $0x440] sm:$0xf] %v744_v16 }
  0xca   : > { %747 = vst [vmem:[%s8572_s29 + $0x444] sm:$0xf] %v746_v17  ;;  %749 = vst [vmem:[%s8572_s29 + $0x448] sm:$0xf] %v748_v18  ;;  %v750_v19 = vld [vmem:[%s8568_s28 + $0x1130] sm:$0xf] }
  0xcb   : > { %v752_v20 = vld [vmem:[%s8568_s28 + $0x1140] sm:$0xf]  ;;  %v754_v21 = vld [vmem:[%s8568_s28 + $0x1150] sm:$0xf]  ;;  %751 = vst [vmem:[%s8572_s29 + $0x44c] sm:$0xf] %v750_v19 }
  0xcc   : > { %753 = vst [vmem:[%s8572_s29 + $0x450] sm:$0xf] %v752_v20  ;;  %755 = vst [vmem:[%s8572_s29 + $0x454] sm:$0xf] %v754_v21  ;;  %v756_v22 = vld [vmem:[%s8568_s28 + $0x1160] sm:$0xf] }
  0xcd   : > { %v758_v23 = vld [vmem:[%s8568_s28 + $0x1170] sm:$0xf]  ;;  %v760_v24 = vld [vmem:[%s8568_s28 + $0x1180] sm:$0xf]  ;;  %757 = vst [vmem:[%s8572_s29 + $0x458] sm:$0xf] %v756_v22 }
  0xce   : > { %759 = vst [vmem:[%s8572_s29 + $0x45c] sm:$0xf] %v758_v23  ;;  %761 = vst [vmem:[%s8572_s29 + $0x460] sm:$0xf] %v760_v24  ;;  %v762_v25 = vld [vmem:[%s8568_s28 + $0x1190] sm:$0xf] }
  0xcf   : > { %v764_v26 = vld [vmem:[%s8568_s28 + $0x11a0] sm:$0xf]  ;;  %v766_v27 = vld [vmem:[%s8568_s28 + $0x11b0] sm:$0xf]  ;;  %763 = vst [vmem:[%s8572_s29 + $0x464] sm:$0xf] %v762_v25 }
  0xd0   : > { %765 = vst [vmem:[%s8572_s29 + $0x468] sm:$0xf] %v764_v26  ;;  %767 = vst [vmem:[%s8572_s29 + $0x46c] sm:$0xf] %v766_v27  ;;  %v768_v28 = vld [vmem:[%s8568_s28 + $0x11c0] sm:$0xf] }
  0xd1   : > { %v770_v29 = vld [vmem:[%s8568_s28 + $0x11d0] sm:$0xf]  ;;  %v772_v30 = vld [vmem:[%s8568_s28 + $0x11e0] sm:$0xf]  ;;  %769 = vst [vmem:[%s8572_s29 + $0x470] sm:$0xf] %v768_v28 }
  0xd2   : > { %771 = vst [vmem:[%s8572_s29 + $0x474] sm:$0xf] %v770_v29  ;;  %773 = vst [vmem:[%s8572_s29 + $0x478] sm:$0xf] %v772_v30  ;;  %v774_v31 = vld [vmem:[%s8568_s28 + $0x11f0] sm:$0xf] }
  0xd3   : > { %v776_v32 = vld [vmem:[%s8568_s28 + $0x1200] sm:$0xf]  ;;  %v778_v33 = vld [vmem:[%s8568_s28 + $0x1210] sm:$0xf]  ;;  %775 = vst [vmem:[%s8572_s29 + $0x47c] sm:$0xf] %v774_v31 }
  0xd4   : > { %777 = vst [vmem:[%s8572_s29 + $0x480] sm:$0xf] %v776_v32  ;;  %779 = vst [vmem:[%s8572_s29 + $0x484] sm:$0xf] %v778_v33  ;;  %v780_v34 = vld [vmem:[%s8568_s28 + $0x1220] sm:$0xf] }
  0xd5   : > { %v782_v35 = vld [vmem:[%s8568_s28 + $0x1230] sm:$0xf]  ;;  %v784_v36 = vld [vmem:[%s8568_s28 + $0x1240] sm:$0xf]  ;;  %781 = vst [vmem:[%s8572_s29 + $0x488] sm:$0xf] %v780_v34 }
  0xd6   : > { %783 = vst [vmem:[%s8572_s29 + $0x48c] sm:$0xf] %v782_v35  ;;  %785 = vst [vmem:[%s8572_s29 + $0x490] sm:$0xf] %v784_v36  ;;  %v786_v37 = vld [vmem:[%s8568_s28 + $0x1250] sm:$0xf] }
  0xd7   : > { %v788_v38 = vld [vmem:[%s8568_s28 + $0x1260] sm:$0xf]  ;;  %v790_v39 = vld [vmem:[%s8568_s28 + $0x1270] sm:$0xf]  ;;  %787 = vst [vmem:[%s8572_s29 + $0x494] sm:$0xf] %v786_v37 }
  0xd8   : > { %789 = vst [vmem:[%s8572_s29 + $0x498] sm:$0xf] %v788_v38  ;;  %791 = vst [vmem:[%s8572_s29 + $0x49c] sm:$0xf] %v790_v39  ;;  %v792_v40 = vld [vmem:[%s8568_s28 + $0x1280] sm:$0xf] }
  0xd9   : > { %v794_v41 = vld [vmem:[%s8568_s28 + $0x1290] sm:$0xf]  ;;  %v796_v42 = vld [vmem:[%s8568_s28 + $0x12a0] sm:$0xf]  ;;  %793 = vst [vmem:[%s8572_s29 + $0x4a0] sm:$0xf] %v792_v40 }
  0xda   : > { %795 = vst [vmem:[%s8572_s29 + $0x4a4] sm:$0xf] %v794_v41  ;;  %797 = vst [vmem:[%s8572_s29 + $0x4a8] sm:$0xf] %v796_v42  ;;  %v798_v43 = vld [vmem:[%s8568_s28 + $0x12b0] sm:$0xf] }
  0xdb   : > { %v800_v44 = vld [vmem:[%s8568_s28 + $0x12c0] sm:$0xf]  ;;  %v802_v45 = vld [vmem:[%s8568_s28 + $0x12d0] sm:$0xf]  ;;  %799 = vst [vmem:[%s8572_s29 + $0x4ac] sm:$0xf] %v798_v43 }
  0xdc   : > { %801 = vst [vmem:[%s8572_s29 + $0x4b0] sm:$0xf] %v800_v44  ;;  %803 = vst [vmem:[%s8572_s29 + $0x4b4] sm:$0xf] %v802_v45  ;;  %v804_v46 = vld [vmem:[%s8568_s28 + $0x12e0] sm:$0xf] }
  0xdd   : > { %v806_v47 = vld [vmem:[%s8568_s28 + $0x12f0] sm:$0xf]  ;;  %v808_v48 = vld [vmem:[%s8568_s28 + $0x1300] sm:$0xf]  ;;  %805 = vst [vmem:[%s8572_s29 + $0x4b8] sm:$0xf] %v804_v46 }
  0xde   : > { %807 = vst [vmem:[%s8572_s29 + $0x4bc] sm:$0xf] %v806_v47  ;;  %809 = vst [vmem:[%s8572_s29 + $0x4c0] sm:$0xf] %v808_v48  ;;  %v810_v49 = vld [vmem:[%s8568_s28 + $0x1310] sm:$0xf] }
  0xdf   : > { %v812_v50 = vld [vmem:[%s8568_s28 + $0x1320] sm:$0xf]  ;;  %v814_v51 = vld [vmem:[%s8568_s28 + $0x1330] sm:$0xf]  ;;  %811 = vst [vmem:[%s8572_s29 + $0x4c4] sm:$0xf] %v810_v49 }
  0xe0   : > { %813 = vst [vmem:[%s8572_s29 + $0x4c8] sm:$0xf] %v812_v50  ;;  %815 = vst [vmem:[%s8572_s29 + $0x4cc] sm:$0xf] %v814_v51  ;;  %v816_v52 = vld [vmem:[%s8568_s28 + $0x1340] sm:$0xf] }
  0xe1   : > { %v818_v53 = vld [vmem:[%s8568_s28 + $0x1350] sm:$0xf]  ;;  %v820_v54 = vld [vmem:[%s8568_s28 + $0x1360] sm:$0xf]  ;;  %817 = vst [vmem:[%s8572_s29 + $0x4d0] sm:$0xf] %v816_v52 }
  0xe2   : > { %819 = vst [vmem:[%s8572_s29 + $0x4d4] sm:$0xf] %v818_v53  ;;  %821 = vst [vmem:[%s8572_s29 + $0x4d8] sm:$0xf] %v820_v54  ;;  %v822_v55 = vld [vmem:[%s8568_s28 + $0x1370] sm:$0xf] }
  0xe3   : > { %v824_v56 = vld [vmem:[%s8568_s28 + $0x1380] sm:$0xf]  ;;  %v826_v57 = vld [vmem:[%s8568_s28 + $0x1390] sm:$0xf]  ;;  %823 = vst [vmem:[%s8572_s29 + $0x4dc] sm:$0xf] %v822_v55 }
  0xe4   : > { %825 = vst [vmem:[%s8572_s29 + $0x4e0] sm:$0xf] %v824_v56  ;;  %827 = vst [vmem:[%s8572_s29 + $0x4e4] sm:$0xf] %v826_v57  ;;  %v828_v58 = vld [vmem:[%s8568_s28 + $0x13a0] sm:$0xf] }
  0xe5   : > { %v830_v59 = vld [vmem:[%s8568_s28 + $0x13b0] sm:$0xf]  ;;  %v832_v60 = vld [vmem:[%s8568_s28 + $0x13c0] sm:$0xf]  ;;  %829 = vst [vmem:[%s8572_s29 + $0x4e8] sm:$0xf] %v828_v58 }
  0xe6   : > { %831 = vst [vmem:[%s8572_s29 + $0x4ec] sm:$0xf] %v830_v59  ;;  %833 = vst [vmem:[%s8572_s29 + $0x4f0] sm:$0xf] %v832_v60  ;;  %v834_v61 = vld [vmem:[%s8568_s28 + $0x13d0] sm:$0xf] }
  0xe7   : > { %v836_v62 = vld [vmem:[%s8568_s28 + $0x13e0] sm:$0xf]  ;;  %v838_v63 = vld [vmem:[%s8568_s28 + $0x13f0] sm:$0xf]  ;;  %835 = vst [vmem:[%s8572_s29 + $0x4f4] sm:$0xf] %v834_v61 }
  0xe8   : > { %837 = vst [vmem:[%s8572_s29 + $0x4f8] sm:$0xf] %v836_v62  ;;  %839 = vst [vmem:[%s8572_s29 + $0x4fc] sm:$0xf] %v838_v63  ;;  %v840_v0 = vld [vmem:[%s8568_s28 + $0x1400] sm:$0xf] }
  0xe9   : > { %v842_v1 = vld [vmem:[%s8568_s28 + $0x1410] sm:$0xf]  ;;  %v844_v2 = vld [vmem:[%s8568_s28 + $0x1420] sm:$0xf]  ;;  %841 = vst [vmem:[%s8572_s29 + $0x500] sm:$0xf] %v840_v0 }
  0xea   : > { %843 = vst [vmem:[%s8572_s29 + $0x504] sm:$0xf] %v842_v1  ;;  %845 = vst [vmem:[%s8572_s29 + $0x508] sm:$0xf] %v844_v2  ;;  %v846_v3 = vld [vmem:[%s8568_s28 + $0x1430] sm:$0xf] }
  0xeb   : > { %v848_v4 = vld [vmem:[%s8568_s28 + $0x1440] sm:$0xf]  ;;  %v850_v5 = vld [vmem:[%s8568_s28 + $0x1450] sm:$0xf]  ;;  %847 = vst [vmem:[%s8572_s29 + $0x50c] sm:$0xf] %v846_v3 }
  0xec   : > { %849 = vst [vmem:[%s8572_s29 + $0x510] sm:$0xf] %v848_v4  ;;  %851 = vst [vmem:[%s8572_s29 + $0x514] sm:$0xf] %v850_v5  ;;  %v852_v6 = vld [vmem:[%s8568_s28 + $0x1460] sm:$0xf] }
  0xed   : > { %v854_v7 = vld [vmem:[%s8568_s28 + $0x1470] sm:$0xf]  ;;  %v856_v8 = vld [vmem:[%s8568_s28 + $0x1480] sm:$0xf]  ;;  %853 = vst [vmem:[%s8572_s29 + $0x518] sm:$0xf] %v852_v6 }
  0xee   : > { %855 = vst [vmem:[%s8572_s29 + $0x51c] sm:$0xf] %v854_v7  ;;  %857 = vst [vmem:[%s8572_s29 + $0x520] sm:$0xf] %v856_v8  ;;  %v858_v9 = vld [vmem:[%s8568_s28 + $0x1490] sm:$0xf] }
  0xef   : > { %v860_v10 = vld [vmem:[%s8568_s28 + $0x14a0] sm:$0xf]  ;;  %v862_v11 = vld [vmem:[%s8568_s28 + $0x14b0] sm:$0xf]  ;;  %859 = vst [vmem:[%s8572_s29 + $0x524] sm:$0xf] %v858_v9 }
  0xf0   : > { %861 = vst [vmem:[%s8572_s29 + $0x528] sm:$0xf] %v860_v10  ;;  %863 = vst [vmem:[%s8572_s29 + $0x52c] sm:$0xf] %v862_v11  ;;  %v864_v12 = vld [vmem:[%s8568_s28 + $0x14c0] sm:$0xf] }
  0xf1   : > { %v866_v13 = vld [vmem:[%s8568_s28 + $0x14d0] sm:$0xf]  ;;  %v868_v14 = vld [vmem:[%s8568_s28 + $0x14e0] sm:$0xf]  ;;  %865 = vst [vmem:[%s8572_s29 + $0x530] sm:$0xf] %v864_v12 }
  0xf2   : > { %867 = vst [vmem:[%s8572_s29 + $0x534] sm:$0xf] %v866_v13  ;;  %869 = vst [vmem:[%s8572_s29 + $0x538] sm:$0xf] %v868_v14  ;;  %v870_v15 = vld [vmem:[%s8568_s28 + $0x14f0] sm:$0xf] }
  0xf3   : > { %v872_v16 = vld [vmem:[%s8568_s28 + $0x1500] sm:$0xf]  ;;  %v874_v17 = vld [vmem:[%s8568_s28 + $0x1510] sm:$0xf]  ;;  %871 = vst [vmem:[%s8572_s29 + $0x53c] sm:$0xf] %v870_v15 }
  0xf4   : > { %873 = vst [vmem:[%s8572_s29 + $0x540] sm:$0xf] %v872_v16  ;;  %875 = vst [vmem:[%s8572_s29 + $0x544] sm:$0xf] %v874_v17  ;;  %v876_v18 = vld [vmem:[%s8568_s28 + $0x1520] sm:$0xf] }
  0xf5   : > { %v878_v19 = vld [vmem:[%s8568_s28 + $0x1530] sm:$0xf]  ;;  %v880_v20 = vld [vmem:[%s8568_s28 + $0x1540] sm:$0xf]  ;;  %877 = vst [vmem:[%s8572_s29 + $0x548] sm:$0xf] %v876_v18 }
  0xf6   : > { %879 = vst [vmem:[%s8572_s29 + $0x54c] sm:$0xf] %v878_v19  ;;  %881 = vst [vmem:[%s8572_s29 + $0x550] sm:$0xf] %v880_v20  ;;  %v882_v21 = vld [vmem:[%s8568_s28 + $0x1550] sm:$0xf] }
  0xf7   : > { %v884_v22 = vld [vmem:[%s8568_s28 + $0x1560] sm:$0xf]  ;;  %v886_v23 = vld [vmem:[%s8568_s28 + $0x1570] sm:$0xf]  ;;  %883 = vst [vmem:[%s8572_s29 + $0x554] sm:$0xf] %v882_v21 }
  0xf8   : > { %885 = vst [vmem:[%s8572_s29 + $0x558] sm:$0xf] %v884_v22  ;;  %887 = vst [vmem:[%s8572_s29 + $0x55c] sm:$0xf] %v886_v23  ;;  %v888_v24 = vld [vmem:[%s8568_s28 + $0x1580] sm:$0xf] }
  0xf9   : > { %v890_v25 = vld [vmem:[%s8568_s28 + $0x1590] sm:$0xf]  ;;  %v892_v26 = vld [vmem:[%s8568_s28 + $0x15a0] sm:$0xf]  ;;  %889 = vst [vmem:[%s8572_s29 + $0x560] sm:$0xf] %v888_v24 }
  0xfa   : > { %891 = vst [vmem:[%s8572_s29 + $0x564] sm:$0xf] %v890_v25  ;;  %893 = vst [vmem:[%s8572_s29 + $0x568] sm:$0xf] %v892_v26  ;;  %v894_v27 = vld [vmem:[%s8568_s28 + $0x15b0] sm:$0xf] }
  0xfb   : > { %v896_v28 = vld [vmem:[%s8568_s28 + $0x15c0] sm:$0xf]  ;;  %v898_v29 = vld [vmem:[%s8568_s28 + $0x15d0] sm:$0xf]  ;;  %895 = vst [vmem:[%s8572_s29 + $0x56c] sm:$0xf] %v894_v27 }
  0xfc   : > { %897 = vst [vmem:[%s8572_s29 + $0x570] sm:$0xf] %v896_v28  ;;  %899 = vst [vmem:[%s8572_s29 + $0x574] sm:$0xf] %v898_v29  ;;  %v900_v30 = vld [vmem:[%s8568_s28 + $0x15e0] sm:$0xf] }
  0xfd   : > { %v902_v31 = vld [vmem:[%s8568_s28 + $0x15f0] sm:$0xf]  ;;  %v904_v32 = vld [vmem:[%s8568_s28 + $0x1600] sm:$0xf]  ;;  %901 = vst [vmem:[%s8572_s29 + $0x578] sm:$0xf] %v900_v30 }
  0xfe   : > { %903 = vst [vmem:[%s8572_s29 + $0x57c] sm:$0xf] %v902_v31  ;;  %905 = vst [vmem:[%s8572_s29 + $0x580] sm:$0xf] %v904_v32  ;;  %v906_v33 = vld [vmem:[%s8568_s28 + $0x1610] sm:$0xf] }
  0xff   : > { %v908_v34 = vld [vmem:[%s8568_s28 + $0x1620] sm:$0xf]  ;;  %v910_v35 = vld [vmem:[%s8568_s28 + $0x1630] sm:$0xf]  ;;  %907 = vst [vmem:[%s8572_s29 + $0x584] sm:$0xf] %v906_v33 }
 0x100   : > { %909 = vst [vmem:[%s8572_s29 + $0x588] sm:$0xf] %v908_v34  ;;  %911 = vst [vmem:[%s8572_s29 + $0x58c] sm:$0xf] %v910_v35  ;;  %v912_v36 = vld [vmem:[%s8568_s28 + $0x1640] sm:$0xf] }
 0x101   : > { %v914_v37 = vld [vmem:[%s8568_s28 + $0x1650] sm:$0xf]  ;;  %v916_v38 = vld [vmem:[%s8568_s28 + $0x1660] sm:$0xf]  ;;  %913 = vst [vmem:[%s8572_s29 + $0x590] sm:$0xf] %v912_v36 }
 0x102   : > { %915 = vst [vmem:[%s8572_s29 + $0x594] sm:$0xf] %v914_v37  ;;  %917 = vst [vmem:[%s8572_s29 + $0x598] sm:$0xf] %v916_v38  ;;  %v918_v39 = vld [vmem:[%s8568_s28 + $0x1670] sm:$0xf] }
 0x103   : > { %v920_v40 = vld [vmem:[%s8568_s28 + $0x1680] sm:$0xf]  ;;  %v922_v41 = vld [vmem:[%s8568_s28 + $0x1690] sm:$0xf]  ;;  %919 = vst [vmem:[%s8572_s29 + $0x59c] sm:$0xf] %v918_v39 }
 0x104   : > { %921 = vst [vmem:[%s8572_s29 + $0x5a0] sm:$0xf] %v920_v40  ;;  %923 = vst [vmem:[%s8572_s29 + $0x5a4] sm:$0xf] %v922_v41  ;;  %v924_v42 = vld [vmem:[%s8568_s28 + $0x16a0] sm:$0xf] }
 0x105   : > { %v926_v43 = vld [vmem:[%s8568_s28 + $0x16b0] sm:$0xf]  ;;  %v928_v44 = vld [vmem:[%s8568_s28 + $0x16c0] sm:$0xf]  ;;  %925 = vst [vmem:[%s8572_s29 + $0x5a8] sm:$0xf] %v924_v42 }
 0x106   : > { %927 = vst [vmem:[%s8572_s29 + $0x5ac] sm:$0xf] %v926_v43  ;;  %929 = vst [vmem:[%s8572_s29 + $0x5b0] sm:$0xf] %v928_v44  ;;  %v930_v45 = vld [vmem:[%s8568_s28 + $0x16d0] sm:$0xf] }
 0x107   : > { %v932_v46 = vld [vmem:[%s8568_s28 + $0x16e0] sm:$0xf]  ;;  %v934_v47 = vld [vmem:[%s8568_s28 + $0x16f0] sm:$0xf]  ;;  %931 = vst [vmem:[%s8572_s29 + $0x5b4] sm:$0xf] %v930_v45 }
 0x108   : > { %933 = vst [vmem:[%s8572_s29 + $0x5b8] sm:$0xf] %v932_v46  ;;  %935 = vst [vmem:[%s8572_s29 + $0x5bc] sm:$0xf] %v934_v47  ;;  %v936_v48 = vld [vmem:[%s8568_s28 + $0x1700] sm:$0xf] }
 0x109   : > { %v938_v49 = vld [vmem:[%s8568_s28 + $0x1710] sm:$0xf]  ;;  %v940_v50 = vld [vmem:[%s8568_s28 + $0x1720] sm:$0xf]  ;;  %937 = vst [vmem:[%s8572_s29 + $0x5c0] sm:$0xf] %v936_v48 }
 0x10a   : > { %939 = vst [vmem:[%s8572_s29 + $0x5c4] sm:$0xf] %v938_v49  ;;  %941 = vst [vmem:[%s8572_s29 + $0x5c8] sm:$0xf] %v940_v50  ;;  %v942_v51 = vld [vmem:[%s8568_s28 + $0x1730] sm:$0xf] }
 0x10b   : > { %v944_v52 = vld [vmem:[%s8568_s28 + $0x1740] sm:$0xf]  ;;  %v946_v53 = vld [vmem:[%s8568_s28 + $0x1750] sm:$0xf]  ;;  %943 = vst [vmem:[%s8572_s29 + $0x5cc] sm:$0xf] %v942_v51 }
 0x10c   : > { %945 = vst [vmem:[%s8572_s29 + $0x5d0] sm:$0xf] %v944_v52  ;;  %947 = vst [vmem:[%s8572_s29 + $0x5d4] sm:$0xf] %v946_v53  ;;  %v948_v54 = vld [vmem:[%s8568_s28 + $0x1760] sm:$0xf] }
 0x10d   : > { %v950_v55 = vld [vmem:[%s8568_s28 + $0x1770] sm:$0xf]  ;;  %v952_v56 = vld [vmem:[%s8568_s28 + $0x1780] sm:$0xf]  ;;  %949 = vst [vmem:[%s8572_s29 + $0x5d8] sm:$0xf] %v948_v54 }
 0x10e   : > { %951 = vst [vmem:[%s8572_s29 + $0x5dc] sm:$0xf] %v950_v55  ;;  %953 = vst [vmem:[%s8572_s29 + $0x5e0] sm:$0xf] %v952_v56  ;;  %v954_v57 = vld [vmem:[%s8568_s28 + $0x1790] sm:$0xf] }
 0x10f   : > { %v956_v58 = vld [vmem:[%s8568_s28 + $0x17a0] sm:$0xf]  ;;  %v958_v59 = vld [vmem:[%s8568_s28 + $0x17b0] sm:$0xf]  ;;  %955 = vst [vmem:[%s8572_s29 + $0x5e4] sm:$0xf] %v954_v57 }
 0x110   : > { %957 = vst [vmem:[%s8572_s29 + $0x5e8] sm:$0xf] %v956_v58  ;;  %959 = vst [vmem:[%s8572_s29 + $0x5ec] sm:$0xf] %v958_v59  ;;  %v960_v60 = vld [vmem:[%s8568_s28 + $0x17c0] sm:$0xf] }
 0x111   : > { %v962_v61 = vld [vmem:[%s8568_s28 + $0x17d0] sm:$0xf]  ;;  %v964_v62 = vld [vmem:[%s8568_s28 + $0x17e0] sm:$0xf]  ;;  %961 = vst [vmem:[%s8572_s29 + $0x5f0] sm:$0xf] %v960_v60 }
 0x112   : > { %963 = vst [vmem:[%s8572_s29 + $0x5f4] sm:$0xf] %v962_v61  ;;  %965 = vst [vmem:[%s8572_s29 + $0x5f8] sm:$0xf] %v964_v62  ;;  %v966_v63 = vld [vmem:[%s8568_s28 + $0x17f0] sm:$0xf] }
 0x113   : > { %v968_v0 = vld [vmem:[%s8568_s28 + $0x1800] sm:$0xf]  ;;  %v970_v1 = vld [vmem:[%s8568_s28 + $0x1810] sm:$0xf]  ;;  %967 = vst [vmem:[%s8572_s29 + $0x5fc] sm:$0xf] %v966_v63 }
 0x114   : > { %969 = vst [vmem:[%s8572_s29 + $0x600] sm:$0xf] %v968_v0  ;;  %971 = vst [vmem:[%s8572_s29 + $0x604] sm:$0xf] %v970_v1  ;;  %v972_v2 = vld [vmem:[%s8568_s28 + $0x1820] sm:$0xf] }
 0x115   : > { %v974_v3 = vld [vmem:[%s8568_s28 + $0x1830] sm:$0xf]  ;;  %v976_v4 = vld [vmem:[%s8568_s28 + $0x1840] sm:$0xf]  ;;  %973 = vst [vmem:[%s8572_s29 + $0x608] sm:$0xf] %v972_v2 }
 0x116   : > { %975 = vst [vmem:[%s8572_s29 + $0x60c] sm:$0xf] %v974_v3  ;;  %977 = vst [vmem:[%s8572_s29 + $0x610] sm:$0xf] %v976_v4  ;;  %v978_v5 = vld [vmem:[%s8568_s28 + $0x1850] sm:$0xf] }
 0x117   : > { %v980_v6 = vld [vmem:[%s8568_s28 + $0x1860] sm:$0xf]  ;;  %v982_v7 = vld [vmem:[%s8568_s28 + $0x1870] sm:$0xf]  ;;  %979 = vst [vmem:[%s8572_s29 + $0x614] sm:$0xf] %v978_v5 }
 0x118   : > { %981 = vst [vmem:[%s8572_s29 + $0x618] sm:$0xf] %v980_v6  ;;  %983 = vst [vmem:[%s8572_s29 + $0x61c] sm:$0xf] %v982_v7  ;;  %v984_v8 = vld [vmem:[%s8568_s28 + $0x1880] sm:$0xf] }
 0x119   : > { %v986_v9 = vld [vmem:[%s8568_s28 + $0x1890] sm:$0xf]  ;;  %v988_v10 = vld [vmem:[%s8568_s28 + $0x18a0] sm:$0xf]  ;;  %985 = vst [vmem:[%s8572_s29 + $0x620] sm:$0xf] %v984_v8 }
 0x11a   : > { %987 = vst [vmem:[%s8572_s29 + $0x624] sm:$0xf] %v986_v9  ;;  %989 = vst [vmem:[%s8572_s29 + $0x628] sm:$0xf] %v988_v10  ;;  %v990_v11 = vld [vmem:[%s8568_s28 + $0x18b0] sm:$0xf] }
 0x11b   : > { %v992_v12 = vld [vmem:[%s8568_s28 + $0x18c0] sm:$0xf]  ;;  %v994_v13 = vld [vmem:[%s8568_s28 + $0x18d0] sm:$0xf]  ;;  %991 = vst [vmem:[%s8572_s29 + $0x62c] sm:$0xf] %v990_v11 }
 0x11c   : > { %993 = vst [vmem:[%s8572_s29 + $0x630] sm:$0xf] %v992_v12  ;;  %995 = vst [vmem:[%s8572_s29 + $0x634] sm:$0xf] %v994_v13  ;;  %v996_v14 = vld [vmem:[%s8568_s28 + $0x18e0] sm:$0xf] }
 0x11d   : > { %v998_v15 = vld [vmem:[%s8568_s28 + $0x18f0] sm:$0xf]  ;;  %v1000_v16 = vld [vmem:[%s8568_s28 + $0x1900] sm:$0xf]  ;;  %997 = vst [vmem:[%s8572_s29 + $0x638] sm:$0xf] %v996_v14 }
 0x11e   : > { %999 = vst [vmem:[%s8572_s29 + $0x63c] sm:$0xf] %v998_v15  ;;  %1001 = vst [vmem:[%s8572_s29 + $0x640] sm:$0xf] %v1000_v16  ;;  %v1002_v17 = vld [vmem:[%s8568_s28 + $0x1910] sm:$0xf] }
 0x11f   : > { %v1004_v18 = vld [vmem:[%s8568_s28 + $0x1920] sm:$0xf]  ;;  %v1006_v19 = vld [vmem:[%s8568_s28 + $0x1930] sm:$0xf]  ;;  %1003 = vst [vmem:[%s8572_s29 + $0x644] sm:$0xf] %v1002_v17 }
 0x120   : > { %1005 = vst [vmem:[%s8572_s29 + $0x648] sm:$0xf] %v1004_v18  ;;  %1007 = vst [vmem:[%s8572_s29 + $0x64c] sm:$0xf] %v1006_v19  ;;  %v1008_v20 = vld [vmem:[%s8568_s28 + $0x1940] sm:$0xf] }
 0x121   : > { %v1010_v21 = vld [vmem:[%s8568_s28 + $0x1950] sm:$0xf]  ;;  %v1012_v22 = vld [vmem:[%s8568_s28 + $0x1960] sm:$0xf]  ;;  %1009 = vst [vmem:[%s8572_s29 + $0x650] sm:$0xf] %v1008_v20 }
 0x122   : > { %1011 = vst [vmem:[%s8572_s29 + $0x654] sm:$0xf] %v1010_v21  ;;  %1013 = vst [vmem:[%s8572_s29 + $0x658] sm:$0xf] %v1012_v22  ;;  %v1014_v23 = vld [vmem:[%s8568_s28 + $0x1970] sm:$0xf] }
 0x123   : > { %v1016_v24 = vld [vmem:[%s8568_s28 + $0x1980] sm:$0xf]  ;;  %v1018_v25 = vld [vmem:[%s8568_s28 + $0x1990] sm:$0xf]  ;;  %1015 = vst [vmem:[%s8572_s29 + $0x65c] sm:$0xf] %v1014_v23 }
 0x124   : > { %1017 = vst [vmem:[%s8572_s29 + $0x660] sm:$0xf] %v1016_v24  ;;  %1019 = vst [vmem:[%s8572_s29 + $0x664] sm:$0xf] %v1018_v25  ;;  %v1020_v26 = vld [vmem:[%s8568_s28 + $0x19a0] sm:$0xf] }
 0x125   : > { %v1022_v27 = vld [vmem:[%s8568_s28 + $0x19b0] sm:$0xf]  ;;  %v1024_v28 = vld [vmem:[%s8568_s28 + $0x19c0] sm:$0xf]  ;;  %1021 = vst [vmem:[%s8572_s29 + $0x668] sm:$0xf] %v1020_v26 }
 0x126   : > { %1023 = vst [vmem:[%s8572_s29 + $0x66c] sm:$0xf] %v1022_v27  ;;  %1025 = vst [vmem:[%s8572_s29 + $0x670] sm:$0xf] %v1024_v28  ;;  %v1026_v29 = vld [vmem:[%s8568_s28 + $0x19d0] sm:$0xf] }
 0x127   : > { %v1028_v30 = vld [vmem:[%s8568_s28 + $0x19e0] sm:$0xf]  ;;  %v1030_v31 = vld [vmem:[%s8568_s28 + $0x19f0] sm:$0xf]  ;;  %1027 = vst [vmem:[%s8572_s29 + $0x674] sm:$0xf] %v1026_v29 }
 0x128   : > { %1029 = vst [vmem:[%s8572_s29 + $0x678] sm:$0xf] %v1028_v30  ;;  %1031 = vst [vmem:[%s8572_s29 + $0x67c] sm:$0xf] %v1030_v31  ;;  %v1032_v32 = vld [vmem:[%s8568_s28 + $0x1a00] sm:$0xf] }
 0x129   : > { %v1034_v33 = vld [vmem:[%s8568_s28 + $0x1a10] sm:$0xf]  ;;  %v1036_v34 = vld [vmem:[%s8568_s28 + $0x1a20] sm:$0xf]  ;;  %1033 = vst [vmem:[%s8572_s29 + $0x680] sm:$0xf] %v1032_v32 }
 0x12a   : > { %1035 = vst [vmem:[%s8572_s29 + $0x684] sm:$0xf] %v1034_v33  ;;  %1037 = vst [vmem:[%s8572_s29 + $0x688] sm:$0xf] %v1036_v34  ;;  %v1038_v35 = vld [vmem:[%s8568_s28 + $0x1a30] sm:$0xf] }
 0x12b   : > { %v1040_v36 = vld [vmem:[%s8568_s28 + $0x1a40] sm:$0xf]  ;;  %v1042_v37 = vld [vmem:[%s8568_s28 + $0x1a50] sm:$0xf]  ;;  %1039 = vst [vmem:[%s8572_s29 + $0x68c] sm:$0xf] %v1038_v35 }
 0x12c   : > { %1041 = vst [vmem:[%s8572_s29 + $0x690] sm:$0xf] %v1040_v36  ;;  %1043 = vst [vmem:[%s8572_s29 + $0x694] sm:$0xf] %v1042_v37  ;;  %v1044_v38 = vld [vmem:[%s8568_s28 + $0x1a60] sm:$0xf] }
 0x12d   : > { %v1046_v39 = vld [vmem:[%s8568_s28 + $0x1a70] sm:$0xf]  ;;  %v1048_v40 = vld [vmem:[%s8568_s28 + $0x1a80] sm:$0xf]  ;;  %1045 = vst [vmem:[%s8572_s29 + $0x698] sm:$0xf] %v1044_v38 }
 0x12e   : > { %1047 = vst [vmem:[%s8572_s29 + $0x69c] sm:$0xf] %v1046_v39  ;;  %1049 = vst [vmem:[%s8572_s29 + $0x6a0] sm:$0xf] %v1048_v40  ;;  %v1050_v41 = vld [vmem:[%s8568_s28 + $0x1a90] sm:$0xf] }
 0x12f   : > { %v1052_v42 = vld [vmem:[%s8568_s28 + $0x1aa0] sm:$0xf]  ;;  %v1054_v43 = vld [vmem:[%s8568_s28 + $0x1ab0] sm:$0xf]  ;;  %1051 = vst [vmem:[%s8572_s29 + $0x6a4] sm:$0xf] %v1050_v41 }
 0x130   : > { %1053 = vst [vmem:[%s8572_s29 + $0x6a8] sm:$0xf] %v1052_v42  ;;  %1055 = vst [vmem:[%s8572_s29 + $0x6ac] sm:$0xf] %v1054_v43  ;;  %v1056_v44 = vld [vmem:[%s8568_s28 + $0x1ac0] sm:$0xf] }
 0x131   : > { %v1058_v45 = vld [vmem:[%s8568_s28 + $0x1ad0] sm:$0xf]  ;;  %v1060_v46 = vld [vmem:[%s8568_s28 + $0x1ae0] sm:$0xf]  ;;  %1057 = vst [vmem:[%s8572_s29 + $0x6b0] sm:$0xf] %v1056_v44 }
 0x132   : > { %1059 = vst [vmem:[%s8572_s29 + $0x6b4] sm:$0xf] %v1058_v45  ;;  %1061 = vst [vmem:[%s8572_s29 + $0x6b8] sm:$0xf] %v1060_v46  ;;  %v1062_v47 = vld [vmem:[%s8568_s28 + $0x1af0] sm:$0xf] }
 0x133   : > { %v1064_v48 = vld [vmem:[%s8568_s28 + $0x1b00] sm:$0xf]  ;;  %v1066_v49 = vld [vmem:[%s8568_s28 + $0x1b10] sm:$0xf]  ;;  %1063 = vst [vmem:[%s8572_s29 + $0x6bc] sm:$0xf] %v1062_v47 }
 0x134   : > { %1065 = vst [vmem:[%s8572_s29 + $0x6c0] sm:$0xf] %v1064_v48  ;;  %1067 = vst [vmem:[%s8572_s29 + $0x6c4] sm:$0xf] %v1066_v49  ;;  %v1068_v50 = vld [vmem:[%s8568_s28 + $0x1b20] sm:$0xf] }
 0x135   : > { %v1070_v51 = vld [vmem:[%s8568_s28 + $0x1b30] sm:$0xf]  ;;  %v1072_v52 = vld [vmem:[%s8568_s28 + $0x1b40] sm:$0xf]  ;;  %1069 = vst [vmem:[%s8572_s29 + $0x6c8] sm:$0xf] %v1068_v50 }
 0x136   : > { %1071 = vst [vmem:[%s8572_s29 + $0x6cc] sm:$0xf] %v1070_v51  ;;  %1073 = vst [vmem:[%s8572_s29 + $0x6d0] sm:$0xf] %v1072_v52  ;;  %v1074_v53 = vld [vmem:[%s8568_s28 + $0x1b50] sm:$0xf] }
 0x137   : > { %v1076_v54 = vld [vmem:[%s8568_s28 + $0x1b60] sm:$0xf]  ;;  %v1078_v55 = vld [vmem:[%s8568_s28 + $0x1b70] sm:$0xf]  ;;  %1075 = vst [vmem:[%s8572_s29 + $0x6d4] sm:$0xf] %v1074_v53 }
 0x138   : > { %1077 = vst [vmem:[%s8572_s29 + $0x6d8] sm:$0xf] %v1076_v54  ;;  %1079 = vst [vmem:[%s8572_s29 + $0x6dc] sm:$0xf] %v1078_v55  ;;  %v1080_v56 = vld [vmem:[%s8568_s28 + $0x1b80] sm:$0xf] }
 0x139   : > { %v1082_v57 = vld [vmem:[%s8568_s28 + $0x1b90] sm:$0xf]  ;;  %v1084_v58 = vld [vmem:[%s8568_s28 + $0x1ba0] sm:$0xf]  ;;  %1081 = vst [vmem:[%s8572_s29 + $0x6e0] sm:$0xf] %v1080_v56 }
 0x13a   : > { %1083 = vst [vmem:[%s8572_s29 + $0x6e4] sm:$0xf] %v1082_v57  ;;  %1085 = vst [vmem:[%s8572_s29 + $0x6e8] sm:$0xf] %v1084_v58  ;;  %v1086_v59 = vld [vmem:[%s8568_s28 + $0x1bb0] sm:$0xf] }
 0x13b   : > { %v1088_v60 = vld [vmem:[%s8568_s28 + $0x1bc0] sm:$0xf]  ;;  %v1090_v61 = vld [vmem:[%s8568_s28 + $0x1bd0] sm:$0xf]  ;;  %1087 = vst [vmem:[%s8572_s29 + $0x6ec] sm:$0xf] %v1086_v59 }
 0x13c   : > { %1089 = vst [vmem:[%s8572_s29 + $0x6f0] sm:$0xf] %v1088_v60  ;;  %1091 = vst [vmem:[%s8572_s29 + $0x6f4] sm:$0xf] %v1090_v61  ;;  %v1092_v62 = vld [vmem:[%s8568_s28 + $0x1be0] sm:$0xf] }
 0x13d   : > { %v1094_v63 = vld [vmem:[%s8568_s28 + $0x1bf0] sm:$0xf]  ;;  %v1096_v0 = vld [vmem:[%s8568_s28 + $0x1c00] sm:$0xf]  ;;  %1093 = vst [vmem:[%s8572_s29 + $0x6f8] sm:$0xf] %v1092_v62 }
 0x13e   : > { %1095 = vst [vmem:[%s8572_s29 + $0x6fc] sm:$0xf] %v1094_v63  ;;  %1097 = vst [vmem:[%s8572_s29 + $0x700] sm:$0xf] %v1096_v0  ;;  %v1098_v1 = vld [vmem:[%s8568_s28 + $0x1c10] sm:$0xf] }
 0x13f   : > { %v1100_v2 = vld [vmem:[%s8568_s28 + $0x1c20] sm:$0xf]  ;;  %v1102_v3 = vld [vmem:[%s8568_s28 + $0x1c30] sm:$0xf]  ;;  %1099 = vst [vmem:[%s8572_s29 + $0x704] sm:$0xf] %v1098_v1 }
 0x140   : > { %1101 = vst [vmem:[%s8572_s29 + $0x708] sm:$0xf] %v1100_v2  ;;  %1103 = vst [vmem:[%s8572_s29 + $0x70c] sm:$0xf] %v1102_v3  ;;  %v1104_v4 = vld [vmem:[%s8568_s28 + $0x1c40] sm:$0xf] }
 0x141   : > { %v1106_v5 = vld [vmem:[%s8568_s28 + $0x1c50] sm:$0xf]  ;;  %v1108_v6 = vld [vmem:[%s8568_s28 + $0x1c60] sm:$0xf]  ;;  %1105 = vst [vmem:[%s8572_s29 + $0x710] sm:$0xf] %v1104_v4 }
 0x142   : > { %1107 = vst [vmem:[%s8572_s29 + $0x714] sm:$0xf] %v1106_v5  ;;  %1109 = vst [vmem:[%s8572_s29 + $0x718] sm:$0xf] %v1108_v6  ;;  %v1110_v7 = vld [vmem:[%s8568_s28 + $0x1c70] sm:$0xf] }
 0x143   : > { %v1112_v8 = vld [vmem:[%s8568_s28 + $0x1c80] sm:$0xf]  ;;  %v1114_v9 = vld [vmem:[%s8568_s28 + $0x1c90] sm:$0xf]  ;;  %1111 = vst [vmem:[%s8572_s29 + $0x71c] sm:$0xf] %v1110_v7 }
 0x144   : > { %1113 = vst [vmem:[%s8572_s29 + $0x720] sm:$0xf] %v1112_v8  ;;  %1115 = vst [vmem:[%s8572_s29 + $0x724] sm:$0xf] %v1114_v9  ;;  %v1116_v10 = vld [vmem:[%s8568_s28 + $0x1ca0] sm:$0xf] }
 0x145   : > { %v1118_v11 = vld [vmem:[%s8568_s28 + $0x1cb0] sm:$0xf]  ;;  %v1120_v12 = vld [vmem:[%s8568_s28 + $0x1cc0] sm:$0xf]  ;;  %1117 = vst [vmem:[%s8572_s29 + $0x728] sm:$0xf] %v1116_v10 }
 0x146   : > { %1119 = vst [vmem:[%s8572_s29 + $0x72c] sm:$0xf] %v1118_v11  ;;  %1121 = vst [vmem:[%s8572_s29 + $0x730] sm:$0xf] %v1120_v12  ;;  %v1122_v13 = vld [vmem:[%s8568_s28 + $0x1cd0] sm:$0xf] }
 0x147   : > { %v1124_v14 = vld [vmem:[%s8568_s28 + $0x1ce0] sm:$0xf]  ;;  %v1126_v15 = vld [vmem:[%s8568_s28 + $0x1cf0] sm:$0xf]  ;;  %1123 = vst [vmem:[%s8572_s29 + $0x734] sm:$0xf] %v1122_v13 }
 0x148   : > { %1125 = vst [vmem:[%s8572_s29 + $0x738] sm:$0xf] %v1124_v14  ;;  %1127 = vst [vmem:[%s8572_s29 + $0x73c] sm:$0xf] %v1126_v15  ;;  %v1128_v16 = vld [vmem:[%s8568_s28 + $0x1d00] sm:$0xf] }
 0x149   : > { %v1130_v17 = vld [vmem:[%s8568_s28 + $0x1d10] sm:$0xf]  ;;  %v1132_v18 = vld [vmem:[%s8568_s28 + $0x1d20] sm:$0xf]  ;;  %1129 = vst [vmem:[%s8572_s29 + $0x740] sm:$0xf] %v1128_v16 }
 0x14a   : > { %1131 = vst [vmem:[%s8572_s29 + $0x744] sm:$0xf] %v1130_v17  ;;  %1133 = vst [vmem:[%s8572_s29 + $0x748] sm:$0xf] %v1132_v18  ;;  %v1134_v19 = vld [vmem:[%s8568_s28 + $0x1d30] sm:$0xf] }
 0x14b   : > { %v1136_v20 = vld [vmem:[%s8568_s28 + $0x1d40] sm:$0xf]  ;;  %v1138_v21 = vld [vmem:[%s8568_s28 + $0x1d50] sm:$0xf]  ;;  %1135 = vst [vmem:[%s8572_s29 + $0x74c] sm:$0xf] %v1134_v19 }
 0x14c   : > { %1137 = vst [vmem:[%s8572_s29 + $0x750] sm:$0xf] %v1136_v20  ;;  %1139 = vst [vmem:[%s8572_s29 + $0x754] sm:$0xf] %v1138_v21  ;;  %v1140_v22 = vld [vmem:[%s8568_s28 + $0x1d60] sm:$0xf] }
 0x14d   : > { %v1142_v23 = vld [vmem:[%s8568_s28 + $0x1d70] sm:$0xf]  ;;  %v1144_v24 = vld [vmem:[%s8568_s28 + $0x1d80] sm:$0xf]  ;;  %1141 = vst [vmem:[%s8572_s29 + $0x758] sm:$0xf] %v1140_v22 }
 0x14e   : > { %1143 = vst [vmem:[%s8572_s29 + $0x75c] sm:$0xf] %v1142_v23  ;;  %1145 = vst [vmem:[%s8572_s29 + $0x760] sm:$0xf] %v1144_v24  ;;  %v1146_v25 = vld [vmem:[%s8568_s28 + $0x1d90] sm:$0xf] }
 0x14f   : > { %v1148_v26 = vld [vmem:[%s8568_s28 + $0x1da0] sm:$0xf]  ;;  %v1150_v27 = vld [vmem:[%s8568_s28 + $0x1db0] sm:$0xf]  ;;  %1147 = vst [vmem:[%s8572_s29 + $0x764] sm:$0xf] %v1146_v25 }
 0x150   : > { %1149 = vst [vmem:[%s8572_s29 + $0x768] sm:$0xf] %v1148_v26  ;;  %1151 = vst [vmem:[%s8572_s29 + $0x76c] sm:$0xf] %v1150_v27  ;;  %v1152_v28 = vld [vmem:[%s8568_s28 + $0x1dc0] sm:$0xf] }
 0x151   : > { %v1154_v29 = vld [vmem:[%s8568_s28 + $0x1dd0] sm:$0xf]  ;;  %v1156_v30 = vld [vmem:[%s8568_s28 + $0x1de0] sm:$0xf]  ;;  %1153 = vst [vmem:[%s8572_s29 + $0x770] sm:$0xf] %v1152_v28 }
 0x152   : > { %1155 = vst [vmem:[%s8572_s29 + $0x774] sm:$0xf] %v1154_v29  ;;  %1157 = vst [vmem:[%s8572_s29 + $0x778] sm:$0xf] %v1156_v30  ;;  %v1158_v31 = vld [vmem:[%s8568_s28 + $0x1df0] sm:$0xf] }
 0x153   : > { %v1160_v32 = vld [vmem:[%s8568_s28 + $0x1e00] sm:$0xf]  ;;  %v1162_v33 = vld [vmem:[%s8568_s28 + $0x1e10] sm:$0xf]  ;;  %1159 = vst [vmem:[%s8572_s29 + $0x77c] sm:$0xf] %v1158_v31 }
 0x154   : > { %1161 = vst [vmem:[%s8572_s29 + $0x780] sm:$0xf] %v1160_v32  ;;  %1163 = vst [vmem:[%s8572_s29 + $0x784] sm:$0xf] %v1162_v33  ;;  %v1164_v34 = vld [vmem:[%s8568_s28 + $0x1e20] sm:$0xf] }
 0x155   : > { %v1166_v35 = vld [vmem:[%s8568_s28 + $0x1e30] sm:$0xf]  ;;  %v1168_v36 = vld [vmem:[%s8568_s28 + $0x1e40] sm:$0xf]  ;;  %1165 = vst [vmem:[%s8572_s29 + $0x788] sm:$0xf] %v1164_v34 }
 0x156   : > { %1167 = vst [vmem:[%s8572_s29 + $0x78c] sm:$0xf] %v1166_v35  ;;  %1169 = vst [vmem:[%s8572_s29 + $0x790] sm:$0xf] %v1168_v36  ;;  %v1170_v37 = vld [vmem:[%s8568_s28 + $0x1e50] sm:$0xf] }
 0x157   : > { %v1172_v38 = vld [vmem:[%s8568_s28 + $0x1e60] sm:$0xf]  ;;  %v1174_v39 = vld [vmem:[%s8568_s28 + $0x1e70] sm:$0xf]  ;;  %1171 = vst [vmem:[%s8572_s29 + $0x794] sm:$0xf] %v1170_v37 }
 0x158   : > { %1173 = vst [vmem:[%s8572_s29 + $0x798] sm:$0xf] %v1172_v38  ;;  %1175 = vst [vmem:[%s8572_s29 + $0x79c] sm:$0xf] %v1174_v39  ;;  %v1176_v40 = vld [vmem:[%s8568_s28 + $0x1e80] sm:$0xf] }
 0x159   : > { %v1178_v41 = vld [vmem:[%s8568_s28 + $0x1e90] sm:$0xf]  ;;  %v1180_v42 = vld [vmem:[%s8568_s28 + $0x1ea0] sm:$0xf]  ;;  %1177 = vst [vmem:[%s8572_s29 + $0x7a0] sm:$0xf] %v1176_v40 }
 0x15a   : > { %1179 = vst [vmem:[%s8572_s29 + $0x7a4] sm:$0xf] %v1178_v41  ;;  %1181 = vst [vmem:[%s8572_s29 + $0x7a8] sm:$0xf] %v1180_v42  ;;  %v1182_v43 = vld [vmem:[%s8568_s28 + $0x1eb0] sm:$0xf] }
 0x15b   : > { %v1184_v44 = vld [vmem:[%s8568_s28 + $0x1ec0] sm:$0xf]  ;;  %v1186_v45 = vld [vmem:[%s8568_s28 + $0x1ed0] sm:$0xf]  ;;  %1183 = vst [vmem:[%s8572_s29 + $0x7ac] sm:$0xf] %v1182_v43 }
 0x15c   : > { %1185 = vst [vmem:[%s8572_s29 + $0x7b0] sm:$0xf] %v1184_v44  ;;  %1187 = vst [vmem:[%s8572_s29 + $0x7b4] sm:$0xf] %v1186_v45  ;;  %v1188_v46 = vld [vmem:[%s8568_s28 + $0x1ee0] sm:$0xf] }
 0x15d   : > { %v1190_v47 = vld [vmem:[%s8568_s28 + $0x1ef0] sm:$0xf]  ;;  %v1192_v48 = vld [vmem:[%s8568_s28 + $0x1f00] sm:$0xf]  ;;  %1189 = vst [vmem:[%s8572_s29 + $0x7b8] sm:$0xf] %v1188_v46 }
 0x15e   : > { %1191 = vst [vmem:[%s8572_s29 + $0x7bc] sm:$0xf] %v1190_v47  ;;  %1193 = vst [vmem:[%s8572_s29 + $0x7c0] sm:$0xf] %v1192_v48  ;;  %v1194_v49 = vld [vmem:[%s8568_s28 + $0x1f10] sm:$0xf] }
 0x15f   : > { %v1196_v50 = vld [vmem:[%s8568_s28 + $0x1f20] sm:$0xf]  ;;  %v1198_v51 = vld [vmem:[%s8568_s28 + $0x1f30] sm:$0xf]  ;;  %1195 = vst [vmem:[%s8572_s29 + $0x7c4] sm:$0xf] %v1194_v49 }
 0x160   : > { %1197 = vst [vmem:[%s8572_s29 + $0x7c8] sm:$0xf] %v1196_v50  ;;  %1199 = vst [vmem:[%s8572_s29 + $0x7cc] sm:$0xf] %v1198_v51  ;;  %v1200_v52 = vld [vmem:[%s8568_s28 + $0x1f40] sm:$0xf] }
 0x161   : > { %v1202_v53 = vld [vmem:[%s8568_s28 + $0x1f50] sm:$0xf]  ;;  %v1204_v54 = vld [vmem:[%s8568_s28 + $0x1f60] sm:$0xf]  ;;  %1201 = vst [vmem:[%s8572_s29 + $0x7d0] sm:$0xf] %v1200_v52 }
 0x162   : > { %1203 = vst [vmem:[%s8572_s29 + $0x7d4] sm:$0xf] %v1202_v53  ;;  %1205 = vst [vmem:[%s8572_s29 + $0x7d8] sm:$0xf] %v1204_v54  ;;  %v1206_v55 = vld [vmem:[%s8568_s28 + $0x1f70] sm:$0xf] }
 0x163   : > { %v1208_v56 = vld [vmem:[%s8568_s28 + $0x1f80] sm:$0xf]  ;;  %v1210_v57 = vld [vmem:[%s8568_s28 + $0x1f90] sm:$0xf]  ;;  %1207 = vst [vmem:[%s8572_s29 + $0x7dc] sm:$0xf] %v1206_v55 }
 0x164   : > { %1209 = vst [vmem:[%s8572_s29 + $0x7e0] sm:$0xf] %v1208_v56  ;;  %1211 = vst [vmem:[%s8572_s29 + $0x7e4] sm:$0xf] %v1210_v57  ;;  %v1212_v58 = vld [vmem:[%s8568_s28 + $0x1fa0] sm:$0xf] }
 0x165   : > { %v1214_v59 = vld [vmem:[%s8568_s28 + $0x1fb0] sm:$0xf]  ;;  %v1216_v60 = vld [vmem:[%s8568_s28 + $0x1fc0] sm:$0xf]  ;;  %1213 = vst [vmem:[%s8572_s29 + $0x7e8] sm:$0xf] %v1212_v58 }
 0x166   : > { %1215 = vst [vmem:[%s8572_s29 + $0x7ec] sm:$0xf] %v1214_v59  ;;  %1217 = vst [vmem:[%s8572_s29 + $0x7f0] sm:$0xf] %v1216_v60  ;;  %v1218_v61 = vld [vmem:[%s8568_s28 + $0x1fd0] sm:$0xf] }
 0x167   : > { %v1220_v62 = vld [vmem:[%s8568_s28 + $0x1fe0] sm:$0xf]  ;;  %v1222_v63 = vld [vmem:[%s8568_s28 + $0x1ff0] sm:$0xf]  ;;  %1219 = vst [vmem:[%s8572_s29 + $0x7f4] sm:$0xf] %v1218_v61 }
 0x168   : > { %1221 = vst [vmem:[%s8572_s29 + $0x7f8] sm:$0xf] %v1220_v62  ;;  %1223 = vst [vmem:[%s8572_s29 + $0x7fc] sm:$0xf] %v1222_v63 }
 0x169 PF: > { %p7507_p8 = scmp.ge.s32.totalorder %s8498_s16, 1  ;;  %p4354_p9 = scmp.lt.s32.totalorder %s8498_s16, 5 }
 0x16b   : > { %p4355_p10 = pnand %p7507_p8, %p4354_p9 }
 0x16c   : > { %s4361_s30 = sand.u32 (!%p4355_p10), 1, %s8482_s12   ;;  %p4409_p11 = scmp.lt.s32.totalorder (!%p4355_p10), %s8490_s14, 3 }
 0x16d   : > { %4358 = sbr.rel (%p4355_p10) target bundleno = 847 (0x34f), region = 80  ;;  %s7508_s10 = sshll.u32 (!%p4355_p10), %s4361_s30, 11 }
 0x16e   : > { %s9625_s19 = scalar_lea.vmem (!%p4355_p10), [#allocation3], %s7508_s10  ;;  %s7509_s4 = sshll.u32 (!%p4355_p10), %s4361_s30, 3 }
 0x16f   : > { %s4395_s5 = scalar_lea.vmem (!%p4355_p10), [#allocation4], %s7509_s4 }
 0x172   : > { %v9602_v0 = vld [vmem:[%s10015_s0] sm:$0xff]  ;;  %v9612_v2 = vld [vmem:[%s10015_s0 + $0x8] sm:$0xff]  ;;  %v8204_v6 = vld [vmem:[%s9625_s19 + $0x78] sm:$0xff]   ;;  %s7802_s6 = sshll.u32 (%p8555_p6), %s8490_s14, 2 }
 0x173   : > { %v9607_v1 = vld [vmem:[%s10015_s0 + $0x80] sm:$0xff]  ;;  %v9621_v4 = vld [vmem:[%s10015_s0 + $0x88] sm:$0xff]  ;;  %v8205_v7 = vld [vmem:[%s9625_s19 + $0xf8] sm:$0xff]   ;;  %7812 = vmatprep.subr.bf16.mxu0 %v8204_v6  ;;  %s7344_s9 = scalar_lea.vmem (%p8555_p6), %s10018_s3, %s7802_s6 }
 0x174   : > { %v7512_v3 = vcombine.high %v9602_v0, %v9607_v1  ;;  %v7514_v5 = vcombine.high %v9612_v2, %v9621_v4  ;;  %v8206_v8 = vld [vmem:[%s9625_s19 + $0x38] sm:$0xff]   ;;  %7834 = vmatprep.subr.bf16.mxu1 %v8205_v7  ;;  %v8208_v10 = vld [vmem:[%s9625_s19 + $0x70] sm:$0xff]   ;;  %v8212_v14 = vld [vmem:[%s9625_s19 + $0x68] sm:$0xff]   ;;  %v7511_v42 = vcombine.low %v9602_v0, %v9607_v1  ;;  %v7513_v43 = vcombine.low %v9612_v2, %v9621_v4 }
 0x175   : > { %v8207_v9 = vld [vmem:[%s9625_s19 + $0xb8] sm:$0xff]   ;;  %7813 = vmatpush3.bf16.msra.mxu0 %v8206_v8  ;;  %v8209_v11 = vld [vmem:[%s9625_s19 + $0xf0] sm:$0xff]   ;;  %v8213_v15 = vld [vmem:[%s9625_s19 + $0xe8] sm:$0xff]  }
 0x176   : > { %6693 = vmatprep.mubr.bf16.mxu0 %v7512_v3  ;;  %6734 = vmatprep.mubr.bf16.mxu1 %v7514_v5  ;;  %v8210_v12 = vld [vmem:[%s9625_s19 + $0x30] sm:$0xff]   ;;  %v8214_v16 = vld [vmem:[%s9625_s19 + $0x28] sm:$0xff]   ;;  %v8216_v18 = vld [vmem:[%s9625_s19 + $0x60] sm:$0xff]  }
 0x177   : > { %7835 = vmatpush3.bf16.msra.mxu1 %v8207_v9  ;;  %7814 = vmatprep.subr.bf16.mxu0 %v8208_v10  ;;  %v8211_v13 = vld [vmem:[%s9625_s19 + $0xb0] sm:$0xff]   ;;  %v8215_v17 = vld [vmem:[%s9625_s19 + $0xa8] sm:$0xff]   ;;  %v8217_v19 = vld [vmem:[%s9625_s19 + $0xe0] sm:$0xff]  }
 0x178   : > { %7836 = vmatprep.subr.bf16.mxu1 %v8209_v11  ;;  %v8218_v20 = vld [vmem:[%s9625_s19 + $0x20] sm:$0xff]   ;;  %v8220_v22 = vld [vmem:[%s9625_s19 + $0x58] sm:$0xff]   ;;  %v8224_v26 = vld [vmem:[%s9625_s19 + $0x50] sm:$0xff]  }
 0x179   : > { %7815 = vmatpush3.bf16.msra.mxu0 %v8210_v12  ;;  %v8219_v21 = vld [vmem:[%s9625_s19 + $0xa0] sm:$0xff]   ;;  %v8221_v23 = vld [vmem:[%s9625_s19 + $0xd8] sm:$0xff]   ;;  %v8225_v27 = vld [vmem:[%s9625_s19 + $0xd0] sm:$0xff]  }
 0x17a   : > { %7816 = vmatprep.subr.bf16.mxu0 %v8212_v14  ;;  %v8222_v24 = vld [vmem:[%s9625_s19 + $0x18] sm:$0xff]   ;;  %v8226_v28 = vld [vmem:[%s9625_s19 + $0x10] sm:$0xff]   ;;  %v8228_v30 = vld [vmem:[%s9625_s19 + $0x48] sm:$0xff]  }
 0x17b   : > { %7837 = vmatpush3.bf16.msra.mxu1 %v8211_v13  ;;  %v8223_v25 = vld [vmem:[%s9625_s19 + $0x98] sm:$0xff]   ;;  %v8227_v29 = vld [vmem:[%s9625_s19 + $0x90] sm:$0xff]   ;;  %v8229_v31 = vld [vmem:[%s9625_s19 + $0xc8] sm:$0xff]  }
 0x17c   : > { %7838 = vmatprep.subr.bf16.mxu1 %v8213_v15  ;;  %v8230_v32 = vld [vmem:[%s9625_s19 + $0x8] sm:$0xff]   ;;  %v8232_v34 = vld [vmem:[%s9625_s19 + $0x40] sm:$0xff]   ;;  %v9659_v35 = vld [vmem:[%s10015_s0 + $0x10] sm:$0xff] }
 0x17d   : > { %7817 = vmatpush3.bf16.msra.mxu0 %v8214_v16  ;;  %v8231_v33 = vld [vmem:[%s9625_s19 + $0x88] sm:$0xff]   ;;  %v9664_v36 = vld [vmem:[%s10015_s0 + $0x90] sm:$0xff]  ;;  %v8233_v37 = vld [vmem:[%s9625_s19 + $0xc0] sm:$0xff]  }
 0x17e   : > { %7818 = vmatprep.subr.bf16.mxu0 %v8216_v18  ;;  %v9670_v38 = vld [vmem:[%s10015_s0 + $0x18] sm:$0xff]  ;;  %v8234_v40 = vld [vmem:[%s9625_s19] sm:$0xff]   ;;  %v7516_v46 = vcombine.high %v9659_v35, %v9664_v36  ;;  %v8240_v50 = vld [vmem:[%s9625_s19 + $0x170] sm:$0xff]   ;;  %v7515_v14 = vcombine.low %v9659_v35, %v9664_v36 }
 0x17f   : > { %7839 = vmatpush3.bf16.msra.mxu1 %v8215_v17  ;;  %v9675_v39 = vld [vmem:[%s10015_s0 + $0x98] sm:$0xff]  ;;  %v8235_v41 = vld [vmem:[%s9625_s19 + $0x80] sm:$0xff]   ;;  %v8241_v51 = vld [vmem:[%s9625_s19 + $0x1f0] sm:$0xff]  }
 0x180   : > { %7840 = vmatprep.subr.bf16.mxu1 %v8217_v19  ;;  %v8236_v44 = vld [vmem:[%s9625_s19 + $0x178] sm:$0xff]   ;;  %v7518_v48 = vcombine.high %v9670_v38, %v9675_v39  ;;  %v8242_v52 = vld [vmem:[%s9625_s19 + $0x130] sm:$0xff]   ;;  %v8244_v54 = vld [vmem:[%s9625_s19 + $0x168] sm:$0xff]   ;;  %v7517_v15 = vcombine.low %v9670_v38, %v9675_v39 }
 0x181   : > { %7819 = vmatpush3.bf16.msra.mxu0 %v8218_v20  ;;  %v8237_v45 = vld [vmem:[%s9625_s19 + $0x1f8] sm:$0xff]   ;;  %v8243_v53 = vld [vmem:[%s9625_s19 + $0x1b0] sm:$0xff]   ;;  %v8245_v55 = vld [vmem:[%s9625_s19 + $0x1e8] sm:$0xff]  }
 0x182   : > { %7820 = vmatprep.subr.bf16.mxu0 %v8220_v22  ;;  %v8238_v47 = vld [vmem:[%s9625_s19 + $0x138] sm:$0xff]   ;;  %v8246_v56 = vld [vmem:[%s9625_s19 + $0x128] sm:$0xff]   ;;  %v8248_v58 = vld [vmem:[%s9625_s19 + $0x160] sm:$0xff]  }
 0x183   : > { %7841 = vmatpush3.bf16.msra.mxu1 %v8219_v21  ;;  %v8239_v49 = vld [vmem:[%s9625_s19 + $0x1b8] sm:$0xff]   ;;  %v8247_v57 = vld [vmem:[%s9625_s19 + $0x1a8] sm:$0xff]   ;;  %v8249_v59 = vld [vmem:[%s9625_s19 + $0x1e0] sm:$0xff]  }
 0x184   : > { %7842 = vmatprep.subr.bf16.mxu1 %v8221_v23  ;;  %v8250_v60 = vld [vmem:[%s9625_s19 + $0x120] sm:$0xff]   ;;  %v8252_v62 = vld [vmem:[%s9625_s19 + $0x158] sm:$0xff]   ;;  %v8256_v2 = vld [vmem:[%s9625_s19 + $0x150] sm:$0xff]  }
 0x185   : > { %7821 = vmatpush3.bf16.msra.mxu0 %v8222_v24  ;;  %v8251_v61 = vld [vmem:[%s9625_s19 + $0x1a0] sm:$0xff]   ;;  %v8253_v63 = vld [vmem:[%s9625_s19 + $0x1d8] sm:$0xff]   ;;  %v8257_v3 = vld [vmem:[%s9625_s19 + $0x1d0] sm:$0xff]  }
 0x186   : > { %7822 = vmatprep.subr.bf16.mxu0 %v8224_v26  ;;  %v8254_v0 = vld [vmem:[%s9625_s19 + $0x118] sm:$0xff]   ;;  %v8258_v4 = vld [vmem:[%s9625_s19 + $0x110] sm:$0xff]   ;;  %v8260_v6 = vld [vmem:[%s9625_s19 + $0x148] sm:$0xff]  }
 0x187   : > { %7843 = vmatpush3.bf16.msra.mxu1 %v8223_v25  ;;  %v8255_v1 = vld [vmem:[%s9625_s19 + $0x198] sm:$0xff]   ;;  %v8259_v5 = vld [vmem:[%s9625_s19 + $0x190] sm:$0xff]   ;;  %v8261_v7 = vld [vmem:[%s9625_s19 + $0x1c8] sm:$0xff]  }
 0x188   : > { %7844 = vmatprep.subr.bf16.mxu1 %v8225_v27  ;;  %v8262_v8 = vld [vmem:[%s9625_s19 + $0x108] sm:$0xff]   ;;  %v8264_v10 = vld [vmem:[%s9625_s19 + $0x140] sm:$0xff]   ;;  %v8268_v16 = vld [vmem:[%s9625_s19 + $0x278] sm:$0xff]  }
 0x189   : > { %7823 = vmatpush3.bf16.msra.mxu0 %v8226_v28  ;;  %v8263_v9 = vld [vmem:[%s9625_s19 + $0x188] sm:$0xff]   ;;  %v8265_v11 = vld [vmem:[%s9625_s19 + $0x1c0] sm:$0xff]   ;;  %v8269_v17 = vld [vmem:[%s9625_s19 + $0x2f8] sm:$0xff]  }
 0x18a   : > { %7824 = vmatprep.subr.bf16.mxu0 %v8228_v30  ;;  %v8266_v12 = vld [vmem:[%s9625_s19 + $0x100] sm:$0xff]   ;;  %v8270_v18 = vld [vmem:[%s9625_s19 + $0x238] sm:$0xff]   ;;  %v8272_v20 = vld [vmem:[%s9625_s19 + $0x270] sm:$0xff]  }
 0x18b   : > { %7845 = vmatpush3.bf16.msra.mxu1 %v8227_v29  ;;  %v8267_v13 = vld [vmem:[%s9625_s19 + $0x180] sm:$0xff]   ;;  %v8271_v19 = vld [vmem:[%s9625_s19 + $0x2b8] sm:$0xff]   ;;  %v8273_v21 = vld [vmem:[%s9625_s19 + $0x2f0] sm:$0xff]  }
 0x18c   : > { %7846 = vmatprep.subr.bf16.mxu1 %v8229_v31  ;;  %v8274_v22 = vld [vmem:[%s9625_s19 + $0x230] sm:$0xff]   ;;  %v8276_v24 = vld [vmem:[%s9625_s19 + $0x268] sm:$0xff]   ;;  %v8280_v28 = vld [vmem:[%s9625_s19 + $0x260] sm:$0xff]  }
 0x18d   : > { %7825 = vmatpush3.bf16.msra.mxu0 %v8230_v32  ;;  %v8275_v23 = vld [vmem:[%s9625_s19 + $0x2b0] sm:$0xff]   ;;  %v8277_v25 = vld [vmem:[%s9625_s19 + $0x2e8] sm:$0xff]   ;;  %v8281_v29 = vld [vmem:[%s9625_s19 + $0x2e0] sm:$0xff]  }
 0x18e   : > { %7826 = vmatprep.subr.bf16.mxu0 %v8232_v34  ;;  %v8278_v26 = vld [vmem:[%s9625_s19 + $0x228] sm:$0xff]   ;;  %v8282_v30 = vld [vmem:[%s9625_s19 + $0x220] sm:$0xff]   ;;  %v8284_v32 = vld [vmem:[%s9625_s19 + $0x258] sm:$0xff]  }
 0x18f   : > { %7847 = vmatpush3.bf16.msra.mxu1 %v8231_v33  ;;  %v8279_v27 = vld [vmem:[%s9625_s19 + $0x2a8] sm:$0xff]   ;;  %v8283_v31 = vld [vmem:[%s9625_s19 + $0x2a0] sm:$0xff]   ;;  %v8285_v33 = vld [vmem:[%s9625_s19 + $0x2d8] sm:$0xff]  }
 0x190   : > { %7848 = vmatprep.subr.bf16.mxu1 %v8233_v37  ;;  %v8286_v34 = vld [vmem:[%s9625_s19 + $0x218] sm:$0xff]   ;;  %v8288_v36 = vld [vmem:[%s9625_s19 + $0x250] sm:$0xff]  }
 0x191   : > { %7827 = vmatpush3.bf16.msra.mxu0 %v8234_v40  ;;  %v8287_v35 = vld [vmem:[%s9625_s19 + $0x298] sm:$0xff]   ;;  %v8289_v37 = vld [vmem:[%s9625_s19 + $0x2d0] sm:$0xff]   ;;  %v8292_v40 = vld [vmem:[%s9625_s19 + $0x248] sm:$0xff]  }
 0x192   : > { %7856 = vmatprep.subr.bf16.mxu0 %v8236_v44  ;;  %v8290_v38 = vld [vmem:[%s9625_s19 + $0x210] sm:$0xff]   ;;  %v8296_v44 = vld [vmem:[%s9625_s19 + $0x240] sm:$0xff]  }
 0x193   : > { %7849 = vmatpush3.bf16.msra.mxu1 %v8235_v41  ;;  %v8291_v39 = vld [vmem:[%s9625_s19 + $0x290] sm:$0xff]   ;;  %v8293_v41 = vld [vmem:[%s9625_s19 + $0x2c8] sm:$0xff]  }
 0x194   : > { %6694 = vmatmul.mubr.bf16.vlgmr.msra.gmra.mxu0 %v7511_v42  ;;  %7878 = vmatprep.subr.bf16.mxu1 %v8237_v45  ;;  %v8294_v42 = vld [vmem:[%s9625_s19 + $0x208] sm:$0xff]   ;;  %v4418_v45 = vld [vmem:[%s10015_s0 + $0x20] sm:$0xff] }
 0x195   : > { %7857 = vmatpush3.bf16.msra.mxu0 %v8238_v47  ;;  %6775 = vmatprep.mubr.bf16.mxu0 %v7516_v46  ;;  %v8297_v46 = vld [vmem:[%s9625_s19 + $0x2c0] sm:$0xff]  }
 0x196   : > { %6735 = vmatmul.mubr.bf16.vlgmr.msra.gmra.mxu1 %v7513_v43  ;;  %7858 = vmatprep.subr.bf16.mxu0 %v8240_v50  ;;  %v8295_v43 = vld [vmem:[%s9625_s19 + $0x288] sm:$0xff]   ;;  %v8298_v47 = vld [vmem:[%s9625_s19 + $0x200] sm:$0xff]  }
 0x197   : > { %7879 = vmatpush3.bf16.msra.mxu1 %v8239_v49  ;;  %6816 = vmatprep.mubr.bf16.mxu1 %v7518_v48  ;;  %v8299_v48 = vld [vmem:[%s9625_s19 + $0x280] sm:$0xff]   ;;  %v4419_v50 = vld [vmem:[%s10015_s0 + $0x28] sm:$0xff] }
 0x198   : > { %7880 = vmatprep.subr.bf16.mxu1 %v8241_v51  ;;  %v4434_v49 = vld [vmem:[%s10015_s0 + $0xa0] sm:$0xff]  ;;  %v4435_v51 = vld [vmem:[%s10015_s0 + $0xa8] sm:$0xff] }
 0x199   : > { %7859 = vmatpush3.bf16.msra.mxu0 %v8242_v52  ;;  %v7519_v52 = vcombine.low %v4418_v45, %v4434_v49 }
 0x19a   : > { %7860 = vmatprep.subr.bf16.mxu0 %v8244_v54  ;;  %v7521_v54 = vcombine.low %v4419_v50, %v4435_v51 }
 0x19b   : > { %7881 = vmatpush3.bf16.msra.mxu1 %v8243_v53  ;;  %v7520_v53 = vcombine.high %v4418_v45, %v4434_v49  ;;  %v8345_v45 = vld [vmem:[%s9625_s19 + $0x4e0] sm:$0xff]   ;;  %v8349_v49 = vld [vmem:[%s9625_s19 + $0x4d8] sm:$0xff]  }
 0x19c   : > { %7882 = vmatprep.subr.bf16.mxu1 %v8245_v55  ;;  %v7522_v55 = vcombine.high %v4419_v50, %v4435_v51  ;;  %v8350_v50 = vld [vmem:[%s9625_s19 + $0x418] sm:$0xff]  }
 0x19d   : > { %7861 = vmatpush3.bf16.msra.mxu0 %v8246_v56  ;;  %v8300_v56 = vld [vmem:[%s9625_s19 + $0x378] sm:$0xff]  }
 0x19e   : > { %7862 = vmatprep.subr.bf16.mxu0 %v8248_v58  ;;  %v8302_v58 = vld [vmem:[%s9625_s19 + $0x338] sm:$0xff]  }
 0x19f   : > { %7883 = vmatpush3.bf16.msra.mxu1 %v8247_v57  ;;  %v8301_v57 = vld [vmem:[%s9625_s19 + $0x3f8] sm:$0xff]  }
 0x1a0   : > { %7884 = vmatprep.subr.bf16.mxu1 %v8249_v59  ;;  %v8303_v59 = vld [vmem:[%s9625_s19 + $0x3b8] sm:$0xff]  }
 0x1a1   : > { %7863 = vmatpush3.bf16.msra.mxu0 %v8250_v60  ;;  %v8304_v60 = vld [vmem:[%s9625_s19 + $0x370] sm:$0xff]   ;;  %v8351_v51 = vld [vmem:[%s9625_s19 + $0x498] sm:$0xff]  }
 0x1a2   : > { %7864 = vmatprep.subr.bf16.mxu0 %v8252_v62  ;;  %v8306_v62 = vld [vmem:[%s9625_s19 + $0x330] sm:$0xff]  }
 0x1a3   : > { %7885 = vmatpush3.bf16.msra.mxu1 %v8251_v61  ;;  %v8305_v61 = vld [vmem:[%s9625_s19 + $0x3f0] sm:$0xff]  }
 0x1a4   : > { %7886 = vmatprep.subr.bf16.mxu1 %v8253_v63  ;;  %v8307_v63 = vld [vmem:[%s9625_s19 + $0x3b0] sm:$0xff]  }
 0x1a5   : > { %7865 = vmatpush3.bf16.msra.mxu0 %v8254_v0  ;;  %v8308_v0 = vld [vmem:[%s9625_s19 + $0x368] sm:$0xff]  }
 0x1a6   : > { %7866 = vmatprep.subr.bf16.mxu0 %v8256_v2  ;;  %v8310_v2 = vld [vmem:[%s9625_s19 + $0x328] sm:$0xff]  }
 0x1a7   : > { %7887 = vmatpush3.bf16.msra.mxu1 %v8255_v1  ;;  %v8309_v1 = vld [vmem:[%s9625_s19 + $0x3e8] sm:$0xff]  }
 0x1a8   : > { %7888 = vmatprep.subr.bf16.mxu1 %v8257_v3  ;;  %v8311_v3 = vld [vmem:[%s9625_s19 + $0x3a8] sm:$0xff]  }
 0x1a9   : > { %7867 = vmatpush3.bf16.msra.mxu0 %v8258_v4  ;;  %v8312_v4 = vld [vmem:[%s9625_s19 + $0x360] sm:$0xff]  }
 0x1aa   : > { %7868 = vmatprep.subr.bf16.mxu0 %v8260_v6  ;;  %v8314_v6 = vld [vmem:[%s9625_s19 + $0x320] sm:$0xff]  }
 0x1ab   : > { %7889 = vmatpush3.bf16.msra.mxu1 %v8259_v5  ;;  %v8313_v5 = vld [vmem:[%s9625_s19 + $0x3e0] sm:$0xff]  }
 0x1ac   : > { %7890 = vmatprep.subr.bf16.mxu1 %v8261_v7  ;;  %v8315_v7 = vld [vmem:[%s9625_s19 + $0x3a0] sm:$0xff]  }
 0x1ad   : > { %7869 = vmatpush3.bf16.msra.mxu0 %v8262_v8  ;;  %v8316_v8 = vld [vmem:[%s9625_s19 + $0x358] sm:$0xff]  }
 0x1ae   : > { %7870 = vmatprep.subr.bf16.mxu0 %v8264_v10  ;;  %v8318_v10 = vld [vmem:[%s9625_s19 + $0x318] sm:$0xff]  }
 0x1af   : > { %7891 = vmatpush3.bf16.msra.mxu1 %v8263_v9  ;;  %v8317_v9 = vld [vmem:[%s9625_s19 + $0x3d8] sm:$0xff]  }
 0x1b0   : > { %7892 = vmatprep.subr.bf16.mxu1 %v8265_v11  ;;  %v8319_v11 = vld [vmem:[%s9625_s19 + $0x398] sm:$0xff]  }
 0x1b1   : > { %7871 = vmatpush3.bf16.msra.mxu0 %v8266_v12  ;;  %v8320_v12 = vld [vmem:[%s9625_s19 + $0x350] sm:$0xff]  }
 0x1b2   : > { %7900 = vmatprep.subr.bf16.mxu0 %v8268_v16  ;;  %v8324_v16 = vld [vmem:[%s9625_s19 + $0x348] sm:$0xff]  }
 0x1b3   : > { %7893 = vmatpush3.bf16.msra.mxu1 %v8267_v13  ;;  %v8321_v13 = vld [vmem:[%s9625_s19 + $0x3d0] sm:$0xff]  }
 0x1b4   : > { %6776 = vmatmul.mubr.bf16.vlgmr.msra.gmra.mxu0 %v7515_v14  ;;  %7922 = vmatprep.subr.bf16.mxu1 %v8269_v17  ;;  %v8322_v14 = vld [vmem:[%s9625_s19 + $0x310] sm:$0xff]   ;;  %v8325_v17 = vld [vmem:[%s9625_s19 + $0x3c8] sm:$0xff]  }
 0x1b5   : > { %7901 = vmatpush3.bf16.msra.mxu0 %v8270_v18  ;;  %6857 = vmatprep.mubr.bf16.mxu0 %v7520_v53  ;;  %v8326_v18 = vld [vmem:[%s9625_s19 + $0x308] sm:$0xff]   ;;  %v8353_v53 = vld [vmem:[%s9625_s19 + $0x4d0] sm:$0xff]  }
 0x1b6   : > { %6817 = vmatmul.mubr.bf16.vlgmr.msra.gmra.mxu1 %v7517_v15  ;;  %7902 = vmatprep.subr.bf16.mxu0 %v8272_v20  ;;  %v8323_v15 = vld [vmem:[%s9625_s19 + $0x390] sm:$0xff]   ;;  %v8328_v20 = vld [vmem:[%s9625_s19 + $0x340] sm:$0xff]  }
 0x1b7   : > { %7923 = vmatpush3.bf16.msra.mxu1 %v8271_v19  ;;  %6898 = vmatprep.mubr.bf16.mxu1 %v7522_v55  ;;  %v8327_v19 = vld [vmem:[%s9625_s19 + $0x388] sm:$0xff]   ;;  %v8355_v55 = vld [vmem:[%s9625_s19 + $0x490] sm:$0xff]  }
 0x1b8   : > { %7924 = vmatprep.subr.bf16.mxu1 %v8273_v21  ;;  %v8329_v21 = vld [vmem:[%s9625_s19 + $0x3c0] sm:$0xff]  }
 0x1b9   : > { %7903 = vmatpush3.bf16.msra.mxu0 %v8274_v22  ;;  %v8330_v22 = vld [vmem:[%s9625_s19 + $0x300] sm:$0xff]  }
 0x1ba   : > { %7904 = vmatprep.subr.bf16.mxu0 %v8276_v24  ;;  %v4420_v24 = vld [vmem:[%s10015_s0 + $0x30] sm:$0xff] }
 0x1bb   : > { %7925 = vmatpush3.bf16.msra.mxu1 %v8275_v23  ;;  %v8331_v23 = vld [vmem:[%s9625_s19 + $0x380] sm:$0xff]  }
 0x1bc   : > { %7926 = vmatprep.subr.bf16.mxu1 %v8277_v25  ;;  %v4436_v25 = vld [vmem:[%s10015_s0 + $0xb0] sm:$0xff] }
 0x1bd   : > { %7905 = vmatpush3.bf16.msra.mxu0 %v8278_v26  ;;  %v4421_v26 = vld [vmem:[%s10015_s0 + $0x38] sm:$0xff] }
 0x1be   : > { %7906 = vmatprep.subr.bf16.mxu0 %v8280_v28  ;;  %v7524_v28 = vcombine.high %v4420_v24, %v4436_v25 }
 0x1bf   : > { %7927 = vmatpush3.bf16.msra.mxu1 %v8279_v27  ;;  %v7523_v27 = vcombine.low %v4420_v24, %v4436_v25  ;;  %v8380_v24 = vld [vmem:[%s9625_s19 + $0x558] sm:$0xff]  }
 0x1c0   : > { %7928 = vmatprep.subr.bf16.mxu1 %v8281_v29  ;;  %v4437_v29 = vld [vmem:[%s10015_s0 + $0xb8] sm:$0xff] }
 0x1c1   : > { %7907 = vmatpush3.bf16.msra.mxu0 %v8282_v30  ;;  %v7525_v30 = vcombine.low %v4421_v26, %v4437_v29  ;;  %v8381_v25 = vld [vmem:[%s9625_s19 + $0x5d8] sm:$0xff]  }
 0x1c2   : > { %7908 = vmatprep.subr.bf16.mxu0 %v8284_v32  ;;  %v8332_v32 = vld [vmem:[%s9625_s19 + $0x478] sm:$0xff]  }
 0x1c3   : > { %7929 = vmatpush3.bf16.msra.mxu1 %v8283_v31  ;;  %v7526_v31 = vcombine.high %v4421_v26, %v4437_v29  ;;  %v8382_v26 = vld [vmem:[%s9625_s19 + $0x518] sm:$0xff]   ;;  %v8385_v29 = vld [vmem:[%s9625_s19 + $0x5d0] sm:$0xff]  }
 0x1c4   : > { %7930 = vmatprep.subr.bf16.mxu1 %v8285_v33  ;;  %v8333_v33 = vld [vmem:[%s9625_s19 + $0x4f8] sm:$0xff]  }
 0x1c5   : > { %7909 = vmatpush3.bf16.msra.mxu0 %v8286_v34  ;;  %v8334_v34 = vld [vmem:[%s9625_s19 + $0x438] sm:$0xff]  }
 0x1c6   : > { %7910 = vmatprep.subr.bf16.mxu0 %v8288_v36  ;;  %v8336_v36 = vld [vmem:[%s9625_s19 + $0x470] sm:$0xff]  }
 0x1c7   : > { %7931 = vmatpush3.bf16.msra.mxu1 %v8287_v35  ;;  %v8335_v35 = vld [vmem:[%s9625_s19 + $0x4b8] sm:$0xff]  }
 0x1c8   : > { %7932 = vmatprep.subr.bf16.mxu1 %v8289_v37  ;;  %v8337_v37 = vld [vmem:[%s9625_s19 + $0x4f0] sm:$0xff]  }
 0x1c9   : > { %7911 = vmatpush3.bf16.msra.mxu0 %v8290_v38  ;;  %v8338_v38 = vld [vmem:[%s9625_s19 + $0x430] sm:$0xff]  }
 0x1ca   : > { %7912 = vmatprep.subr.bf16.mxu0 %v8292_v40  ;;  %v8340_v40 = vld [vmem:[%s9625_s19 + $0x468] sm:$0xff]  }
 0x1cb   : > { %7933 = vmatpush3.bf16.msra.mxu1 %v8291_v39  ;;  %v8339_v39 = vld [vmem:[%s9625_s19 + $0x4b0] sm:$0xff]  }
 0x1cc   : > { %7934 = vmatprep.subr.bf16.mxu1 %v8293_v41  ;;  %v8341_v41 = vld [vmem:[%s9625_s19 + $0x4e8] sm:$0xff]  }
 0x1cd   : > { %7913 = vmatpush3.bf16.msra.mxu0 %v8294_v42  ;;  %v8342_v42 = vld [vmem:[%s9625_s19 + $0x428] sm:$0xff]  }
 0x1ce   : > { %7914 = vmatprep.subr.bf16.mxu0 %v8296_v44  ;;  %v8344_v44 = vld [vmem:[%s9625_s19 + $0x460] sm:$0xff]  }
 0x1cf   : > { %7935 = vmatpush3.bf16.msra.mxu1 %v8295_v43  ;;  %v8343_v43 = vld [vmem:[%s9625_s19 + $0x4a8] sm:$0xff]  }
 0x1d0   : > { %7936 = vmatprep.subr.bf16.mxu1 %v8297_v46  ;;  %v8346_v46 = vld [vmem:[%s9625_s19 + $0x420] sm:$0xff]  }
 0x1d1   : > { %7915 = vmatpush3.bf16.msra.mxu0 %v8298_v47  ;;  %v8347_v47 = vld [vmem:[%s9625_s19 + $0x4a0] sm:$0xff]  }
 0x1d2   : > { %7944 = vmatprep.subr.bf16.mxu0 %v8300_v56  ;;  %v8356_v56 = vld [vmem:[%s9625_s19 + $0x448] sm:$0xff]  }
 0x1d3   : > { %7937 = vmatpush3.bf16.msra.mxu1 %v8299_v48  ;;  %v8348_v48 = vld [vmem:[%s9625_s19 + $0x458] sm:$0xff]  }
 0x1d4   : > { %6858 = vmatmul.mubr.bf16.vlgmr.msra.gmra.mxu0 %v7519_v52  ;;  %7966 = vmatprep.subr.bf16.mxu1 %v8301_v57  ;;  %v8352_v52 = vld [vmem:[%s9625_s19 + $0x450] sm:$0xff]   ;;  %v8357_v57 = vld [vmem:[%s9625_s19 + $0x4c8] sm:$0xff]  }
 0x1d5   : > { %7945 = vmatpush3.bf16.msra.mxu0 %v8302_v58  ;;  %6939 = vmatprep.mubr.bf16.mxu0 %v7524_v28  ;;  %v8358_v58 = vld [vmem:[%s9625_s19 + $0x408] sm:$0xff]   ;;  %v8384_v28 = vld [vmem:[%s9625_s19 + $0x550] sm:$0xff]  }
 0x1d6   : > { %6899 = vmatmul.mubr.bf16.vlgmr.msra.gmra.mxu1 %v7521_v54  ;;  %7946 = vmatprep.subr.bf16.mxu0 %v8304_v60  ;;  %v8354_v54 = vld [vmem:[%s9625_s19 + $0x410] sm:$0xff]   ;;  %v8360_v60 = vld [vmem:[%s9625_s19 + $0x440] sm:$0xff]  }
 0x1d7   : > { %7967 = vmatpush3.bf16.msra.mxu1 %v8303_v59  ;;  %6980 = vmatprep.mubr.bf16.mxu1 %v7526_v31  ;;  %v8359_v59 = vld [vmem:[%s9625_s19 + $0x488] sm:$0xff]   ;;  %v8387_v31 = vld [vmem:[%s9625_s19 + $0x590] sm:$0xff]  }
 0x1d8   : > { %7968 = vmatprep.subr.bf16.mxu1 %v8305_v61  ;;  %v8361_v61 = vld [vmem:[%s9625_s19 + $0x4c0] sm:$0xff]  }
 0x1d9   : > { %7947 = vmatpush3.bf16.msra.mxu0 %v8306_v62  ;;  %v8362_v62 = vld [vmem:[%s9625_s19 + $0x400] sm:$0xff]  }
 0x1da   : > { %7948 = vmatprep.subr.bf16.mxu0 %v8308_v0  ;;  %v4422_v0 = vld [vmem:[%s10015_s0 + $0x40] sm:$0xff] }
 0x1db   : > { %7969 = vmatpush3.bf16.msra.mxu1 %v8307_v63  ;;  %v8363_v63 = vld [vmem:[%s9625_s19 + $0x480] sm:$0xff]  }
 0x1dc   : > { %7970 = vmatprep.subr.bf16.mxu1 %v8309_v1  ;;  %v4438_v1 = vld [vmem:[%s10015_s0 + $0xc0] sm:$0xff] }
 0x1dd   : > { %7949 = vmatpush3.bf16.msra.mxu0 %v8310_v2  ;;  %v7527_v2 = vcombine.low %v4422_v0, %v4438_v1 }
 0x1de   : > { %7950 = vmatprep.subr.bf16.mxu0 %v8312_v4  ;;  %v4423_v4 = vld [vmem:[%s10015_s0 + $0x48] sm:$0xff] }
 0x1df   : > { %7971 = vmatpush3.bf16.msra.mxu1 %v8311_v3  ;;  %v7528_v3 = vcombine.high %v4422_v0, %v4438_v1  ;;  %v8412_v0 = vld [vmem:[%s9625_s19 + $0x658] sm:$0xff]  }
 0x1e0   : > { %7972 = vmatprep.subr.bf16.mxu1 %v8313_v5  ;;  %v4439_v5 = vld [vmem:[%s10015_s0 + $0xc8] sm:$0xff]  ;;  %v8413_v1 = vld [vmem:[%s9625_s19 + $0x6d8] sm:$0xff]  }
 0x1e1   : > { %7951 = vmatpush3.bf16.msra.mxu0 %v8314_v6  ;;  %v7529_v6 = vcombine.low %v4423_v4, %v4439_v5 }
 0x1e2   : > { %7952 = vmatprep.subr.bf16.mxu0 %v8316_v8  ;;  %v8364_v8 = vld [vmem:[%s9625_s19 + $0x578] sm:$0xff]  }
 0x1e3   : > { %7973 = vmatpush3.bf16.msra.mxu1 %v8315_v7  ;;  %v7530_v7 = vcombine.high %v4423_v4, %v4439_v5  ;;  %v8416_v4 = vld [vmem:[%s9625_s19 + $0x650] sm:$0xff]  }
 0x1e4   : > { %7974 = vmatprep.subr.bf16.mxu1 %v8317_v9  ;;  %v8365_v9 = vld [vmem:[%s9625_s19 + $0x5f8] sm:$0xff]   ;;  %v8417_v5 = vld [vmem:[%s9625_s19 + $0x6d0] sm:$0xff]  }
 0x1e5   : > { %7953 = vmatpush3.bf16.msra.mxu0 %v8318_v10  ;;  %v8366_v10 = vld [vmem:[%s9625_s19 + $0x538] sm:$0xff]  }
 0x1e6   : > { %7954 = vmatprep.subr.bf16.mxu0 %v8320_v12  ;;  %v8368_v12 = vld [vmem:[%s9625_s19 + $0x570] sm:$0xff]  }
 0x1e7   : > { %7975 = vmatpush3.bf16.msra.mxu1 %v8319_v11  ;;  %v8367_v11 = vld [vmem:[%s9625_s19 + $0x5b8] sm:$0xff]  }
 0x1e8   : > { %7976 = vmatprep.subr.bf16.mxu1 %v8321_v13  ;;  %v8369_v13 = vld [vmem:[%s9625_s19 + $0x5f0] sm:$0xff]  }
 0x1e9   : > { %7955 = vmatpush3.bf16.msra.mxu0 %v8322_v14  ;;  %v8370_v14 = vld [vmem:[%s9625_s19 + $0x530] sm:$0xff]  }
 0x1ea   : > { %7956 = vmatprep.subr.bf16.mxu0 %v8324_v16  ;;  %v8372_v16 = vld [vmem:[%s9625_s19 + $0x568] sm:$0xff]  }
 0x1eb   : > { %7977 = vmatpush3.bf16.msra.mxu1 %v8323_v15  ;;  %v8371_v15 = vld [vmem:[%s9625_s19 + $0x5b0] sm:$0xff]  }
 0x1ec   : > { %7978 = vmatprep.subr.bf16.mxu1 %v8325_v17  ;;  %v8373_v17 = vld [vmem:[%s9625_s19 + $0x5e8] sm:$0xff]  }
 0x1ed   : > { %7957 = vmatpush3.bf16.msra.mxu0 %v8326_v18  ;;  %v8374_v18 = vld [vmem:[%s9625_s19 + $0x528] sm:$0xff]  }
 0x1ee   : > { %7958 = vmatprep.subr.bf16.mxu0 %v8328_v20  ;;  %v8376_v20 = vld [vmem:[%s9625_s19 + $0x560] sm:$0xff]  }
 0x1ef   : > { %7979 = vmatpush3.bf16.msra.mxu1 %v8327_v19  ;;  %v8375_v19 = vld [vmem:[%s9625_s19 + $0x5a8] sm:$0xff]  }
 0x1f0   : > { %7980 = vmatprep.subr.bf16.mxu1 %v8329_v21  ;;  %v8377_v21 = vld [vmem:[%s9625_s19 + $0x5e0] sm:$0xff]  }
 0x1f1   : > { %7959 = vmatpush3.bf16.msra.mxu0 %v8330_v22  ;;  %v8378_v22 = vld [vmem:[%s9625_s19 + $0x520] sm:$0xff]  }
 0x1f2   : > { %7988 = vmatprep.subr.bf16.mxu0 %v8332_v32  ;;  %v8388_v32 = vld [vmem:[%s9625_s19 + $0x548] sm:$0xff]  }
 0x1f3   : > { %7981 = vmatpush3.bf16.msra.mxu1 %v8331_v23  ;;  %v8379_v23 = vld [vmem:[%s9625_s19 + $0x5a0] sm:$0xff]  }
 0x1f4   : > { %6940 = vmatmul.mubr.bf16.vlgmr.msra.gmra.mxu0 %v7523_v27  ;;  %8010 = vmatprep.subr.bf16.mxu1 %v8333_v33  ;;  %v8383_v27 = vld [vmem:[%s9625_s19 + $0x598] sm:$0xff]   ;;  %v8389_v33 = vld [vmem:[%s9625_s19 + $0x5c8] sm:$0xff]  }
 0x1f5   : > { %7989 = vmatpush3.bf16.msra.mxu0 %v8334_v34  ;;  %7021 = vmatprep.mubr.bf16.mxu0 %v7528_v3  ;;  %v8390_v34 = vld [vmem:[%s9625_s19 + $0x508] sm:$0xff]   ;;  %v8415_v3 = vld [vmem:[%s9625_s19 + $0x698] sm:$0xff]  }
 0x1f6   : > { %6981 = vmatmul.mubr.bf16.vlgmr.msra.gmra.mxu1 %v7525_v30  ;;  %7990 = vmatprep.subr.bf16.mxu0 %v8336_v36  ;;  %v8386_v30 = vld [vmem:[%s9625_s19 + $0x510] sm:$0xff]   ;;  %v8392_v36 = vld [vmem:[%s9625_s19 + $0x540] sm:$0xff]  }
 0x1f7   : > { %8011 = vmatpush3.bf16.msra.mxu1 %v8335_v35  ;;  %7062 = vmatprep.mubr.bf16.mxu1 %v7530_v7  ;;  %v8391_v35 = vld [vmem:[%s9625_s19 + $0x588] sm:$0xff]   ;;  %v8419_v7 = vld [vmem:[%s9625_s19 + $0x690] sm:$0xff]  }
 0x1f8   : > { %8012 = vmatprep.subr.bf16.mxu1 %v8337_v37  ;;  %v8393_v37 = vld [vmem:[%s9625_s19 + $0x5c0] sm:$0xff]  }
 0x1f9   : > { %7991 = vmatpush3.bf16.msra.mxu0 %v8338_v38  ;;  %v8394_v38 = vld [vmem:[%s9625_s19 + $0x500] sm:$0xff]  }
 0x1fa   : > { %7992 = vmatprep.subr.bf16.mxu0 %v8340_v40  ;;  %v4424_v40 = vld [vmem:[%s10015_s0 + $0x50] sm:$0xff] }
 0x1fb   : > { %8013 = vmatpush3.bf16.msra.mxu1 %v8339_v39  ;;  %v8395_v39 = vld [vmem:[%s9625_s19 + $0x580] sm:$0xff]  }
 0x1fc   : > { %8014 = vmatprep.subr.bf16.mxu1 %v8341_v41  ;;  %v4440_v41 = vld [vmem:[%s10015_s0 + $0xd0] sm:$0xff] }
 0x1fd   : > { %7993 = vmatpush3.bf16.msra.mxu0 %v8342_v42  ;;  %v4425_v42 = vld [vmem:[%s10015_s0 + $0x58] sm:$0xff] }
 0x1fe   : > { %7994 = vmatprep.subr.bf16.mxu0 %v8344_v44  ;;  %v7531_v44 = vcombine.low %v4424_v40, %v4440_v41 }
 0x1ff   : > { %8015 = vmatpush3.bf16.msra.mxu1 %v8343_v43  ;;  %v4441_v43 = vld [vmem:[%s10015_s0 + $0xd8] sm:$0xff] }
 0x200   : > { %8016 = vmatprep.subr.bf16.mxu1 %v8345_v45  ;;  %v7532_v45 = vcombine.high %v4424_v40, %v4440_v41  ;;  %v8444_v40 = vld [vmem:[%s9625_s19 + $0x758] sm:$0xff]  }
 0x201   : > { %7995 = vmatpush3.bf16.msra.mxu0 %v8346_v46  ;;  %v7533_v46 = vcombine.low %v4425_v42, %v4441_v43  ;;  %v8445_v41 = vld [vmem:[%s9625_s19 + $0x7d8] sm:$0xff]  }
 0x202   : > { %7996 = vmatprep.subr.bf16.mxu0 %v8348_v48  ;;  %v8396_v48 = vld [vmem:[%s9625_s19 + $0x678] sm:$0xff]  }
 0x203   : > { %8017 = vmatpush3.bf16.msra.mxu1 %v8347_v47  ;;  %v7534_v47 = vcombine.high %v4425_v42, %v4441_v43  ;;  %v8446_v42 = vld [vmem:[%s9625_s19 + $0x718] sm:$0xff]  }
 0x204   : > { %8018 = vmatprep.subr.bf16.mxu1 %v8349_v49  ;;  %v8397_v49 = vld [vmem:[%s9625_s19 + $0x6f8] sm:$0xff]  }
 0x205   : > { %7997 = vmatpush3.bf16.msra.mxu0 %v8350_v50  ;;  %v8398_v50 = vld [vmem:[%s9625_s19 + $0x638] sm:$0xff]  }
 0x206   : > { %7998 = vmatprep.subr.bf16.mxu0 %v8352_v52  ;;  %v8400_v52 = vld [vmem:[%s9625_s19 + $0x670] sm:$0xff]   ;;  %v8447_v43 = vld [vmem:[%s9625_s19 + $0x798] sm:$0xff]  }
 0x207   : > { %8019 = vmatpush3.bf16.msra.mxu1 %v8351_v51  ;;  %v8399_v51 = vld [vmem:[%s9625_s19 + $0x6b8] sm:$0xff]  }
 0x208   : > { %8020 = vmatprep.subr.bf16.mxu1 %v8353_v53  ;;  %v8401_v53 = vld [vmem:[%s9625_s19 + $0x6f0] sm:$0xff]  }
 0x209   : > { %7999 = vmatpush3.bf16.msra.mxu0 %v8354_v54  ;;  %v8402_v54 = vld [vmem:[%s9625_s19 + $0x630] sm:$0xff]  }
 0x20a   : > { %8000 = vmatprep.subr.bf16.mxu0 %v8356_v56  ;;  %v8404_v56 = vld [vmem:[%s9625_s19 + $0x668] sm:$0xff]  }
 0x20b   : > { %8021 = vmatpush3.bf16.msra.mxu1 %v8355_v55  ;;  %v8403_v55 = vld [vmem:[%s9625_s19 + $0x6b0] sm:$0xff]  }
 0x20c   : > { %8022 = vmatprep.subr.bf16.mxu1 %v8357_v57  ;;  %v8405_v57 = vld [vmem:[%s9625_s19 + $0x6e8] sm:$0xff]  }
 0x20d   : > { %8001 = vmatpush3.bf16.msra.mxu0 %v8358_v58  ;;  %v8406_v58 = vld [vmem:[%s9625_s19 + $0x628] sm:$0xff]  }
 0x20e   : > { %8002 = vmatprep.subr.bf16.mxu0 %v8360_v60  ;;  %v8408_v60 = vld [vmem:[%s9625_s19 + $0x660] sm:$0xff]  }
 0x20f   : > { %8023 = vmatpush3.bf16.msra.mxu1 %v8359_v59  ;;  %v8407_v59 = vld [vmem:[%s9625_s19 + $0x6a8] sm:$0xff]  }
 0x210   : > { %8024 = vmatprep.subr.bf16.mxu1 %v8361_v61  ;;  %v8409_v61 = vld [vmem:[%s9625_s19 + $0x6e0] sm:$0xff]  }
 0x211   : > { %8003 = vmatpush3.bf16.msra.mxu0 %v8362_v62  ;;  %v8410_v62 = vld [vmem:[%s9625_s19 + $0x620] sm:$0xff]  }
 0x212   : > { %8032 = vmatprep.subr.bf16.mxu0 %v8364_v8  ;;  %v8420_v8 = vld [vmem:[%s9625_s19 + $0x648] sm:$0xff]  }
 0x213   : > { %8025 = vmatpush3.bf16.msra.mxu1 %v8363_v63  ;;  %v8411_v63 = vld [vmem:[%s9625_s19 + $0x6a0] sm:$0xff]  }
 0x214   : > { %7022 = vmatmul.mubr.bf16.vlgmr.msra.gmra.mxu0 %v7527_v2  ;;  %8054 = vmatprep.subr.bf16.mxu1 %v8365_v9  ;;  %v8414_v2 = vld [vmem:[%s9625_s19 + $0x618] sm:$0xff]   ;;  %v8421_v9 = vld [vmem:[%s9625_s19 + $0x6c8] sm:$0xff]  }
 0x215   : > { %8033 = vmatpush3.bf16.msra.mxu0 %v8366_v10  ;;  %7103 = vmatprep.mubr.bf16.mxu0 %v7532_v45  ;;  %v8422_v10 = vld [vmem:[%s9625_s19 + $0x608] sm:$0xff]   ;;  %v8449_v45 = vld [vmem:[%s9625_s19 + $0x7d0] sm:$0xff]  }
 0x216   : > { %7063 = vmatmul.mubr.bf16.vlgmr.msra.gmra.mxu1 %v7529_v6  ;;  %8034 = vmatprep.subr.bf16.mxu0 %v8368_v12  ;;  %v8418_v6 = vld [vmem:[%s9625_s19 + $0x610] sm:$0xff]   ;;  %v8424_v12 = vld [vmem:[%s9625_s19 + $0x640] sm:$0xff]  }
 0x217   : > { %8055 = vmatpush3.bf16.msra.mxu1 %v8367_v11  ;;  %7144 = vmatprep.mubr.bf16.mxu1 %v7534_v47  ;;  %v8423_v11 = vld [vmem:[%s9625_s19 + $0x688] sm:$0xff]   ;;  %v8451_v47 = vld [vmem:[%s9625_s19 + $0x790] sm:$0xff]  }
 0x218   : > { %8056 = vmatprep.subr.bf16.mxu1 %v8369_v13  ;;  %v8425_v13 = vld [vmem:[%s9625_s19 + $0x6c0] sm:$0xff]  }
 0x219   : > { %8035 = vmatpush3.bf16.msra.mxu0 %v8370_v14  ;;  %v8426_v14 = vld [vmem:[%s9625_s19 + $0x600] sm:$0xff]  }
 0x21a   : > { %8036 = vmatprep.subr.bf16.mxu0 %v8372_v16  ;;  %v4426_v16 = vld [vmem:[%s10015_s0 + $0x60] sm:$0xff] }
 0x21b   : > { %8057 = vmatpush3.bf16.msra.mxu1 %v8371_v15  ;;  %v8427_v15 = vld [vmem:[%s9625_s19 + $0x680] sm:$0xff]  }
 0x21c   : > { %8058 = vmatprep.subr.bf16.mxu1 %v8373_v17  ;;  %v4442_v17 = vld [vmem:[%s10015_s0 + $0xe0] sm:$0xff] }
 0x21d   : > { %8037 = vmatpush3.bf16.msra.mxu0 %v8374_v18  ;;  %v4427_v18 = vld [vmem:[%s10015_s0 + $0x68] sm:$0xff] }
 0x21e   : > { %8038 = vmatprep.subr.bf16.mxu0 %v8376_v20  ;;  %v7536_v20 = vcombine.high %v4426_v16, %v4442_v17 }
 0x21f   : > { %8059 = vmatpush3.bf16.msra.mxu1 %v8375_v19  ;;  %v7535_v19 = vcombine.low %v4426_v16, %v4442_v17 }
 0x220   : > { %8060 = vmatprep.subr.bf16.mxu1 %v8377_v21  ;;  %v4443_v21 = vld [vmem:[%s10015_s0 + $0xe8] sm:$0xff] }
 0x221   : > { %8039 = vmatpush3.bf16.msra.mxu0 %v8378_v22  ;;  %v7537_v22 = vcombine.low %v4427_v18, %v4443_v21 }
 0x222   : > { %8040 = vmatprep.subr.bf16.mxu0 %v8380_v24  ;;  %v8428_v24 = vld [vmem:[%s9625_s19 + $0x778] sm:$0xff]  }
 0x223   : > { %8061 = vmatpush3.bf16.msra.mxu1 %v8379_v23  ;;  %v7538_v23 = vcombine.high %v4427_v18, %v4443_v21 }
 0x224   : > { %8062 = vmatprep.subr.bf16.mxu1 %v8381_v25  ;;  %v8429_v25 = vld [vmem:[%s9625_s19 + $0x7f8] sm:$0xff]  }
 0x225   : > { %8041 = vmatpush3.bf16.msra.mxu0 %v8382_v26  ;;  %v8430_v26 = vld [vmem:[%s9625_s19 + $0x738] sm:$0xff]  }
 0x226   : > { %8042 = vmatprep.subr.bf16.mxu0 %v8384_v28  ;;  %v8432_v28 = vld [vmem:[%s9625_s19 + $0x770] sm:$0xff]  }
 0x227   : > { %8063 = vmatpush3.bf16.msra.mxu1 %v8383_v27  ;;  %v8431_v27 = vld [vmem:[%s9625_s19 + $0x7b8] sm:$0xff]  }
 0x228   : > { %8064 = vmatprep.subr.bf16.mxu1 %v8385_v29  ;;  %v8433_v29 = vld [vmem:[%s9625_s19 + $0x7f0] sm:$0xff]  }
 0x229   : > { %8043 = vmatpush3.bf16.msra.mxu0 %v8386_v30  ;;  %v8434_v30 = vld [vmem:[%s9625_s19 + $0x730] sm:$0xff]  }
 0x22a   : > { %8044 = vmatprep.subr.bf16.mxu0 %v8388_v32  ;;  %v8436_v32 = vld [vmem:[%s9625_s19 + $0x768] sm:$0xff]  }
 0x22b   : > { %8065 = vmatpush3.bf16.msra.mxu1 %v8387_v31  ;;  %v8435_v31 = vld [vmem:[%s9625_s19 + $0x7b0] sm:$0xff]  }
 0x22c   : > { %8066 = vmatprep.subr.bf16.mxu1 %v8389_v33  ;;  %v8437_v33 = vld [vmem:[%s9625_s19 + $0x7e8] sm:$0xff]  }
 0x22d   : > { %8045 = vmatpush3.bf16.msra.mxu0 %v8390_v34  ;;  %v8438_v34 = vld [vmem:[%s9625_s19 + $0x728] sm:$0xff]  }
 0x22e   : > { %8046 = vmatprep.subr.bf16.mxu0 %v8392_v36  ;;  %v8440_v36 = vld [vmem:[%s9625_s19 + $0x760] sm:$0xff]  }
 0x22f   : > { %8067 = vmatpush3.bf16.msra.mxu1 %v8391_v35  ;;  %v8439_v35 = vld [vmem:[%s9625_s19 + $0x7a8] sm:$0xff]  }
 0x230   : > { %8068 = vmatprep.subr.bf16.mxu1 %v8393_v37  ;;  %v8441_v37 = vld [vmem:[%s9625_s19 + $0x7e0] sm:$0xff]  }
 0x231   : > { %8047 = vmatpush3.bf16.msra.mxu0 %v8394_v38  ;;  %v8442_v38 = vld [vmem:[%s9625_s19 + $0x720] sm:$0xff]  }
 0x232   : > { %8076 = vmatprep.subr.bf16.mxu0 %v8396_v48  ;;  %v8452_v48 = vld [vmem:[%s9625_s19 + $0x748] sm:$0xff]  }
 0x233   : > { %8069 = vmatpush3.bf16.msra.mxu1 %v8395_v39  ;;  %v8443_v39 = vld [vmem:[%s9625_s19 + $0x7a0] sm:$0xff]  }
 0x234   : > { %7104 = vmatmul.mubr.bf16.vlgmr.msra.gmra.mxu0 %v7531_v44  ;;  %8098 = vmatprep.subr.bf16.mxu1 %v8397_v49  ;;  %v8448_v44 = vld [vmem:[%s9625_s19 + $0x750] sm:$0xff]   ;;  %v8453_v49 = vld [vmem:[%s9625_s19 + $0x7c8] sm:$0xff]  }
 0x235   : > { %8077 = vmatpush3.bf16.msra.mxu0 %v8398_v50  ;;  %7185 = vmatprep.mubr.bf16.mxu0 %v7536_v20  ;;  %v8454_v50 = vld [vmem:[%s9625_s19 + $0x708] sm:$0xff]  }
 0x236   : > { %7145 = vmatmul.mubr.bf16.vlgmr.msra.gmra.mxu1 %v7533_v46  ;;  %8078 = vmatprep.subr.bf16.mxu0 %v8400_v52  ;;  %v8450_v46 = vld [vmem:[%s9625_s19 + $0x710] sm:$0xff]   ;;  %v8456_v52 = vld [vmem:[%s9625_s19 + $0x740] sm:$0xff]  }
 0x237   : > { %8099 = vmatpush3.bf16.msra.mxu1 %v8399_v51  ;;  %7226 = vmatprep.mubr.bf16.mxu1 %v7538_v23  ;;  %v8455_v51 = vld [vmem:[%s9625_s19 + $0x788] sm:$0xff]  }
 0x238   : > { %8100 = vmatprep.subr.bf16.mxu1 %v8401_v53  ;;  %v8457_v53 = vld [vmem:[%s9625_s19 + $0x7c0] sm:$0xff]  }
 0x239   : > { %8079 = vmatpush3.bf16.msra.mxu0 %v8402_v54  ;;  %v8458_v54 = vld [vmem:[%s9625_s19 + $0x700] sm:$0xff]  }
 0x23a   : > { %8080 = vmatprep.subr.bf16.mxu0 %v8404_v56  ;;  %v4428_v56 = vld [vmem:[%s10015_s0 + $0x70] sm:$0xff] }
 0x23b   : > { %8101 = vmatpush3.bf16.msra.mxu1 %v8403_v55  ;;  %v8459_v55 = vld [vmem:[%s9625_s19 + $0x780] sm:$0xff]   ;;  %s4410_s19 = scalar_select %p4409_p11, %s8490_s14, 3 }
 0x23c   : > { %8102 = vmatprep.subr.bf16.mxu1 %v8405_v57  ;;  %v4444_v57 = vld [vmem:[%s10015_s0 + $0xf0] sm:$0xff] }
 0x23d   : > { %8081 = vmatpush3.bf16.msra.mxu0 %v8406_v58  ;;  %v4429_v58 = vld [vmem:[%s10015_s0 + $0x78] sm:$0xff]  ;;  %s4411_s29 = scalar_lea.vmem %s10017_s2, %s4410_s19 }
 0x23e   : > { %8082 = vmatprep.subr.bf16.mxu0 %v8408_v60  ;;  %v7539_v60 = vcombine.low %v4428_v56, %v4444_v57 }
 0x23f   : > { %8103 = vmatpush3.bf16.msra.mxu1 %v8407_v59  ;;  %v4445_v59 = vld [vmem:[%s10015_s0 + $0xf8] sm:$0xff] }
 0x240   : > { %8104 = vmatprep.subr.bf16.mxu1 %v8409_v61  ;;  %v7540_v61 = vcombine.high %v4428_v56, %v4444_v57 }
 0x241   : > { %8083 = vmatpush3.bf16.msra.mxu0 %v8410_v62  ;;  %v7541_v62 = vcombine.low %v4429_v58, %v4445_v59 }
 0x242   : > { %8084 = vmatprep.subr.bf16.mxu0 %v8412_v0 }
 0x243   : > { %8105 = vmatpush3.bf16.msra.mxu1 %v8411_v63  ;;  %v7542_v63 = vcombine.high %v4429_v58, %v4445_v59 }
 0x244   : > { %8106 = vmatprep.subr.bf16.mxu1 %v8413_v1 }
 0x245   : > { %8085 = vmatpush3.bf16.msra.mxu0 %v8414_v2 }
 0x246   : > { %8086 = vmatprep.subr.bf16.mxu0 %v8416_v4 }
 0x247   : > { %8107 = vmatpush3.bf16.msra.mxu1 %v8415_v3 }
 0x248   : > { %8108 = vmatprep.subr.bf16.mxu1 %v8417_v5 }
 0x249   : > { %8087 = vmatpush3.bf16.msra.mxu0 %v8418_v6 }
 0x24a   : > { %8088 = vmatprep.subr.bf16.mxu0 %v8420_v8 }
 0x24b   : > { %8109 = vmatpush3.bf16.msra.mxu1 %v8419_v7 }
 0x24c   : > { %8110 = vmatprep.subr.bf16.mxu1 %v8421_v9 }
 0x24d   : > { %8089 = vmatpush3.bf16.msra.mxu0 %v8422_v10 }
 0x24e   : > { %8090 = vmatprep.subr.bf16.mxu0 %v8424_v12 }
 0x24f   : > { %8111 = vmatpush3.bf16.msra.mxu1 %v8423_v11 }
 0x250   : > { %8112 = vmatprep.subr.bf16.mxu1 %v8425_v13 }
 0x251   : > { %8091 = vmatpush3.bf16.msra.mxu0 %v8426_v14 }
 0x252   : > { %8120 = vmatprep.subr.bf16.mxu0 %v8428_v24 }
 0x253   : > { %8113 = vmatpush3.bf16.msra.mxu1 %v8427_v15 }
 0x254   : > { %7186 = vmatmul.mubr.bf16.vlgmr.msra.gmra.mxu0 %v7535_v19  ;;  %8142 = vmatprep.subr.bf16.mxu1 %v8429_v25  ;;  %v7828_v0 = vpop.f32.mrf.mxu0 }
 0x255   : > { %8121 = vmatpush3.bf16.msra.mxu0 %v8430_v26  ;;  %7267 = vmatprep.mubr.bf16.mxu0 %v7540_v61 }
 0x256   : > { %7227 = vmatmul.mubr.bf16.vlgmr.msra.gmra.mxu1 %v7537_v22  ;;  %8122 = vmatprep.subr.bf16.mxu0 %v8432_v28  ;;  %v7850_v1 = vpop.f32.mrf.mxu1  ;;  %v7829_v2 = vpop.f32.mrf.mxu0 }
 0x257   : > { %8143 = vmatpush3.bf16.msra.mxu1 %v8431_v27  ;;  %7308 = vmatprep.mubr.bf16.mxu1 %v7542_v63 }
 0x258   : > { %8144 = vmatprep.subr.bf16.mxu1 %v8433_v29  ;;  %v7851_v3 = vpop.f32.mrf.mxu1  ;;  %v7831_v4 = vpop.f32.mrf.mxu0 }
 0x259   : > { %8123 = vmatpush3.bf16.msra.mxu0 %v8434_v30 }
 0x25a   : > { %8124 = vmatprep.subr.bf16.mxu0 %v8436_v32  ;;  %v7853_v5 = vpop.f32.mrf.mxu1  ;;  %v7832_v6 = vpop.f32.mrf.mxu0 }
 0x25b   : > { %8145 = vmatpush3.bf16.msra.mxu1 %v8435_v31 }
 0x25c   : > { %8146 = vmatprep.subr.bf16.mxu1 %v8437_v33  ;;  %v7854_v7 = vpop.f32.mrf.mxu1 }
 0x25d   : > { %8125 = vmatpush3.bf16.msra.mxu0 %v8438_v34  ;;  %v7830_v34 = vadd.f32 %v7829_v2, %v7828_v0 }
 0x25e   : > { %8126 = vmatprep.subr.bf16.mxu0 %v8440_v36 }
 0x25f   : > { %8147 = vmatpush3.bf16.msra.mxu1 %v8439_v35  ;;  %v7510_v35 = vld [vmem:[%s4411_s29] ss:$0 sm:$0xff] }
 0x260   : > { %8148 = vmatprep.subr.bf16.mxu1 %v8441_v37 }
 0x261   : > { %8127 = vmatpush3.bf16.msra.mxu0 %v8442_v38  ;;  %v6696_v38 = vadd.f32 %v7830_v34, %v7510_v35 }
 0x262   : > { %8128 = vmatprep.subr.bf16.mxu0 %v8444_v40  ;;  %v7833_v40 = vadd.f32 %v7832_v6, %v7831_v4 }
 0x263   : > { %8149 = vmatpush3.bf16.msra.mxu1 %v8443_v39  ;;  %v7852_v39 = vadd.f32 %v7851_v3, %v7850_v1 }
 0x264   : > { %8150 = vmatprep.subr.bf16.mxu1 %v8445_v41 }
 0x265   : > { %8129 = vmatpush3.bf16.msra.mxu0 %v8446_v42 }
 0x266   : > { %8130 = vmatprep.subr.bf16.mxu0 %v8448_v44  ;;  %v6737_v44 = vadd.f32 %v7852_v39, %v6696_v38 }
 0x267   : > { %8151 = vmatpush3.bf16.msra.mxu1 %v8447_v43 }
 0x268   : > { %8152 = vmatprep.subr.bf16.mxu1 %v8449_v45  ;;  %v6699_v45 = vadd.f32 %v7833_v40, %v7510_v35 }
 0x269   : > { %8131 = vmatpush3.bf16.msra.mxu0 %v8450_v46 }
 0x26a   : > { %8132 = vmatprep.subr.bf16.mxu0 %v8452_v48 }
 0x26b   : > { %8153 = vmatpush3.bf16.msra.mxu1 %v8451_v47  ;;  %v7855_v47 = vadd.f32 %v7854_v7, %v7853_v5 }
 0x26c   : > { %8154 = vmatprep.subr.bf16.mxu1 %v8453_v49 }
 0x26d   : > { %8133 = vmatpush3.bf16.msra.mxu0 %v8454_v50 }
 0x26e   : > { %8134 = vmatprep.subr.bf16.mxu0 %v8456_v52 }
 0x26f   : > { %8155 = vmatpush3.bf16.msra.mxu1 %v8455_v51 }
 0x270   : > { %8156 = vmatprep.subr.bf16.mxu1 %v8457_v53  ;;  %v6740_v53 = vadd.f32 %v7855_v47, %v6699_v45 }
 0x271   : > { %8135 = vmatpush3.bf16.msra.mxu0 %v8458_v54 }
 0x273   : > { %8157 = vmatpush3.bf16.msra.mxu1 %v8459_v55 }
 0x274   : > { %7268 = vmatmul.mubr.bf16.vlgmr.msra.gmra.mxu0 %v7539_v60  ;;  %v7872_v8 = vpop.f32.mrf.mxu0 }
 0x276   : > { %7309 = vmatmul.mubr.bf16.vlgmr.msra.gmra.mxu1 %v7541_v62  ;;  %v7894_v9 = vpop.f32.mrf.mxu1  ;;  %v7873_v10 = vpop.f32.mrf.mxu0 }
 0x277   : > { %v7874_v42 = vadd.f32 %v7873_v10, %v7872_v8 }
 0x278   : > { %v7895_v11 = vpop.f32.mrf.mxu1  ;;  %v7875_v12 = vpop.f32.mrf.mxu0 }
 0x279   : > { %v6778_v48 = vadd.f32 %v7874_v42, %v6737_v44  ;;  %v7896_v49 = vadd.f32 %v7895_v11, %v7894_v9 }
 0x27a   : > { %v7897_v13 = vpop.f32.mrf.mxu1  ;;  %v7876_v14 = vpop.f32.mrf.mxu0 }
 0x27b   : > { %v7877_v50 = vadd.f32 %v7876_v14, %v7875_v12  ;;  %v6819_v56 = vadd.f32 %v7896_v49, %v6778_v48 }
 0x27c   : > { %v7898_v15 = vpop.f32.mrf.mxu1 }
 0x27d   : > { %v6781_v57 = vadd.f32 %v7877_v50, %v6740_v53  ;;  %v7899_v59 = vadd.f32 %v7898_v15, %v7897_v13 }
 0x27f   : > { %v6822_v0 = vadd.f32 %v7899_v59, %v6781_v57 }
 0x294   : > { %v7916_v16 = vpop.f32.mrf.mxu0 }
 0x296   : > { %v7938_v17 = vpop.f32.mrf.mxu1  ;;  %v7917_v18 = vpop.f32.mrf.mxu0 }
 0x297   : > { %v7918_v54 = vadd.f32 %v7917_v18, %v7916_v16 }
 0x298   : > { %v7939_v19 = vpop.f32.mrf.mxu1  ;;  %v7919_v20 = vpop.f32.mrf.mxu0 }
 0x299   : > { %v6860_v60 = vadd.f32 %v7918_v54, %v6819_v56  ;;  %v7940_v61 = vadd.f32 %v7939_v19, %v7938_v17 }
 0x29a   : > { %v7941_v21 = vpop.f32.mrf.mxu1  ;;  %v7920_v22 = vpop.f32.mrf.mxu0 }
 0x29b   : > { %v7921_v62 = vadd.f32 %v7920_v22, %v7919_v20  ;;  %v6901_v3 = vadd.f32 %v7940_v61, %v6860_v60 }
 0x29c   : > { %v7942_v23 = vpop.f32.mrf.mxu1 }
 0x29d   : > { %v6863_v4 = vadd.f32 %v7921_v62, %v6822_v0  ;;  %v7943_v6 = vadd.f32 %v7942_v23, %v7941_v21 }
 0x29f   : > { %v6904_v11 = vadd.f32 %v7943_v6, %v6863_v4 }
 0x2b4   : > { %v7960_v24 = vpop.f32.mrf.mxu0 }
 0x2b6   : > { %v7982_v25 = vpop.f32.mrf.mxu1  ;;  %v7961_v26 = vpop.f32.mrf.mxu0 }
 0x2b7   : > { %v7962_v1 = vadd.f32 %v7961_v26, %v7960_v24 }
 0x2b8   : > { %v7983_v27 = vpop.f32.mrf.mxu1  ;;  %v7963_v28 = vpop.f32.mrf.mxu0 }
 0x2b9   : > { %v6942_v7 = vadd.f32 %v7962_v1, %v6901_v3  ;;  %v7984_v8 = vadd.f32 %v7983_v27, %v7982_v25 }
 0x2ba   : > { %v7985_v29 = vpop.f32.mrf.mxu1  ;;  %v7964_v30 = vpop.f32.mrf.mxu0 }
 0x2bb   : > { %v7965_v9 = vadd.f32 %v7964_v30, %v7963_v28  ;;  %v6983_v13 = vadd.f32 %v7984_v8, %v6942_v7 }
 0x2bc   : > { %v7986_v31 = vpop.f32.mrf.mxu1 }
 0x2bd   : > { %v6945_v15 = vadd.f32 %v7965_v9, %v6904_v11  ;;  %v7987_v18 = vadd.f32 %v7986_v31, %v7985_v29 }
 0x2bf   : > { %v6986_v26 = vadd.f32 %v7987_v18, %v6945_v15 }
 0x2d4   : > { %v8004_v32 = vpop.f32.mrf.mxu0 }
 0x2d6   : > { %v8026_v33 = vpop.f32.mrf.mxu1  ;;  %v8005_v36 = vpop.f32.mrf.mxu0 }
 0x2d7   : > { %v8006_v12 = vadd.f32 %v8005_v36, %v8004_v32 }
 0x2d8   : > { %v8027_v37 = vpop.f32.mrf.mxu1  ;;  %v8007_v41 = vpop.f32.mrf.mxu0 }
 0x2d9   : > { %v7024_v19 = vadd.f32 %v8006_v12, %v6983_v13  ;;  %v8028_v20 = vadd.f32 %v8027_v37, %v8026_v33 }
 0x2da   : > { %v8029_v43 = vpop.f32.mrf.mxu1  ;;  %v8008_v46 = vpop.f32.mrf.mxu0 }
 0x2db   : > { %v8009_v22 = vadd.f32 %v8008_v46, %v8007_v41  ;;  %v7065_v21 = vadd.f32 %v8028_v20, %v7024_v19 }
 0x2dc   : > { %v8030_v51 = vpop.f32.mrf.mxu1 }
 0x2dd   : > { %v7027_v23 = vadd.f32 %v8009_v22, %v6986_v26  ;;  %v8031_v27 = vadd.f32 %v8030_v51, %v8029_v43 }
 0x2df   : > { %v7068_v38 = vadd.f32 %v8031_v27, %v7027_v23 }
 0x2f4   : > { %v8048_v52 = vpop.f32.mrf.mxu0 }
 0x2f6   : > { %v8070_v55 = vpop.f32.mrf.mxu1  ;;  %v8049_v58 = vpop.f32.mrf.mxu0 }
 0x2f7   : > { %v8050_v34 = vadd.f32 %v8049_v58, %v8048_v52 }
 0x2f8   : > { %v8071_v63 = vpop.f32.mrf.mxu1  ;;  %v8051_v2 = vpop.f32.mrf.mxu0 }
 0x2f9   : > { %v7106_v28 = vadd.f32 %v8050_v34, %v7065_v21  ;;  %v8072_v30 = vadd.f32 %v8071_v63, %v8070_v55 }
 0x2fa   : > { %v8073_v5 = vpop.f32.mrf.mxu1  ;;  %v8052_v10 = vpop.f32.mrf.mxu0 }
 0x2fb   : > { %v8053_v32 = vadd.f32 %v8052_v10, %v8051_v2  ;;  %v7147_v42 = vadd.f32 %v8072_v30, %v7106_v28 }
 0x2fc   : > { %v8074_v14 = vpop.f32.mrf.mxu1 }
 0x2fd   : > { %v7109_v29 = vadd.f32 %v8053_v32, %v7068_v38  ;;  %v8075_v33 = vadd.f32 %v8074_v14, %v8073_v5 }
 0x2ff   : > { %v7150_v47 = vadd.f32 %v8075_v33, %v7109_v29 }
 0x314   : > { %v8092_v16 = vpop.f32.mrf.mxu0 }
 0x316   : > { %v8114_v17 = vpop.f32.mrf.mxu1  ;;  %v8093_v24 = vpop.f32.mrf.mxu0 }
 0x317   : > { %v8094_v39 = vadd.f32 %v8093_v24, %v8092_v16 }
 0x318   : > { %v8115_v35 = vpop.f32.mrf.mxu1  ;;  %v8095_v25 = vpop.f32.mrf.mxu0 }
 0x319   : > { %v7188_v37 = vadd.f32 %v8094_v39, %v7147_v42  ;;  %v8116_v41 = vadd.f32 %v8115_v35, %v8114_v17 }
 0x31a   : > { %v8117_v36 = vpop.f32.mrf.mxu1  ;;  %v8096_v40 = vpop.f32.mrf.mxu0 }
 0x31b   : > { %v8097_v44 = vadd.f32 %v8096_v40, %v8095_v25  ;;  %v7229_v43 = vadd.f32 %v8116_v41, %v7188_v37 }
 0x31c   : > { %v8118_v31 = vpop.f32.mrf.mxu1 }
 0x31d   : > { %v7191_v50 = vadd.f32 %v8097_v44, %v7150_v47  ;;  %v8119_v54 = vadd.f32 %v8118_v31, %v8117_v36 }
 0x31f   : > { %v7232_v59 = vadd.f32 %v8119_v54, %v7191_v50 }
 0x334   : > { %v8136_v45 = vpop.f32.mrf.mxu0 }
 0x336   : > { %v8158_v46 = vpop.f32.mrf.mxu1  ;;  %v8137_v48 = vpop.f32.mrf.mxu0 }
 0x337   : > { %v8138_v51 = vadd.f32 %v8137_v48, %v8136_v45 }
 0x338   : > { %v8159_v49 = vpop.f32.mrf.mxu1  ;;  %v8139_v52 = vpop.f32.mrf.mxu0 }
 0x339   : > { %v7270_v55 = vadd.f32 %v8138_v51, %v7229_v43  ;;  %v8160_v56 = vadd.f32 %v8159_v49, %v8158_v46 }
 0x33a   : > { %v8161_v53 = vpop.f32.mrf.mxu1  ;;  %v8140_v57 = vpop.f32.mrf.mxu0 }
 0x33b   : > { %v7311_v60 = vadd.f32 %v8160_v56, %v7270_v55  ;;  %v8141_v61 = vadd.f32 %v8140_v57, %v8139_v52 }
 0x33c   : > { %v8162_v58 = vpop.f32.mrf.mxu1 }
 0x33d   : > { %v7273_v62 = vadd.f32 %v8141_v61, %v7232_v59  ;;  %v8163_v63 = vadd.f32 %v8162_v58, %v8161_v53  ;;  %v7319_v0 = vmul.f32 0.2, %v7311_v60  ;;  %vm7317_vm0 = vcmp.ge.f32.partialorder %v7311_v60, 0.0 }
 0x33f   : > { %v7314_v1 = vadd.f32 %v8163_v63, %v7273_v62  ;;  %v7321_v3 = vsel %vm7317_vm0, %v7311_v60, %v7319_v0 }
 0x341   : > { %vm7318_vm1 = vcmp.ge.f32.partialorder %v7314_v1, 0.0  ;;  %v7320_v2 = vmul.f32 0.2, %v7314_v1 }
 0x342   : > { %7339 = sbr.rel (!%p8555_p6) target bundleno = 847 (0x34f), region = 88 }
 0x343   : > { %v7322_v4 = vsel %vm7318_vm1, %v7314_v1, %v7320_v2 }
 0x344   : > { %v7810_v5 = vpack.c.bf16 %v7322_v4, %v7321_v3 }
 0x346   : > { %7811 = vst [vmem:[%s4395_s5] sm:$0xff] %v7810_v5  }
 0x34d   : > { %v7361_v6 = vld [vmem:[%s4395_s5] sm:$0xf]  ;;  %v7363_v7 = vld [vmem:[%s4395_s5 + $0x4] sm:$0xf] }
 0x34e   : > { %7362 = vst [vmem:[%s7344_s9] sm:$0xf] %v7361_v6  ;;  %7364 = vst [vmem:[%s7344_s9 + $0x10] sm:$0xf] %v7363_v7 }
 0x34f PF: > { %s13_s16 = sadd.s32 1, %s8498_s16   ;;  %s10020_s12 = smov %s8486_s13 }
 0x350   : > { %p10_p12 = scmp.ge.s32.totalorder %s13_s16, 6   ;;  %s10021_s13 = smov %s8560_s22 }
 0x351   : > { %s10022_s14 = smov %s8494_s15  ;;  %s10023_s15 = smov %s10025_s17 }
 0x352   :  { %12 = sbr.rel (!%p10_p12) target bundleno = 3 (0x3), region = 170 }

</bundles_post_ra>
